<compile_context>
chip_gen: v7x
topology: tpu7x:2x2x1
jax: 0.10.0
libtpu: 0.0.40
codegen_flags: <defaults>
</compile_context>

<pallas_src>
import functools

import jax
import jax.numpy as jnp
from jax.experimental import pallas as pl
from jax.experimental.pallas import tpu as pltpu

_VMEM = functools.partial(pl.BlockSpec, memory_space=pltpu.MemorySpace.VMEM)
_LANE = 128  # conv output channels padded to this -> lane-dense stores


# ---------------------------------------------------------------------------
# Pallas kernels
# ---------------------------------------------------------------------------
def matmul_bias_relu_kernel(x_ref, w_ref, b_ref, o_ref):
    """o = relu(x @ w + b); bf16 operands, f32 MXU accumulation, bf16 output."""
    y = jnp.dot(x_ref[...], w_ref[...], preferred_element_type=jnp.float32)
    y = jnp.maximum(y + b_ref[...], 0.0)
    o_ref[...] = y.astype(o_ref.dtype)


def fc_dueling_kernel(h_ref, wfc_ref, bfc_ref, wh_ref, bh_ref, o_ref, *, n_action):
    """Fused fc + dueling head.

    h = relu(x @ Wfc + bfc)
    z = h @ [Wq | Wv] + [bq | bv]          (single (512, A+1) matmul)
    q = v + (adv - 1/A * max(adv, -1, keepdims=True))
    """
    h = jnp.dot(h_ref[...], wfc_ref[...], preferred_element_type=jnp.float32)
    h = jnp.maximum(h + bfc_ref[...], 0.0)
    z = jnp.dot(h.astype(wh_ref.dtype), wh_ref[...],
                preferred_element_type=jnp.float32) + bh_ref[...]      # (B, A+1)

    # Column A of z is the value stream; extract it with a masked reduce
    # (avoids an unaligned lane-offset slice).
    col = jax.lax.broadcasted_iota(jnp.int32, z.shape, 1)
    adv = z[:, :n_action]                                              # (B, A)
    adv_max = jnp.max(jnp.where(col < n_action, z, -jnp.inf),
                      axis=-1, keepdims=True)                          # (B, 1)
    v = jnp.sum(jnp.where(col == n_action, z, 0.0),
                axis=-1, keepdims=True)                                # (B, 1)
    o_ref[...] = v + (adv - (1.0 / n_action) * adv_max)


# ---------------------------------------------------------------------------
# pallas_call wrappers (whole arrays as single VMEM blocks; no grid needed)
# ---------------------------------------------------------------------------
def pallas_matmul_bias_relu(x, w, b):
    M = x.shape[0]
    N = w.shape[1]
    return pl.pallas_call(
        matmul_bias_relu_kernel,
        out_shape=jax.ShapeDtypeStruct((M, N), jnp.bfloat16),
        in_specs=[_VMEM(), _VMEM(), _VMEM()],
        out_specs=_VMEM(),
    )(x, w, b)


def pallas_fc_dueling(h, wfc, bfc, wh, bh):
    B = h.shape[0]
    n_action = wh.shape[1] - 1
    return pl.pallas_call(
        functools.partial(fc_dueling_kernel, n_action=n_action),
        out_shape=jax.ShapeDtypeStruct((B, n_action), jnp.float32),
        in_specs=[_VMEM()] * 5,
        out_specs=_VMEM(),
    )(h, wfc, bfc, wh, bh)


# ---------------------------------------------------------------------------
# Patch extraction (one fused XLA op per conv layer)
# ---------------------------------------------------------------------------
def extract_patches(x, ksize, stride, dn):
    # Output feature order is (input_channel, kh, kw) with the channel changing
    # slowest — same as torch's Conv2d weight.view(Cout, -1).
    return jax.lax.conv_general_dilated_patches(
        x, (ksize, ksize), (stride, stride), "VALID", dimension_numbers=dn)


# ---------------------------------------------------------------------------
# Parameter init (kaiming_normal_, fan_in, relu gain; zero bias) — torch layout
# ---------------------------------------------------------------------------
def init_params(key, n_frame, n_action):
    ks = jax.random.split(key, 6)

    def kaiming(k, shape, fan_in):
        std = (2.0 / fan_in) ** 0.5
        return jax.random.normal(k, shape, dtype=jnp.float32) * std

    p = {}
    p["w1"] = kaiming(ks[0], (32, n_frame, 8, 8), n_frame * 8 * 8)
    p["b1"] = jnp.zeros((32,), jnp.float32)
    p["w2"] = kaiming(ks[1], (64, 32, 4, 4), 32 * 4 * 4)
    p["b2"] = jnp.zeros((64,), jnp.float32)
    p["w3"] = kaiming(ks[2], (64, 64, 3, 3), 64 * 3 * 3)
    p["b3"] = jnp.zeros((64,), jnp.float32)
    feat = 64 * 7 * 7  # feature_map_size for 84x84 inputs (as in the module)
    p["wfc"] = kaiming(ks[3], (feat, 512), feat)   # stored [in, out]; rows in torch (c,h,w) order
    p["bfc"] = jnp.zeros((512,), jnp.float32)
    p["wq"] = kaiming(ks[4], (512, n_action), 512)
    p["bq"] = jnp.zeros((n_action,), jnp.float32)
    p["wv"] = kaiming(ks[5], (512, 1), 512)
    p["bv"] = jnp.zeros((1,), jnp.float32)
    return p


# ---------------------------------------------------------------------------
# One-time packing of the torch-layout params into kernel-friendly matrices
# ---------------------------------------------------------------------------
def _conv_w_mat(w, cin_pad, cout_pad):
    # torch (Cout, Cin, KH, KW) -> bf16 (cin_pad*KH*KW, cout_pad) whose row order
    # matches the (c, kh, kw) feature order of extract_patches.  Padded rows /
    # columns are zero, so padded channels contribute exact zeros.
    cout, cin, kh, kw = w.shape
    wm = jnp.zeros((cin_pad, kh, kw, cout_pad), jnp.float32)
    wm = wm.at[:cin, :, :, :cout].set(jnp.transpose(w, (1, 2, 3, 0)))
    return wm.reshape(cin_pad * kh * kw, cout_pad).astype(jnp.bfloat16)


def _pad_bias(b, n_pad):
    return jnp.zeros((1, n_pad), jnp.float32).at[0, : b.shape[0]].set(b)


def prepare_fast_params(p):
    n_action = p["wq"].shape[1]
    c3 = p["w3"].shape[0]
    feat = p["wfc"].shape[0]
    side = int(round((feat // c3) ** 0.5))           # 7 for 84x84 inputs

    fp = {}
    fp["w1"] = _conv_w_mat(p["w1"], p["w1"].shape[1], _LANE)   # (256, 128)
    fp["b1"] = _pad_bias(p["b1"], _LANE)
    fp["w2"] = _conv_w_mat(p["w2"], _LANE, _LANE)              # (2048, 128)
    fp["b2"] = _pad_bias(p["b2"], _LANE)
    fp["w3"] = _conv_w_mat(p["w3"], _LANE, c3)                 # (1152, 64) — last layer not padded
    fp["b3"] = _pad_bias(p["b3"], c3)

    # Fold the PyTorch NCHW flatten (c,h,w) into the fc weight: our conv3 output
    # flattens NHWC (h,w,c), so permute wfc's rows once at init.
    wfc = p["wfc"].reshape(c3, side, side, -1)                 # (c, h, w, out)
    wfc = jnp.transpose(wfc, (1, 2, 0, 3)).reshape(feat, -1)   # (h, w, c) rows
    fp["wfc"] = wfc.astype(jnp.bfloat16)
    fp["bfc"] = p["bfc"].reshape(1, -1)

    # Dueling head: single concatenated matmul [wq | wv], [bq | bv].
    fp["wh"] = jnp.concatenate([p["wq"], p["wv"]], axis=1).astype(jnp.bfloat16)
    fp["bh"] = jnp.concatenate([p["bq"], p["bv"]]).reshape(1, n_action + 1)
    return fp


# ---------------------------------------------------------------------------
# Forward pass (Pallas) and pure-JAX f32 reference
# ---------------------------------------------------------------------------
def model_forward(x, fp):
    # x: [B, n_frame, 84, 84] float32 (NCHW, like PyTorch)
    B = x.shape[0]
    xb = x.astype(jnp.bfloat16)

    # conv1: patches come out NHWC directly (mixed dimension_numbers), so no
    # explicit layout transpose is ever materialized.
    p1 = extract_patches(xb, 8, 4, ("NCHW", "OIHW", "NHWC"))       # (B,20,20,256)
    oh1, ow1 = p1.shape[1], p1.shape[2]
    y1 = pallas_matmul_bias_relu(p1.reshape(B * oh1 * ow1, -1), fp["w1"], fp["b1"])
    y1 = y1.reshape(B, oh1, ow1, _LANE)

    p2 = extract_patches(y1, 4, 2, ("NHWC", "HWIO", "NHWC"))       # (B,9,9,2048)
    oh2, ow2 = p2.shape[1], p2.shape[2]
    y2 = pallas_matmul_bias_relu(p2.reshape(B * oh2 * ow2, -1), fp["w2"], fp["b2"])
    y2 = y2.reshape(B, oh2, ow2, _LANE)

    p3 = extract_patches(y2, 3, 1, ("NHWC", "HWIO", "NHWC"))       # (B,7,7,1152)
    oh3, ow3 = p3.shape[1], p3.shape[2]
    y3 = pallas_matmul_bias_relu(p3.reshape(B * oh3 * ow3, -1), fp["w3"], fp["b3"])

    # NHWC flatten; the NCHW re-ordering lives in fp["wfc"]'s row permutation.
    h = y3.reshape(B, oh3 * ow3 * fp["w3"].shape[1])               # (B, 3136)
    return pallas_fc_dueling(h, fp["wfc"], fp["bfc"], fp["wh"], fp["bh"])


def ref_forward(x, p):
    def conv(x, w, b, s):
        y = jax.lax.conv_general_dilated(
            x, w, (s, s), "VALID", dimension_numbers=("NCHW", "OIHW", "NCHW"))
        return jax.nn.relu(y + b.reshape(1, -1, 1, 1))

    x = conv(x, p["w1"], p["b1"], 4)
    x = conv(x, p["w2"], p["b2"], 2)
    x = conv(x, p["w3"], p["b3"], 1)
    B = x.shape[0]
    x = x.reshape(B, -1)
    x = jax.nn.relu(x @ p["wfc"] + p["bfc"])
    adv = x @ p["wq"] + p["bq"]
    v = x @ p["wv"] + p["bv"]
    return v + (adv - (1.0 / adv.shape[-1]) * jnp.max(adv, axis=-1, keepdims=True))


# ---------------------------------------------------------------------------
if __name__ == "__main__":
    B, n_frame, n_action = 2, 4, 6
    key = jax.random.PRNGKey(0)
    pkey, xkey = jax.random.split(key)

    params = init_params(pkey, n_frame, n_action)
    fast = prepare_fast_params(params)
    # Spatial size must be 84x84 — the module hard-codes the fc input size for it.
    x = jax.random.uniform(xkey, (B, n_frame, 84, 84), dtype=jnp.float32)

    fwd = jax.jit(model_forward)
    q = jax.block_until_ready(fwd(x, fast))

    q_ref = jax.block_until_ready(ref_forward(x, params))
    assert q.shape == (B, n_action)
    # Tolerance accounts for bf16 MXU operands in the Pallas path vs the f32
    # reference (Q-values are O(1); bf16 drift is ~1e-2 worst case here).
    assert jnp.allclose(q, q_ref, atol=5e-2, rtol=5e-2), "mismatch vs reference"

    print("KERNEL_OK")
</pallas_src>

<mosaic_0001>
module attributes {stable_mosaic.version = 11 : i64} {
  func.func @matmul_bias_relu_kernel(%arg0: memref<800x256xbf16, #tpu.memory_space<vmem>>, %arg1: memref<256x128xbf16, #tpu.memory_space<vmem>>, %arg2: memref<1x128xf32, #tpu.memory_space<vmem>>, %arg3: memref<800x128xbf16, #tpu.memory_space<vmem>>) attributes {dimension_semantics = [], scalar_prefetch = 0 : i64, scratch_operands = 0 : i64, tpu.core_type = #tpu.core_type<tc>} {
    %c0 = arith.constant 0 : index
    %c0_0 = arith.constant 0 : index
    %0 = vector.load %arg0[%c0, %c0_0] : memref<800x256xbf16, #tpu.memory_space<vmem>>, vector<800x256xbf16>
    %c0_1 = arith.constant 0 : index
    %c0_2 = arith.constant 0 : index
    %1 = vector.load %arg1[%c0_1, %c0_2] : memref<256x128xbf16, #tpu.memory_space<vmem>>, vector<256x128xbf16>
    %cst = arith.constant dense<0.000000e+00> : vector<800x128xf32>
    %2 = tpu.matmul %0, %1, %cst {dimension_numbers = #tpu.dot_dimension_numbers<[1], [0], [0], [1], [0, 0, 1, 1], [], []>} : vector<800x256xbf16>, vector<256x128xbf16>, vector<800x128xf32> -> vector<800x128xf32>
    %c0_3 = arith.constant 0 : index
    %c0_4 = arith.constant 0 : index
    %3 = vector.load %arg2[%c0_3, %c0_4] : memref<1x128xf32, #tpu.memory_space<vmem>>, vector<1x128xf32>
    %4 = vector.broadcast %3 : vector<1x128xf32> to vector<800x128xf32>
    %5 = arith.addf %2, %4 : vector<800x128xf32>
    %cst_5 = arith.constant 0.000000e+00 : f32
    %6 = vector.broadcast %cst_5 : f32 to vector<800x128xf32>
    %7 = arith.maximumf %5, %6 : vector<800x128xf32>
    %8 = arith.truncf %7 : vector<800x128xf32> to vector<800x128xbf16>
    %c0_6 = arith.constant 0 : index
    %c0_7 = arith.constant 0 : index
    %9 = vector.load %arg3[%c0_6, %c0_7] : memref<800x128xbf16, #tpu.memory_space<vmem>>, vector<800x128xbf16>
    tpu.vector_store %arg3[%c0_6, %c0_7], %8 {strides = array<i32>} : memref<800x128xbf16, #tpu.memory_space<vmem>>, vector<800x128xbf16>,
    return
  }
}

module attributes {stable_mosaic.version = 11 : i64} {
  func.func @matmul_bias_relu_kernel(%arg0: memref<162x2048xbf16, #tpu.memory_space<vmem>>, %arg1: memref<2048x128xbf16, #tpu.memory_space<vmem>>, %arg2: memref<1x128xf32, #tpu.memory_space<vmem>>, %arg3: memref<162x128xbf16, #tpu.memory_space<vmem>>) attributes {dimension_semantics = [], scalar_prefetch = 0 : i64, scratch_operands = 0 : i64, tpu.core_type = #tpu.core_type<tc>} {
    %c0 = arith.constant 0 : index
    %c0_0 = arith.constant 0 : index
    %0 = vector.load %arg0[%c0, %c0_0] : memref<162x2048xbf16, #tpu.memory_space<vmem>>, vector<162x2048xbf16>
    %c0_1 = arith.constant 0 : index
    %c0_2 = arith.constant 0 : index
    %1 = vector.load %arg1[%c0_1, %c0_2] : memref<2048x128xbf16, #tpu.memory_space<vmem>>, vector<2048x128xbf16>
    %cst = arith.constant dense<0.000000e+00> : vector<162x128xf32>
    %2 = tpu.matmul %0, %1, %cst {dimension_numbers = #tpu.dot_dimension_numbers<[1], [0], [0], [1], [0, 0, 1, 1], [], []>} : vector<162x2048xbf16>, vector<2048x128xbf16>, vector<162x128xf32> -> vector<162x128xf32>
    %c0_3 = arith.constant 0 : index
    %c0_4 = arith.constant 0 : index
    %3 = vector.load %arg2[%c0_3, %c0_4] : memref<1x128xf32, #tpu.memory_space<vmem>>, vector<1x128xf32>
    %4 = vector.broadcast %3 : vector<1x128xf32> to vector<162x128xf32>
    %5 = arith.addf %2, %4 : vector<162x128xf32>
    %cst_5 = arith.constant 0.000000e+00 : f32
    %6 = vector.broadcast %cst_5 : f32 to vector<162x128xf32>
    %7 = arith.maximumf %5, %6 : vector<162x128xf32>
    %8 = arith.truncf %7 : vector<162x128xf32> to vector<162x128xbf16>
    %c0_6 = arith.constant 0 : index
    %c0_7 = arith.constant 0 : index
    %9 = vector.load %arg3[%c0_6, %c0_7] : memref<162x128xbf16, #tpu.memory_space<vmem>>, vector<162x128xbf16>
    tpu.vector_store %arg3[%c0_6, %c0_7], %8 {strides = array<i32>} : memref<162x128xbf16, #tpu.memory_space<vmem>>, vector<162x128xbf16>,
    return
  }
}

module attributes {stable_mosaic.version = 11 : i64} {
  func.func @matmul_bias_relu_kernel(%arg0: memref<98x1152xbf16, #tpu.memory_space<vmem>>, %arg1: memref<1152x64xbf16, #tpu.memory_space<vmem>>, %arg2: memref<1x64xf32, #tpu.memory_space<vmem>>, %arg3: memref<98x64xbf16, #tpu.memory_space<vmem>>) attributes {dimension_semantics = [], scalar_prefetch = 0 : i64, scratch_operands = 0 : i64, tpu.core_type = #tpu.core_type<tc>} {
    %c0 = arith.constant 0 : index
    %c0_0 = arith.constant 0 : index
    %0 = vector.load %arg0[%c0, %c0_0] : memref<98x1152xbf16, #tpu.memory_space<vmem>>, vector<98x1152xbf16>
    %c0_1 = arith.constant 0 : index
    %c0_2 = arith.constant 0 : index
    %1 = vector.load %arg1[%c0_1, %c0_2] : memref<1152x64xbf16, #tpu.memory_space<vmem>>, vector<1152x64xbf16>
    %cst = arith.constant dense<0.000000e+00> : vector<98x64xf32>
    %2 = tpu.matmul %0, %1, %cst {dimension_numbers = #tpu.dot_dimension_numbers<[1], [0], [0], [1], [0, 0, 1, 1], [], []>} : vector<98x1152xbf16>, vector<1152x64xbf16>, vector<98x64xf32> -> vector<98x64xf32>
    %c0_3 = arith.constant 0 : index
    %c0_4 = arith.constant 0 : index
    %3 = vector.load %arg2[%c0_3, %c0_4] : memref<1x64xf32, #tpu.memory_space<vmem>>, vector<1x64xf32>
    %4 = vector.broadcast %3 : vector<1x64xf32> to vector<98x64xf32>
    %5 = arith.addf %2, %4 : vector<98x64xf32>
    %cst_5 = arith.constant 0.000000e+00 : f32
    %6 = vector.broadcast %cst_5 : f32 to vector<98x64xf32>
    %7 = arith.maximumf %5, %6 : vector<98x64xf32>
    %8 = arith.truncf %7 : vector<98x64xf32> to vector<98x64xbf16>
    %c0_6 = arith.constant 0 : index
    %c0_7 = arith.constant 0 : index
    %9 = vector.load %arg3[%c0_6, %c0_7] : memref<98x64xbf16, #tpu.memory_space<vmem>>, vector<98x64xbf16>
    tpu.vector_store %arg3[%c0_6, %c0_7], %8 {strides = array<i32>} : memref<98x64xbf16, #tpu.memory_space<vmem>>, vector<98x64xbf16>,
    return
  }
}

module attributes {stable_mosaic.version = 11 : i64} {
  func.func @fc_dueling_kernel(%arg0: memref<2x3136xbf16, #tpu.memory_space<vmem>>, %arg1: memref<3136x512xbf16, #tpu.memory_space<vmem>>, %arg2: memref<1x512xf32, #tpu.memory_space<vmem>>, %arg3: memref<512x7xbf16, #tpu.memory_space<vmem>>, %arg4: memref<1x7xf32, #tpu.memory_space<vmem>>, %arg5: memref<2x6xf32, #tpu.memory_space<vmem>>) attributes {dimension_semantics = [], scalar_prefetch = 0 : i64, scratch_operands = 0 : i64, tpu.core_type = #tpu.core_type<tc>} {
    %c0 = arith.constant 0 : index
    %c0_0 = arith.constant 0 : index
    %0 = vector.load %arg0[%c0, %c0_0] : memref<2x3136xbf16, #tpu.memory_space<vmem>>, vector<2x3136xbf16>
    %c0_1 = arith.constant 0 : index
    %c0_2 = arith.constant 0 : index
    %1 = vector.load %arg1[%c0_1, %c0_2] : memref<3136x512xbf16, #tpu.memory_space<vmem>>, vector<3136x512xbf16>
    %cst = arith.constant dense<0.000000e+00> : vector<2x512xf32>
    %2 = tpu.matmul %0, %1, %cst {dimension_numbers = #tpu.dot_dimension_numbers<[1], [0], [0], [1], [0, 0, 1, 1], [], []>} : vector<2x3136xbf16>, vector<3136x512xbf16>, vector<2x512xf32> -> vector<2x512xf32>
    %c0_3 = arith.constant 0 : index
    %c0_4 = arith.constant 0 : index
    %3 = vector.load %arg2[%c0_3, %c0_4] : memref<1x512xf32, #tpu.memory_space<vmem>>, vector<1x512xf32>
    %4 = vector.broadcast %3 : vector<1x512xf32> to vector<2x512xf32>
    %5 = arith.addf %2, %4 : vector<2x512xf32>
    %cst_5 = arith.constant 0.000000e+00 : f32
    %6 = vector.broadcast %cst_5 : f32 to vector<2x512xf32>
    %7 = arith.maximumf %5, %6 : vector<2x512xf32>
    %8 = arith.truncf %7 : vector<2x512xf32> to vector<2x512xbf16>
    %c0_6 = arith.constant 0 : index
    %c0_7 = arith.constant 0 : index
    %9 = vector.load %arg3[%c0_6, %c0_7] : memref<512x7xbf16, #tpu.memory_space<vmem>>, vector<512x7xbf16>
    %cst_8 = arith.constant dense<0.000000e+00> : vector<2x7xf32>
    %10 = tpu.matmul %8, %9, %cst_8 {dimension_numbers = #tpu.dot_dimension_numbers<[1], [0], [0], [1], [0, 0, 1, 1], [], []>} : vector<2x512xbf16>, vector<512x7xbf16>, vector<2x7xf32> -> vector<2x7xf32>
    %c0_9 = arith.constant 0 : index
    %c0_10 = arith.constant 0 : index
    %11 = vector.load %arg4[%c0_9, %c0_10] : memref<1x7xf32, #tpu.memory_space<vmem>>, vector<1x7xf32>
    %12 = vector.broadcast %11 : vector<1x7xf32> to vector<2x7xf32>
    %13 = arith.addf %10, %12 : vector<2x7xf32>
    %14 = tpu.iota {dimensions = array<i32: 1>} : vector<2x7xi32>
    %15 = vector.extract_strided_slice %13 {offsets = [0, 0], sizes = [2, 6], strides = [1, 1]} : vector<2x7xf32> to vector<2x6xf32>
    %c6_i32 = arith.constant 6 : i32
    %16 = vector.broadcast %c6_i32 : i32 to vector<2x7xi32>
    %17 = arith.cmpi slt, %14, %16 : vector<2x7xi32>
    %cst_11 = arith.constant 0xFF800000 : f32
    %18 = vector.broadcast %cst_11 : f32 to vector<2x7xf32>
    %19 = arith.select %17, %13, %18 : vector<2x7xi1>, vector<2x7xf32>
    %cst_12 = arith.constant dense<0xFF800000> : vector<2xf32>
    %20 = vector.multi_reduction <maximumf>, %19, %cst_12 [1] : vector<2x7xf32> to vector<2xf32>
    %21 = vector.shape_cast %20 : vector<2xf32> to vector<2x1xf32>
    %c6_i32_13 = arith.constant 6 : i32
    %22 = vector.broadcast %c6_i32_13 : i32 to vector<2x7xi32>
    %23 = arith.cmpi eq, %14, %22 : vector<2x7xi32>
    %cst_14 = arith.constant 0.000000e+00 : f32
    %24 = vector.broadcast %cst_14 : f32 to vector<2x7xf32>
    %25 = arith.select %23, %13, %24 : vector<2x7xi1>, vector<2x7xf32>
    %cst_15 = arith.constant dense<0.000000e+00> : vector<2xf32>
    %26 = vector.multi_reduction <add>, %25, %cst_15 [1] : vector<2x7xf32> to vector<2xf32>
    %27 = vector.shape_cast %26 : vector<2xf32> to vector<2x1xf32>
    %cst_16 = arith.constant 0.166666672 : f32
    %28 = vector.broadcast %cst_16 : f32 to vector<2x1xf32>
    %29 = arith.mulf %28, %21 : vector<2x1xf32>
    %30 = vector.broadcast %29 : vector<2x1xf32> to vector<2x6xf32>
    %31 = arith.subf %15, %30 : vector<2x6xf32>
    %32 = vector.broadcast %27 : vector<2x1xf32> to vector<2x6xf32>
    %33 = arith.addf %32, %31 : vector<2x6xf32>
    %c0_17 = arith.constant 0 : index
    %c0_18 = arith.constant 0 : index
    %34 = vector.load %arg5[%c0_17, %c0_18] : memref<2x6xf32, #tpu.memory_space<vmem>>, vector<2x6xf32>
    tpu.vector_store %arg5[%c0_17, %c0_18], %33 {strides = array<i32>} : memref<2x6xf32, #tpu.memory_space<vmem>>, vector<2x6xf32>,
    return
  }
}

</mosaic_0001>

<bundles_post_ra>
// kernel: model_forward.4
= control target key start
LH: loop header
LB: loop body
LE: loop exit
PB: predicated region body
PF: predicated region fallthrough
CT: control target
= control target key end

     0   :  { %v2602_v0 = vmov 0   ;;  %s3258_s1 = inlined_call_operand.vmem [shape: bf16[256,128], index: 1, kind: input, shape index: {}]   ;;  %s3259_s0 = inlined_call_operand.vmem [shape: bf16[800,256], index: 0, kind: input, shape index: {}]   ;;  %s3260_s2 = inlined_call_operand.vmem [shape: f32[1,128], index: 2, kind: input, shape index: {}]   ;;  %s3261_s3 = inlined_call_operand.vmem [shape: bf16[800,128], index: 3, kind: output, shape index: {}]  }
   0x1   :  { %750 = vmatprep.subr.bf16.mxu0 %v2602_v0  ;;  %2403 = vmatprep.subr.bf16.mxu1 %v2602_v0  ;;  %v2436_v1 = vld [vmem:[%s3258_s1] sm:$0xff]   ;;  %v2437_v2 = vld [vmem:[%s3258_s1 + $0x8] sm:$0xff]   ;;  %v2438_v3 = vld [vmem:[%s3258_s1 + $0x10] sm:$0xff]  }
   0x2   :  { %751 = vmatpush1.bf16.msra.mxu0 %v2436_v1  ;;  %2419 = vmatpush1.bf16.msra.mxu1 %v2436_v1  ;;  %v2439_v4 = vld [vmem:[%s3258_s1 + $0x18] sm:$0xff]   ;;  %v2440_v5 = vld [vmem:[%s3258_s1 + $0x20] sm:$0xff]   ;;  %v2441_v7 = vld [vmem:[%s3258_s1 + $0x28] sm:$0xff]  }
   0x3   :  { %752 = vmatprep.subr.bf16.mxu0 %v2602_v0  ;;  %2404 = vmatprep.subr.bf16.mxu1 %v2602_v0  ;;  %v2454_v6 = vld [vmem:[%s3259_s0 + $0x4] ss:$8 sps:$4 sm:$0xff]   ;;  %v2457_v8 = vld [vmem:[%s3259_s0 + $0x194] ss:$8 sps:$4 sm:$0xff]   ;;  %v2452_v19 = vld [vmem:[%s3259_s0] ss:$8 sps:$4 sm:$0xff]  }
   0x4   :  { %782 = vmatprep.mubr.bf16.mxu0 %v2454_v6  ;;  %982 = vmatprep.mubr.bf16.mxu1 %v2457_v8  ;;  %v2442_v9 = vld [vmem:[%s3258_s1 + $0x30] sm:$0xff]   ;;  %v2443_v10 = vld [vmem:[%s3258_s1 + $0x38] sm:$0xff]   ;;  %v2444_v11 = vld [vmem:[%s3258_s1 + $0x40] sm:$0xff]  }
   0x5   :  { %v2445_v12 = vld [vmem:[%s3258_s1 + $0x48] sm:$0xff]   ;;  %v2446_v13 = vld [vmem:[%s3258_s1 + $0x50] sm:$0xff]   ;;  %v2447_v14 = vld [vmem:[%s3258_s1 + $0x58] sm:$0xff]  }
   0x6   :  { %753 = vmatpush1.bf16.msra.mxu0 %v2437_v2  ;;  %2420 = vmatpush1.bf16.msra.mxu1 %v2437_v2  ;;  %v2448_v15 = vld [vmem:[%s3258_s1 + $0x60] sm:$0xff]   ;;  %v2449_v16 = vld [vmem:[%s3258_s1 + $0x68] sm:$0xff]   ;;  %v2450_v17 = vld [vmem:[%s3258_s1 + $0x70] sm:$0xff]  }
   0x7   :  { %754 = vmatprep.subr.bf16.mxu0 %v2602_v0  ;;  %2405 = vmatprep.subr.bf16.mxu1 %v2602_v0  ;;  %v2451_v18 = vld [vmem:[%s3258_s1 + $0x78] sm:$0xff]   ;;  %v2460_v22 = vld [vmem:[%s3259_s0 + $0x1a4] ss:$8 sps:$4 sm:$0xff]   ;;  %v2463_v24 = vld [vmem:[%s3259_s0 + $0x1a0] ss:$8 sps:$4 sm:$0xff]  }
   0x8   :  { %v2455_v20 = vld [vmem:[%s3259_s0 + $0x190] ss:$8 sps:$4 sm:$0xff]   ;;  %v2458_v21 = vld [vmem:[%s3259_s0 + $0x14] ss:$8 sps:$4 sm:$0xff]   ;;  %v2464_v25 = vld [vmem:[%s3259_s0 + $0x24] ss:$8 sps:$4 sm:$0xff]  }
   0x9   :  { %v2462_v23 = vld [vmem:[%s3259_s0 + $0x10] ss:$8 sps:$4 sm:$0xff]   ;;  %v2466_v26 = vld [vmem:[%s3259_s0 + $0x1b4] ss:$8 sps:$4 sm:$0xff]   ;;  %v2468_v27 = vld [vmem:[%s3259_s0 + $0x20] ss:$8 sps:$4 sm:$0xff]  }
   0xa   :  { %755 = vmatpush1.bf16.msra.mxu0 %v2438_v3  ;;  %2421 = vmatpush1.bf16.msra.mxu1 %v2438_v3  ;;  %v2469_v28 = vld [vmem:[%s3259_s0 + $0x1b0] ss:$8 sps:$4 sm:$0xff]   ;;  %v2470_v29 = vld [vmem:[%s3259_s0 + $0x34] ss:$8 sps:$4 sm:$0xff]   ;;  %v2472_v30 = vld [vmem:[%s3259_s0 + $0x1c4] ss:$8 sps:$4 sm:$0xff]  }
   0xb   :  { %756 = vmatprep.subr.bf16.mxu0 %v2602_v0  ;;  %2406 = vmatprep.subr.bf16.mxu1 %v2602_v0  ;;  %v2474_v31 = vld [vmem:[%s3259_s0 + $0x30] ss:$8 sps:$4 sm:$0xff]   ;;  %v2475_v32 = vld [vmem:[%s3259_s0 + $0x1c0] ss:$8 sps:$4 sm:$0xff]   ;;  %v2476_v33 = vld [vmem:[%s3259_s0 + $0x44] ss:$8 sps:$4 sm:$0xff]  }
   0xc   :  { %v2478_v34 = vld [vmem:[%s3259_s0 + $0x1d4] ss:$8 sps:$4 sm:$0xff]   ;;  %v2480_v35 = vld [vmem:[%s3259_s0 + $0x40] ss:$8 sps:$4 sm:$0xff]   ;;  %v2481_v36 = vld [vmem:[%s3259_s0 + $0x1d0] ss:$8 sps:$4 sm:$0xff]  }
   0xd   :  { %v2482_v37 = vld [vmem:[%s3259_s0 + $0x54] ss:$8 sps:$4 sm:$0xff]   ;;  %v2484_v38 = vld [vmem:[%s3259_s0 + $0x1e4] ss:$8 sps:$4 sm:$0xff]   ;;  %v2486_v39 = vld [vmem:[%s3259_s0 + $0x50] ss:$8 sps:$4 sm:$0xff]  }
   0xe   :  { %757 = vmatpush1.bf16.msra.mxu0 %v2439_v4  ;;  %2422 = vmatpush1.bf16.msra.mxu1 %v2439_v4  ;;  %v2487_v40 = vld [vmem:[%s3259_s0 + $0x1e0] ss:$8 sps:$4 sm:$0xff]   ;;  %v2488_v41 = vld [vmem:[%s3259_s0 + $0x64] ss:$8 sps:$4 sm:$0xff]   ;;  %v2490_v42 = vld [vmem:[%s3259_s0 + $0x1f4] ss:$8 sps:$4 sm:$0xff]  }
   0xf   :  { %758 = vmatprep.subr.bf16.mxu0 %v2602_v0  ;;  %2407 = vmatprep.subr.bf16.mxu1 %v2602_v0  ;;  %v2492_v43 = vld [vmem:[%s3259_s0 + $0x60] ss:$8 sps:$4 sm:$0xff]   ;;  %v2493_v44 = vld [vmem:[%s3259_s0 + $0x1f0] ss:$8 sps:$4 sm:$0xff]   ;;  %v2494_v45 = vld [vmem:[%s3259_s0 + $0x74] ss:$8 sps:$4 sm:$0xff]  }
  0x10   :  { %v2496_v46 = vld [vmem:[%s3259_s0 + $0x204] ss:$8 sps:$4 sm:$0xff]   ;;  %v2498_v47 = vld [vmem:[%s3259_s0 + $0x70] ss:$8 sps:$4 sm:$0xff]   ;;  %v2499_v48 = vld [vmem:[%s3259_s0 + $0x200] ss:$8 sps:$4 sm:$0xff]  }
  0x11   :  { %v2500_v49 = vld [vmem:[%s3259_s0 + $0x84] ss:$8 sps:$4 sm:$0xff]   ;;  %v2502_v50 = vld [vmem:[%s3259_s0 + $0x214] ss:$8 sps:$4 sm:$0xff]   ;;  %v2504_v51 = vld [vmem:[%s3259_s0 + $0x80] ss:$8 sps:$4 sm:$0xff]  }
  0x12   :  { %759 = vmatpush1.bf16.msra.mxu0 %v2440_v5  ;;  %2423 = vmatpush1.bf16.msra.mxu1 %v2440_v5  ;;  %v2505_v52 = vld [vmem:[%s3259_s0 + $0x210] ss:$8 sps:$4 sm:$0xff]   ;;  %v2506_v53 = vld [vmem:[%s3259_s0 + $0x94] ss:$8 sps:$4 sm:$0xff]   ;;  %v2508_v54 = vld [vmem:[%s3259_s0 + $0x224] ss:$8 sps:$4 sm:$0xff]  }
  0x13   :  { %760 = vmatprep.subr.bf16.mxu0 %v2602_v0  ;;  %2408 = vmatprep.subr.bf16.mxu1 %v2602_v0  ;;  %v2510_v55 = vld [vmem:[%s3259_s0 + $0x90] ss:$8 sps:$4 sm:$0xff]   ;;  %v2511_v56 = vld [vmem:[%s3259_s0 + $0x220] ss:$8 sps:$4 sm:$0xff]   ;;  %v2512_v57 = vld [vmem:[%s3259_s0 + $0xa4] ss:$8 sps:$4 sm:$0xff]  }
  0x14   :  { %v2514_v58 = vld [vmem:[%s3259_s0 + $0x234] ss:$8 sps:$4 sm:$0xff]   ;;  %v2516_v59 = vld [vmem:[%s3259_s0 + $0xa0] ss:$8 sps:$4 sm:$0xff]   ;;  %v2517_v60 = vld [vmem:[%s3259_s0 + $0x230] ss:$8 sps:$4 sm:$0xff]  }
  0x15   :  { %v2518_v61 = vld [vmem:[%s3259_s0 + $0xb4] ss:$8 sps:$4 sm:$0xff]   ;;  %v2520_v62 = vld [vmem:[%s3259_s0 + $0x244] ss:$8 sps:$4 sm:$0xff]   ;;  %v2522_v63 = vld [vmem:[%s3259_s0 + $0xb0] ss:$8 sps:$4 sm:$0xff]  }
  0x16   :  { %761 = vmatpush1.bf16.msra.mxu0 %v2441_v7  ;;  %2424 = vmatpush1.bf16.msra.mxu1 %v2441_v7  ;;  %v2524_v1 = vld [vmem:[%s3259_s0 + $0xc4] ss:$8 sps:$4 sm:$0xff]   ;;  %v2526_v2 = vld [vmem:[%s3259_s0 + $0x254] ss:$8 sps:$4 sm:$0xff]   ;;  %v2528_v3 = vld [vmem:[%s3259_s0 + $0xc0] ss:$8 sps:$4 sm:$0xff]  }
  0x17   :  { %762 = vmatprep.subr.bf16.mxu0 %v2602_v0  ;;  %2409 = vmatprep.subr.bf16.mxu1 %v2602_v0  ;;  %v2529_v4 = vld [vmem:[%s3259_s0 + $0x250] ss:$8 sps:$4 sm:$0xff]   ;;  %v2530_v5 = vld [vmem:[%s3259_s0 + $0xd4] ss:$8 sps:$4 sm:$0xff]   ;;  %v2532_v6 = vld [vmem:[%s3259_s0 + $0x264] ss:$8 sps:$4 sm:$0xff]  }
  0x18   :  { %v2534_v7 = vld [vmem:[%s3259_s0 + $0xd0] ss:$8 sps:$4 sm:$0xff]   ;;  %v2535_v8 = vld [vmem:[%s3259_s0 + $0x260] ss:$8 sps:$4 sm:$0xff]  }
  0x1a   :  { %763 = vmatpush1.bf16.msra.mxu0 %v2442_v9  ;;  %2425 = vmatpush1.bf16.msra.mxu1 %v2442_v9  ;;  %v2536_v9 = vld [vmem:[%s3259_s0 + $0xe4] ss:$8 sps:$4 sm:$0xff]  }
  0x1b   :  { %764 = vmatprep.subr.bf16.mxu0 %v2602_v0  ;;  %2410 = vmatprep.subr.bf16.mxu1 %v2602_v0 }
  0x1e   :  { %765 = vmatpush1.bf16.msra.mxu0 %v2443_v10  ;;  %2426 = vmatpush1.bf16.msra.mxu1 %v2443_v10  ;;  %v2538_v10 = vld [vmem:[%s3259_s0 + $0x274] ss:$8 sps:$4 sm:$0xff]  }
  0x1f   :  { %766 = vmatprep.subr.bf16.mxu0 %v2602_v0  ;;  %2411 = vmatprep.subr.bf16.mxu1 %v2602_v0 }
  0x22   :  { %767 = vmatpush1.bf16.msra.mxu0 %v2444_v11  ;;  %2427 = vmatpush1.bf16.msra.mxu1 %v2444_v11  ;;  %v2540_v11 = vld [vmem:[%s3259_s0 + $0xe0] ss:$8 sps:$4 sm:$0xff]  }
  0x23   :  { %768 = vmatprep.subr.bf16.mxu0 %v2602_v0  ;;  %2412 = vmatprep.subr.bf16.mxu1 %v2602_v0 }
  0x26   :  { %769 = vmatpush1.bf16.msra.mxu0 %v2445_v12  ;;  %2428 = vmatpush1.bf16.msra.mxu1 %v2445_v12  ;;  %v2541_v12 = vld [vmem:[%s3259_s0 + $0x270] ss:$8 sps:$4 sm:$0xff]  }
  0x27   :  { %770 = vmatprep.subr.bf16.mxu0 %v2602_v0  ;;  %2413 = vmatprep.subr.bf16.mxu1 %v2602_v0 }
  0x2a   :  { %771 = vmatpush1.bf16.msra.mxu0 %v2446_v13  ;;  %2429 = vmatpush1.bf16.msra.mxu1 %v2446_v13  ;;  %v2542_v13 = vld [vmem:[%s3259_s0 + $0xf4] ss:$8 sps:$4 sm:$0xff]  }
  0x2b   :  { %772 = vmatprep.subr.bf16.mxu0 %v2602_v0  ;;  %2414 = vmatprep.subr.bf16.mxu1 %v2602_v0 }
  0x2e   :  { %773 = vmatpush1.bf16.msra.mxu0 %v2447_v14  ;;  %2430 = vmatpush1.bf16.msra.mxu1 %v2447_v14  ;;  %v2544_v14 = vld [vmem:[%s3259_s0 + $0x284] ss:$8 sps:$4 sm:$0xff]  }
  0x2f   :  { %774 = vmatprep.subr.bf16.mxu0 %v2602_v0  ;;  %2415 = vmatprep.subr.bf16.mxu1 %v2602_v0 }
  0x32   :  { %775 = vmatpush1.bf16.msra.mxu0 %v2448_v15  ;;  %2431 = vmatpush1.bf16.msra.mxu1 %v2448_v15  ;;  %v2546_v15 = vld [vmem:[%s3259_s0 + $0xf0] ss:$8 sps:$4 sm:$0xff]  }
  0x33   :  { %776 = vmatprep.subr.bf16.mxu0 %v2602_v0  ;;  %2416 = vmatprep.subr.bf16.mxu1 %v2602_v0 }
  0x36   :  { %777 = vmatpush1.bf16.msra.mxu0 %v2449_v16  ;;  %2432 = vmatpush1.bf16.msra.mxu1 %v2449_v16  ;;  %v2547_v16 = vld [vmem:[%s3259_s0 + $0x280] ss:$8 sps:$4 sm:$0xff]  }
  0x37   :  { %778 = vmatprep.subr.bf16.mxu0 %v2602_v0  ;;  %2417 = vmatprep.subr.bf16.mxu1 %v2602_v0 }
  0x3a   :  { %779 = vmatpush1.bf16.msra.mxu0 %v2450_v17  ;;  %2433 = vmatpush1.bf16.msra.mxu1 %v2450_v17  ;;  %v2548_v17 = vld [vmem:[%s3259_s0 + $0x104] ss:$8 sps:$4 sm:$0xff]  }
  0x3b   :  { %780 = vmatprep.subr.bf16.mxu0 %v2602_v0  ;;  %2418 = vmatprep.subr.bf16.mxu1 %v2602_v0  ;;  %v2523_v0 = vld [vmem:[%s3259_s0 + $0x240] ss:$8 sps:$4 sm:$0xff]  }
  0x3e   :  { %781 = vmatpush1.bf16.msra.mxu0 %v2451_v18  ;;  %2434 = vmatpush1.bf16.msra.mxu1 %v2451_v18  ;;  %v2550_v18 = vld [vmem:[%s3259_s0 + $0x294] ss:$8 sps:$4 sm:$0xff]  }
  0x41   :  { %783 = vmatmul.mubr.bf16.vlgmr.msra.gmra.mrb[0].mxu0 %v2452_v19  ;;  %983 = vmatmul.mubr.bf16.vlgmr.msra.gmra.mrb[0].mxu1 %v2455_v20  ;;  %v2552_v19 = vld [vmem:[%s3259_s0 + $0x100] ss:$8 sps:$4 sm:$0xff]   ;;  %v2553_v20 = vld [vmem:[%s3259_s0 + $0x290] ss:$8 sps:$4 sm:$0xff]  }
  0x42   :  { %790 = vmatprep.mubr.bf16.mxu0 %v2458_v21  ;;  %990 = vmatprep.mubr.bf16.mxu1 %v2460_v22  ;;  %v2554_v21 = vld [vmem:[%s3259_s0 + $0x114] ss:$8 sps:$4 sm:$0xff]   ;;  %v2556_v22 = vld [vmem:[%s3259_s0 + $0x2a4] ss:$8 sps:$4 sm:$0xff]  }
  0x49   :  { %791 = vmatmul.mubr.bf16.gmra.mrb[4].mxu0 %v2462_v23  ;;  %991 = vmatmul.mubr.bf16.gmra.mrb[4].mxu1 %v2463_v24  ;;  %v2558_v23 = vld [vmem:[%s3259_s0 + $0x110] ss:$8 sps:$4 sm:$0xff]   ;;  %v2559_v24 = vld [vmem:[%s3259_s0 + $0x2a0] ss:$8 sps:$4 sm:$0xff]  }
  0x4a   :  { %798 = vmatprep.mubr.bf16.mxu0 %v2464_v25  ;;  %998 = vmatprep.mubr.bf16.mxu1 %v2466_v26  ;;  %v2560_v25 = vld [vmem:[%s3259_s0 + $0x124] ss:$8 sps:$4 sm:$0xff]   ;;  %v2562_v26 = vld [vmem:[%s3259_s0 + $0x2b4] ss:$8 sps:$4 sm:$0xff]  }
  0x51   :  { %799 = vmatmul.mubr.bf16.gmra.mrb[8].mxu0 %v2468_v27  ;;  %999 = vmatmul.mubr.bf16.gmra.mrb[8].mxu1 %v2469_v28  ;;  %v2564_v27 = vld [vmem:[%s3259_s0 + $0x120] ss:$8 sps:$4 sm:$0xff]   ;;  %v2565_v28 = vld [vmem:[%s3259_s0 + $0x2b0] ss:$8 sps:$4 sm:$0xff]  }
  0x52   :  { %806 = vmatprep.mubr.bf16.mxu0 %v2470_v29  ;;  %1006 = vmatprep.mubr.bf16.mxu1 %v2472_v30  ;;  %v2566_v29 = vld [vmem:[%s3259_s0 + $0x134] ss:$8 sps:$4 sm:$0xff]   ;;  %v2568_v30 = vld [vmem:[%s3259_s0 + $0x2c4] ss:$8 sps:$4 sm:$0xff]  }
  0x59   :  { %807 = vmatmul.mubr.bf16.gmra.mrb[12].mxu0 %v2474_v31  ;;  %1007 = vmatmul.mubr.bf16.gmra.mrb[12].mxu1 %v2475_v32  ;;  %v2570_v31 = vld [vmem:[%s3259_s0 + $0x130] ss:$8 sps:$4 sm:$0xff]   ;;  %v2571_v32 = vld [vmem:[%s3259_s0 + $0x2c0] ss:$8 sps:$4 sm:$0xff]  }
  0x5a   :  { %814 = vmatprep.mubr.bf16.mxu0 %v2476_v33  ;;  %1014 = vmatprep.mubr.bf16.mxu1 %v2478_v34  ;;  %v2572_v33 = vld [vmem:[%s3259_s0 + $0x144] ss:$8 sps:$4 sm:$0xff]   ;;  %v2574_v34 = vld [vmem:[%s3259_s0 + $0x2d4] ss:$8 sps:$4 sm:$0xff]  }
  0x61   :  { %815 = vmatmul.mubr.bf16.gmra.mrb[16].mxu0 %v2480_v35  ;;  %1015 = vmatmul.mubr.bf16.gmra.mrb[16].mxu1 %v2481_v36  ;;  %v2576_v35 = vld [vmem:[%s3259_s0 + $0x140] ss:$8 sps:$4 sm:$0xff]   ;;  %v2577_v36 = vld [vmem:[%s3259_s0 + $0x2d0] ss:$8 sps:$4 sm:$0xff]  }
  0x62   :  { %822 = vmatprep.mubr.bf16.mxu0 %v2482_v37  ;;  %1022 = vmatprep.mubr.bf16.mxu1 %v2484_v38  ;;  %v2578_v37 = vld [vmem:[%s3259_s0 + $0x154] ss:$8 sps:$4 sm:$0xff]   ;;  %v2580_v38 = vld [vmem:[%s3259_s0 + $0x2e4] ss:$8 sps:$4 sm:$0xff]  }
  0x69   :  { %823 = vmatmul.mubr.bf16.gmra.mrb[20].mxu0 %v2486_v39  ;;  %1023 = vmatmul.mubr.bf16.gmra.mrb[20].mxu1 %v2487_v40  ;;  %v2582_v39 = vld [vmem:[%s3259_s0 + $0x150] ss:$8 sps:$4 sm:$0xff]   ;;  %v2583_v40 = vld [vmem:[%s3259_s0 + $0x2e0] ss:$8 sps:$4 sm:$0xff]  }
  0x6a   :  { %830 = vmatprep.mubr.bf16.mxu0 %v2488_v41  ;;  %1030 = vmatprep.mubr.bf16.mxu1 %v2490_v42  ;;  %v2584_v41 = vld [vmem:[%s3259_s0 + $0x164] ss:$8 sps:$4 sm:$0xff]   ;;  %v2586_v42 = vld [vmem:[%s3259_s0 + $0x2f4] ss:$8 sps:$4 sm:$0xff]  }
  0x71   :  { %831 = vmatmul.mubr.bf16.gmra.mrb[24].mxu0 %v2492_v43  ;;  %1031 = vmatmul.mubr.bf16.gmra.mrb[24].mxu1 %v2493_v44  ;;  %v2588_v43 = vld [vmem:[%s3259_s0 + $0x160] ss:$8 sps:$4 sm:$0xff]   ;;  %v2589_v44 = vld [vmem:[%s3259_s0 + $0x2f0] ss:$8 sps:$4 sm:$0xff]  }
  0x72   :  { %838 = vmatprep.mubr.bf16.mxu0 %v2494_v45  ;;  %1038 = vmatprep.mubr.bf16.mxu1 %v2496_v46  ;;  %v2590_v45 = vld [vmem:[%s3259_s0 + $0x174] ss:$8 sps:$4 sm:$0xff]   ;;  %v2592_v46 = vld [vmem:[%s3259_s0 + $0x304] ss:$8 sps:$4 sm:$0xff]  }
  0x79   :  { %839 = vmatmul.mubr.bf16.gmra.mrb[28].mxu0 %v2498_v47  ;;  %1039 = vmatmul.mubr.bf16.gmra.mrb[28].mxu1 %v2499_v48  ;;  %v2594_v47 = vld [vmem:[%s3259_s0 + $0x170] ss:$8 sps:$4 sm:$0xff]   ;;  %v2595_v48 = vld [vmem:[%s3259_s0 + $0x300] ss:$8 sps:$4 sm:$0xff]  }
  0x7a   :  { %846 = vmatprep.mubr.bf16.mxu0 %v2500_v49  ;;  %1046 = vmatprep.mubr.bf16.mxu1 %v2502_v50  ;;  %v2596_v49 = vld [vmem:[%s3259_s0 + $0x184] ss:$8 sps:$4 sm:$0xff]   ;;  %v2598_v50 = vld [vmem:[%s3259_s0 + $0x314] ss:$8 sps:$4 sm:$0xff]  }
  0x81   :  { %847 = vmatmul.mubr.bf16.gmra.mrb[32].mxu0 %v2504_v51  ;;  %1047 = vmatmul.mubr.bf16.gmra.mrb[32].mxu1 %v2505_v52  ;;  %v2600_v51 = vld [vmem:[%s3259_s0 + $0x180] ss:$8 sps:$4 sm:$0xff]   ;;  %v2601_v52 = vld [vmem:[%s3259_s0 + $0x310] ss:$8 sps:$4 sm:$0xff]  }
  0x82   :  { %854 = vmatprep.mubr.bf16.mxu0 %v2506_v53  ;;  %1054 = vmatprep.mubr.bf16.mxu1 %v2508_v54  ;;  %v3006_v53 = vld [vmem:[%s3260_s2] ss:$0 sm:$0xff] }
  0x89   :  { %855 = vmatmul.mubr.bf16.gmra.mrb[36].mxu0 %v2510_v55  ;;  %1055 = vmatmul.mubr.bf16.gmra.mrb[36].mxu1 %v2511_v56 }
  0x8a   :  { %862 = vmatprep.mubr.bf16.mxu0 %v2512_v57  ;;  %1062 = vmatprep.mubr.bf16.mxu1 %v2514_v58 }
  0x91   :  { %863 = vmatmul.mubr.bf16.gmra.mrb[40].mxu0 %v2516_v59  ;;  %1063 = vmatmul.mubr.bf16.gmra.mrb[40].mxu1 %v2517_v60 }
  0x92   :  { %870 = vmatprep.mubr.bf16.mxu0 %v2518_v61  ;;  %1070 = vmatprep.mubr.bf16.mxu1 %v2520_v62 }
  0x99   :  { %871 = vmatmul.mubr.bf16.gmra.mrb[44].mxu0 %v2522_v63  ;;  %1071 = vmatmul.mubr.bf16.gmra.mrb[44].mxu1 %v2523_v0 }
  0x9a   :  { %878 = vmatprep.mubr.bf16.mxu0 %v2524_v1  ;;  %1078 = vmatprep.mubr.bf16.mxu1 %v2526_v2 }
  0xa1   :  { %879 = vmatmul.mubr.bf16.gmra.mrb[48].mxu0 %v2528_v3  ;;  %1079 = vmatmul.mubr.bf16.gmra.mrb[48].mxu1 %v2529_v4 }
  0xa2   :  { %886 = vmatprep.mubr.bf16.mxu0 %v2530_v5  ;;  %1086 = vmatprep.mubr.bf16.mxu1 %v2532_v6 }
  0xa9   :  { %887 = vmatmul.mubr.bf16.gmra.mrb[52].mxu0 %v2534_v7  ;;  %1087 = vmatmul.mubr.bf16.gmra.mrb[52].mxu1 %v2535_v8 }
  0xaa   :  { %894 = vmatprep.mubr.bf16.mxu0 %v2536_v9  ;;  %1094 = vmatprep.mubr.bf16.mxu1 %v2538_v10 }
  0xb1   :  { %895 = vmatmul.mubr.bf16.gmra.mrb[56].mxu0 %v2540_v11  ;;  %1095 = vmatmul.mubr.bf16.gmra.mrb[56].mxu1 %v2541_v12 }
  0xb2   :  { %902 = vmatprep.mubr.bf16.mxu0 %v2542_v13  ;;  %1102 = vmatprep.mubr.bf16.mxu1 %v2544_v14 }
  0xb9   :  { %903 = vmatmul.mubr.bf16.gmra.mrb[60].mxu0 %v2546_v15  ;;  %1103 = vmatmul.mubr.bf16.gmra.mrb[60].mxu1 %v2547_v16 }
  0xba   :  { %910 = vmatprep.mubr.bf16.mxu0 %v2548_v17  ;;  %1110 = vmatprep.mubr.bf16.mxu1 %v2550_v18 }
  0xc1   :  { %911 = vmatmul.mubr.bf16.gmra.mrb[64].mxu0 %v2552_v19  ;;  %1111 = vmatmul.mubr.bf16.gmra.mrb[64].mxu1 %v2553_v20 }
  0xc2   :  { %918 = vmatprep.mubr.bf16.mxu0 %v2554_v21  ;;  %1118 = vmatprep.mubr.bf16.mxu1 %v2556_v22 }
  0xc9   :  { %919 = vmatmul.mubr.bf16.gmra.mrb[68].mxu0 %v2558_v23  ;;  %1119 = vmatmul.mubr.bf16.gmra.mrb[68].mxu1 %v2559_v24 }
  0xca   :  { %926 = vmatprep.mubr.bf16.mxu0 %v2560_v25  ;;  %1126 = vmatprep.mubr.bf16.mxu1 %v2562_v26 }
  0xd1   :  { %927 = vmatmul.mubr.bf16.gmra.mrb[72].mxu0 %v2564_v27  ;;  %1127 = vmatmul.mubr.bf16.gmra.mrb[72].mxu1 %v2565_v28 }
  0xd2   :  { %934 = vmatprep.mubr.bf16.mxu0 %v2566_v29  ;;  %1134 = vmatprep.mubr.bf16.mxu1 %v2568_v30 }
  0xd9   :  { %935 = vmatmul.mubr.bf16.gmra.mrb[76].mxu0 %v2570_v31  ;;  %1135 = vmatmul.mubr.bf16.gmra.mrb[76].mxu1 %v2571_v32 }
  0xda   :  { %942 = vmatprep.mubr.bf16.mxu0 %v2572_v33  ;;  %1142 = vmatprep.mubr.bf16.mxu1 %v2574_v34 }
  0xe1   :  { %943 = vmatmul.mubr.bf16.gmra.mrb[80].mxu0 %v2576_v35  ;;  %1143 = vmatmul.mubr.bf16.gmra.mrb[80].mxu1 %v2577_v36 }
  0xe2   :  { %950 = vmatprep.mubr.bf16.mxu0 %v2578_v37  ;;  %1150 = vmatprep.mubr.bf16.mxu1 %v2580_v38 }
  0xe9   :  { %951 = vmatmul.mubr.bf16.gmra.mrb[84].mxu0 %v2582_v39  ;;  %1151 = vmatmul.mubr.bf16.gmra.mrb[84].mxu1 %v2583_v40 }
  0xea   :  { %958 = vmatprep.mubr.bf16.mxu0 %v2584_v41  ;;  %1158 = vmatprep.mubr.bf16.mxu1 %v2586_v42 }
  0xf1   :  { %959 = vmatmul.mubr.bf16.gmra.mrb[88].mxu0 %v2588_v43  ;;  %1159 = vmatmul.mubr.bf16.gmra.mrb[88].mxu1 %v2589_v44 }
  0xf2   :  { %966 = vmatprep.mubr.bf16.mxu0 %v2590_v45  ;;  %1166 = vmatprep.mubr.bf16.mxu1 %v2592_v46 }
  0xf9   :  { %967 = vmatmul.mubr.bf16.gmra.mrb[92].mxu0 %v2594_v47  ;;  %1167 = vmatmul.mubr.bf16.gmra.mrb[92].mxu1 %v2595_v48 }
  0xfa   :  { %974 = vmatprep.mubr.bf16.mxu0 %v2596_v49  ;;  %1174 = vmatprep.mubr.bf16.mxu1 %v2598_v50 }
 0x101   :  { %975 = vmatmul.mubr.bf16.gmra.mrb[96].mxu0 %v2600_v51  ;;  %1175 = vmatmul.mubr.bf16.gmra.mrb[96].mxu1 %v2601_v52 }
 0x114   :  { %v784_v54 = vpop.f32.mrb[0].mxu0  ;;  %v984_v55 = vpop.f32.mrb[0].mxu1 }
 0x115   :  { %v785_v56 = vadd.f32 %v3006_v53, %v784_v54  ;;  %v985_v57 = vadd.f32 %v3006_v53, %v984_v55  ;;  %v786_v58 = vpop.f32.mrb[1].mxu0  ;;  %v986_v59 = vpop.f32.mrb[1].mxu1 }
 0x116   :  { %v787_v60 = vpop.f32.mrb[2].mxu0  ;;  %v987_v61 = vpop.f32.mrb[2].mxu1 }
 0x117   :  { %v788_v62 = vadd.f32 %v3006_v53, %v787_v60  ;;  %v988_v63 = vadd.f32 %v3006_v53, %v987_v61  ;;  %v789_v0 = vpop.f32.mrb[3].mxu0  ;;  %v989_v1 = vpop.f32.mrb[3].mxu1  ;;  %v1183_v2 = vmax.f32 %v785_v56, 0.0  ;;  %v1233_v3 = vmax.f32 %v985_v57, 0.0 }
 0x119   :  { %v1184_v4 = vmax.f32 %v788_v62, 0.0  ;;  %v1234_v5 = vmax.f32 %v988_v63, 0.0 }
 0x11b   :  { %v2107_v6 = vpack.c.bf16 %v1184_v4, %v1183_v2  ;;  %v2232_v7 = vpack.c.bf16 %v1234_v5, %v1233_v3 }
 0x11c   :  { %v792_v8 = vpop.f32.mrb[4].mxu0  ;;  %v992_v9 = vpop.f32.mrb[4].mxu1 }
 0x11d   :  { %2108 = vst [vmem:[%s3261_s3] sm:$0xff] %v2107_v6   ;;  %2378 = vst [vmem:[%s3261_s3 + $0xc8] sm:$0xff] %v2232_v7   ;;  %v793_v10 = vadd.f32 %v3006_v53, %v792_v8  ;;  %v993_v11 = vadd.f32 %v3006_v53, %v992_v9  ;;  %v794_v12 = vpop.f32.mrb[5].mxu0  ;;  %v994_v13 = vpop.f32.mrb[5].mxu1 }
 0x11e   :  { %v795_v14 = vpop.f32.mrb[6].mxu0  ;;  %v995_v15 = vpop.f32.mrb[6].mxu1 }
 0x11f   :  { %v796_v16 = vadd.f32 %v3006_v53, %v795_v14  ;;  %v996_v17 = vadd.f32 %v3006_v53, %v995_v15  ;;  %v797_v18 = vpop.f32.mrb[7].mxu0  ;;  %v997_v19 = vpop.f32.mrb[7].mxu1  ;;  %v1185_v20 = vmax.f32 %v793_v10, 0.0  ;;  %v1235_v21 = vmax.f32 %v993_v11, 0.0 }
 0x121   :  { %v1186_v22 = vmax.f32 %v796_v16, 0.0  ;;  %v1236_v23 = vmax.f32 %v996_v17, 0.0 }
 0x123   :  { %v2112_v24 = vpack.c.bf16 %v1186_v22, %v1185_v20  ;;  %v2237_v25 = vpack.c.bf16 %v1236_v23, %v1235_v21 }
 0x124   :  { %v800_v26 = vpop.f32.mrb[8].mxu0  ;;  %v1000_v27 = vpop.f32.mrb[8].mxu1 }
 0x125   :  { %2354 = vst [vmem:[%s3261_s3 + $0x8] sm:$0xff] %v2112_v24   ;;  %2379 = vst [vmem:[%s3261_s3 + $0xd0] sm:$0xff] %v2237_v25   ;;  %v801_v28 = vadd.f32 %v3006_v53, %v800_v26  ;;  %v1001_v29 = vadd.f32 %v3006_v53, %v1000_v27  ;;  %v802_v30 = vpop.f32.mrb[9].mxu0  ;;  %v1002_v31 = vpop.f32.mrb[9].mxu1 }
 0x126   :  { %v803_v32 = vpop.f32.mrb[10].mxu0  ;;  %v1003_v33 = vpop.f32.mrb[10].mxu1 }
 0x127   :  { %v804_v34 = vadd.f32 %v3006_v53, %v803_v32  ;;  %v1004_v35 = vadd.f32 %v3006_v53, %v1003_v33  ;;  %v805_v36 = vpop.f32.mrb[11].mxu0  ;;  %v1005_v37 = vpop.f32.mrb[11].mxu1  ;;  %v1187_v38 = vmax.f32 %v801_v28, 0.0  ;;  %v1237_v39 = vmax.f32 %v1001_v29, 0.0 }
 0x129   :  { %v1188_v40 = vmax.f32 %v804_v34, 0.0  ;;  %v1238_v41 = vmax.f32 %v1004_v35, 0.0 }
 0x12b   :  { %v2117_v42 = vpack.c.bf16 %v1188_v40, %v1187_v38  ;;  %v2242_v43 = vpack.c.bf16 %v1238_v41, %v1237_v39 }
 0x12c   :  { %v808_v44 = vpop.f32.mrb[12].mxu0  ;;  %v1008_v45 = vpop.f32.mrb[12].mxu1 }
 0x12d   :  { %2355 = vst [vmem:[%s3261_s3 + $0x10] sm:$0xff] %v2117_v42   ;;  %2380 = vst [vmem:[%s3261_s3 + $0xd8] sm:$0xff] %v2242_v43   ;;  %v809_v46 = vadd.f32 %v3006_v53, %v808_v44  ;;  %v1009_v47 = vadd.f32 %v3006_v53, %v1008_v45  ;;  %v810_v48 = vpop.f32.mrb[13].mxu0  ;;  %v1010_v49 = vpop.f32.mrb[13].mxu1 }
 0x12e   :  { %v811_v50 = vpop.f32.mrb[14].mxu0  ;;  %v1011_v51 = vpop.f32.mrb[14].mxu1 }
 0x12f   :  { %v812_v52 = vadd.f32 %v3006_v53, %v811_v50  ;;  %v1012_v54 = vadd.f32 %v3006_v53, %v1011_v51  ;;  %v813_v55 = vpop.f32.mrb[15].mxu0  ;;  %v1013_v56 = vpop.f32.mrb[15].mxu1  ;;  %v1189_v57 = vmax.f32 %v809_v46, 0.0  ;;  %v1239_v58 = vmax.f32 %v1009_v47, 0.0 }
 0x131   :  { %v1190_v59 = vmax.f32 %v812_v52, 0.0  ;;  %v1240_v60 = vmax.f32 %v1012_v54, 0.0 }
 0x133   :  { %v2122_v61 = vpack.c.bf16 %v1190_v59, %v1189_v57  ;;  %v2247_v62 = vpack.c.bf16 %v1240_v60, %v1239_v58 }
 0x134   :  { %v816_v63 = vpop.f32.mrb[16].mxu0  ;;  %v1016_v0 = vpop.f32.mrb[16].mxu1 }
 0x135   :  { %2356 = vst [vmem:[%s3261_s3 + $0x18] sm:$0xff] %v2122_v61   ;;  %2381 = vst [vmem:[%s3261_s3 + $0xe0] sm:$0xff] %v2247_v62   ;;  %v817_v1 = vadd.f32 %v3006_v53, %v816_v63  ;;  %v1017_v2 = vadd.f32 %v3006_v53, %v1016_v0  ;;  %v818_v3 = vpop.f32.mrb[17].mxu0  ;;  %v1018_v4 = vpop.f32.mrb[17].mxu1 }
 0x136   :  { %v819_v5 = vpop.f32.mrb[18].mxu0  ;;  %v1019_v6 = vpop.f32.mrb[18].mxu1 }
 0x137   :  { %v820_v7 = vadd.f32 %v3006_v53, %v819_v5  ;;  %v1020_v8 = vadd.f32 %v3006_v53, %v1019_v6  ;;  %v821_v9 = vpop.f32.mrb[19].mxu0  ;;  %v1021_v10 = vpop.f32.mrb[19].mxu1  ;;  %v1191_v11 = vmax.f32 %v817_v1, 0.0  ;;  %v1241_v12 = vmax.f32 %v1017_v2, 0.0 }
 0x139   :  { %v1192_v13 = vmax.f32 %v820_v7, 0.0  ;;  %v1242_v14 = vmax.f32 %v1020_v8, 0.0 }
 0x13b   :  { %v2127_v15 = vpack.c.bf16 %v1192_v13, %v1191_v11  ;;  %v2252_v16 = vpack.c.bf16 %v1242_v14, %v1241_v12 }
 0x13c   :  { %v824_v17 = vpop.f32.mrb[20].mxu0  ;;  %v1024_v18 = vpop.f32.mrb[20].mxu1 }
 0x13d   :  { %2357 = vst [vmem:[%s3261_s3 + $0x20] sm:$0xff] %v2127_v15   ;;  %2382 = vst [vmem:[%s3261_s3 + $0xe8] sm:$0xff] %v2252_v16   ;;  %v825_v19 = vadd.f32 %v3006_v53, %v824_v17  ;;  %v1025_v20 = vadd.f32 %v3006_v53, %v1024_v18  ;;  %v826_v21 = vpop.f32.mrb[21].mxu0  ;;  %v1026_v22 = vpop.f32.mrb[21].mxu1 }
 0x13e   :  { %v827_v23 = vpop.f32.mrb[22].mxu0  ;;  %v1027_v24 = vpop.f32.mrb[22].mxu1 }
 0x13f   :  { %v828_v25 = vadd.f32 %v3006_v53, %v827_v23  ;;  %v1028_v26 = vadd.f32 %v3006_v53, %v1027_v24  ;;  %v829_v27 = vpop.f32.mrb[23].mxu0  ;;  %v1029_v28 = vpop.f32.mrb[23].mxu1  ;;  %v1193_v29 = vmax.f32 %v825_v19, 0.0  ;;  %v1243_v30 = vmax.f32 %v1025_v20, 0.0 }
 0x141   :  { %v1194_v31 = vmax.f32 %v828_v25, 0.0  ;;  %v1244_v32 = vmax.f32 %v1028_v26, 0.0 }
 0x143   :  { %v2132_v33 = vpack.c.bf16 %v1194_v31, %v1193_v29  ;;  %v2257_v34 = vpack.c.bf16 %v1244_v32, %v1243_v30 }
 0x144   :  { %v832_v35 = vpop.f32.mrb[24].mxu0  ;;  %v1032_v36 = vpop.f32.mrb[24].mxu1 }
 0x145   :  { %2358 = vst [vmem:[%s3261_s3 + $0x28] sm:$0xff] %v2132_v33   ;;  %2383 = vst [vmem:[%s3261_s3 + $0xf0] sm:$0xff] %v2257_v34   ;;  %v833_v37 = vadd.f32 %v3006_v53, %v832_v35  ;;  %v1033_v38 = vadd.f32 %v3006_v53, %v1032_v36  ;;  %v834_v39 = vpop.f32.mrb[25].mxu0  ;;  %v1034_v40 = vpop.f32.mrb[25].mxu1 }
 0x146   :  { %v835_v41 = vpop.f32.mrb[26].mxu0  ;;  %v1035_v42 = vpop.f32.mrb[26].mxu1 }
 0x147   :  { %v836_v43 = vadd.f32 %v3006_v53, %v835_v41  ;;  %v1036_v44 = vadd.f32 %v3006_v53, %v1035_v42  ;;  %v837_v45 = vpop.f32.mrb[27].mxu0  ;;  %v1037_v46 = vpop.f32.mrb[27].mxu1  ;;  %v1195_v47 = vmax.f32 %v833_v37, 0.0  ;;  %v1245_v48 = vmax.f32 %v1033_v38, 0.0 }
 0x149   :  { %v1196_v49 = vmax.f32 %v836_v43, 0.0  ;;  %v1246_v50 = vmax.f32 %v1036_v44, 0.0 }
 0x14b   :  { %v2137_v51 = vpack.c.bf16 %v1196_v49, %v1195_v47  ;;  %v2262_v52 = vpack.c.bf16 %v1246_v50, %v1245_v48 }
 0x14c   :  { %v840_v54 = vpop.f32.mrb[28].mxu0  ;;  %v1040_v55 = vpop.f32.mrb[28].mxu1 }
 0x14d   :  { %2359 = vst [vmem:[%s3261_s3 + $0x30] sm:$0xff] %v2137_v51   ;;  %2384 = vst [vmem:[%s3261_s3 + $0xf8] sm:$0xff] %v2262_v52   ;;  %v841_v56 = vadd.f32 %v3006_v53, %v840_v54  ;;  %v1041_v57 = vadd.f32 %v3006_v53, %v1040_v55  ;;  %v842_v58 = vpop.f32.mrb[29].mxu0  ;;  %v1042_v59 = vpop.f32.mrb[29].mxu1 }
 0x14e   :  { %v843_v60 = vpop.f32.mrb[30].mxu0  ;;  %v1043_v61 = vpop.f32.mrb[30].mxu1 }
 0x14f   :  { %v844_v62 = vadd.f32 %v3006_v53, %v843_v60  ;;  %v1044_v63 = vadd.f32 %v3006_v53, %v1043_v61  ;;  %v845_v0 = vpop.f32.mrb[31].mxu0  ;;  %v1045_v1 = vpop.f32.mrb[31].mxu1  ;;  %v1197_v2 = vmax.f32 %v841_v56, 0.0  ;;  %v1247_v3 = vmax.f32 %v1041_v57, 0.0 }
 0x151   :  { %v1198_v4 = vmax.f32 %v844_v62, 0.0  ;;  %v1248_v5 = vmax.f32 %v1044_v63, 0.0 }
 0x153   :  { %v2142_v6 = vpack.c.bf16 %v1198_v4, %v1197_v2  ;;  %v2267_v7 = vpack.c.bf16 %v1248_v5, %v1247_v3 }
 0x154   :  { %v848_v8 = vpop.f32.mrb[32].mxu0  ;;  %v1048_v9 = vpop.f32.mrb[32].mxu1 }
 0x155   :  { %2360 = vst [vmem:[%s3261_s3 + $0x38] sm:$0xff] %v2142_v6   ;;  %2385 = vst [vmem:[%s3261_s3 + $0x100] sm:$0xff] %v2267_v7   ;;  %v849_v10 = vadd.f32 %v3006_v53, %v848_v8  ;;  %v1049_v11 = vadd.f32 %v3006_v53, %v1048_v9  ;;  %v850_v12 = vpop.f32.mrb[33].mxu0  ;;  %v1050_v13 = vpop.f32.mrb[33].mxu1 }
 0x156   :  { %v851_v14 = vpop.f32.mrb[34].mxu0  ;;  %v1051_v15 = vpop.f32.mrb[34].mxu1 }
 0x157   :  { %v852_v16 = vadd.f32 %v3006_v53, %v851_v14  ;;  %v1052_v17 = vadd.f32 %v3006_v53, %v1051_v15  ;;  %v853_v18 = vpop.f32.mrb[35].mxu0  ;;  %v1053_v19 = vpop.f32.mrb[35].mxu1  ;;  %v1199_v20 = vmax.f32 %v849_v10, 0.0  ;;  %v1249_v21 = vmax.f32 %v1049_v11, 0.0 }
 0x159   :  { %v1200_v22 = vmax.f32 %v852_v16, 0.0  ;;  %v1250_v23 = vmax.f32 %v1052_v17, 0.0 }
 0x15b   :  { %v2147_v24 = vpack.c.bf16 %v1200_v22, %v1199_v20  ;;  %v2272_v25 = vpack.c.bf16 %v1250_v23, %v1249_v21 }
 0x15c   :  { %v856_v26 = vpop.f32.mrb[36].mxu0  ;;  %v1056_v27 = vpop.f32.mrb[36].mxu1 }
 0x15d   :  { %2361 = vst [vmem:[%s3261_s3 + $0x40] sm:$0xff] %v2147_v24   ;;  %2386 = vst [vmem:[%s3261_s3 + $0x108] sm:$0xff] %v2272_v25   ;;  %v857_v28 = vadd.f32 %v3006_v53, %v856_v26  ;;  %v1057_v29 = vadd.f32 %v3006_v53, %v1056_v27  ;;  %v858_v30 = vpop.f32.mrb[37].mxu0  ;;  %v1058_v31 = vpop.f32.mrb[37].mxu1 }
 0x15e   :  { %v859_v32 = vpop.f32.mrb[38].mxu0  ;;  %v1059_v33 = vpop.f32.mrb[38].mxu1 }
 0x15f   :  { %v860_v34 = vadd.f32 %v3006_v53, %v859_v32  ;;  %v1060_v35 = vadd.f32 %v3006_v53, %v1059_v33  ;;  %v861_v36 = vpop.f32.mrb[39].mxu0  ;;  %v1061_v37 = vpop.f32.mrb[39].mxu1  ;;  %v1201_v38 = vmax.f32 %v857_v28, 0.0  ;;  %v1251_v39 = vmax.f32 %v1057_v29, 0.0 }
 0x161   :  { %v1202_v40 = vmax.f32 %v860_v34, 0.0  ;;  %v1252_v41 = vmax.f32 %v1060_v35, 0.0 }
 0x163   :  { %v2152_v42 = vpack.c.bf16 %v1202_v40, %v1201_v38  ;;  %v2277_v43 = vpack.c.bf16 %v1252_v41, %v1251_v39 }
 0x164   :  { %v864_v44 = vpop.f32.mrb[40].mxu0  ;;  %v1064_v45 = vpop.f32.mrb[40].mxu1 }
 0x165   :  { %2362 = vst [vmem:[%s3261_s3 + $0x48] sm:$0xff] %v2152_v42   ;;  %2387 = vst [vmem:[%s3261_s3 + $0x110] sm:$0xff] %v2277_v43   ;;  %v865_v46 = vadd.f32 %v3006_v53, %v864_v44  ;;  %v1065_v47 = vadd.f32 %v3006_v53, %v1064_v45  ;;  %v866_v48 = vpop.f32.mrb[41].mxu0  ;;  %v1066_v49 = vpop.f32.mrb[41].mxu1 }
 0x166   :  { %v867_v50 = vpop.f32.mrb[42].mxu0  ;;  %v1067_v51 = vpop.f32.mrb[42].mxu1 }
 0x167   :  { %v868_v52 = vadd.f32 %v3006_v53, %v867_v50  ;;  %v1068_v54 = vadd.f32 %v3006_v53, %v1067_v51  ;;  %v869_v55 = vpop.f32.mrb[43].mxu0  ;;  %v1069_v56 = vpop.f32.mrb[43].mxu1  ;;  %v1203_v57 = vmax.f32 %v865_v46, 0.0  ;;  %v1253_v58 = vmax.f32 %v1065_v47, 0.0 }
 0x169   :  { %v1204_v59 = vmax.f32 %v868_v52, 0.0  ;;  %v1254_v60 = vmax.f32 %v1068_v54, 0.0 }
 0x16b   :  { %v2157_v61 = vpack.c.bf16 %v1204_v59, %v1203_v57  ;;  %v2282_v62 = vpack.c.bf16 %v1254_v60, %v1253_v58 }
 0x16c   :  { %v872_v63 = vpop.f32.mrb[44].mxu0  ;;  %v1072_v0 = vpop.f32.mrb[44].mxu1 }
 0x16d   :  { %2363 = vst [vmem:[%s3261_s3 + $0x50] sm:$0xff] %v2157_v61   ;;  %2388 = vst [vmem:[%s3261_s3 + $0x118] sm:$0xff] %v2282_v62   ;;  %v873_v1 = vadd.f32 %v3006_v53, %v872_v63  ;;  %v1073_v2 = vadd.f32 %v3006_v53, %v1072_v0  ;;  %v874_v3 = vpop.f32.mrb[45].mxu0  ;;  %v1074_v4 = vpop.f32.mrb[45].mxu1 }
 0x16e   :  { %v875_v5 = vpop.f32.mrb[46].mxu0  ;;  %v1075_v6 = vpop.f32.mrb[46].mxu1 }
 0x16f   :  { %v876_v7 = vadd.f32 %v3006_v53, %v875_v5  ;;  %v1076_v8 = vadd.f32 %v3006_v53, %v1075_v6  ;;  %v877_v9 = vpop.f32.mrb[47].mxu0  ;;  %v1077_v10 = vpop.f32.mrb[47].mxu1  ;;  %v1205_v11 = vmax.f32 %v873_v1, 0.0  ;;  %v1255_v12 = vmax.f32 %v1073_v2, 0.0 }
 0x171   :  { %v1206_v13 = vmax.f32 %v876_v7, 0.0  ;;  %v1256_v14 = vmax.f32 %v1076_v8, 0.0 }
 0x173   :  { %v2162_v15 = vpack.c.bf16 %v1206_v13, %v1205_v11  ;;  %v2287_v16 = vpack.c.bf16 %v1256_v14, %v1255_v12 }
 0x174   :  { %v880_v17 = vpop.f32.mrb[48].mxu0  ;;  %v1080_v18 = vpop.f32.mrb[48].mxu1 }
 0x175   :  { %2364 = vst [vmem:[%s3261_s3 + $0x58] sm:$0xff] %v2162_v15   ;;  %2389 = vst [vmem:[%s3261_s3 + $0x120] sm:$0xff] %v2287_v16   ;;  %v881_v19 = vadd.f32 %v3006_v53, %v880_v17  ;;  %v1081_v20 = vadd.f32 %v3006_v53, %v1080_v18  ;;  %v882_v21 = vpop.f32.mrb[49].mxu0  ;;  %v1082_v22 = vpop.f32.mrb[49].mxu1 }
 0x176   :  { %v883_v23 = vpop.f32.mrb[50].mxu0  ;;  %v1083_v24 = vpop.f32.mrb[50].mxu1 }
 0x177   :  { %v884_v25 = vadd.f32 %v3006_v53, %v883_v23  ;;  %v1084_v26 = vadd.f32 %v3006_v53, %v1083_v24  ;;  %v885_v27 = vpop.f32.mrb[51].mxu0  ;;  %v1085_v28 = vpop.f32.mrb[51].mxu1  ;;  %v1207_v29 = vmax.f32 %v881_v19, 0.0  ;;  %v1257_v30 = vmax.f32 %v1081_v20, 0.0 }
 0x179   :  { %v1208_v31 = vmax.f32 %v884_v25, 0.0  ;;  %v1258_v32 = vmax.f32 %v1084_v26, 0.0 }
 0x17b   :  { %v2167_v33 = vpack.c.bf16 %v1208_v31, %v1207_v29  ;;  %v2292_v34 = vpack.c.bf16 %v1258_v32, %v1257_v30 }
 0x17c   :  { %v888_v35 = vpop.f32.mrb[52].mxu0  ;;  %v1088_v36 = vpop.f32.mrb[52].mxu1 }
 0x17d   :  { %2365 = vst [vmem:[%s3261_s3 + $0x60] sm:$0xff] %v2167_v33   ;;  %2390 = vst [vmem:[%s3261_s3 + $0x128] sm:$0xff] %v2292_v34   ;;  %v889_v37 = vadd.f32 %v3006_v53, %v888_v35  ;;  %v1089_v38 = vadd.f32 %v3006_v53, %v1088_v36  ;;  %v890_v39 = vpop.f32.mrb[53].mxu0  ;;  %v1090_v40 = vpop.f32.mrb[53].mxu1 }
 0x17e   :  { %v891_v41 = vpop.f32.mrb[54].mxu0  ;;  %v1091_v42 = vpop.f32.mrb[54].mxu1 }
 0x17f   :  { %v892_v43 = vadd.f32 %v3006_v53, %v891_v41  ;;  %v1092_v44 = vadd.f32 %v3006_v53, %v1091_v42  ;;  %v893_v45 = vpop.f32.mrb[55].mxu0  ;;  %v1093_v46 = vpop.f32.mrb[55].mxu1  ;;  %v1209_v47 = vmax.f32 %v889_v37, 0.0  ;;  %v1259_v48 = vmax.f32 %v1089_v38, 0.0 }
 0x181   :  { %v1210_v49 = vmax.f32 %v892_v43, 0.0  ;;  %v1260_v50 = vmax.f32 %v1092_v44, 0.0 }
 0x183   :  { %v2172_v51 = vpack.c.bf16 %v1210_v49, %v1209_v47  ;;  %v2297_v52 = vpack.c.bf16 %v1260_v50, %v1259_v48 }
 0x184   :  { %v896_v54 = vpop.f32.mrb[56].mxu0  ;;  %v1096_v55 = vpop.f32.mrb[56].mxu1 }
 0x185   :  { %2366 = vst [vmem:[%s3261_s3 + $0x68] sm:$0xff] %v2172_v51   ;;  %2391 = vst [vmem:[%s3261_s3 + $0x130] sm:$0xff] %v2297_v52   ;;  %v897_v56 = vadd.f32 %v3006_v53, %v896_v54  ;;  %v1097_v57 = vadd.f32 %v3006_v53, %v1096_v55  ;;  %v898_v58 = vpop.f32.mrb[57].mxu0  ;;  %v1098_v59 = vpop.f32.mrb[57].mxu1 }
 0x186   :  { %v899_v60 = vpop.f32.mrb[58].mxu0  ;;  %v1099_v61 = vpop.f32.mrb[58].mxu1 }
 0x187   :  { %v900_v62 = vadd.f32 %v3006_v53, %v899_v60  ;;  %v1100_v63 = vadd.f32 %v3006_v53, %v1099_v61  ;;  %v901_v0 = vpop.f32.mrb[59].mxu0  ;;  %v1101_v1 = vpop.f32.mrb[59].mxu1  ;;  %v1211_v2 = vmax.f32 %v897_v56, 0.0  ;;  %v1261_v3 = vmax.f32 %v1097_v57, 0.0 }
 0x189   :  { %v1212_v4 = vmax.f32 %v900_v62, 0.0  ;;  %v1262_v5 = vmax.f32 %v1100_v63, 0.0 }
 0x18b   :  { %v2177_v6 = vpack.c.bf16 %v1212_v4, %v1211_v2  ;;  %v2302_v7 = vpack.c.bf16 %v1262_v5, %v1261_v3 }
 0x18c   :  { %v904_v8 = vpop.f32.mrb[60].mxu0  ;;  %v1104_v9 = vpop.f32.mrb[60].mxu1 }
 0x18d   :  { %2367 = vst [vmem:[%s3261_s3 + $0x70] sm:$0xff] %v2177_v6   ;;  %2392 = vst [vmem:[%s3261_s3 + $0x138] sm:$0xff] %v2302_v7   ;;  %v905_v10 = vadd.f32 %v3006_v53, %v904_v8  ;;  %v1105_v11 = vadd.f32 %v3006_v53, %v1104_v9  ;;  %v906_v12 = vpop.f32.mrb[61].mxu0  ;;  %v1106_v13 = vpop.f32.mrb[61].mxu1 }
 0x18e   :  { %v907_v14 = vpop.f32.mrb[62].mxu0  ;;  %v1107_v15 = vpop.f32.mrb[62].mxu1 }
 0x18f   :  { %v908_v16 = vadd.f32 %v3006_v53, %v907_v14  ;;  %v1108_v17 = vadd.f32 %v3006_v53, %v1107_v15  ;;  %v909_v18 = vpop.f32.mrb[63].mxu0  ;;  %v1109_v19 = vpop.f32.mrb[63].mxu1  ;;  %v1213_v20 = vmax.f32 %v905_v10, 0.0  ;;  %v1263_v21 = vmax.f32 %v1105_v11, 0.0 }
 0x191   :  { %v1214_v22 = vmax.f32 %v908_v16, 0.0  ;;  %v1264_v23 = vmax.f32 %v1108_v17, 0.0 }
 0x193   :  { %v2182_v24 = vpack.c.bf16 %v1214_v22, %v1213_v20  ;;  %v2307_v25 = vpack.c.bf16 %v1264_v23, %v1263_v21 }
 0x194   :  { %v912_v26 = vpop.f32.mrb[64].mxu0  ;;  %v1112_v27 = vpop.f32.mrb[64].mxu1 }
 0x195   :  { %2368 = vst [vmem:[%s3261_s3 + $0x78] sm:$0xff] %v2182_v24   ;;  %2393 = vst [vmem:[%s3261_s3 + $0x140] sm:$0xff] %v2307_v25   ;;  %v913_v28 = vadd.f32 %v3006_v53, %v912_v26  ;;  %v1113_v29 = vadd.f32 %v3006_v53, %v1112_v27  ;;  %v914_v30 = vpop.f32.mrb[65].mxu0  ;;  %v1114_v31 = vpop.f32.mrb[65].mxu1 }
 0x196   :  { %v915_v32 = vpop.f32.mrb[66].mxu0  ;;  %v1115_v33 = vpop.f32.mrb[66].mxu1 }
 0x197   :  { %v916_v34 = vadd.f32 %v3006_v53, %v915_v32  ;;  %v1116_v35 = vadd.f32 %v3006_v53, %v1115_v33  ;;  %v917_v36 = vpop.f32.mrb[67].mxu0  ;;  %v1117_v37 = vpop.f32.mrb[67].mxu1  ;;  %v1215_v38 = vmax.f32 %v913_v28, 0.0  ;;  %v1265_v39 = vmax.f32 %v1113_v29, 0.0 }
 0x199   :  { %v1216_v40 = vmax.f32 %v916_v34, 0.0  ;;  %v1266_v41 = vmax.f32 %v1116_v35, 0.0 }
 0x19b   :  { %v2187_v42 = vpack.c.bf16 %v1216_v40, %v1215_v38  ;;  %v2312_v43 = vpack.c.bf16 %v1266_v41, %v1265_v39 }
 0x19c   :  { %v920_v44 = vpop.f32.mrb[68].mxu0  ;;  %v1120_v45 = vpop.f32.mrb[68].mxu1 }
 0x19d   :  { %2369 = vst [vmem:[%s3261_s3 + $0x80] sm:$0xff] %v2187_v42   ;;  %2394 = vst [vmem:[%s3261_s3 + $0x148] sm:$0xff] %v2312_v43   ;;  %v921_v46 = vadd.f32 %v3006_v53, %v920_v44  ;;  %v1121_v47 = vadd.f32 %v3006_v53, %v1120_v45  ;;  %v922_v48 = vpop.f32.mrb[69].mxu0  ;;  %v1122_v49 = vpop.f32.mrb[69].mxu1 }
 0x19e   :  { %v923_v50 = vpop.f32.mrb[70].mxu0  ;;  %v1123_v51 = vpop.f32.mrb[70].mxu1 }
 0x19f   :  { %v924_v52 = vadd.f32 %v3006_v53, %v923_v50  ;;  %v1124_v54 = vadd.f32 %v3006_v53, %v1123_v51  ;;  %v925_v55 = vpop.f32.mrb[71].mxu0  ;;  %v1125_v56 = vpop.f32.mrb[71].mxu1  ;;  %v1217_v57 = vmax.f32 %v921_v46, 0.0  ;;  %v1267_v58 = vmax.f32 %v1121_v47, 0.0 }
 0x1a1   :  { %v1218_v59 = vmax.f32 %v924_v52, 0.0  ;;  %v1268_v60 = vmax.f32 %v1124_v54, 0.0 }
 0x1a3   :  { %v2192_v61 = vpack.c.bf16 %v1218_v59, %v1217_v57  ;;  %v2317_v62 = vpack.c.bf16 %v1268_v60, %v1267_v58 }
 0x1a4   :  { %v928_v63 = vpop.f32.mrb[72].mxu0  ;;  %v1128_v0 = vpop.f32.mrb[72].mxu1 }
 0x1a5   :  { %2370 = vst [vmem:[%s3261_s3 + $0x88] sm:$0xff] %v2192_v61   ;;  %2395 = vst [vmem:[%s3261_s3 + $0x150] sm:$0xff] %v2317_v62   ;;  %v929_v1 = vadd.f32 %v3006_v53, %v928_v63  ;;  %v1129_v2 = vadd.f32 %v3006_v53, %v1128_v0  ;;  %v930_v3 = vpop.f32.mrb[73].mxu0  ;;  %v1130_v4 = vpop.f32.mrb[73].mxu1 }
 0x1a6   :  { %v931_v5 = vpop.f32.mrb[74].mxu0  ;;  %v1131_v6 = vpop.f32.mrb[74].mxu1 }
 0x1a7   :  { %v932_v7 = vadd.f32 %v3006_v53, %v931_v5  ;;  %v1132_v8 = vadd.f32 %v3006_v53, %v1131_v6  ;;  %v933_v9 = vpop.f32.mrb[75].mxu0  ;;  %v1133_v10 = vpop.f32.mrb[75].mxu1  ;;  %v1219_v11 = vmax.f32 %v929_v1, 0.0  ;;  %v1269_v12 = vmax.f32 %v1129_v2, 0.0 }
 0x1a9   :  { %v1220_v13 = vmax.f32 %v932_v7, 0.0  ;;  %v1270_v14 = vmax.f32 %v1132_v8, 0.0 }
 0x1ab   :  { %v2197_v15 = vpack.c.bf16 %v1220_v13, %v1219_v11  ;;  %v2322_v16 = vpack.c.bf16 %v1270_v14, %v1269_v12 }
 0x1ac   :  { %v936_v17 = vpop.f32.mrb[76].mxu0  ;;  %v1136_v18 = vpop.f32.mrb[76].mxu1 }
 0x1ad   :  { %2371 = vst [vmem:[%s3261_s3 + $0x90] sm:$0xff] %v2197_v15   ;;  %2396 = vst [vmem:[%s3261_s3 + $0x158] sm:$0xff] %v2322_v16   ;;  %v937_v19 = vadd.f32 %v3006_v53, %v936_v17  ;;  %v1137_v20 = vadd.f32 %v3006_v53, %v1136_v18  ;;  %v938_v21 = vpop.f32.mrb[77].mxu0  ;;  %v1138_v22 = vpop.f32.mrb[77].mxu1 }
 0x1ae   :  { %v939_v23 = vpop.f32.mrb[78].mxu0  ;;  %v1139_v24 = vpop.f32.mrb[78].mxu1 }
 0x1af   :  { %v940_v25 = vadd.f32 %v3006_v53, %v939_v23  ;;  %v1140_v26 = vadd.f32 %v3006_v53, %v1139_v24  ;;  %v941_v27 = vpop.f32.mrb[79].mxu0  ;;  %v1141_v28 = vpop.f32.mrb[79].mxu1  ;;  %v1221_v29 = vmax.f32 %v937_v19, 0.0  ;;  %v1271_v30 = vmax.f32 %v1137_v20, 0.0 }
 0x1b1   :  { %v1222_v31 = vmax.f32 %v940_v25, 0.0  ;;  %v1272_v32 = vmax.f32 %v1140_v26, 0.0 }
 0x1b3   :  { %v2202_v33 = vpack.c.bf16 %v1222_v31, %v1221_v29  ;;  %v2327_v34 = vpack.c.bf16 %v1272_v32, %v1271_v30 }
 0x1b4   :  { %v944_v35 = vpop.f32.mrb[80].mxu0  ;;  %v1144_v36 = vpop.f32.mrb[80].mxu1 }
 0x1b5   :  { %2372 = vst [vmem:[%s3261_s3 + $0x98] sm:$0xff] %v2202_v33   ;;  %2397 = vst [vmem:[%s3261_s3 + $0x160] sm:$0xff] %v2327_v34   ;;  %v945_v37 = vadd.f32 %v3006_v53, %v944_v35  ;;  %v1145_v38 = vadd.f32 %v3006_v53, %v1144_v36  ;;  %v946_v39 = vpop.f32.mrb[81].mxu0  ;;  %v1146_v40 = vpop.f32.mrb[81].mxu1 }
 0x1b6   :  { %v947_v41 = vpop.f32.mrb[82].mxu0  ;;  %v1147_v42 = vpop.f32.mrb[82].mxu1 }
 0x1b7   :  { %v948_v43 = vadd.f32 %v3006_v53, %v947_v41  ;;  %v1148_v44 = vadd.f32 %v3006_v53, %v1147_v42  ;;  %v949_v45 = vpop.f32.mrb[83].mxu0  ;;  %v1149_v46 = vpop.f32.mrb[83].mxu1  ;;  %v1223_v47 = vmax.f32 %v945_v37, 0.0  ;;  %v1273_v48 = vmax.f32 %v1145_v38, 0.0 }
 0x1b9   :  { %v1224_v49 = vmax.f32 %v948_v43, 0.0  ;;  %v1274_v50 = vmax.f32 %v1148_v44, 0.0 }
 0x1bb   :  { %v2207_v51 = vpack.c.bf16 %v1224_v49, %v1223_v47  ;;  %v2332_v52 = vpack.c.bf16 %v1274_v50, %v1273_v48 }
 0x1bc   :  { %v952_v54 = vpop.f32.mrb[84].mxu0  ;;  %v1152_v55 = vpop.f32.mrb[84].mxu1 }
 0x1bd   :  { %2373 = vst [vmem:[%s3261_s3 + $0xa0] sm:$0xff] %v2207_v51   ;;  %2398 = vst [vmem:[%s3261_s3 + $0x168] sm:$0xff] %v2332_v52   ;;  %v953_v56 = vadd.f32 %v3006_v53, %v952_v54  ;;  %v1153_v57 = vadd.f32 %v3006_v53, %v1152_v55  ;;  %v954_v58 = vpop.f32.mrb[85].mxu0  ;;  %v1154_v59 = vpop.f32.mrb[85].mxu1 }
 0x1be   :  { %v955_v60 = vpop.f32.mrb[86].mxu0  ;;  %v1155_v61 = vpop.f32.mrb[86].mxu1 }
 0x1bf   :  { %v956_v62 = vadd.f32 %v3006_v53, %v955_v60  ;;  %v1156_v63 = vadd.f32 %v3006_v53, %v1155_v61  ;;  %v957_v0 = vpop.f32.mrb[87].mxu0  ;;  %v1157_v1 = vpop.f32.mrb[87].mxu1  ;;  %v1225_v2 = vmax.f32 %v953_v56, 0.0  ;;  %v1275_v3 = vmax.f32 %v1153_v57, 0.0 }
 0x1c1   :  { %v1226_v4 = vmax.f32 %v956_v62, 0.0  ;;  %v1276_v5 = vmax.f32 %v1156_v63, 0.0 }
 0x1c3   :  { %v2212_v6 = vpack.c.bf16 %v1226_v4, %v1225_v2  ;;  %v2337_v7 = vpack.c.bf16 %v1276_v5, %v1275_v3 }
 0x1c4   :  { %v960_v8 = vpop.f32.mrb[88].mxu0  ;;  %v1160_v9 = vpop.f32.mrb[88].mxu1 }
 0x1c5   :  { %2374 = vst [vmem:[%s3261_s3 + $0xa8] sm:$0xff] %v2212_v6   ;;  %2399 = vst [vmem:[%s3261_s3 + $0x170] sm:$0xff] %v2337_v7   ;;  %v961_v10 = vadd.f32 %v3006_v53, %v960_v8  ;;  %v1161_v11 = vadd.f32 %v3006_v53, %v1160_v9  ;;  %v962_v12 = vpop.f32.mrb[89].mxu0  ;;  %v1162_v13 = vpop.f32.mrb[89].mxu1 }
 0x1c6   :  { %v963_v14 = vpop.f32.mrb[90].mxu0  ;;  %v1163_v15 = vpop.f32.mrb[90].mxu1 }
 0x1c7   :  { %v964_v16 = vadd.f32 %v3006_v53, %v963_v14  ;;  %v1164_v17 = vadd.f32 %v3006_v53, %v1163_v15  ;;  %v965_v18 = vpop.f32.mrb[91].mxu0  ;;  %v1165_v19 = vpop.f32.mrb[91].mxu1  ;;  %v1227_v20 = vmax.f32 %v961_v10, 0.0  ;;  %v1277_v21 = vmax.f32 %v1161_v11, 0.0 }
 0x1c9   :  { %v1228_v22 = vmax.f32 %v964_v16, 0.0  ;;  %v1278_v23 = vmax.f32 %v1164_v17, 0.0 }
 0x1cb   :  { %v2217_v24 = vpack.c.bf16 %v1228_v22, %v1227_v20  ;;  %v2342_v25 = vpack.c.bf16 %v1278_v23, %v1277_v21 }
 0x1cc   :  { %v968_v26 = vpop.f32.mrb[92].mxu0  ;;  %v1168_v27 = vpop.f32.mrb[92].mxu1 }
 0x1cd   :  { %2375 = vst [vmem:[%s3261_s3 + $0xb0] sm:$0xff] %v2217_v24   ;;  %2400 = vst [vmem:[%s3261_s3 + $0x178] sm:$0xff] %v2342_v25   ;;  %v969_v28 = vadd.f32 %v3006_v53, %v968_v26  ;;  %v1169_v29 = vadd.f32 %v3006_v53, %v1168_v27  ;;  %v970_v30 = vpop.f32.mrb[93].mxu0  ;;  %v1170_v31 = vpop.f32.mrb[93].mxu1 }
 0x1ce   :  { %v971_v32 = vpop.f32.mrb[94].mxu0  ;;  %v1171_v33 = vpop.f32.mrb[94].mxu1 }
 0x1cf   :  { %v972_v34 = vadd.f32 %v3006_v53, %v971_v32  ;;  %v1172_v35 = vadd.f32 %v3006_v53, %v1171_v33  ;;  %v973_v36 = vpop.f32.mrb[95].mxu0  ;;  %v1173_v37 = vpop.f32.mrb[95].mxu1  ;;  %v1229_v38 = vmax.f32 %v969_v28, 0.0  ;;  %v1279_v39 = vmax.f32 %v1169_v29, 0.0 }
 0x1d1   :  { %v1230_v40 = vmax.f32 %v972_v34, 0.0  ;;  %v1280_v41 = vmax.f32 %v1172_v35, 0.0 }
 0x1d3   :  { %v2222_v42 = vpack.c.bf16 %v1230_v40, %v1229_v38  ;;  %v2347_v43 = vpack.c.bf16 %v1280_v41, %v1279_v39 }
 0x1d4   :  { %v976_v44 = vpop.f32.mrb[96].mxu0  ;;  %v1176_v45 = vpop.f32.mrb[96].mxu1 }
 0x1d5   :  { %2376 = vst [vmem:[%s3261_s3 + $0xb8] sm:$0xff] %v2222_v42   ;;  %2401 = vst [vmem:[%s3261_s3 + $0x180] sm:$0xff] %v2347_v43   ;;  %v977_v46 = vadd.f32 %v3006_v53, %v976_v44  ;;  %v1177_v47 = vadd.f32 %v3006_v53, %v1176_v45  ;;  %v978_v48 = vpop.f32.mrb[97].mxu0  ;;  %v1178_v49 = vpop.f32.mrb[97].mxu1 }
 0x1d6   :  { %v979_v50 = vpop.f32.mrb[98].mxu0  ;;  %v1179_v51 = vpop.f32.mrb[98].mxu1 }
 0x1d7   :  { %v980_v52 = vadd.f32 %v3006_v53, %v979_v50  ;;  %v1180_v54 = vadd.f32 %v3006_v53, %v1179_v51  ;;  %v981_v55 = vpop.f32.mrb[99].mxu0  ;;  %v1181_v56 = vpop.f32.mrb[99].mxu1  ;;  %v1231_v57 = vmax.f32 %v977_v46, 0.0  ;;  %v1281_v58 = vmax.f32 %v1177_v47, 0.0 }
 0x1d9   :  { %v1232_v59 = vmax.f32 %v980_v52, 0.0  ;;  %v1282_v60 = vmax.f32 %v1180_v54, 0.0 }
 0x1db   :  { %v2227_v61 = vpack.c.bf16 %v1232_v59, %v1231_v57  ;;  %v2352_v62 = vpack.c.bf16 %v1282_v60, %v1281_v58 }
 0x1dd   :  { %2377 = vst [vmem:[%s3261_s3 + $0xc0] sm:$0xff] %v2227_v61   ;;  %2402 = vst [vmem:[%s3261_s3 + $0x188] sm:$0xff] %v2352_v62  }

// kernel: model_forward.5
= control target key start
LH: loop header
LB: loop body
LE: loop exit
PB: predicated region body
PF: predicated region fallthrough
CT: control target
= control target key end

     0   :  { %s5523_s1 = inlined_call_operand.vmem [shape: bf16[2048,128], index: 1, kind: input, shape index: {}]   ;;  %s5524_s0 = inlined_call_operand.vmem [shape: bf16[162,2048], index: 0, kind: input, shape index: {}]   ;;  %s5525_s2 = inlined_call_operand.vmem [shape: f32[1,128], index: 2, kind: input, shape index: {}]   ;;  %s5526_s3 = inlined_call_operand.vmem [shape: bf16[162,128], index: 3, kind: output, shape index: {}]  }
   0x1   :  { %v4223_v0 = vld [vmem:[%s5523_s1 + $0x40] sm:$0xff]   ;;  %v4227_v4 = vld [vmem:[%s5523_s1 + $0x48] sm:$0xff]   ;;  %v4231_v8 = vld [vmem:[%s5523_s1 + $0x50] sm:$0xff]  }
   0x2   :  { %v4224_v1 = vld [vmem:[%s5523_s1 + $0xc0] sm:$0xff]   ;;  %3567 = vmatprep.subr.bf16.mxu0 %v4223_v0  ;;  %v4228_v5 = vld [vmem:[%s5523_s1 + $0xc8] sm:$0xff]   ;;  %v4232_v9 = vld [vmem:[%s5523_s1 + $0xd0] sm:$0xff]  }
   0x3   :  { %v4225_v2 = vld [vmem:[%s5523_s1] sm:$0xff]   ;;  %3649 = vmatprep.subr.bf16.mxu1 %v4224_v1  ;;  %v4229_v6 = vld [vmem:[%s5523_s1 + $0x8] sm:$0xff]   ;;  %v4233_v10 = vld [vmem:[%s5523_s1 + $0x10] sm:$0xff]  }
   0x4   :  { %v4226_v3 = vld [vmem:[%s5523_s1 + $0x80] sm:$0xff]   ;;  %3568 = vmatpush3.bf16.msra.mxu0 %v4225_v2  ;;  %v4230_v7 = vld [vmem:[%s5523_s1 + $0x88] sm:$0xff]   ;;  %v4234_v11 = vld [vmem:[%s5523_s1 + $0x90] sm:$0xff]  }
   0x5   :  { %3650 = vmatpush3.bf16.msra.mxu1 %v4226_v3  ;;  %3569 = vmatprep.subr.bf16.mxu0 %v4227_v4  ;;  %v4235_v12 = vld [vmem:[%s5523_s1 + $0x58] sm:$0xff]   ;;  %v4239_v16 = vld [vmem:[%s5523_s1 + $0x60] sm:$0xff]   ;;  %v4243_v20 = vld [vmem:[%s5523_s1 + $0x68] sm:$0xff]  }
   0x6   :  { %3651 = vmatprep.subr.bf16.mxu1 %v4228_v5  ;;  %v4236_v13 = vld [vmem:[%s5523_s1 + $0xd8] sm:$0xff]   ;;  %v4240_v17 = vld [vmem:[%s5523_s1 + $0xe0] sm:$0xff]   ;;  %v4244_v21 = vld [vmem:[%s5523_s1 + $0xe8] sm:$0xff]  }
   0x7   :  { %v4237_v14 = vld [vmem:[%s5523_s1 + $0x18] sm:$0xff]   ;;  %v4241_v18 = vld [vmem:[%s5523_s1 + $0x20] sm:$0xff]   ;;  %v4245_v22 = vld [vmem:[%s5523_s1 + $0x28] sm:$0xff]  }
   0x8   :  { %3570 = vmatpush3.bf16.msra.mxu0 %v4229_v6  ;;  %v4238_v15 = vld [vmem:[%s5523_s1 + $0x98] sm:$0xff]   ;;  %v4242_v19 = vld [vmem:[%s5523_s1 + $0xa0] sm:$0xff]   ;;  %v4246_v23 = vld [vmem:[%s5523_s1 + $0xa8] sm:$0xff]  }
   0x9   :  { %3652 = vmatpush3.bf16.msra.mxu1 %v4230_v7  ;;  %3571 = vmatprep.subr.bf16.mxu0 %v4231_v8  ;;  %v4247_v24 = vld [vmem:[%s5523_s1 + $0x70] sm:$0xff]   ;;  %v4251_v28 = vld [vmem:[%s5523_s1 + $0x78] sm:$0xff]   ;;  %v15_v32 = vld [vmem:[%s5524_s0] sm:$0xff] }
   0xa   :  { %3653 = vmatprep.subr.bf16.mxu1 %v4232_v9  ;;  %v4248_v25 = vld [vmem:[%s5523_s1 + $0xf0] sm:$0xff]   ;;  %v4252_v29 = vld [vmem:[%s5523_s1 + $0xf8] sm:$0xff]   ;;  %v23_v33 = vld [vmem:[%s5524_s0 + $0x40] sm:$0xff] }
   0xb   :  { %v4249_v26 = vld [vmem:[%s5523_s1 + $0x30] sm:$0xff]   ;;  %v4253_v30 = vld [vmem:[%s5523_s1 + $0x38] sm:$0xff]   ;;  %v16_v34 = vld [vmem:[%s5524_s0 + $0x8] sm:$0xff]  ;;  %v3162_v35 = vcombine.low %v15_v32, %v23_v33  ;;  %v3163_v36 = vcombine.high %v15_v32, %v23_v33 }
   0xc   :  { %3572 = vmatpush3.bf16.msra.mxu0 %v4233_v10  ;;  %v4250_v27 = vld [vmem:[%s5523_s1 + $0xb0] sm:$0xff]   ;;  %v4254_v31 = vld [vmem:[%s5523_s1 + $0xb8] sm:$0xff]   ;;  %v24_v37 = vld [vmem:[%s5524_s0 + $0x48] sm:$0xff] }
   0xd   :  { %3654 = vmatpush3.bf16.msra.mxu1 %v4234_v11  ;;  %3573 = vmatprep.subr.bf16.mxu0 %v4235_v12  ;;  %v3164_v38 = vcombine.low %v16_v34, %v24_v37  ;;  %v3165_v39 = vcombine.high %v16_v34, %v24_v37  ;;  %v4255_v40 = vld [vmem:[%s5523_s1 + $0x140] sm:$0xff]   ;;  %v32_v47 = vld [vmem:[%s5524_s0 + $0x88] sm:$0xff]  ;;  %v4263_v62 = vld [vmem:[%s5523_s1 + $0x150] sm:$0xff]  }
   0xe   :  { %3655 = vmatprep.subr.bf16.mxu1 %v4236_v13  ;;  %2102 = vmatprep.mubr.bf16.mxu0 %v3163_v36  ;;  %v4256_v41 = vld [vmem:[%s5523_s1 + $0x100] sm:$0xff]   ;;  %v40_v48 = vld [vmem:[%s5524_s0 + $0xc8] sm:$0xff]  ;;  %v4264_v3 = vld [vmem:[%s5523_s1 + $0x110] sm:$0xff]  }
   0xf   :  { %2222 = vmatprep.mubr.bf16.mxu1 %v3165_v39  ;;  %v4257_v42 = vld [vmem:[%s5523_s1 + $0x1c0] sm:$0xff]   ;;  %v3181_v49 = vcombine.high %v32_v47, %v40_v48  ;;  %v4259_v50 = vld [vmem:[%s5523_s1 + $0x148] sm:$0xff]   ;;  %v3180_v53 = vcombine.low %v32_v47, %v40_v48  ;;  %v4265_v5 = vld [vmem:[%s5523_s1 + $0x1d0] sm:$0xff]  }
  0x10   :  { %3574 = vmatpush3.bf16.msra.mxu0 %v4237_v14  ;;  %v4258_v43 = vld [vmem:[%s5523_s1 + $0x180] sm:$0xff]   ;;  %v4260_v52 = vld [vmem:[%s5523_s1 + $0x108] sm:$0xff]   ;;  %v4266_v8 = vld [vmem:[%s5523_s1 + $0x190] sm:$0xff]  }
  0x11   :  { %3656 = vmatpush3.bf16.msra.mxu1 %v4238_v15  ;;  %3575 = vmatprep.subr.bf16.mxu0 %v4239_v16  ;;  %v31_v44 = vld [vmem:[%s5524_s0 + $0x80] sm:$0xff]  ;;  %v4261_v54 = vld [vmem:[%s5523_s1 + $0x1c8] sm:$0xff]   ;;  %v4267_v10 = vld [vmem:[%s5523_s1 + $0x158] sm:$0xff]  }
  0x12   :  { %3657 = vmatprep.subr.bf16.mxu1 %v4240_v17  ;;  %v39_v45 = vld [vmem:[%s5524_s0 + $0xc0] sm:$0xff]  ;;  %v4262_v55 = vld [vmem:[%s5523_s1 + $0x188] sm:$0xff]   ;;  %v4268_v12 = vld [vmem:[%s5523_s1 + $0x118] sm:$0xff]  }
  0x13   :  { %v3179_v46 = vcombine.high %v31_v44, %v39_v45  ;;  %v3178_v51 = vcombine.low %v31_v44, %v39_v45  ;;  %v47_v56 = vld [vmem:[%s5524_s0 + $0x100] sm:$0xff]  ;;  %v48_v58 = vld [vmem:[%s5524_s0 + $0x108] sm:$0xff]  ;;  %v4269_v13 = vld [vmem:[%s5523_s1 + $0x1d8] sm:$0xff]  }
  0x14   :  { %3576 = vmatpush3.bf16.msra.mxu0 %v4241_v18  ;;  %v55_v57 = vld [vmem:[%s5524_s0 + $0x140] sm:$0xff]  ;;  %v56_v59 = vld [vmem:[%s5524_s0 + $0x148] sm:$0xff]  ;;  %v4270_v15 = vld [vmem:[%s5523_s1 + $0x198] sm:$0xff]  }
  0x15   :  { %3658 = vmatpush3.bf16.msra.mxu1 %v4242_v19  ;;  %3577 = vmatprep.subr.bf16.mxu0 %v4243_v20  ;;  %v3195_v60 = vcombine.high %v47_v56, %v55_v57  ;;  %v3197_v61 = vcombine.high %v48_v58, %v56_v59  ;;  %v63_v63 = vld [vmem:[%s5524_s0 + $0x180] sm:$0xff]  ;;  %v64_v1 = vld [vmem:[%s5524_s0 + $0x188] sm:$0xff]  ;;  %v3194_v4 = vcombine.low %v47_v56, %v55_v57  ;;  %v4281_v44 = vld [vmem:[%s5523_s1 + $0x1f0] sm:$0xff]  }
  0x16   :  { %3659 = vmatprep.subr.bf16.mxu1 %v4244_v21  ;;  %v71_v0 = vld [vmem:[%s5524_s0 + $0x1c0] sm:$0xff]  ;;  %v72_v2 = vld [vmem:[%s5524_s0 + $0x1c8] sm:$0xff]  ;;  %v3196_v6 = vcombine.low %v48_v58, %v56_v59  ;;  %v4282_v45 = vld [vmem:[%s5523_s1 + $0x1b0] sm:$0xff]  }
  0x17   :  { %v3211_v7 = vcombine.high %v63_v63, %v71_v0  ;;  %v3213_v9 = vcombine.high %v64_v1, %v72_v2  ;;  %v79_v11 = vld [vmem:[%s5524_s0 + $0x200] sm:$0xff]  ;;  %v80_v16 = vld [vmem:[%s5524_s0 + $0x208] sm:$0xff]  ;;  %v3210_v18 = vcombine.low %v63_v63, %v71_v0  ;;  %v3212_v20 = vcombine.low %v64_v1, %v72_v2 }
  0x18   :  { %3578 = vmatpush3.bf16.msra.mxu0 %v4245_v22  ;;  %v87_v14 = vld [vmem:[%s5524_s0 + $0x240] sm:$0xff]  ;;  %v88_v17 = vld [vmem:[%s5524_s0 + $0x248] sm:$0xff] }
  0x19   :  { %3660 = vmatpush3.bf16.msra.mxu1 %v4246_v23  ;;  %3579 = vmatprep.subr.bf16.mxu0 %v4247_v24  ;;  %v4271_v19 = vld [vmem:[%s5523_s1 + $0x160] sm:$0xff]   ;;  %v3227_v21 = vcombine.high %v79_v11, %v87_v14  ;;  %v3229_v23 = vcombine.high %v80_v16, %v88_v17  ;;  %v4276_v32 = vld [vmem:[%s5523_s1 + $0x128] sm:$0xff]   ;;  %v3228_v33 = vcombine.low %v80_v16, %v88_v17 }
  0x1a   :  { %3661 = vmatprep.subr.bf16.mxu1 %v4248_v25  ;;  %v4272_v22 = vld [vmem:[%s5523_s1 + $0x120] sm:$0xff]   ;;  %v4278_v37 = vld [vmem:[%s5523_s1 + $0x1a8] sm:$0xff]  }
  0x1b   :  { %v4273_v24 = vld [vmem:[%s5523_s1 + $0x1e0] sm:$0xff]   ;;  %v128_v56 = vld [vmem:[%s5524_s0 + $0x388] sm:$0xff] }
  0x1c   :  { %3580 = vmatpush3.bf16.msra.mxu0 %v4249_v26  ;;  %v95_v25 = vld [vmem:[%s5524_s0 + $0x280] sm:$0xff]  ;;  %v136_v57 = vld [vmem:[%s5524_s0 + $0x3c8] sm:$0xff] }
  0x1d   :  { %3662 = vmatpush3.bf16.msra.mxu1 %v4250_v27  ;;  %3581 = vmatprep.subr.bf16.mxu0 %v4251_v28  ;;  %v103_v26 = vld [vmem:[%s5524_s0 + $0x2c0] sm:$0xff]  ;;  %v96_v28 = vld [vmem:[%s5524_s0 + $0x288] sm:$0xff] }
  0x1e   :  { %3663 = vmatprep.subr.bf16.mxu1 %v4252_v29  ;;  %v4274_v27 = vld [vmem:[%s5523_s1 + $0x1a0] sm:$0xff]   ;;  %v104_v29 = vld [vmem:[%s5524_s0 + $0x2c8] sm:$0xff]  ;;  %v3243_v34 = vcombine.high %v95_v25, %v103_v26 }
  0x1f   :  { %v3245_v36 = vcombine.high %v96_v28, %v104_v29  ;;  %v119_v39 = vld [vmem:[%s5524_s0 + $0x340] sm:$0xff]  ;;  %v3244_v47 = vcombine.low %v96_v28, %v104_v29  ;;  %v144_v2 = vld [vmem:[%s5524_s0 + $0x408] sm:$0xff] }
  0x20   :  { %3582 = vmatpush3.bf16.msra.mxu0 %v4253_v30  ;;  %v4275_v30 = vld [vmem:[%s5523_s1 + $0x168] sm:$0xff]   ;;  %v4291_v59 = vld [vmem:[%s5523_s1 + $0x240] sm:$0xff]  }
  0x21   :  { %3664 = vmatpush3.bf16.msra.mxu1 %v4254_v31  ;;  %3731 = vmatprep.subr.bf16.mxu0 %v4255_v40  ;;  %v3226_v31 = vcombine.low %v79_v11, %v87_v14  ;;  %v4279_v40 = vld [vmem:[%s5523_s1 + $0x170] sm:$0xff]   ;;  %v4293_v63 = vld [vmem:[%s5523_s1 + $0x2c0] sm:$0xff]   ;;  %v168_v11 = vld [vmem:[%s5524_s0 + $0x4c8] sm:$0xff] }
  0x22   :  { %3813 = vmatprep.subr.bf16.mxu1 %v4257_v42  ;;  %v120_v42 = vld [vmem:[%s5524_s0 + $0x348] sm:$0xff]  ;;  %v143_v0 = vld [vmem:[%s5524_s0 + $0x400] sm:$0xff] }
  0x23   :  { %2103 = vmatmul.mubr.bf16.vlgmr.msra.gmra.mrb[0].mxu0 %v3162_v35  ;;  %v4277_v35 = vld [vmem:[%s5523_s1 + $0x1e8] sm:$0xff]   ;;  %v151_v1 = vld [vmem:[%s5524_s0 + $0x440] sm:$0xff] }
  0x24   :  { %2223 = vmatmul.mubr.bf16.vlgmr.msra.gmra.mrb[0].mxu1 %v3164_v38  ;;  %3732 = vmatpush3.bf16.msra.mxu0 %v4256_v41  ;;  %v111_v38 = vld [vmem:[%s5524_s0 + $0x300] sm:$0xff]  ;;  %v112_v41 = vld [vmem:[%s5524_s0 + $0x308] sm:$0xff] }
  0x25   :  { %3814 = vmatpush3.bf16.msra.mxu1 %v4258_v43  ;;  %2110 = vmatprep.mubr.bf16.mxu0 %v3179_v46  ;;  %v4280_v43 = vld [vmem:[%s5523_s1 + $0x130] sm:$0xff]   ;;  %v3242_v46 = vcombine.low %v95_v25, %v103_v26  ;;  %v3259_v48 = vcombine.high %v111_v38, %v119_v39  ;;  %v3258_v58 = vcombine.low %v111_v38, %v119_v39  ;;  %v175_v16 = vld [vmem:[%s5524_s0 + $0x500] sm:$0x11]  ;;  %v176_v17 = vld [vmem:[%s5524_s0 + $0x508] sm:$0x11] }
  0x26   :  { %2230 = vmatprep.mubr.bf16.mxu1 %v3181_v49  ;;  %3733 = vmatprep.subr.bf16.mxu0 %v4259_v50  ;;  %v3261_v49 = vcombine.high %v112_v41, %v120_v42  ;;  %v4283_v50 = vld [vmem:[%s5523_s1 + $0x178] sm:$0xff]   ;;  %v3322_v26 = vcombine.low %v175_v16, %v175_v16  ;;  %v4295_v39 = vld [vmem:[%s5523_s1 + $0x248] sm:$0xff]  }
  0x27   :  { %3815 = vmatprep.subr.bf16.mxu1 %v4261_v54  ;;  %v127_v54 = vld [vmem:[%s5524_s0 + $0x380] sm:$0xff]  ;;  %v26_v25 = vld [vmem:[%s5524_s0 + $0x58] sm:$0xff] }
  0x28   :  { %3734 = vmatpush3.bf16.msra.mxu0 %v4260_v52  ;;  %v4287_v52 = vld [vmem:[%s5523_s1 + $0x1f8] sm:$0xff]  }
  0x29   :  { %3816 = vmatpush3.bf16.msra.mxu1 %v4262_v55  ;;  %3735 = vmatprep.subr.bf16.mxu0 %v4263_v62  ;;  %v135_v55 = vld [vmem:[%s5524_s0 + $0x3c0] sm:$0xff]  ;;  %v3277_v62 = vcombine.high %v128_v56, %v136_v57 }
  0x2a   :  { %3817 = vmatprep.subr.bf16.mxu1 %v4265_v5  ;;  %v3276_v5 = vcombine.low %v128_v56, %v136_v57  ;;  %v4303_v56 = vld [vmem:[%s5523_s1 + $0x258] sm:$0xff]   ;;  %v65_v57 = vld [vmem:[%s5524_s0 + $0x190] sm:$0xff] }
  0x2b   :  { %2111 = vmatmul.mubr.bf16.gmra.mrb[4].mxu0 %v3178_v51  ;;  %v4284_v51 = vld [vmem:[%s5523_s1 + $0x138] sm:$0xff]  }
  0x2c   :  { %2231 = vmatmul.mubr.bf16.gmra.mrb[4].mxu1 %v3180_v53  ;;  %2118 = vmatprep.mubr.bf16.mxu0 %v3195_v60  ;;  %v4290_v53 = vld [vmem:[%s5523_s1 + $0x1b8] sm:$0xff]   ;;  %v3260_v60 = vcombine.low %v112_v41, %v120_v42  ;;  %v4296_v41 = vld [vmem:[%s5523_s1 + $0x208] sm:$0xff]  }
  0x2d   :  { %2238 = vmatprep.mubr.bf16.mxu1 %v3197_v61  ;;  %3736 = vmatpush3.bf16.msra.mxu0 %v4264_v3  ;;  %v3275_v61 = vcombine.high %v127_v54, %v135_v55  ;;  %v152_v3 = vld [vmem:[%s5524_s0 + $0x448] sm:$0xff] }
  0x2e   :  { %3818 = vmatpush3.bf16.msra.mxu1 %v4266_v8  ;;  %3737 = vmatprep.subr.bf16.mxu0 %v4267_v10  ;;  %v159_v8 = vld [vmem:[%s5524_s0 + $0x480] sm:$0xff]  ;;  %v160_v10 = vld [vmem:[%s5524_s0 + $0x488] sm:$0xff] }
  0x2f   :  { %3819 = vmatprep.subr.bf16.mxu1 %v4269_v13  ;;  %v3292_v13 = vcombine.low %v144_v2, %v152_v3  ;;  %v4297_v42 = vld [vmem:[%s5523_s1 + $0x2c8] sm:$0xff]  }
  0x31   :  { %3738 = vmatpush3.bf16.msra.mxu0 %v4268_v12  ;;  %v3290_v12 = vcombine.low %v143_v0, %v151_v1 }
  0x32   :  { %3820 = vmatpush3.bf16.msra.mxu1 %v4270_v15  ;;  %3739 = vmatprep.subr.bf16.mxu0 %v4271_v19  ;;  %v3309_v15 = vcombine.high %v160_v10, %v168_v11  ;;  %v3308_v19 = vcombine.low %v160_v10, %v168_v11  ;;  %v4313_v10 = vld [vmem:[%s5523_s1 + $0x2e8] sm:$0xff]   ;;  %v89_v11 = vld [vmem:[%s5524_s0 + $0x250] sm:$0xff] }
  0x33   :  { %2119 = vmatmul.mubr.bf16.gmra.mrb[8].mxu0 %v3194_v4  ;;  %3821 = vmatprep.subr.bf16.mxu1 %v4273_v24  ;;  %v3274_v4 = vcombine.low %v127_v54, %v135_v55  ;;  %v18_v24 = vld [vmem:[%s5524_s0 + $0x18] sm:$0xff]  ;;  %v4300_v54 = vld [vmem:[%s5523_s1 + $0x210] sm:$0xff]  }
  0x34   :  { %2239 = vmatmul.mubr.bf16.gmra.mrb[8].mxu1 %v3196_v6  ;;  %2126 = vmatprep.mubr.bf16.mxu0 %v3211_v7  ;;  %v3291_v6 = vcombine.high %v143_v0, %v151_v1  ;;  %v3293_v7 = vcombine.high %v144_v2, %v152_v3  ;;  %v3169_v29 = vcombine.high %v18_v24, %v26_v25  ;;  %v4302_v55 = vld [vmem:[%s5523_s1 + $0x290] sm:$0xff]   ;;  %v4307_v0 = vld [vmem:[%s5523_s1 + $0x260] sm:$0xff]  }
  0x35   :  { %2246 = vmatprep.mubr.bf16.mxu1 %v3213_v9  ;;  %3740 = vmatpush3.bf16.msra.mxu0 %v4272_v22  ;;  %v167_v9 = vld [vmem:[%s5524_s0 + $0x4c0] sm:$0xff]  ;;  %v17_v22 = vld [vmem:[%s5524_s0 + $0x10] sm:$0xff] }
  0x36   :  { %3822 = vmatpush3.bf16.msra.mxu1 %v4274_v27  ;;  %3741 = vmatprep.subr.bf16.mxu0 %v4275_v30  ;;  %v3307_v14 = vcombine.high %v159_v8, %v167_v9  ;;  %v3324_v27 = vcombine.low %v176_v17, %v176_v17  ;;  %v33_v30 = vld [vmem:[%s5524_s0 + $0x90] sm:$0xff]  ;;  %v4309_v2 = vld [vmem:[%s5523_s1 + $0x2e0] sm:$0xff]  }
  0x37   :  { %3823 = vmatprep.subr.bf16.mxu1 %v4277_v35  ;;  %v3168_v35 = vcombine.low %v18_v24, %v26_v25  ;;  %v4319_v24 = vld [vmem:[%s5523_s1 + $0x278] sm:$0xff]   ;;  %v97_v25 = vld [vmem:[%s5524_s0 + $0x290] sm:$0xff] }
  0x39   :  { %3742 = vmatpush3.bf16.msra.mxu0 %v4276_v32  ;;  %v34_v32 = vld [vmem:[%s5524_s0 + $0x98] sm:$0xff] }
  0x3a   :  { %3824 = vmatpush3.bf16.msra.mxu1 %v4278_v37  ;;  %3743 = vmatprep.subr.bf16.mxu0 %v4279_v40  ;;  %v4294_v37 = vld [vmem:[%s5523_s1 + $0x280] sm:$0xff]  }
  0x3b   :  { %2127 = vmatmul.mubr.bf16.gmra.mrb[12].mxu0 %v3210_v18  ;;  %3825 = vmatprep.subr.bf16.mxu1 %v4281_v44  ;;  %v3306_v18 = vcombine.low %v159_v8, %v167_v9  ;;  %v49_v44 = vld [vmem:[%s5524_s0 + $0x110] sm:$0xff]  ;;  %v4311_v8 = vld [vmem:[%s5523_s1 + $0x268] sm:$0xff]  }
  0x3c   :  { %2247 = vmatmul.mubr.bf16.gmra.mrb[12].mxu1 %v3212_v20  ;;  %2134 = vmatprep.mubr.bf16.mxu0 %v3227_v21  ;;  %v3323_v20 = vcombine.high %v175_v16, %v175_v16  ;;  %v3325_v21 = vcombine.high %v176_v17, %v176_v17  ;;  %v81_v9 = vld [vmem:[%s5524_s0 + $0x210] sm:$0xff] }
  0x3d   :  { %2254 = vmatprep.mubr.bf16.mxu1 %v3229_v23  ;;  %3744 = vmatpush3.bf16.msra.mxu0 %v4280_v43  ;;  %v25_v23 = vld [vmem:[%s5524_s0 + $0x50] sm:$0xff]  ;;  %v4298_v43 = vld [vmem:[%s5523_s1 + $0x288] sm:$0xff]  }
  0x3e   :  { %3826 = vmatpush3.bf16.msra.mxu1 %v4282_v45  ;;  %3745 = vmatprep.subr.bf16.mxu0 %v4283_v50  ;;  %v3167_v28 = vcombine.high %v17_v22, %v25_v23  ;;  %v57_v45 = vld [vmem:[%s5524_s0 + $0x150] sm:$0xff] }
  0x3f   :  { %3827 = vmatprep.subr.bf16.mxu1 %v4287_v52  ;;  %v3199_v52 = vcombine.high %v49_v44, %v57_v45  ;;  %v3198_v1 = vcombine.low %v49_v44, %v57_v45  ;;  %v4315_v16 = vld [vmem:[%s5523_s1 + $0x270] sm:$0xff]  }
  0x41   :  { %3746 = vmatpush3.bf16.msra.mxu0 %v4284_v51 }
  0x42   :  { %3828 = vmatpush3.bf16.msra.mxu1 %v4290_v53  ;;  %3895 = vmatprep.subr.bf16.mxu0 %v4291_v59  ;;  %v73_v59 = vld [vmem:[%s5524_s0 + $0x1d0] sm:$0xff] }
  0x43   :  { %2135 = vmatmul.mubr.bf16.gmra.mrb[16].mxu0 %v3226_v31  ;;  %3977 = vmatprep.subr.bf16.mxu1 %v4293_v63  ;;  %v41_v31 = vld [vmem:[%s5524_s0 + $0xd0] sm:$0xff]  ;;  %v4306_v63 = vld [vmem:[%s5523_s1 + $0x298] sm:$0xff]   ;;  %v3214_v17 = vcombine.low %v65_v57, %v73_v59 }
  0x44   :  { %2255 = vmatmul.mubr.bf16.gmra.mrb[16].mxu1 %v3228_v33  ;;  %2142 = vmatprep.mubr.bf16.mxu0 %v3243_v34  ;;  %v3166_v33 = vcombine.low %v17_v22, %v25_v23  ;;  %v42_v34 = vld [vmem:[%s5524_s0 + $0xd8] sm:$0xff]  ;;  %v3183_v38 = vcombine.high %v33_v30, %v41_v31  ;;  %v3182_v50 = vcombine.low %v33_v30, %v41_v31  ;;  %v4316_v22 = vld [vmem:[%s5523_s1 + $0x230] sm:$0xff]  }
  0x45   :  { %2262 = vmatprep.mubr.bf16.mxu1 %v3245_v36  ;;  %v4292_v36 = vld [vmem:[%s5523_s1 + $0x200] sm:$0xff]   ;;  %v3185_v40 = vcombine.high %v34_v32, %v42_v34  ;;  %v3184_v51 = vcombine.low %v34_v32, %v42_v34  ;;  %v4318_v23 = vld [vmem:[%s5523_s1 + $0x2b0] sm:$0xff]   ;;  %v106_v30 = vld [vmem:[%s5524_s0 + $0x2d8] sm:$0xff] }
  0x46   :  { %v4326_v31 = vld [vmem:[%s5523_s1 + $0x2b8] sm:$0xff]   ;;  %v4327_v32 = vld [vmem:[%s5523_s1 + $0x340] sm:$0xff]  }
  0x47   :  { %v4329_v34 = vld [vmem:[%s5523_s1 + $0x3c0] sm:$0xff]  }
  0x4b   :  { %2143 = vmatmul.mubr.bf16.gmra.mrb[20].mxu0 %v3242_v46  ;;  %v50_v46 = vld [vmem:[%s5524_s0 + $0x118] sm:$0xff] }
  0x4c   :  { %2263 = vmatmul.mubr.bf16.gmra.mrb[20].mxu1 %v3244_v47  ;;  %2150 = vmatprep.mubr.bf16.mxu0 %v3259_v48  ;;  %v58_v47 = vld [vmem:[%s5524_s0 + $0x158] sm:$0xff]  ;;  %v4299_v48 = vld [vmem:[%s5523_s1 + $0x250] sm:$0xff]  }
  0x4d   :  { %2270 = vmatprep.mubr.bf16.mxu1 %v3261_v49  ;;  %v4301_v49 = vld [vmem:[%s5523_s1 + $0x2d0] sm:$0xff]   ;;  %v3201_v53 = vcombine.high %v50_v46, %v58_v47  ;;  %v3200_v3 = vcombine.low %v50_v46, %v58_v47 }
  0x4e   :  { %v129_v46 = vld [vmem:[%s5524_s0 + $0x390] sm:$0xff] }
  0x4f   :  { %v137_v47 = vld [vmem:[%s5524_s0 + $0x3d0] sm:$0xff] }
  0x53   :  { %2151 = vmatmul.mubr.bf16.gmra.mrb[24].mxu0 %v3258_v58  ;;  %v4305_v58 = vld [vmem:[%s5523_s1 + $0x2d8] sm:$0xff]  }
  0x54   :  { %2271 = vmatmul.mubr.bf16.gmra.mrb[24].mxu1 %v3260_v60  ;;  %2158 = vmatprep.mubr.bf16.mxu0 %v3275_v61  ;;  %v66_v60 = vld [vmem:[%s5524_s0 + $0x198] sm:$0xff] }
  0x55   :  { %2278 = vmatprep.mubr.bf16.mxu1 %v3277_v62  ;;  %v4304_v61 = vld [vmem:[%s5523_s1 + $0x218] sm:$0xff]  }
  0x56   :  { %v74_v62 = vld [vmem:[%s5524_s0 + $0x1d8] sm:$0xff] }
  0x5b   :  { %2159 = vmatmul.mubr.bf16.gmra.mrb[28].mxu0 %v3274_v4  ;;  %v3215_v4 = vcombine.high %v65_v57, %v73_v59  ;;  %v154_v57 = vld [vmem:[%s5524_s0 + $0x458] sm:$0xff] }
  0x5c   :  { %2279 = vmatmul.mubr.bf16.gmra.mrb[28].mxu1 %v3276_v5  ;;  %2166 = vmatprep.mubr.bf16.mxu0 %v3291_v6  ;;  %v4308_v5 = vld [vmem:[%s5523_s1 + $0x220] sm:$0xff]   ;;  %v3217_v6 = vcombine.high %v66_v60, %v74_v62 }
  0x5d   :  { %2286 = vmatprep.mubr.bf16.mxu1 %v3293_v7  ;;  %v4310_v7 = vld [vmem:[%s5523_s1 + $0x2a0] sm:$0xff]  }
  0x63   :  { %2167 = vmatmul.mubr.bf16.gmra.mrb[32].mxu0 %v3290_v12  ;;  %v82_v12 = vld [vmem:[%s5524_s0 + $0x218] sm:$0xff] }
  0x64   :  { %2287 = vmatmul.mubr.bf16.gmra.mrb[32].mxu1 %v3292_v13  ;;  %2174 = vmatprep.mubr.bf16.mxu0 %v3307_v14  ;;  %v90_v13 = vld [vmem:[%s5524_s0 + $0x258] sm:$0xff]  ;;  %v4312_v14 = vld [vmem:[%s5523_s1 + $0x228] sm:$0xff]  }
  0x65   :  { %2294 = vmatprep.mubr.bf16.mxu1 %v3309_v15  ;;  %v4314_v15 = vld [vmem:[%s5523_s1 + $0x2a8] sm:$0xff]  }
  0x6b   :  { %2175 = vmatmul.mubr.bf16.gmra.mrb[36].mxu0 %v3306_v18  ;;  %v4317_v18 = vld [vmem:[%s5523_s1 + $0x2f0] sm:$0xff]  }
  0x6c   :  { %2295 = vmatmul.mubr.bf16.gmra.mrb[36].mxu1 %v3308_v19  ;;  %2182 = vmatprep.mubr.bf16.mxu0 %v3323_v20  ;;  %v3216_v19 = vcombine.low %v66_v60, %v74_v62  ;;  %v3231_v20 = vcombine.high %v81_v9, %v89_v11  ;;  %v161_v62 = vld [vmem:[%s5524_s0 + $0x490] sm:$0xff] }
  0x6d   :  { %2302 = vmatprep.mubr.bf16.mxu1 %v3325_v21  ;;  %v3233_v21 = vcombine.high %v82_v12, %v90_v13 }
  0x73   :  { %2183 = vmatmul.mubr.bf16.gmra.mrb[40].mxu0 %v3322_v26  ;;  %v105_v26 = vld [vmem:[%s5524_s0 + $0x2d0] sm:$0xff] }
  0x74   :  { %2303 = vmatmul.mubr.bf16.gmra.mrb[40].mxu1 %v3324_v27  ;;  %2342 = vmatprep.mubr.bf16.mxu0 %v3167_v28  ;;  %v4323_v27 = vld [vmem:[%s5523_s1 + $0x2f8] sm:$0xff]  }
  0x75   :  { %2462 = vmatprep.mubr.bf16.mxu1 %v3169_v29  ;;  %v98_v28 = vld [vmem:[%s5524_s0 + $0x298] sm:$0xff] }
  0x76   :  { %v4320_v29 = vld [vmem:[%s5523_s1 + $0x238] sm:$0xff]  }
  0x7b   :  { %2343 = vmatmul.mubr.bf16.vlgmr.msra.gmra.mrb[44].mxu0 %v3166_v33  ;;  %v3230_v33 = vcombine.low %v81_v9, %v89_v11 }
  0x7c   :  { %2463 = vmatmul.mubr.bf16.vlgmr.msra.gmra.mrb[44].mxu1 %v3168_v35  ;;  %3896 = vmatpush3.bf16.msra.mxu0 %v4292_v36  ;;  %v3232_v35 = vcombine.low %v82_v12, %v90_v13  ;;  %v3247_v36 = vcombine.high %v97_v25, %v105_v26  ;;  %v19_v12 = vld [vmem:[%s5524_s0 + $0x20] sm:$0xff] }
  0x7d   :  { %3978 = vmatpush3.bf16.msra.mxu1 %v4294_v37  ;;  %2350 = vmatprep.mubr.bf16.mxu0 %v3183_v38  ;;  %v3249_v37 = vcombine.high %v98_v28, %v106_v30  ;;  %v113_v38 = vld [vmem:[%s5524_s0 + $0x310] sm:$0xff]  ;;  %v27_v13 = vld [vmem:[%s5524_s0 + $0x60] sm:$0xff] }
  0x7e   :  { %2470 = vmatprep.mubr.bf16.mxu1 %v3185_v40  ;;  %3897 = vmatprep.subr.bf16.mxu0 %v4295_v39  ;;  %v121_v39 = vld [vmem:[%s5524_s0 + $0x350] sm:$0xff]  ;;  %v114_v40 = vld [vmem:[%s5524_s0 + $0x318] sm:$0xff] }
  0x7f   :  { %3979 = vmatprep.subr.bf16.mxu1 %v4297_v42  ;;  %v3246_v42 = vcombine.low %v97_v25, %v105_v26  ;;  %v3263_v44 = vcombine.high %v113_v38, %v121_v39  ;;  %v4328_v26 = vld [vmem:[%s5523_s1 + $0x300] sm:$0xff]  }
  0x80   :  { %3898 = vmatpush3.bf16.msra.mxu0 %v4296_v41  ;;  %v122_v41 = vld [vmem:[%s5524_s0 + $0x358] sm:$0xff] }
  0x81   :  { %3980 = vmatpush3.bf16.msra.mxu1 %v4298_v43  ;;  %3899 = vmatprep.subr.bf16.mxu0 %v4299_v48  ;;  %v3248_v43 = vcombine.low %v98_v28, %v106_v30  ;;  %v3265_v45 = vcombine.high %v114_v40, %v122_v41  ;;  %v130_v48 = vld [vmem:[%s5524_s0 + $0x398] sm:$0xff]  ;;  %v4331_v30 = vld [vmem:[%s5523_s1 + $0x348] sm:$0xff]  }
  0x82   :  { %3981 = vmatprep.subr.bf16.mxu1 %v4301_v49  ;;  %v138_v49 = vld [vmem:[%s5524_s0 + $0x3d8] sm:$0xff] }
  0x83   :  { %2351 = vmatmul.mubr.bf16.gmra.mrb[48].mxu0 %v3182_v50  ;;  %v3262_v50 = vcombine.low %v113_v38, %v121_v39  ;;  %v3280_v59 = vcombine.low %v130_v48, %v138_v49  ;;  %v60_v38 = vld [vmem:[%s5524_s0 + $0x168] sm:$0xff]  ;;  %v4337_v39 = vld [vmem:[%s5523_s1 + $0x3d0] sm:$0xff]  }
  0x84   :  { %2471 = vmatmul.mubr.bf16.gmra.mrb[48].mxu1 %v3184_v51  ;;  %2358 = vmatprep.mubr.bf16.mxu0 %v3199_v52  ;;  %v3264_v51 = vcombine.low %v114_v40, %v122_v41  ;;  %v3279_v52 = vcombine.high %v129_v46, %v137_v47 }
  0x85   :  { %2478 = vmatprep.mubr.bf16.mxu1 %v3201_v53  ;;  %3900 = vmatpush3.bf16.msra.mxu0 %v4300_v54  ;;  %v3281_v53 = vcombine.high %v130_v48, %v138_v49  ;;  %v145_v54 = vld [vmem:[%s5524_s0 + $0x410] sm:$0xff]  ;;  %v67_v48 = vld [vmem:[%s5524_s0 + $0x1a0] sm:$0xff] }
  0x86   :  { %3982 = vmatpush3.bf16.msra.mxu1 %v4302_v55  ;;  %3901 = vmatprep.subr.bf16.mxu0 %v4303_v56  ;;  %v153_v55 = vld [vmem:[%s5524_s0 + $0x450] sm:$0xff]  ;;  %v146_v56 = vld [vmem:[%s5524_s0 + $0x418] sm:$0xff]  ;;  %v75_v49 = vld [vmem:[%s5524_s0 + $0x1e0] sm:$0xff] }
  0x87   :  { %3983 = vmatprep.subr.bf16.mxu1 %v4305_v58  ;;  %v3278_v58 = vcombine.low %v129_v46, %v137_v47  ;;  %v3295_v60 = vcombine.high %v145_v54, %v153_v55  ;;  %v4339_v46 = vld [vmem:[%s5523_s1 + $0x358] sm:$0xff]  }
  0x88   :  { %v4341_v47 = vld [vmem:[%s5523_s1 + $0x3d8] sm:$0xff]  }
  0x89   :  { %3902 = vmatpush3.bf16.msra.mxu0 %v4304_v61  ;;  %v3297_v61 = vcombine.high %v146_v56, %v154_v57 }
  0x8a   :  { %3984 = vmatpush3.bf16.msra.mxu1 %v4306_v63  ;;  %3903 = vmatprep.subr.bf16.mxu0 %v4307_v0  ;;  %v169_v63 = vld [vmem:[%s5524_s0 + $0x4d0] sm:$0xff]  ;;  %v162_v0 = vld [vmem:[%s5524_s0 + $0x498] sm:$0xff] }
  0x8b   :  { %2359 = vmatmul.mubr.bf16.gmra.mrb[52].mxu0 %v3198_v1  ;;  %3985 = vmatprep.subr.bf16.mxu1 %v4309_v2  ;;  %v170_v1 = vld [vmem:[%s5524_s0 + $0x4d8] sm:$0xff]  ;;  %v3294_v2 = vcombine.low %v145_v54, %v153_v55  ;;  %v4343_v54 = vld [vmem:[%s5523_s1 + $0x360] sm:$0xff]  }
  0x8c   :  { %2479 = vmatmul.mubr.bf16.gmra.mrb[52].mxu1 %v3200_v3  ;;  %2366 = vmatprep.mubr.bf16.mxu0 %v3215_v4  ;;  %v3296_v3 = vcombine.low %v146_v56, %v154_v57  ;;  %v3311_v4 = vcombine.high %v161_v62, %v169_v63  ;;  %v3312_v9 = vcombine.low %v162_v0, %v170_v1  ;;  %v4345_v56 = vld [vmem:[%s5523_s1 + $0x3e0] sm:$0xff]  }
  0x8d   :  { %2486 = vmatprep.mubr.bf16.mxu1 %v3217_v6  ;;  %3904 = vmatpush3.bf16.msra.mxu0 %v4308_v5  ;;  %v3313_v5 = vcombine.high %v162_v0, %v170_v1  ;;  %v177_v6 = vld [vmem:[%s5524_s0 + $0x510] sm:$0x11]  ;;  %v83_v0 = vld [vmem:[%s5524_s0 + $0x220] sm:$0xff] }
  0x8e   :  { %3986 = vmatpush3.bf16.msra.mxu1 %v4310_v7  ;;  %3905 = vmatprep.subr.bf16.mxu0 %v4311_v8  ;;  %v178_v7 = vld [vmem:[%s5524_s0 + $0x518] sm:$0x11]  ;;  %v3310_v8 = vcombine.low %v161_v62, %v169_v63  ;;  %v4347_v62 = vld [vmem:[%s5523_s1 + $0x368] sm:$0xff]   ;;  %v91_v1 = vld [vmem:[%s5524_s0 + $0x260] sm:$0xff] }
  0x8f   :  { %3987 = vmatprep.subr.bf16.mxu1 %v4313_v10  ;;  %v3327_v10 = vcombine.high %v177_v6, %v177_v6  ;;  %v3329_v11 = vcombine.high %v178_v7, %v178_v7  ;;  %v4349_v63 = vld [vmem:[%s5523_s1 + $0x3e8] sm:$0xff]  }
  0x91   :  { %3906 = vmatpush3.bf16.msra.mxu0 %v4312_v14  ;;  %v20_v14 = vld [vmem:[%s5524_s0 + $0x28] sm:$0xff] }
  0x92   :  { %3988 = vmatpush3.bf16.msra.mxu1 %v4314_v15  ;;  %3907 = vmatprep.subr.bf16.mxu0 %v4315_v16  ;;  %v28_v15 = vld [vmem:[%s5524_s0 + $0x68] sm:$0xff]  ;;  %v3326_v16 = vcombine.low %v177_v6, %v177_v6  ;;  %v4351_v6 = vld [vmem:[%s5523_s1 + $0x370] sm:$0xff]  }
  0x93   :  { %2367 = vmatmul.mubr.bf16.gmra.mrb[56].mxu0 %v3214_v17  ;;  %3989 = vmatprep.subr.bf16.mxu1 %v4317_v18  ;;  %v3328_v17 = vcombine.low %v178_v7, %v178_v7  ;;  %v3171_v18 = vcombine.high %v19_v12, %v27_v13  ;;  %v3172_v25 = vcombine.low %v20_v14, %v28_v15 }
  0x94   :  { %2487 = vmatmul.mubr.bf16.gmra.mrb[56].mxu1 %v3216_v19  ;;  %2374 = vmatprep.mubr.bf16.mxu0 %v3231_v20  ;;  %v3173_v19 = vcombine.high %v20_v14, %v28_v15  ;;  %v35_v20 = vld [vmem:[%s5524_s0 + $0xa0] sm:$0xff]  ;;  %v3218_v7 = vcombine.low %v67_v48, %v75_v49  ;;  %v4355_v14 = vld [vmem:[%s5523_s1 + $0x378] sm:$0xff]  }
  0x95   :  { %2494 = vmatprep.mubr.bf16.mxu1 %v3233_v21  ;;  %3908 = vmatpush3.bf16.msra.mxu0 %v4316_v22  ;;  %v43_v21 = vld [vmem:[%s5524_s0 + $0xe0] sm:$0xff]  ;;  %v3170_v22 = vcombine.low %v19_v12, %v27_v13  ;;  %v4352_v12 = vld [vmem:[%s5523_s1 + $0x330] sm:$0xff]   ;;  %v4359_v15 = vld [vmem:[%s5523_s1 + $0x3f8] sm:$0xff]  }
  0x96   :  { %3990 = vmatpush3.bf16.msra.mxu1 %v4318_v23  ;;  %3909 = vmatprep.subr.bf16.mxu0 %v4319_v24  ;;  %v36_v23 = vld [vmem:[%s5524_s0 + $0xa8] sm:$0xff]  ;;  %v3187_v28 = vcombine.high %v35_v20, %v43_v21  ;;  %v3186_v40 = vcombine.low %v35_v20, %v43_v21  ;;  %v4354_v13 = vld [vmem:[%s5523_s1 + $0x3b0] sm:$0xff]   ;;  %v4362_v21 = vld [vmem:[%s5523_s1 + $0x3b8] sm:$0xff]  }
  0x97   :  { %3991 = vmatprep.subr.bf16.mxu1 %v4323_v27  ;;  %v44_v24 = vld [vmem:[%s5524_s0 + $0xe8] sm:$0xff]  ;;  %v4330_v27 = vld [vmem:[%s5523_s1 + $0x380] sm:$0xff]  }
  0x98   :  { %v3188_v41 = vcombine.low %v36_v23, %v44_v24  ;;  %v108_v20 = vld [vmem:[%s5524_s0 + $0x2e8] sm:$0xff] }
  0x99   :  { %3910 = vmatpush3.bf16.msra.mxu0 %v4320_v29  ;;  %v3189_v29 = vcombine.high %v36_v23, %v44_v24 }
  0x9a   :  { %3992 = vmatpush3.bf16.msra.mxu1 %v4326_v31  ;;  %4059 = vmatprep.subr.bf16.mxu0 %v4327_v32  ;;  %v4333_v31 = vld [vmem:[%s5523_s1 + $0x3c8] sm:$0xff]  }
  0x9b   :  { %2375 = vmatmul.mubr.bf16.gmra.mrb[60].mxu0 %v3230_v33  ;;  %4141 = vmatprep.subr.bf16.mxu1 %v4329_v34  ;;  %v4332_v32 = vld [vmem:[%s5523_s1 + $0x308] sm:$0xff]   ;;  %v51_v34 = vld [vmem:[%s5524_s0 + $0x120] sm:$0xff] }
  0x9c   :  { %2495 = vmatmul.mubr.bf16.gmra.mrb[60].mxu1 %v3232_v35  ;;  %2382 = vmatprep.mubr.bf16.mxu0 %v3247_v36  ;;  %v4334_v33 = vld [vmem:[%s5523_s1 + $0x388] sm:$0xff]   ;;  %v59_v35 = vld [vmem:[%s5524_s0 + $0x160] sm:$0xff]  ;;  %v4335_v36 = vld [vmem:[%s5523_s1 + $0x350] sm:$0xff]  }
  0x9d   :  { %2502 = vmatprep.mubr.bf16.mxu1 %v3249_v37  ;;  %v52_v37 = vld [vmem:[%s5524_s0 + $0x128] sm:$0xff]  ;;  %v3202_v55 = vcombine.low %v51_v34, %v59_v35 }
  0x9e   :  { %v3204_v57 = vcombine.low %v52_v37, %v60_v38 }
  0xa3   :  { %2383 = vmatmul.mubr.bf16.gmra.mrb[64].mxu0 %v3246_v42  ;;  %v3203_v42 = vcombine.high %v51_v34, %v59_v35 }
  0xa4   :  { %2503 = vmatmul.mubr.bf16.gmra.mrb[64].mxu1 %v3248_v43  ;;  %2390 = vmatprep.mubr.bf16.mxu0 %v3263_v44  ;;  %v3205_v43 = vcombine.high %v52_v37, %v60_v38  ;;  %v4336_v44 = vld [vmem:[%s5523_s1 + $0x310] sm:$0xff]  }
  0xa5   :  { %2510 = vmatprep.mubr.bf16.mxu1 %v3265_v45  ;;  %v4338_v45 = vld [vmem:[%s5523_s1 + $0x390] sm:$0xff]  }
  0xab   :  { %2391 = vmatmul.mubr.bf16.gmra.mrb[68].mxu0 %v3262_v50  ;;  %v68_v50 = vld [vmem:[%s5524_s0 + $0x1a8] sm:$0xff] }
  0xac   :  { %2511 = vmatmul.mubr.bf16.gmra.mrb[68].mxu1 %v3264_v51  ;;  %2398 = vmatprep.mubr.bf16.mxu0 %v3279_v52  ;;  %v4340_v51 = vld [vmem:[%s5523_s1 + $0x318] sm:$0xff]   ;;  %v76_v52 = vld [vmem:[%s5524_s0 + $0x1e8] sm:$0xff] }
  0xad   :  { %2518 = vmatprep.mubr.bf16.mxu1 %v3281_v53  ;;  %v4342_v53 = vld [vmem:[%s5523_s1 + $0x398] sm:$0xff]  }
  0xb3   :  { %2399 = vmatmul.mubr.bf16.gmra.mrb[72].mxu0 %v3278_v58  ;;  %v3219_v58 = vcombine.high %v67_v48, %v75_v49 }
  0xb4   :  { %2519 = vmatmul.mubr.bf16.gmra.mrb[72].mxu1 %v3280_v59  ;;  %2406 = vmatprep.mubr.bf16.mxu0 %v3295_v60  ;;  %v3221_v59 = vcombine.high %v68_v50, %v76_v52  ;;  %v4344_v60 = vld [vmem:[%s5523_s1 + $0x320] sm:$0xff]  }
  0xb5   :  { %2526 = vmatprep.mubr.bf16.mxu1 %v3297_v61  ;;  %v4346_v61 = vld [vmem:[%s5523_s1 + $0x3a0] sm:$0xff]  }
  0xbb   :  { %2407 = vmatmul.mubr.bf16.gmra.mrb[76].mxu0 %v3294_v2  ;;  %v84_v2 = vld [vmem:[%s5524_s0 + $0x228] sm:$0xff] }
  0xbc   :  { %2527 = vmatmul.mubr.bf16.gmra.mrb[76].mxu1 %v3296_v3  ;;  %2414 = vmatprep.mubr.bf16.mxu0 %v3311_v4  ;;  %v4348_v3 = vld [vmem:[%s5523_s1 + $0x328] sm:$0xff]  }
  0xbd   :  { %2534 = vmatprep.mubr.bf16.mxu1 %v3313_v5  ;;  %v92_v4 = vld [vmem:[%s5524_s0 + $0x268] sm:$0xff] }
  0xbe   :  { %v4350_v5 = vld [vmem:[%s5523_s1 + $0x3a8] sm:$0xff]   ;;  %v3236_v23 = vcombine.low %v84_v2, %v92_v4 }
  0xc3   :  { %2415 = vmatmul.mubr.bf16.gmra.mrb[80].mxu0 %v3310_v8  ;;  %v4353_v8 = vld [vmem:[%s5523_s1 + $0x3f0] sm:$0xff]  }
  0xc4   :  { %2535 = vmatmul.mubr.bf16.gmra.mrb[80].mxu1 %v3312_v9  ;;  %2422 = vmatprep.mubr.bf16.mxu0 %v3327_v10  ;;  %v3220_v9 = vcombine.low %v68_v50, %v76_v52  ;;  %v3235_v10 = vcombine.high %v83_v0, %v91_v1  ;;  %v131_v50 = vld [vmem:[%s5524_s0 + $0x3a0] sm:$0xff] }
  0xc5   :  { %2542 = vmatprep.mubr.bf16.mxu1 %v3329_v11  ;;  %v3237_v11 = vcombine.high %v84_v2, %v92_v4 }
  0xcb   :  { %2423 = vmatmul.mubr.bf16.gmra.mrb[84].mxu0 %v3326_v16  ;;  %v99_v16 = vld [vmem:[%s5524_s0 + $0x2a0] sm:$0xff] }
  0xcc   :  { %2543 = vmatmul.mubr.bf16.gmra.mrb[84].mxu1 %v3328_v17  ;;  %2582 = vmatprep.mubr.bf16.mxu0 %v3171_v18  ;;  %v107_v17 = vld [vmem:[%s5524_s0 + $0x2e0] sm:$0xff]  ;;  %v4356_v18 = vld [vmem:[%s5523_s1 + $0x338] sm:$0xff]  }
  0xcd   :  { %2702 = vmatprep.mubr.bf16.mxu1 %v3173_v19  ;;  %v100_v19 = vld [vmem:[%s5524_s0 + $0x2a8] sm:$0xff]  ;;  %v3251_v24 = vcombine.high %v99_v16, %v107_v17  ;;  %v3250_v34 = vcombine.low %v99_v16, %v107_v17 }
  0xce   :  { %v3252_v38 = vcombine.low %v100_v19, %v108_v20 }
  0xd3   :  { %2583 = vmatmul.mubr.bf16.vlgmr.msra.gmra.mrb[88].mxu0 %v3170_v22  ;;  %v3234_v22 = vcombine.low %v83_v0, %v91_v1 }
  0xd4   :  { %2703 = vmatmul.mubr.bf16.vlgmr.msra.gmra.mrb[88].mxu1 %v3172_v25  ;;  %4060 = vmatpush3.bf16.msra.mxu0 %v4328_v26  ;;  %v3253_v25 = vcombine.high %v100_v19, %v108_v20  ;;  %v115_v26 = vld [vmem:[%s5524_s0 + $0x320] sm:$0xff] }
  0xd5   :  { %4142 = vmatpush3.bf16.msra.mxu1 %v4330_v27  ;;  %2590 = vmatprep.mubr.bf16.mxu0 %v3187_v28  ;;  %v123_v27 = vld [vmem:[%s5524_s0 + $0x360] sm:$0xff] }
  0xd6   :  { %2710 = vmatprep.mubr.bf16.mxu1 %v3189_v29  ;;  %4061 = vmatprep.subr.bf16.mxu0 %v4331_v30  ;;  %v116_v29 = vld [vmem:[%s5524_s0 + $0x328] sm:$0xff] }
  0xd7   :  { %4143 = vmatprep.subr.bf16.mxu1 %v4333_v31  ;;  %v124_v30 = vld [vmem:[%s5524_s0 + $0x368] sm:$0xff] }
  0xd8   :  { %4062 = vmatpush3.bf16.msra.mxu0 %v4332_v32  ;;  %v5110_v32 = vld [vmem:[%s5525_s2] ss:$0 sm:$0xff] }
  0xd9   :  { %4144 = vmatpush3.bf16.msra.mxu1 %v4334_v33  ;;  %4063 = vmatprep.subr.bf16.mxu0 %v4335_v36 }
  0xda   :  { %4145 = vmatprep.subr.bf16.mxu1 %v4337_v39  ;;  %v3267_v39 = vcombine.high %v115_v26, %v123_v27 }
  0xdb   :  { %2591 = vmatmul.mubr.bf16.gmra.mrb[92].mxu0 %v3186_v40 }
  0xdc   :  { %2711 = vmatmul.mubr.bf16.gmra.mrb[92].mxu1 %v3188_v41  ;;  %2598 = vmatprep.mubr.bf16.mxu0 %v3203_v42 }
  0xdd   :  { %2718 = vmatprep.mubr.bf16.mxu1 %v3205_v43  ;;  %4064 = vmatpush3.bf16.msra.mxu0 %v4336_v44  ;;  %v3269_v43 = vcombine.high %v116_v29, %v124_v30 }
  0xde   :  { %4146 = vmatpush3.bf16.msra.mxu1 %v4338_v45  ;;  %4065 = vmatprep.subr.bf16.mxu0 %v4339_v46 }
  0xdf   :  { %4147 = vmatprep.subr.bf16.mxu1 %v4341_v47 }
  0xe1   :  { %4066 = vmatpush3.bf16.msra.mxu0 %v4340_v51  ;;  %v139_v51 = vld [vmem:[%s5524_s0 + $0x3e0] sm:$0xff] }
  0xe2   :  { %4148 = vmatpush3.bf16.msra.mxu1 %v4342_v53  ;;  %4067 = vmatprep.subr.bf16.mxu0 %v4343_v54  ;;  %v132_v54 = vld [vmem:[%s5524_s0 + $0x3a8] sm:$0xff] }
  0xe3   :  { %2599 = vmatmul.mubr.bf16.gmra.mrb[96].mxu0 %v3202_v55  ;;  %4149 = vmatprep.subr.bf16.mxu1 %v4345_v56  ;;  %v140_v55 = vld [vmem:[%s5524_s0 + $0x3e8] sm:$0xff] }
  0xe4   :  { %2719 = vmatmul.mubr.bf16.gmra.mrb[96].mxu1 %v3204_v57  ;;  %2606 = vmatprep.mubr.bf16.mxu0 %v3219_v58  ;;  %v3266_v58 = vcombine.low %v115_v26, %v123_v27 }
  0xe5   :  { %2726 = vmatprep.mubr.bf16.mxu1 %v3221_v59  ;;  %4068 = vmatpush3.bf16.msra.mxu0 %v4344_v60 }
  0xe6   :  { %4150 = vmatpush3.bf16.msra.mxu1 %v4346_v61  ;;  %4069 = vmatprep.subr.bf16.mxu0 %v4347_v62  ;;  %v3268_v62 = vcombine.low %v116_v29, %v124_v30 }
  0xe7   :  { %4151 = vmatprep.subr.bf16.mxu1 %v4349_v63  ;;  %v3283_v63 = vcombine.high %v131_v50, %v139_v51 }
  0xe9   :  { %4070 = vmatpush3.bf16.msra.mxu0 %v4348_v3  ;;  %v3285_v3 = vcombine.high %v132_v54, %v140_v55 }
  0xea   :  { %4152 = vmatpush3.bf16.msra.mxu1 %v4350_v5  ;;  %4071 = vmatprep.subr.bf16.mxu0 %v4351_v6 }
  0xeb   :  { %2607 = vmatmul.mubr.bf16.gmra.mrb[100].mxu0 %v3218_v7  ;;  %4153 = vmatprep.subr.bf16.mxu1 %v4353_v8 }
  0xec   :  { %2727 = vmatmul.mubr.bf16.gmra.mrb[100].mxu1 %v3220_v9  ;;  %2614 = vmatprep.mubr.bf16.mxu0 %v3235_v10  ;;  %v147_v10 = vld [vmem:[%s5524_s0 + $0x420] sm:$0xff] }
  0xed   :  { %2734 = vmatprep.mubr.bf16.mxu1 %v3237_v11  ;;  %4072 = vmatpush3.bf16.msra.mxu0 %v4352_v12  ;;  %v155_v11 = vld [vmem:[%s5524_s0 + $0x460] sm:$0xff] }
  0xee   :  { %4154 = vmatpush3.bf16.msra.mxu1 %v4354_v13  ;;  %4073 = vmatprep.subr.bf16.mxu0 %v4355_v14  ;;  %v148_v14 = vld [vmem:[%s5524_s0 + $0x428] sm:$0xff] }
  0xef   :  { %4155 = vmatprep.subr.bf16.mxu1 %v4359_v15  ;;  %v156_v15 = vld [vmem:[%s5524_s0 + $0x468] sm:$0xff] }
  0xf0   :  { %v3301_v27 = vcombine.high %v148_v14, %v156_v15 }
  0xf1   :  { %4074 = vmatpush3.bf16.msra.mxu0 %v4356_v18  ;;  %v3282_v18 = vcombine.low %v131_v50, %v139_v51 }
  0xf2   :  { %4156 = vmatpush3.bf16.msra.mxu1 %v4362_v21 }
  0xf3   :  { %2615 = vmatmul.mubr.bf16.gmra.mrb[104].mxu0 %v3234_v22  ;;  %v3284_v22 = vcombine.low %v132_v54, %v140_v55 }
  0xf4   :  { %2735 = vmatmul.mubr.bf16.gmra.mrb[104].mxu1 %v3236_v23  ;;  %2622 = vmatprep.mubr.bf16.mxu0 %v3251_v24  ;;  %v3299_v23 = vcombine.high %v147_v10, %v155_v11 }
  0xf5   :  { %2742 = vmatprep.mubr.bf16.mxu1 %v3253_v25 }
  0xf6   :  { %v3583_v28 = vpop.f32.mrb[0].mxu0 }
  0xf7   :  { %v3665_v31 = vpop.f32.mrb[0].mxu1  ;;  %v3584_v33 = vpop.f32.mrb[1].mxu0 }
  0xf8   :  { %v3585_v35 = vadd.f32 %v3584_v33, %v3583_v28  ;;  %v3666_v36 = vpop.f32.mrb[1].mxu1  ;;  %v3586_v37 = vpop.f32.mrb[2].mxu0 }
  0xf9   :  { %v3667_v40 = vadd.f32 %v3666_v36, %v3665_v31  ;;  %v3668_v41 = vpop.f32.mrb[2].mxu1  ;;  %v3587_v42 = vpop.f32.mrb[3].mxu0  ;;  %v171_v36 = vld [vmem:[%s5524_s0 + $0x4e0] sm:$0xff] }
  0xfa   :  { %v2105_v44 = vadd.f32 %v3585_v35, %v5110_v32  ;;  %v3588_v45 = vadd.f32 %v3587_v42, %v3586_v37  ;;  %v3669_v46 = vpop.f32.mrb[3].mxu1  ;;  %v163_v35 = vld [vmem:[%s5524_s0 + $0x4a0] sm:$0xff] }
  0xfb   :  { %v3670_v47 = vadd.f32 %v3669_v46, %v3668_v41  ;;  %2623 = vmatmul.mubr.bf16.gmra.mrb[108].mxu0 %v3250_v34 }
  0xfc   :  { %v5113_v48 = vadd.f32 %v3667_v40, %v2105_v44  ;;  %v2108_v49 = vadd.f32 %v3588_v45, %v5110_v32  ;;  %2743 = vmatmul.mubr.bf16.gmra.mrb[108].mxu1 %v3252_v38  ;;  %2630 = vmatprep.mubr.bf16.mxu0 %v3267_v39  ;;  %v164_v39 = vld [vmem:[%s5524_s0 + $0x4a8] sm:$0xff] }
  0xfd   :  { %2750 = vmatprep.mubr.bf16.mxu1 %v3269_v43  ;;  %v172_v40 = vld [vmem:[%s5524_s0 + $0x4e8] sm:$0xff]  ;;  %v3298_v43 = vcombine.low %v147_v10, %v155_v11 }
  0xfe   :  { %v5122_v52 = vadd.f32 %v3670_v47, %v2108_v49  ;;  %v3589_v53 = vpop.f32.mrb[4].mxu0  ;;  %v3300_v47 = vcombine.low %v148_v14, %v156_v15  ;;  %v3315_v49 = vcombine.high %v163_v35, %v171_v36  ;;  %v3317_v54 = vcombine.high %v164_v39, %v172_v40 }
  0xff   :  { %v3671_v56 = vpop.f32.mrb[4].mxu1  ;;  %v3590_v57 = vpop.f32.mrb[5].mxu0 }
 0x100   :  { %v3591_v59 = vadd.f32 %v3590_v57, %v3589_v53  ;;  %v3672_v60 = vpop.f32.mrb[5].mxu1  ;;  %v3592_v61 = vpop.f32.mrb[6].mxu0 }
 0x101   :  { %v3673_v0 = vadd.f32 %v3672_v60, %v3671_v56  ;;  %v3674_v1 = vpop.f32.mrb[6].mxu1  ;;  %v3593_v2 = vpop.f32.mrb[7].mxu0 }
 0x102   :  { %v2113_v4 = vadd.f32 %v3591_v59, %v5110_v32  ;;  %v3594_v5 = vadd.f32 %v3593_v2, %v3592_v61  ;;  %v3675_v6 = vpop.f32.mrb[7].mxu1  ;;  %v179_v61 = vld [vmem:[%s5524_s0 + $0x520] sm:$0x11] }
 0x103   :  { %v3676_v7 = vadd.f32 %v3675_v6, %v3674_v1  ;;  %2631 = vmatmul.mubr.bf16.gmra.mrb[112].mxu0 %v3266_v58 }
 0x104   :  { %v5131_v8 = vadd.f32 %v3673_v0, %v2113_v4  ;;  %v2116_v9 = vadd.f32 %v3594_v5, %v5110_v32  ;;  %2751 = vmatmul.mubr.bf16.gmra.mrb[112].mxu1 %v3268_v62  ;;  %2638 = vmatprep.mubr.bf16.mxu0 %v3283_v63  ;;  %v180_v0 = vld [vmem:[%s5524_s0 + $0x528] sm:$0x11] }
 0x105   :  { %2758 = vmatprep.mubr.bf16.mxu1 %v3285_v3  ;;  %v3314_v3 = vcombine.low %v163_v35, %v171_v36  ;;  %v3333_v14 = vcombine.high %v180_v0, %v180_v0  ;;  %v3332_v35 = vcombine.low %v180_v0, %v180_v0 }
 0x106   :  { %v5140_v12 = vadd.f32 %v3676_v7, %v2116_v9  ;;  %v3595_v13 = vpop.f32.mrb[8].mxu0  ;;  %v3316_v7 = vcombine.low %v164_v39, %v172_v40  ;;  %v3331_v9 = vcombine.high %v179_v61, %v179_v61 }
 0x107   :  { %v3677_v16 = vpop.f32.mrb[8].mxu1  ;;  %v3596_v17 = vpop.f32.mrb[9].mxu0 }
 0x108   :  { %v3597_v19 = vadd.f32 %v3596_v17, %v3595_v13  ;;  %v3678_v20 = vpop.f32.mrb[9].mxu1  ;;  %v3598_v21 = vpop.f32.mrb[10].mxu0 }
 0x109   :  { %v3679_v24 = vadd.f32 %v3678_v20, %v3677_v16  ;;  %v3680_v25 = vpop.f32.mrb[10].mxu1  ;;  %v3599_v26 = vpop.f32.mrb[11].mxu0 }
 0x10a   :  { %v2121_v28 = vadd.f32 %v3597_v19, %v5110_v32  ;;  %v3600_v29 = vadd.f32 %v3599_v26, %v3598_v21  ;;  %v3681_v30 = vpop.f32.mrb[11].mxu1  ;;  %v21_v21 = vld [vmem:[%s5524_s0 + $0x30] sm:$0xff]  ;;  %v30_v26 = vld [vmem:[%s5524_s0 + $0x78] sm:$0xff] }
 0x10b   :  { %v3682_v31 = vadd.f32 %v3681_v30, %v3680_v25  ;;  %2639 = vmatmul.mubr.bf16.gmra.mrb[116].mxu0 %v3282_v18  ;;  %v22_v25 = vld [vmem:[%s5524_s0 + $0x38] sm:$0xff] }
 0x10c   :  { %v5149_v33 = vadd.f32 %v3679_v24, %v2121_v28  ;;  %v2124_v34 = vadd.f32 %v3600_v29, %v5110_v32  ;;  %2759 = vmatmul.mubr.bf16.gmra.mrb[116].mxu1 %v3284_v22  ;;  %2646 = vmatprep.mubr.bf16.mxu0 %v3299_v23  ;;  %v29_v22 = vld [vmem:[%s5524_s0 + $0x70] sm:$0xff]  ;;  %v3330_v29 = vcombine.low %v179_v61, %v179_v61 }
 0x10d   :  { %2766 = vmatprep.mubr.bf16.mxu1 %v3301_v27  ;;  %v3175_v36 = vcombine.high %v21_v21, %v29_v22  ;;  %v3176_v0 = vcombine.low %v22_v25, %v30_v26 }
 0x10e   :  { %v5158_v37 = vadd.f32 %v3682_v31, %v2124_v34  ;;  %v3601_v38 = vpop.f32.mrb[12].mxu0 }
 0x10f   :  { %v3683_v41 = vpop.f32.mrb[12].mxu1  ;;  %v3602_v42 = vpop.f32.mrb[13].mxu0 }
 0x110   :  { %v3603_v44 = vadd.f32 %v3602_v42, %v3601_v38  ;;  %v3684_v45 = vpop.f32.mrb[13].mxu1  ;;  %v3604_v46 = vpop.f32.mrb[14].mxu0 }
 0x111   :  { %v3685_v50 = vadd.f32 %v3684_v45, %v3683_v41  ;;  %v3686_v51 = vpop.f32.mrb[14].mxu1  ;;  %v3605_v53 = vpop.f32.mrb[15].mxu0  ;;  %v3177_v41 = vcombine.high %v22_v25, %v30_v26 }
 0x112   :  { %v2129_v55 = vadd.f32 %v3603_v44, %v5110_v32  ;;  %v3606_v56 = vadd.f32 %v3605_v53, %v3604_v46  ;;  %v3687_v57 = vpop.f32.mrb[15].mxu1 }
 0x113   :  { %v3688_v58 = vadd.f32 %v3687_v57, %v3686_v51  ;;  %2647 = vmatmul.mubr.bf16.gmra.mrb[120].mxu0 %v3298_v43 }
 0x114   :  { %v5167_v59 = vadd.f32 %v3685_v50, %v2129_v55  ;;  %v2132_v60 = vadd.f32 %v3606_v56, %v5110_v32  ;;  %2767 = vmatmul.mubr.bf16.gmra.mrb[120].mxu1 %v3300_v47  ;;  %2654 = vmatprep.mubr.bf16.mxu0 %v3315_v49  ;;  %v37_v49 = vld [vmem:[%s5524_s0 + $0xb0] sm:$0xff]  ;;  %v46_v55 = vld [vmem:[%s5524_s0 + $0xf8] sm:$0xff] }
 0x115   :  { %2774 = vmatprep.mubr.bf16.mxu1 %v3317_v54  ;;  %v45_v50 = vld [vmem:[%s5524_s0 + $0xf0] sm:$0xff]  ;;  %v38_v54 = vld [vmem:[%s5524_s0 + $0xb8] sm:$0xff] }
 0x116   :  { %v5173_v62 = vadd.f32 %v3688_v58, %v2132_v60  ;;  %v3607_v63 = vpop.f32.mrb[16].mxu0  ;;  %v3174_v58 = vcombine.low %v21_v21, %v29_v22 }
 0x117   :  { %v3689_v1 = vpop.f32.mrb[16].mxu1  ;;  %v3608_v2 = vpop.f32.mrb[17].mxu0 }
 0x118   :  { %v3609_v4 = vadd.f32 %v3608_v2, %v3607_v63  ;;  %v3690_v5 = vpop.f32.mrb[17].mxu1  ;;  %v3610_v6 = vpop.f32.mrb[18].mxu0 }
 0x119   :  { %v3691_v10 = vadd.f32 %v3690_v5, %v3689_v1  ;;  %v3692_v11 = vpop.f32.mrb[18].mxu1  ;;  %v3611_v13 = vpop.f32.mrb[19].mxu0  ;;  %v3191_v1 = vcombine.high %v37_v49, %v45_v50  ;;  %v3193_v5 = vcombine.high %v38_v54, %v46_v55 }
 0x11a   :  { %v2137_v15 = vadd.f32 %v3609_v4, %v5110_v32  ;;  %v3612_v16 = vadd.f32 %v3611_v13, %v3610_v6  ;;  %v3693_v17 = vpop.f32.mrb[19].mxu1 }
 0x11b   :  { %v3694_v18 = vadd.f32 %v3693_v17, %v3692_v11  ;;  %2655 = vmatmul.mubr.bf16.gmra.mrb[124].mxu0 %v3314_v3 }
 0x11c   :  { %v5179_v19 = vadd.f32 %v3691_v10, %v2137_v15  ;;  %v2140_v20 = vadd.f32 %v3612_v16, %v5110_v32  ;;  %2775 = vmatmul.mubr.bf16.gmra.mrb[124].mxu1 %v3316_v7  ;;  %2662 = vmatprep.mubr.bf16.mxu0 %v3331_v9  ;;  %v61_v15 = vld [vmem:[%s5524_s0 + $0x170] sm:$0xff] }
 0x11d   :  { %2782 = vmatprep.mubr.bf16.mxu1 %v3333_v14  ;;  %v53_v14 = vld [vmem:[%s5524_s0 + $0x130] sm:$0xff] }
 0x11e   :  { %v5188_v23 = vadd.f32 %v3694_v18, %v2140_v20  ;;  %v3613_v24 = vpop.f32.mrb[20].mxu0  ;;  %v54_v18 = vld [vmem:[%s5524_s0 + $0x138] sm:$0xff] }
 0x11f   :  { %v3695_v27 = vpop.f32.mrb[20].mxu1  ;;  %v3614_v28 = vpop.f32.mrb[21].mxu0  ;;  %v62_v20 = vld [vmem:[%s5524_s0 + $0x178] sm:$0xff] }
 0x120   :  { %v3615_v30 = vadd.f32 %v3614_v28, %v3613_v24  ;;  %v3696_v31 = vpop.f32.mrb[21].mxu1  ;;  %v3616_v34 = vpop.f32.mrb[22].mxu0  ;;  %v3190_v24 = vcombine.low %v37_v49, %v45_v50  ;;  %v3192_v28 = vcombine.low %v38_v54, %v46_v55  ;;  %v70_v49 = vld [vmem:[%s5524_s0 + $0x1b8] sm:$0xff]  ;;  %v3206_v55 = vcombine.low %v53_v14, %v61_v15 }
 0x121   :  { %v3697_v38 = vadd.f32 %v3696_v31, %v3695_v27  ;;  %v3698_v39 = vpop.f32.mrb[22].mxu1  ;;  %v3617_v40 = vpop.f32.mrb[23].mxu0  ;;  %v78_v50 = vld [vmem:[%s5524_s0 + $0x1f8] sm:$0xff] }
 0x122   :  { %v2145_v42 = vadd.f32 %v3615_v30, %v5110_v32  ;;  %v3618_v43 = vadd.f32 %v3617_v40, %v3616_v34  ;;  %v3699_v44 = vpop.f32.mrb[23].mxu1 }
 0x123   :  { %v3700_v45 = vadd.f32 %v3699_v44, %v3698_v39  ;;  %2663 = vmatmul.mubr.bf16.gmra.mrb[128].mxu0 %v3330_v29  ;;  %v3207_v29 = vcombine.high %v53_v14, %v61_v15  ;;  %v77_v44 = vld [vmem:[%s5524_s0 + $0x1f0] sm:$0xff] }
 0x124   :  { %v5197_v46 = vadd.f32 %v3697_v38, %v2145_v42  ;;  %v2148_v47 = vadd.f32 %v3618_v43, %v5110_v32  ;;  %2783 = vmatmul.mubr.bf16.gmra.mrb[128].mxu1 %v3332_v35  ;;  %2822 = vmatprep.mubr.bf16.mxu0 %v3175_v36  ;;  %v3209_v35 = vcombine.high %v54_v18, %v62_v20  ;;  %v69_v43 = vld [vmem:[%s5524_s0 + $0x1b0] sm:$0xff] }
 0x125   :  { %2942 = vmatprep.mubr.bf16.mxu1 %v3177_v41 }
 0x126   :  { %v5206_v51 = vadd.f32 %v3700_v45, %v2148_v47  ;;  %v3619_v53 = vpop.f32.mrb[24].mxu0 }
 0x127   :  { %v3701_v56 = vpop.f32.mrb[24].mxu1  ;;  %v3620_v57 = vpop.f32.mrb[25].mxu0 }
 0x128   :  { %v3621_v60 = vadd.f32 %v3620_v57, %v3619_v53  ;;  %v3702_v61 = vpop.f32.mrb[25].mxu1  ;;  %v3622_v63 = vpop.f32.mrb[26].mxu0 }
 0x129   :  { %v3703_v2 = vadd.f32 %v3702_v61, %v3701_v56  ;;  %v3704_v3 = vpop.f32.mrb[26].mxu1  ;;  %v3623_v4 = vpop.f32.mrb[27].mxu0  ;;  %v3223_v61 = vcombine.high %v69_v43, %v77_v44 }
 0x12a   :  { %v2153_v6 = vadd.f32 %v3621_v60, %v5110_v32  ;;  %v3624_v7 = vadd.f32 %v3623_v4, %v3622_v63  ;;  %v3705_v9 = vpop.f32.mrb[27].mxu1  ;;  %v3208_v60 = vcombine.low %v54_v18, %v62_v20  ;;  %v94_v18 = vld [vmem:[%s5524_s0 + $0x278] sm:$0xff] }
 0x12b   :  { %v3706_v10 = vadd.f32 %v3705_v9, %v3704_v3  ;;  %2823 = vmatmul.mubr.bf16.vlgmr.msra.gmra.mrb[132].mxu0 %v3174_v58 }
 0x12c   :  { %v5215_v11 = vadd.f32 %v3703_v2, %v2153_v6  ;;  %v2156_v13 = vadd.f32 %v3624_v7, %v5110_v32  ;;  %2943 = vmatmul.mubr.bf16.vlgmr.msra.gmra.mrb[132].mxu1 %v3176_v0  ;;  %2830 = vmatprep.mubr.bf16.mxu0 %v3191_v1  ;;  %v3225_v2 = vcombine.high %v70_v49, %v78_v50 }
 0x12d   :  { %2950 = vmatprep.mubr.bf16.mxu1 %v3193_v5 }
 0x12e   :  { %v5224_v16 = vadd.f32 %v3706_v10, %v2156_v13  ;;  %v3625_v17 = vpop.f32.mrb[28].mxu0  ;;  %v85_v10 = vld [vmem:[%s5524_s0 + $0x230] sm:$0xff] }
 0x12f   :  { %v3707_v21 = vpop.f32.mrb[28].mxu1  ;;  %v3626_v22 = vpop.f32.mrb[29].mxu0  ;;  %v93_v13 = vld [vmem:[%s5524_s0 + $0x270] sm:$0xff] }
 0x130   :  { %v3627_v25 = vadd.f32 %v3626_v22, %v3625_v17  ;;  %v3708_v26 = vpop.f32.mrb[29].mxu1  ;;  %v3628_v27 = vpop.f32.mrb[30].mxu0  ;;  %v86_v17 = vld [vmem:[%s5524_s0 + $0x238] sm:$0xff]  ;;  %v3222_v22 = vcombine.low %v69_v43, %v77_v44  ;;  %v101_v43 = vld [vmem:[%s5524_s0 + $0x2b0] sm:$0xff] }
 0x131   :  { %v3709_v30 = vadd.f32 %v3708_v26, %v3707_v21  ;;  %v3710_v31 = vpop.f32.mrb[30].mxu1  ;;  %v3629_v34 = vpop.f32.mrb[31].mxu0  ;;  %v109_v44 = vld [vmem:[%s5524_s0 + $0x2f0] sm:$0xff] }
 0x132   :  { %v2161_v36 = vadd.f32 %v3627_v25, %v5110_v32  ;;  %v3630_v38 = vadd.f32 %v3629_v34, %v3628_v27  ;;  %v3711_v39 = vpop.f32.mrb[31].mxu1  ;;  %v3224_v27 = vcombine.low %v70_v49, %v78_v50  ;;  %v3241_v34 = vcombine.high %v86_v17, %v94_v18  ;;  %v102_v50 = vld [vmem:[%s5524_s0 + $0x2b8] sm:$0xff] }
 0x133   :  { %v3712_v40 = vadd.f32 %v3711_v39, %v3710_v31  ;;  %2831 = vmatmul.mubr.bf16.gmra.mrb[136].mxu0 %v3190_v24 }
 0x134   :  { %v5233_v41 = vadd.f32 %v3709_v30, %v2161_v36  ;;  %v2164_v42 = vadd.f32 %v3630_v38, %v5110_v32  ;;  %2951 = vmatmul.mubr.bf16.gmra.mrb[136].mxu1 %v3192_v28  ;;  %2838 = vmatprep.mubr.bf16.mxu0 %v3207_v29  ;;  %v3239_v28 = vcombine.high %v85_v10, %v93_v13 }
 0x135   :  { %2958 = vmatprep.mubr.bf16.mxu1 %v3209_v35 }
 0x136   :  { %v5242_v45 = vadd.f32 %v3712_v40, %v2164_v42  ;;  %v3631_v47 = vpop.f32.mrb[32].mxu0 }
 0x137   :  { %v3713_v53 = vpop.f32.mrb[32].mxu1  ;;  %v3632_v54 = vpop.f32.mrb[33].mxu0 }
 0x138   :  { %v3633_v56 = vadd.f32 %v3632_v54, %v3631_v47  ;;  %v3714_v57 = vpop.f32.mrb[33].mxu1  ;;  %v3634_v58 = vpop.f32.mrb[34].mxu0 }
 0x139   :  { %v3715_v63 = vadd.f32 %v3714_v57, %v3713_v53  ;;  %v3716_v0 = vpop.f32.mrb[34].mxu1  ;;  %v3635_v1 = vpop.f32.mrb[35].mxu0  ;;  %v110_v53 = vld [vmem:[%s5524_s0 + $0x2f8] sm:$0xff] }
 0x13a   :  { %v2169_v3 = vadd.f32 %v3633_v56, %v5110_v32  ;;  %v3636_v4 = vadd.f32 %v3635_v1, %v3634_v58  ;;  %v3717_v5 = vpop.f32.mrb[35].mxu1  ;;  %v3238_v56 = vcombine.low %v85_v10, %v93_v13  ;;  %v125_v10 = vld [vmem:[%s5524_s0 + $0x370] sm:$0xff] }
 0x13b   :  { %v3718_v6 = vadd.f32 %v3717_v5, %v3716_v0  ;;  %2839 = vmatmul.mubr.bf16.gmra.mrb[140].mxu0 %v3206_v55 }
 0x13c   :  { %v5251_v7 = vadd.f32 %v3715_v63, %v2169_v3  ;;  %v2172_v9 = vadd.f32 %v3636_v4, %v5110_v32  ;;  %2959 = vmatmul.mubr.bf16.gmra.mrb[140].mxu1 %v3208_v60  ;;  %2846 = vmatprep.mubr.bf16.mxu0 %v3223_v61  ;;  %v3240_v61 = vcombine.low %v86_v17, %v94_v18 }
 0x13d   :  { %2966 = vmatprep.mubr.bf16.mxu1 %v3225_v2  ;;  %v3255_v63 = vcombine.high %v101_v43, %v109_v44  ;;  %v3257_v3 = vcombine.high %v102_v50, %v110_v53 }
 0x13e   :  { %v5260_v14 = vadd.f32 %v3718_v6, %v2172_v9  ;;  %v3637_v15 = vpop.f32.mrb[36].mxu0  ;;  %v117_v9 = vld [vmem:[%s5524_s0 + $0x330] sm:$0xff] }
 0x13f   :  { %v3719_v20 = vpop.f32.mrb[36].mxu1  ;;  %v3638_v21 = vpop.f32.mrb[37].mxu0 }
 0x140   :  { %v3639_v24 = vadd.f32 %v3638_v21, %v3637_v15  ;;  %v3720_v25 = vpop.f32.mrb[37].mxu1  ;;  %v3640_v26 = vpop.f32.mrb[38].mxu0  ;;  %v126_v15 = vld [vmem:[%s5524_s0 + $0x378] sm:$0xff] }
 0x141   :  { %v3721_v29 = vadd.f32 %v3720_v25, %v3719_v20  ;;  %v3722_v30 = vpop.f32.mrb[38].mxu1  ;;  %v3641_v31 = vpop.f32.mrb[39].mxu0  ;;  %v3254_v20 = vcombine.low %v101_v43, %v109_v44  ;;  %v3256_v25 = vcombine.low %v102_v50, %v110_v53  ;;  %v141_v43 = vld [vmem:[%s5524_s0 + $0x3f0] sm:$0xff] }
 0x142   :  { %v2177_v35 = vadd.f32 %v3639_v24, %v5110_v32  ;;  %v3642_v36 = vadd.f32 %v3641_v31, %v3640_v26  ;;  %v3723_v38 = vpop.f32.mrb[39].mxu1  ;;  %v3271_v26 = vcombine.high %v117_v9, %v125_v10 }
 0x143   :  { %v3724_v39 = vadd.f32 %v3723_v38, %v3722_v30  ;;  %2847 = vmatmul.mubr.bf16.gmra.mrb[144].mxu0 %v3222_v22 }
 0x144   :  { %v5269_v40 = vadd.f32 %v3721_v29, %v2177_v35  ;;  %v2180_v42 = vadd.f32 %v3642_v36, %v5110_v32  ;;  %2967 = vmatmul.mubr.bf16.gmra.mrb[144].mxu1 %v3224_v27  ;;  %2854 = vmatprep.mubr.bf16.mxu0 %v3239_v28 }
 0x145   :  { %2974 = vmatprep.mubr.bf16.mxu1 %v3241_v34 }
 0x146   :  { %v5278_v47 = vadd.f32 %v3724_v39, %v2180_v42  ;;  %v3643_v49 = vpop.f32.mrb[40].mxu0  ;;  %v133_v42 = vld [vmem:[%s5524_s0 + $0x3b0] sm:$0xff] }
 0x147   :  { %v3725_v54 = vpop.f32.mrb[40].mxu1  ;;  %v3644_v55 = vpop.f32.mrb[41].mxu0 }
 0x148   :  { %v3645_v57 = vadd.f32 %v3644_v55, %v3643_v49  ;;  %v3726_v58 = vpop.f32.mrb[41].mxu1  ;;  %v3646_v60 = vpop.f32.mrb[42].mxu0  ;;  %v134_v49 = vld [vmem:[%s5524_s0 + $0x3b8] sm:$0xff] }
 0x149   :  { %v3727_v0 = vadd.f32 %v3726_v58, %v3725_v54  ;;  %v3728_v1 = vpop.f32.mrb[42].mxu1  ;;  %v3647_v2 = vpop.f32.mrb[43].mxu0  ;;  %v3270_v54 = vcombine.low %v117_v9, %v125_v10  ;;  %v3287_v60 = vcombine.high %v133_v42, %v141_v43  ;;  %v149_v9 = vld [vmem:[%s5524_s0 + $0x430] sm:$0xff] }
 0x14a   :  { %v2185_v4 = vadd.f32 %v3645_v57, %v5110_v32  ;;  %v3729_v5 = vpop.f32.mrb[43].mxu1  ;;  %v118_v32 = vld [vmem:[%s5524_s0 + $0x338] sm:$0xff]  ;;  %v157_v10 = vld [vmem:[%s5524_s0 + $0x470] sm:$0xff] }
 0x14b   :  { %2855 = vmatmul.mubr.bf16.gmra.mrb[148].mxu0 %v3238_v56  ;;  %v3273_v30 = vcombine.high %v118_v32, %v126_v15  ;;  %v3272_v58 = vcombine.low %v118_v32, %v126_v15  ;;  %v150_v15 = vld [vmem:[%s5524_s0 + $0x438] sm:$0xff] }
 0x14c   :  { %v5287_v6 = vadd.f32 %v3727_v0, %v2185_v4  ;;  %2975 = vmatmul.mubr.bf16.gmra.mrb[148].mxu1 %v3240_v61  ;;  %2862 = vmatprep.mubr.bf16.mxu0 %v3255_v63 }
 0x14d   :  { %2982 = vmatprep.mubr.bf16.mxu1 %v3257_v3 }
 0x14e   :  { %v3747_v13 = vpop.f32.mrb[44].mxu0 }
 0x14f   :  { %v3829_v17 = vpop.f32.mrb[44].mxu1  ;;  %v3748_v18 = vpop.f32.mrb[45].mxu0 }
 0x150   :  { %v3749_v21 = vadd.f32 %v3748_v18, %v3747_v13  ;;  %v3830_v22 = vpop.f32.mrb[45].mxu1  ;;  %v3750_v24 = vpop.f32.mrb[46].mxu0 }
 0x151   :  { %v3831_v27 = vadd.f32 %v3830_v22, %v3829_v17  ;;  %v3832_v28 = vpop.f32.mrb[46].mxu1  ;;  %v3751_v29 = vpop.f32.mrb[47].mxu0 }
 0x152   :  { %v2345_v31 = vadd.f32 %v3749_v21, %v5113_v48  ;;  %v3752_v34 = vadd.f32 %v3751_v29, %v3750_v24  ;;  %v3833_v35 = vpop.f32.mrb[47].mxu1  ;;  %v3286_v21 = vcombine.low %v133_v42, %v141_v43  ;;  %v165_v42 = vld [vmem:[%s5524_s0 + $0x4b0] sm:$0xff] }
 0x153   :  { %v3834_v36 = vadd.f32 %v3833_v35, %v3832_v28  ;;  %2863 = vmatmul.mubr.bf16.gmra.mrb[152].mxu0 %v3254_v20  ;;  %v173_v43 = vld [vmem:[%s5524_s0 + $0x4f0] sm:$0xff] }
 0x154   :  { %v5302_v38 = vadd.f32 %v3831_v27, %v2345_v31  ;;  %v2348_v39 = vadd.f32 %v3752_v34, %v5122_v52  ;;  %2983 = vmatmul.mubr.bf16.gmra.mrb[152].mxu1 %v3256_v25  ;;  %2870 = vmatprep.mubr.bf16.mxu0 %v3271_v26  ;;  %v142_v52 = vld [vmem:[%s5524_s0 + $0x3f8] sm:$0xff]  ;;  %v3303_v27 = vcombine.high %v149_v9, %v157_v10 }
 0x155   :  { %2990 = vmatprep.mubr.bf16.mxu1 %v3273_v30  ;;  %v3289_v1 = vcombine.high %v134_v49, %v142_v52  ;;  %v3288_v26 = vcombine.low %v134_v49, %v142_v52  ;;  %v166_v52 = vld [vmem:[%s5524_s0 + $0x4b8] sm:$0xff] }
 0x156   :  { %v5311_v48 = vadd.f32 %v3834_v36, %v2348_v39  ;;  %v3753_v44 = vpop.f32.mrb[48].mxu0 }
 0x157   :  { %v3835_v50 = vpop.f32.mrb[48].mxu1  ;;  %v3754_v53 = vpop.f32.mrb[49].mxu0 }
 0x158   :  { %v3755_v55 = vadd.f32 %v3754_v53, %v3753_v44  ;;  %v3836_v56 = vpop.f32.mrb[49].mxu1  ;;  %v3756_v57 = vpop.f32.mrb[50].mxu0 }
 0x159   :  { %v3837_v61 = vadd.f32 %v3836_v56, %v3835_v50  ;;  %v3838_v63 = vpop.f32.mrb[50].mxu1  ;;  %v3757_v0 = vpop.f32.mrb[51].mxu0 }
 0x15a   :  { %v2353_v2 = vadd.f32 %v3755_v55, %v5131_v8  ;;  %v3758_v3 = vadd.f32 %v3757_v0, %v3756_v57  ;;  %v3839_v4 = vpop.f32.mrb[51].mxu1  ;;  %v3302_v55 = vcombine.low %v149_v9, %v157_v10  ;;  %v181_v9 = vld [vmem:[%s5524_s0 + $0x530] sm:$0x11] }
 0x15b   :  { %v3840_v5 = vadd.f32 %v3839_v4, %v3838_v63  ;;  %2871 = vmatmul.mubr.bf16.gmra.mrb[156].mxu0 %v3270_v54 }
 0x15c   :  { %v5320_v13 = vadd.f32 %v3837_v61, %v2353_v2  ;;  %v2356_v17 = vadd.f32 %v3758_v3, %v5140_v12  ;;  %2991 = vmatmul.mubr.bf16.gmra.mrb[156].mxu1 %v3272_v58  ;;  %2878 = vmatprep.mubr.bf16.mxu0 %v3287_v60  ;;  %v158_v12 = vld [vmem:[%s5524_s0 + $0x478] sm:$0xff]  ;;  %v3319_v61 = vcombine.high %v165_v42, %v173_v43 }
 0x15d   :  { %2998 = vmatprep.mubr.bf16.mxu1 %v3289_v1  ;;  %v3305_v31 = vcombine.high %v150_v15, %v158_v12  ;;  %v3304_v60 = vcombine.low %v150_v15, %v158_v12 }
 0x15e   :  { %v5329_v8 = vadd.f32 %v3840_v5, %v2356_v17  ;;  %v3759_v32 = vpop.f32.mrb[52].mxu0 }
 0x15f   :  { %v3841_v18 = vpop.f32.mrb[52].mxu1  ;;  %v3760_v20 = vpop.f32.mrb[53].mxu0 }
 0x160   :  { %v3761_v22 = vadd.f32 %v3760_v20, %v3759_v32  ;;  %v3842_v24 = vpop.f32.mrb[53].mxu1  ;;  %v3762_v25 = vpop.f32.mrb[54].mxu0 }
 0x161   :  { %v3843_v28 = vadd.f32 %v3842_v24, %v3841_v18  ;;  %v3844_v29 = vpop.f32.mrb[54].mxu1  ;;  %v3763_v30 = vpop.f32.mrb[55].mxu0 }
 0x162   :  { %v2361_v34 = vadd.f32 %v3761_v22, %v5149_v33  ;;  %v3764_v35 = vadd.f32 %v3763_v30, %v3762_v25  ;;  %v3845_v36 = vpop.f32.mrb[55].mxu1 }
 0x163   :  { %v3846_v39 = vadd.f32 %v3845_v36, %v3844_v29  ;;  %2879 = vmatmul.mubr.bf16.gmra.mrb[160].mxu0 %v3286_v21  ;;  %v3318_v21 = vcombine.low %v165_v42, %v173_v43 }
 0x164   :  { %v5338_v44 = vadd.f32 %v3843_v28, %v2361_v34  ;;  %v2364_v50 = vadd.f32 %v3764_v35, %v5158_v37  ;;  %2999 = vmatmul.mubr.bf16.gmra.mrb[160].mxu1 %v3288_v26  ;;  %2886 = vmatprep.mubr.bf16.mxu0 %v3303_v27  ;;  %v174_v37 = vld [vmem:[%s5524_s0 + $0x4f8] sm:$0xff]  ;;  %v3335_v26 = vcombine.high %v181_v9, %v181_v9 }
 0x165   :  { %3006 = vmatprep.mubr.bf16.mxu1 %v3305_v31  ;;  %v3321_v2 = vcombine.high %v166_v52, %v174_v37  ;;  %v3320_v25 = vcombine.low %v166_v52, %v174_v37  ;;  %v3334_v37 = vcombine.low %v181_v9, %v181_v9 }
 0x166   :  { %v5347_v33 = vadd.f32 %v3846_v39, %v2364_v50  ;;  %v3765_v49 = vpop.f32.mrb[56].mxu0 }
 0x167   :  { %v3847_v53 = vpop.f32.mrb[56].mxu1  ;;  %v3766_v54 = vpop.f32.mrb[57].mxu0 }
 0x168   :  { %v3767_v56 = vadd.f32 %v3766_v54, %v3765_v49  ;;  %v3848_v57 = vpop.f32.mrb[57].mxu1  ;;  %v3768_v58 = vpop.f32.mrb[58].mxu0 }
 0x169   :  { %v3849_v63 = vadd.f32 %v3848_v57, %v3847_v53  ;;  %v3850_v0 = vpop.f32.mrb[58].mxu1  ;;  %v3769_v1 = vpop.f32.mrb[59].mxu0 }
 0x16a   :  { %v2369_v3 = vadd.f32 %v3767_v56, %v5167_v59  ;;  %v3770_v4 = vadd.f32 %v3769_v1, %v3768_v58  ;;  %v3851_v5 = vpop.f32.mrb[59].mxu1  ;;  %v182_v59 = vld [vmem:[%s5524_s0 + $0x538] sm:$0x11] }
 0x16b   :  { %v3852_v17 = vadd.f32 %v3851_v5, %v3850_v0  ;;  %2887 = vmatmul.mubr.bf16.gmra.mrb[164].mxu0 %v3302_v55  ;;  %v3337_v30 = vcombine.high %v182_v59, %v182_v59  ;;  %v3336_v55 = vcombine.low %v182_v59, %v182_v59 }
 0x16c   :  { %v5356_v32 = vadd.f32 %v3849_v63, %v2369_v3  ;;  %v2372_v18 = vadd.f32 %v3770_v4, %v5173_v62  ;;  %3007 = vmatmul.mubr.bf16.gmra.mrb[164].mxu1 %v3304_v60  ;;  %2894 = vmatprep.mubr.bf16.mxu0 %v3319_v61 }
 0x16d   :  { %3014 = vmatprep.mubr.bf16.mxu1 %v3321_v2 }
 0x16e   :  { %v5362_v10 = vadd.f32 %v3852_v17, %v2372_v18  ;;  %v3771_v15 = vpop.f32.mrb[60].mxu0 }
 0x16f   :  { %v3853_v12 = vpop.f32.mrb[60].mxu1  ;;  %v3772_v20 = vpop.f32.mrb[61].mxu0 }
 0x170   :  { %v3773_v22 = vadd.f32 %v3772_v20, %v3771_v15  ;;  %v3854_v24 = vpop.f32.mrb[61].mxu1  ;;  %v3774_v62 = vpop.f32.mrb[62].mxu0 }
 0x171   :  { %v3855_v27 = vadd.f32 %v3854_v24, %v3853_v12  ;;  %v3856_v28 = vpop.f32.mrb[62].mxu1  ;;  %v3775_v29 = vpop.f32.mrb[63].mxu0 }
 0x172   :  { %v2377_v31 = vadd.f32 %v3773_v22, %v5179_v19  ;;  %v3776_v34 = vadd.f32 %v3775_v29, %v3774_v62  ;;  %v3857_v35 = vpop.f32.mrb[63].mxu1 }
 0x173   :  { %v3858_v36 = vadd.f32 %v3857_v35, %v3856_v28  ;;  %2895 = vmatmul.mubr.bf16.gmra.mrb[168].mxu0 %v3318_v21 }
 0x174   :  { %v5368_v39 = vadd.f32 %v3855_v27, %v2377_v31  ;;  %v2380_v50 = vadd.f32 %v3776_v34, %v5188_v23  ;;  %3015 = vmatmul.mubr.bf16.gmra.mrb[168].mxu1 %v3320_v25  ;;  %2902 = vmatprep.mubr.bf16.mxu0 %v3335_v26 }
 0x175   :  { %3022 = vmatprep.mubr.bf16.mxu1 %v3337_v30 }
 0x176   :  { %v5371_v42 = vadd.f32 %v3858_v36, %v2380_v50  ;;  %v3777_v43 = vpop.f32.mrb[64].mxu0 }
 0x177   :  { %v3859_v49 = vpop.f32.mrb[64].mxu1  ;;  %v3778_v52 = vpop.f32.mrb[65].mxu0 }
 0x178   :  { %v3779_v53 = vadd.f32 %v3778_v52, %v3777_v43  ;;  %v3860_v54 = vpop.f32.mrb[65].mxu1  ;;  %v3780_v19 = vpop.f32.mrb[66].mxu0 }
 0x179   :  { %v3861_v56 = vadd.f32 %v3860_v54, %v3859_v49  ;;  %v3862_v57 = vpop.f32.mrb[66].mxu1  ;;  %v3781_v58 = vpop.f32.mrb[67].mxu0 }
 0x17a   :  { %v2385_v60 = vadd.f32 %v3779_v53, %v5197_v46  ;;  %v3782_v61 = vadd.f32 %v3781_v58, %v3780_v19  ;;  %v3863_v23 = vpop.f32.mrb[67].mxu1 }
 0x17b   :  { %v3864_v63 = vadd.f32 %v3863_v23, %v3862_v57  ;;  %2903 = vmatmul.mubr.bf16.gmra.mrb[172].mxu0 %v3334_v37 }
 0x17c   :  { %v5374_v0 = vadd.f32 %v3861_v56, %v2385_v60  ;;  %v2388_v1 = vadd.f32 %v3782_v61, %v5206_v51  ;;  %3023 = vmatmul.mubr.bf16.gmra.mrb[172].mxu1 %v3336_v55 }
 0x17e   :  { %v5377_v2 = vadd.f32 %v3864_v63, %v2388_v1  ;;  %v3783_v3 = vpop.f32.mrb[68].mxu0 }
 0x17f   :  { %v3865_v4 = vpop.f32.mrb[68].mxu1  ;;  %v3784_v5 = vpop.f32.mrb[69].mxu0 }
 0x180   :  { %v3785_v17 = vadd.f32 %v3784_v5, %v3783_v3  ;;  %v3866_v18 = vpop.f32.mrb[69].mxu1  ;;  %v3786_v9 = vpop.f32.mrb[70].mxu0 }
 0x181   :  { %v3867_v15 = vadd.f32 %v3866_v18, %v3865_v4  ;;  %v3868_v59 = vpop.f32.mrb[70].mxu1  ;;  %v3787_v46 = vpop.f32.mrb[71].mxu0 }
 0x182   :  { %v2393_v12 = vadd.f32 %v3785_v17, %v5215_v11  ;;  %v3788_v20 = vadd.f32 %v3787_v46, %v3786_v9  ;;  %v3869_v21 = vpop.f32.mrb[71].mxu1 }
 0x183   :  { %v3870_v22 = vadd.f32 %v3869_v21, %v3868_v59 }
 0x184   :  { %v5380_v24 = vadd.f32 %v3867_v15, %v2393_v12  ;;  %v2396_v51 = vadd.f32 %v3788_v20, %v5224_v16 }
 0x186   :  { %v5383_v62 = vadd.f32 %v3870_v22, %v2396_v51  ;;  %v3789_v25 = vpop.f32.mrb[72].mxu0 }
 0x187   :  { %v3871_v26 = vpop.f32.mrb[72].mxu1  ;;  %v3790_v27 = vpop.f32.mrb[73].mxu0 }
 0x188   :  { %v3791_v28 = vadd.f32 %v3790_v27, %v3789_v25  ;;  %v3872_v29 = vpop.f32.mrb[73].mxu1  ;;  %v3792_v30 = vpop.f32.mrb[74].mxu0 }
 0x189   :  { %v3873_v31 = vadd.f32 %v3872_v29, %v3871_v26  ;;  %v3874_v34 = vpop.f32.mrb[74].mxu1  ;;  %v3793_v35 = vpop.f32.mrb[75].mxu0 }
 0x18a   :  { %v2401_v11 = vadd.f32 %v3791_v28, %v5233_v41  ;;  %v3794_v36 = vadd.f32 %v3793_v35, %v3792_v30  ;;  %v3875_v50 = vpop.f32.mrb[75].mxu1 }
 0x18b   :  { %v3876_v43 = vadd.f32 %v3875_v50, %v3874_v34 }
 0x18c   :  { %v5386_v49 = vadd.f32 %v3873_v31, %v2401_v11  ;;  %v2404_v16 = vadd.f32 %v3794_v36, %v5242_v45 }
 0x18e   :  { %v5389_v52 = vadd.f32 %v3876_v43, %v2404_v16  ;;  %v3795_v37 = vpop.f32.mrb[76].mxu0 }
 0x18f   :  { %v3877_v53 = vpop.f32.mrb[76].mxu1  ;;  %v3796_v54 = vpop.f32.mrb[77].mxu0 }
 0x190   :  { %v3797_v19 = vadd.f32 %v3796_v54, %v3795_v37  ;;  %v3878_v55 = vpop.f32.mrb[77].mxu1  ;;  %v3798_v56 = vpop.f32.mrb[78].mxu0 }
 0x191   :  { %v3879_v57 = vadd.f32 %v3878_v55, %v3877_v53  ;;  %v3880_v58 = vpop.f32.mrb[78].mxu1  ;;  %v3799_v60 = vpop.f32.mrb[79].mxu0 }
 0x192   :  { %v2409_v41 = vadd.f32 %v3797_v19, %v5251_v7  ;;  %v3800_v61 = vadd.f32 %v3799_v60, %v3798_v56  ;;  %v3881_v23 = vpop.f32.mrb[79].mxu1 }
 0x193   :  { %v3882_v63 = vadd.f32 %v3881_v23, %v3880_v58 }
 0x194   :  { %v5392_v1 = vadd.f32 %v3879_v57, %v2409_v41  ;;  %v2412_v45 = vadd.f32 %v3800_v61, %v5260_v14 }
 0x196   :  { %v5395_v3 = vadd.f32 %v3882_v63, %v2412_v45  ;;  %v3801_v4 = vpop.f32.mrb[80].mxu0 }
 0x197   :  { %v3883_v5 = vpop.f32.mrb[80].mxu1  ;;  %v3802_v17 = vpop.f32.mrb[81].mxu0 }
 0x198   :  { %v3803_v18 = vadd.f32 %v3802_v17, %v3801_v4  ;;  %v3884_v9 = vpop.f32.mrb[81].mxu1  ;;  %v3804_v15 = vpop.f32.mrb[82].mxu0 }
 0x199   :  { %v3885_v59 = vadd.f32 %v3884_v9, %v3883_v5  ;;  %v3886_v46 = vpop.f32.mrb[82].mxu1  ;;  %v3805_v12 = vpop.f32.mrb[83].mxu0 }
 0x19a   :  { %v2417_v7 = vadd.f32 %v3803_v18, %v5269_v40  ;;  %v3806_v20 = vadd.f32 %v3805_v12, %v3804_v15  ;;  %v3887_v21 = vpop.f32.mrb[83].mxu1 }
 0x19b   :  { %v3888_v22 = vadd.f32 %v3887_v21, %v3886_v46 }
 0x19c   :  { %v5398_v51 = vadd.f32 %v3885_v59, %v2417_v7  ;;  %v2420_v14 = vadd.f32 %v3806_v20, %v5278_v47 }
 0x19e   :  { %v5401_v25 = vadd.f32 %v3888_v22, %v2420_v14  ;;  %v3807_v26 = vpop.f32.mrb[84].mxu0 }
 0x19f   :  { %v3889_v27 = vpop.f32.mrb[84].mxu1  ;;  %v3808_v28 = vpop.f32.mrb[85].mxu0 }
 0x1a0   :  { %v3809_v29 = vadd.f32 %v3808_v28, %v3807_v26  ;;  %v3890_v30 = vpop.f32.mrb[85].mxu1  ;;  %v3810_v31 = vpop.f32.mrb[86].mxu0 }
 0x1a1   :  { %v3891_v34 = vadd.f32 %v3890_v30, %v3889_v27  ;;  %v3892_v35 = vpop.f32.mrb[86].mxu1  ;;  %v3811_v11 = vpop.f32.mrb[87].mxu0 }
 0x1a2   :  { %v2425_v40 = vadd.f32 %v3809_v29, %v5287_v6  ;;  %v3893_v36 = vpop.f32.mrb[87].mxu1 }
 0x1a4   :  { %v5404_v50 = vadd.f32 %v3891_v34, %v2425_v40 }
 0x1a6   :  { %v3911_v43 = vpop.f32.mrb[88].mxu0 }
 0x1a7   :  { %v3993_v16 = vpop.f32.mrb[88].mxu1  ;;  %v3912_v37 = vpop.f32.mrb[89].mxu0 }
 0x1a8   :  { %v3913_v47 = vadd.f32 %v3912_v37, %v3911_v43  ;;  %v3994_v53 = vpop.f32.mrb[89].mxu1  ;;  %v3914_v54 = vpop.f32.mrb[90].mxu0 }
 0x1a9   :  { %v3995_v19 = vadd.f32 %v3994_v53, %v3993_v16  ;;  %v3996_v55 = vpop.f32.mrb[90].mxu1  ;;  %v3915_v56 = vpop.f32.mrb[91].mxu0 }
 0x1aa   :  { %v2585_v57 = vadd.f32 %v3913_v47, %v5302_v38  ;;  %v3916_v58 = vadd.f32 %v3915_v56, %v3914_v54  ;;  %v3997_v60 = vpop.f32.mrb[91].mxu1 }
 0x1ab   :  { %v3998_v41 = vadd.f32 %v3997_v60, %v3996_v55 }
 0x1ac   :  { %v5407_v61 = vadd.f32 %v3995_v19, %v2585_v57  ;;  %v2588_v6 = vadd.f32 %v3916_v58, %v5311_v48 }
 0x1ae   :  { %v5410_v23 = vadd.f32 %v3998_v41, %v2588_v6  ;;  %v3917_v63 = vpop.f32.mrb[92].mxu0 }
 0x1af   :  { %v3999_v45 = vpop.f32.mrb[92].mxu1  ;;  %v3918_v4 = vpop.f32.mrb[93].mxu0 }
 0x1b0   :  { %v3919_v5 = vadd.f32 %v3918_v4, %v3917_v63  ;;  %v4000_v17 = vpop.f32.mrb[93].mxu1  ;;  %v3920_v18 = vpop.f32.mrb[94].mxu0 }
 0x1b1   :  { %v4001_v9 = vadd.f32 %v4000_v17, %v3999_v45  ;;  %v4002_v15 = vpop.f32.mrb[94].mxu1  ;;  %v3921_v59 = vpop.f32.mrb[95].mxu0 }
 0x1b2   :  { %v2593_v38 = vadd.f32 %v3919_v5, %v5320_v13  ;;  %v3922_v46 = vadd.f32 %v3921_v59, %v3920_v18  ;;  %v4003_v12 = vpop.f32.mrb[95].mxu1 }
 0x1b3   :  { %v4004_v7 = vadd.f32 %v4003_v12, %v4002_v15 }
 0x1b4   :  { %v5413_v20 = vadd.f32 %v4001_v9, %v2593_v38  ;;  %v2596_v48 = vadd.f32 %v3922_v46, %v5329_v8 }
 0x1b6   :  { %v5416_v21 = vadd.f32 %v4004_v7, %v2596_v48  ;;  %v3923_v22 = vpop.f32.mrb[96].mxu0 }
 0x1b7   :  { %v4005_v14 = vpop.f32.mrb[96].mxu1  ;;  %v3924_v26 = vpop.f32.mrb[97].mxu0 }
 0x1b8   :  { %v3925_v27 = vadd.f32 %v3924_v26, %v3923_v22  ;;  %v4006_v28 = vpop.f32.mrb[97].mxu1  ;;  %v3926_v29 = vpop.f32.mrb[98].mxu0 }
 0x1b9   :  { %v4007_v30 = vadd.f32 %v4006_v28, %v4005_v14  ;;  %v4008_v31 = vpop.f32.mrb[98].mxu1  ;;  %v3927_v34 = vpop.f32.mrb[99].mxu0 }
 0x1ba   :  { %v2601_v13 = vadd.f32 %v3925_v27, %v5338_v44  ;;  %v3928_v35 = vadd.f32 %v3927_v34, %v3926_v29  ;;  %v4009_v11 = vpop.f32.mrb[99].mxu1 }
 0x1bb   :  { %v4010_v40 = vadd.f32 %v4009_v11, %v4008_v31 }
 0x1bc   :  { %v5419_v36 = vadd.f32 %v4007_v30, %v2601_v13  ;;  %v2604_v8 = vadd.f32 %v3928_v35, %v5347_v33 }
 0x1be   :  { %v5422_v43 = vadd.f32 %v4010_v40, %v2604_v8  ;;  %v3929_v16 = vpop.f32.mrb[100].mxu0 }
 0x1bf   :  { %v4011_v37 = vpop.f32.mrb[100].mxu1  ;;  %v3930_v47 = vpop.f32.mrb[101].mxu0 }
 0x1c0   :  { %v3931_v53 = vadd.f32 %v3930_v47, %v3929_v16  ;;  %v4012_v54 = vpop.f32.mrb[101].mxu1  ;;  %v3932_v19 = vpop.f32.mrb[102].mxu0 }
 0x1c1   :  { %v4013_v55 = vadd.f32 %v4012_v54, %v4011_v37  ;;  %v4014_v56 = vpop.f32.mrb[102].mxu1  ;;  %v3933_v57 = vpop.f32.mrb[103].mxu0 }
 0x1c2   :  { %v2609_v44 = vadd.f32 %v3931_v53, %v5356_v32  ;;  %v3934_v58 = vadd.f32 %v3933_v57, %v3932_v19  ;;  %v4015_v60 = vpop.f32.mrb[103].mxu1 }
 0x1c3   :  { %v4016_v41 = vadd.f32 %v4015_v60, %v4014_v56 }
 0x1c4   :  { %v5425_v6 = vadd.f32 %v4013_v55, %v2609_v44  ;;  %v2612_v33 = vadd.f32 %v3934_v58, %v5362_v10 }
 0x1c6   :  { %v5428_v63 = vadd.f32 %v4016_v41, %v2612_v33  ;;  %v3935_v45 = vpop.f32.mrb[104].mxu0 }
 0x1c7   :  { %v4017_v4 = vpop.f32.mrb[104].mxu1  ;;  %v3936_v5 = vpop.f32.mrb[105].mxu0 }
 0x1c8   :  { %v3937_v17 = vadd.f32 %v3936_v5, %v3935_v45  ;;  %v4018_v18 = vpop.f32.mrb[105].mxu1  ;;  %v3938_v9 = vpop.f32.mrb[106].mxu0 }
 0x1c9   :  { %v4019_v15 = vadd.f32 %v4018_v18, %v4017_v4  ;;  %v4020_v59 = vpop.f32.mrb[106].mxu1  ;;  %v3939_v38 = vpop.f32.mrb[107].mxu0 }
 0x1ca   :  { %v2617_v32 = vadd.f32 %v3937_v17, %v5368_v39  ;;  %v3940_v46 = vadd.f32 %v3939_v38, %v3938_v9  ;;  %v4021_v12 = vpop.f32.mrb[107].mxu1 }
 0x1cb   :  { %v4022_v7 = vadd.f32 %v4021_v12, %v4020_v59 }
 0x1cc   :  { %v5431_v48 = vadd.f32 %v4019_v15, %v2617_v32  ;;  %v2620_v10 = vadd.f32 %v3940_v46, %v5371_v42 }
 0x1ce   :  { %v5434_v22 = vadd.f32 %v4022_v7, %v2620_v10  ;;  %v3941_v14 = vpop.f32.mrb[108].mxu0 }
 0x1cf   :  { %v4023_v26 = vpop.f32.mrb[108].mxu1  ;;  %v3942_v27 = vpop.f32.mrb[109].mxu0 }
 0x1d0   :  { %v3943_v28 = vadd.f32 %v3942_v27, %v3941_v14  ;;  %v4024_v29 = vpop.f32.mrb[109].mxu1  ;;  %v3944_v30 = vpop.f32.mrb[110].mxu0 }
 0x1d1   :  { %v4025_v31 = vadd.f32 %v4024_v29, %v4023_v26  ;;  %v4026_v34 = vpop.f32.mrb[110].mxu1  ;;  %v3945_v13 = vpop.f32.mrb[111].mxu0 }
 0x1d2   :  { %v2625_v39 = vadd.f32 %v3943_v28, %v5374_v0  ;;  %v3946_v35 = vadd.f32 %v3945_v13, %v3944_v30  ;;  %v4027_v11 = vpop.f32.mrb[111].mxu1 }
 0x1d3   :  { %v4028_v40 = vadd.f32 %v4027_v11, %v4026_v34 }
 0x1d4   :  { %v5437_v8 = vadd.f32 %v4025_v31, %v2625_v39  ;;  %v2628_v42 = vadd.f32 %v3946_v35, %v5377_v2 }
 0x1d6   :  { %v5440_v16 = vadd.f32 %v4028_v40, %v2628_v42  ;;  %v3947_v37 = vpop.f32.mrb[112].mxu0 }
 0x1d7   :  { %v4029_v47 = vpop.f32.mrb[112].mxu1  ;;  %v3948_v53 = vpop.f32.mrb[113].mxu0 }
 0x1d8   :  { %v3949_v54 = vadd.f32 %v3948_v53, %v3947_v37  ;;  %v4030_v19 = vpop.f32.mrb[113].mxu1  ;;  %v3950_v55 = vpop.f32.mrb[114].mxu0 }
 0x1d9   :  { %v4031_v56 = vadd.f32 %v4030_v19, %v4029_v47  ;;  %v4032_v57 = vpop.f32.mrb[114].mxu1  ;;  %v3951_v44 = vpop.f32.mrb[115].mxu0 }
 0x1da   :  { %v2633_v0 = vadd.f32 %v3949_v54, %v5380_v24  ;;  %v3952_v58 = vadd.f32 %v3951_v44, %v3950_v55  ;;  %v4033_v60 = vpop.f32.mrb[115].mxu1 }
 0x1db   :  { %v4034_v41 = vadd.f32 %v4033_v60, %v4032_v57 }
 0x1dc   :  { %v5443_v33 = vadd.f32 %v4031_v56, %v2633_v0  ;;  %v2636_v2 = vadd.f32 %v3952_v58, %v5383_v62 }
 0x1de   :  { %v5446_v45 = vadd.f32 %v4034_v41, %v2636_v2  ;;  %v3953_v4 = vpop.f32.mrb[116].mxu0 }
 0x1df   :  { %v4035_v5 = vpop.f32.mrb[116].mxu1  ;;  %v3954_v17 = vpop.f32.mrb[117].mxu0 }
 0x1e0   :  { %v3955_v18 = vadd.f32 %v3954_v17, %v3953_v4  ;;  %v4036_v9 = vpop.f32.mrb[117].mxu1  ;;  %v3956_v15 = vpop.f32.mrb[118].mxu0 }
 0x1e1   :  { %v4037_v59 = vadd.f32 %v4036_v9, %v4035_v5  ;;  %v4038_v38 = vpop.f32.mrb[118].mxu1  ;;  %v3957_v32 = vpop.f32.mrb[119].mxu0 }
 0x1e2   :  { %v2641_v24 = vadd.f32 %v3955_v18, %v5386_v49  ;;  %v3958_v46 = vadd.f32 %v3957_v32, %v3956_v15  ;;  %v4039_v12 = vpop.f32.mrb[119].mxu1 }
 0x1e3   :  { %v4040_v7 = vadd.f32 %v4039_v12, %v4038_v38 }
 0x1e4   :  { %v5449_v10 = vadd.f32 %v4037_v59, %v2641_v24  ;;  %v2644_v62 = vadd.f32 %v3958_v46, %v5389_v52 }
 0x1e6   :  { %v5452_v14 = vadd.f32 %v4040_v7, %v2644_v62  ;;  %v3959_v26 = vpop.f32.mrb[120].mxu0 }
 0x1e7   :  { %v4041_v27 = vpop.f32.mrb[120].mxu1  ;;  %v3960_v28 = vpop.f32.mrb[121].mxu0 }
 0x1e8   :  { %v3961_v29 = vadd.f32 %v3960_v28, %v3959_v26  ;;  %v4042_v30 = vpop.f32.mrb[121].mxu1  ;;  %v3962_v31 = vpop.f32.mrb[122].mxu0 }
 0x1e9   :  { %v4043_v34 = vadd.f32 %v4042_v30, %v4041_v27  ;;  %v4044_v13 = vpop.f32.mrb[122].mxu1  ;;  %v3963_v39 = vpop.f32.mrb[123].mxu0 }
 0x1ea   :  { %v2649_v49 = vadd.f32 %v3961_v29, %v5392_v1  ;;  %v3964_v35 = vadd.f32 %v3963_v39, %v3962_v31  ;;  %v4045_v11 = vpop.f32.mrb[123].mxu1 }
 0x1eb   :  { %v4046_v40 = vadd.f32 %v4045_v11, %v4044_v13 }
 0x1ec   :  { %v5455_v42 = vadd.f32 %v4043_v34, %v2649_v49  ;;  %v2652_v52 = vadd.f32 %v3964_v35, %v5395_v3 }
 0x1ee   :  { %v5458_v37 = vadd.f32 %v4046_v40, %v2652_v52  ;;  %v3965_v47 = vpop.f32.mrb[124].mxu0 }
 0x1ef   :  { %v4047_v53 = vpop.f32.mrb[124].mxu1  ;;  %v3966_v54 = vpop.f32.mrb[125].mxu0 }
 0x1f0   :  { %v3967_v19 = vadd.f32 %v3966_v54, %v3965_v47  ;;  %v4048_v55 = vpop.f32.mrb[125].mxu1  ;;  %v3968_v56 = vpop.f32.mrb[126].mxu0 }
 0x1f1   :  { %v4049_v57 = vadd.f32 %v4048_v55, %v4047_v53  ;;  %v4050_v44 = vpop.f32.mrb[126].mxu1  ;;  %v3969_v0 = vpop.f32.mrb[127].mxu0 }
 0x1f2   :  { %v2657_v1 = vadd.f32 %v3967_v19, %v5398_v51  ;;  %v3970_v58 = vadd.f32 %v3969_v0, %v3968_v56  ;;  %v4051_v60 = vpop.f32.mrb[127].mxu1 }
 0x1f3   :  { %v4052_v41 = vadd.f32 %v4051_v60, %v4050_v44 }
 0x1f4   :  { %v5461_v2 = vadd.f32 %v4049_v57, %v2657_v1  ;;  %v2660_v3 = vadd.f32 %v3970_v58, %v5401_v25 }
 0x1f6   :  { %v5464_v4 = vadd.f32 %v4052_v41, %v2660_v3  ;;  %v3971_v5 = vpop.f32.mrb[128].mxu0 }
 0x1f7   :  { %v4053_v17 = vpop.f32.mrb[128].mxu1  ;;  %v3972_v18 = vpop.f32.mrb[129].mxu0 }
 0x1f8   :  { %v3973_v9 = vadd.f32 %v3972_v18, %v3971_v5  ;;  %v4054_v15 = vpop.f32.mrb[129].mxu1  ;;  %v3974_v59 = vpop.f32.mrb[130].mxu0 }
 0x1f9   :  { %v4055_v38 = vadd.f32 %v4054_v15, %v4053_v17  ;;  %v4056_v32 = vpop.f32.mrb[130].mxu1  ;;  %v3975_v24 = vpop.f32.mrb[131].mxu0 }
 0x1fa   :  { %v2665_v51 = vadd.f32 %v3973_v9, %v5404_v50  ;;  %v4057_v46 = vpop.f32.mrb[131].mxu1 }
 0x1fc   :  { %v5467_v12 = vadd.f32 %v4055_v38, %v2665_v51 }
 0x1fe   :  { %v4075_v7 = vpop.f32.mrb[132].mxu0 }
 0x1ff   :  { %v4157_v62 = vpop.f32.mrb[132].mxu1  ;;  %v4076_v26 = vpop.f32.mrb[133].mxu0 }
 0x200   :  { %v4077_v25 = vadd.f32 %v4076_v26, %v4075_v7  ;;  %v4158_v27 = vpop.f32.mrb[133].mxu1  ;;  %v4078_v28 = vpop.f32.mrb[134].mxu0 }
 0x201   :  { %v4159_v29 = vadd.f32 %v4158_v27, %v4157_v62  ;;  %v4160_v30 = vpop.f32.mrb[134].mxu1  ;;  %v4079_v31 = vpop.f32.mrb[135].mxu0 }
 0x202   :  { %v2825_v34 = vadd.f32 %v4077_v25, %v5407_v61  ;;  %v4080_v13 = vadd.f32 %v4079_v31, %v4078_v28  ;;  %v4161_v39 = vpop.f32.mrb[135].mxu1 }
 0x203   :  { %v4162_v49 = vadd.f32 %v4161_v39, %v4160_v30 }
 0x204   :  { %v2945_v35 = vadd.f32 %v4159_v29, %v2825_v34  ;;  %v2828_v50 = vadd.f32 %v4080_v13, %v5410_v23 }
 0x206   :  { %v2948_v11 = vadd.f32 %v4162_v49, %v2828_v50  ;;  %v4081_v40 = vpop.f32.mrb[136].mxu0  ;;  %v3030_v53 = vmax.f32 %v2945_v35, 0.0 }
 0x207   :  { %v4163_v52 = vpop.f32.mrb[136].mxu1  ;;  %v4082_v47 = vpop.f32.mrb[137].mxu0 }
 0x208   :  { %v3031_v54 = vmax.f32 %v2948_v11, 0.0  ;;  %v4083_v19 = vadd.f32 %v4082_v47, %v4081_v40  ;;  %v4164_v55 = vpop.f32.mrb[137].mxu1  ;;  %v4084_v56 = vpop.f32.mrb[138].mxu0 }
 0x209   :  { %v4165_v57 = vadd.f32 %v4164_v55, %v4163_v52  ;;  %v4166_v44 = vpop.f32.mrb[138].mxu1  ;;  %v4085_v0 = vpop.f32.mrb[139].mxu0 }
 0x20a   :  { %v3511_v1 = vpack.c.bf16 %v3031_v54, %v3030_v53  ;;  %v2833_v61 = vadd.f32 %v4083_v19, %v5413_v20  ;;  %v4086_v58 = vadd.f32 %v4085_v0, %v4084_v56  ;;  %v4167_v60 = vpop.f32.mrb[139].mxu1 }
 0x20b   :  { %v4168_v41 = vadd.f32 %v4167_v60, %v4166_v44 }
 0x20c   :  { %3512 = vst [vmem:[%s5526_s3] sm:$0xff] %v3511_v1   ;;  %v2953_v23 = vadd.f32 %v4165_v57, %v2833_v61  ;;  %v2836_v3 = vadd.f32 %v4086_v58, %v5416_v21 }
 0x20e   :  { %v2956_v5 = vadd.f32 %v4168_v41, %v2836_v3  ;;  %v4087_v17 = vpop.f32.mrb[140].mxu0  ;;  %v3032_v15 = vmax.f32 %v2953_v23, 0.0 }
 0x20f   :  { %v4169_v18 = vpop.f32.mrb[140].mxu1  ;;  %v4088_v9 = vpop.f32.mrb[141].mxu0 }
 0x210   :  { %v3033_v59 = vmax.f32 %v2956_v5, 0.0  ;;  %v4089_v38 = vadd.f32 %v4088_v9, %v4087_v17  ;;  %v4170_v32 = vpop.f32.mrb[141].mxu1  ;;  %v4090_v24 = vpop.f32.mrb[142].mxu0 }
 0x211   :  { %v4171_v20 = vadd.f32 %v4170_v32, %v4169_v18  ;;  %v4172_v51 = vpop.f32.mrb[142].mxu1  ;;  %v4091_v46 = vpop.f32.mrb[143].mxu0 }
 0x212   :  { %v3516_v7 = vpack.c.bf16 %v3033_v59, %v3032_v15  ;;  %v2841_v62 = vadd.f32 %v4089_v38, %v5419_v36  ;;  %v4092_v26 = vadd.f32 %v4091_v46, %v4090_v24  ;;  %v4173_v25 = vpop.f32.mrb[143].mxu1 }
 0x213   :  { %v4174_v27 = vadd.f32 %v4173_v25, %v4172_v51 }
 0x214   :  { %3558 = vst [vmem:[%s5526_s3 + $0x8] sm:$0xff] %v3516_v7   ;;  %v2961_v21 = vadd.f32 %v4171_v20, %v2841_v62  ;;  %v2844_v28 = vadd.f32 %v4092_v26, %v5422_v43 }
 0x216   :  { %v2964_v29 = vadd.f32 %v4174_v27, %v2844_v28  ;;  %v4093_v30 = vpop.f32.mrb[144].mxu0  ;;  %v3034_v13 = vmax.f32 %v2961_v21, 0.0 }
 0x217   :  { %v4175_v31 = vpop.f32.mrb[144].mxu1  ;;  %v4094_v34 = vpop.f32.mrb[145].mxu0 }
 0x218   :  { %v3035_v39 = vmax.f32 %v2964_v29, 0.0  ;;  %v4095_v49 = vadd.f32 %v4094_v34, %v4093_v30  ;;  %v4176_v35 = vpop.f32.mrb[145].mxu1  ;;  %v4096_v50 = vpop.f32.mrb[146].mxu0 }
 0x219   :  { %v4177_v36 = vadd.f32 %v4176_v35, %v4175_v31  ;;  %v4178_v11 = vpop.f32.mrb[146].mxu1  ;;  %v4097_v40 = vpop.f32.mrb[147].mxu0 }
 0x21a   :  { %v3521_v52 = vpack.c.bf16 %v3035_v39, %v3034_v13  ;;  %v2849_v47 = vadd.f32 %v4095_v49, %v5425_v6  ;;  %v4098_v53 = vadd.f32 %v4097_v40, %v4096_v50  ;;  %v4179_v54 = vpop.f32.mrb[147].mxu1 }
 0x21b   :  { %v4180_v19 = vadd.f32 %v4179_v54, %v4178_v11 }
 0x21c   :  { %3559 = vst [vmem:[%s5526_s3 + $0x10] sm:$0xff] %v3521_v52   ;;  %v2969_v43 = vadd.f32 %v4177_v36, %v2849_v47  ;;  %v2852_v55 = vadd.f32 %v4098_v53, %v5428_v63 }
 0x21e   :  { %v2972_v56 = vadd.f32 %v4180_v19, %v2852_v55  ;;  %v4099_v57 = vpop.f32.mrb[148].mxu0  ;;  %v3036_v1 = vmax.f32 %v2969_v43, 0.0 }
 0x21f   :  { %v4181_v44 = vpop.f32.mrb[148].mxu1  ;;  %v4100_v0 = vpop.f32.mrb[149].mxu0 }
 0x220   :  { %v3037_v61 = vmax.f32 %v2972_v56, 0.0  ;;  %v4101_v58 = vadd.f32 %v4100_v0, %v4099_v57  ;;  %v4182_v60 = vpop.f32.mrb[149].mxu1  ;;  %v4102_v41 = vpop.f32.mrb[150].mxu0 }
 0x221   :  { %v4183_v6 = vadd.f32 %v4182_v60, %v4181_v44  ;;  %v4184_v23 = vpop.f32.mrb[150].mxu1  ;;  %v4103_v3 = vpop.f32.mrb[151].mxu0 }
 0x222   :  { %v3526_v5 = vpack.c.bf16 %v3037_v61, %v3036_v1  ;;  %v2857_v17 = vadd.f32 %v4101_v58, %v5431_v48  ;;  %v4104_v18 = vadd.f32 %v4103_v3, %v4102_v41  ;;  %v4185_v9 = vpop.f32.mrb[151].mxu1 }
 0x223   :  { %v4186_v15 = vadd.f32 %v4185_v9, %v4184_v23 }
 0x224   :  { %3560 = vst [vmem:[%s5526_s3 + $0x18] sm:$0xff] %v3526_v5   ;;  %v2977_v63 = vadd.f32 %v4183_v6, %v2857_v17  ;;  %v2860_v59 = vadd.f32 %v4104_v18, %v5434_v22 }
 0x226   :  { %v2980_v38 = vadd.f32 %v4186_v15, %v2860_v59  ;;  %v4105_v32 = vpop.f32.mrb[152].mxu0  ;;  %v3038_v51 = vmax.f32 %v2977_v63, 0.0 }
 0x227   :  { %v4187_v24 = vpop.f32.mrb[152].mxu1  ;;  %v4106_v20 = vpop.f32.mrb[153].mxu0 }
 0x228   :  { %v3039_v46 = vmax.f32 %v2980_v38, 0.0  ;;  %v4107_v7 = vadd.f32 %v4106_v20, %v4105_v32  ;;  %v4188_v62 = vpop.f32.mrb[153].mxu1  ;;  %v4108_v26 = vpop.f32.mrb[154].mxu0 }
 0x229   :  { %v4189_v48 = vadd.f32 %v4188_v62, %v4187_v24  ;;  %v4190_v25 = vpop.f32.mrb[154].mxu1  ;;  %v4109_v27 = vpop.f32.mrb[155].mxu0 }
 0x22a   :  { %v3531_v21 = vpack.c.bf16 %v3039_v46, %v3038_v51  ;;  %v2865_v28 = vadd.f32 %v4107_v7, %v5437_v8  ;;  %v4110_v29 = vadd.f32 %v4109_v27, %v4108_v26  ;;  %v4191_v30 = vpop.f32.mrb[155].mxu1 }
 0x22b   :  { %v4192_v31 = vadd.f32 %v4191_v30, %v4190_v25 }
 0x22c   :  { %3561 = vst [vmem:[%s5526_s3 + $0x20] sm:$0xff] %v3531_v21   ;;  %v2985_v22 = vadd.f32 %v4189_v48, %v2865_v28  ;;  %v2868_v34 = vadd.f32 %v4110_v29, %v5440_v16 }
 0x22e   :  { %v2988_v13 = vadd.f32 %v4192_v31, %v2868_v34  ;;  %v4111_v39 = vpop.f32.mrb[156].mxu0  ;;  %v3040_v50 = vmax.f32 %v2985_v22, 0.0 }
 0x22f   :  { %v4193_v49 = vpop.f32.mrb[156].mxu1  ;;  %v4112_v35 = vpop.f32.mrb[157].mxu0 }
 0x230   :  { %v3041_v36 = vmax.f32 %v2988_v13, 0.0  ;;  %v4113_v11 = vadd.f32 %v4112_v35, %v4111_v39  ;;  %v4194_v40 = vpop.f32.mrb[157].mxu1  ;;  %v4114_v52 = vpop.f32.mrb[158].mxu0 }
 0x231   :  { %v4195_v8 = vadd.f32 %v4194_v40, %v4193_v49  ;;  %v4196_v47 = vpop.f32.mrb[158].mxu1  ;;  %v4115_v53 = vpop.f32.mrb[159].mxu0 }
 0x232   :  { %v3536_v54 = vpack.c.bf16 %v3041_v36, %v3040_v50  ;;  %v2873_v19 = vadd.f32 %v4113_v11, %v5443_v33  ;;  %v4116_v43 = vadd.f32 %v4115_v53, %v4114_v52  ;;  %v4197_v55 = vpop.f32.mrb[159].mxu1 }
 0x233   :  { %v4198_v56 = vadd.f32 %v4197_v55, %v4196_v47 }
 0x234   :  { %3562 = vst [vmem:[%s5526_s3 + $0x28] sm:$0xff] %v3536_v54   ;;  %v2993_v16 = vadd.f32 %v4195_v8, %v2873_v19  ;;  %v2876_v57 = vadd.f32 %v4116_v43, %v5446_v45 }
 0x236   :  { %v2996_v44 = vadd.f32 %v4198_v56, %v2876_v57  ;;  %v4117_v0 = vpop.f32.mrb[160].mxu0  ;;  %v3042_v58 = vmax.f32 %v2993_v16, 0.0 }
 0x237   :  { %v4199_v1 = vpop.f32.mrb[160].mxu1  ;;  %v4118_v61 = vpop.f32.mrb[161].mxu0 }
 0x238   :  { %v3043_v60 = vmax.f32 %v2996_v44, 0.0  ;;  %v4119_v41 = vadd.f32 %v4118_v61, %v4117_v0  ;;  %v4200_v6 = vpop.f32.mrb[161].mxu1  ;;  %v4120_v23 = vpop.f32.mrb[162].mxu0 }
 0x239   :  { %v4201_v33 = vadd.f32 %v4200_v6, %v4199_v1  ;;  %v4202_v3 = vpop.f32.mrb[162].mxu1  ;;  %v4121_v5 = vpop.f32.mrb[163].mxu0 }
 0x23a   :  { %v3541_v17 = vpack.c.bf16 %v3043_v60, %v3042_v58  ;;  %v2881_v18 = vadd.f32 %v4119_v41, %v5449_v10  ;;  %v4122_v9 = vadd.f32 %v4121_v5, %v4120_v23  ;;  %v4203_v15 = vpop.f32.mrb[163].mxu1 }
 0x23b   :  { %v4204_v63 = vadd.f32 %v4203_v15, %v4202_v3 }
 0x23c   :  { %3563 = vst [vmem:[%s5526_s3 + $0x30] sm:$0xff] %v3541_v17   ;;  %v3001_v45 = vadd.f32 %v4201_v33, %v2881_v18  ;;  %v2884_v59 = vadd.f32 %v4122_v9, %v5452_v14 }
 0x23e   :  { %v3004_v38 = vadd.f32 %v4204_v63, %v2884_v59  ;;  %v4123_v32 = vpop.f32.mrb[164].mxu0  ;;  %v3044_v51 = vmax.f32 %v3001_v45, 0.0 }
 0x23f   :  { %v4205_v24 = vpop.f32.mrb[164].mxu1  ;;  %v4124_v20 = vpop.f32.mrb[165].mxu0 }
 0x240   :  { %v3045_v46 = vmax.f32 %v3004_v38, 0.0  ;;  %v4125_v7 = vadd.f32 %v4124_v20, %v4123_v32  ;;  %v4206_v62 = vpop.f32.mrb[165].mxu1  ;;  %v4126_v26 = vpop.f32.mrb[166].mxu0 }
 0x241   :  { %v4207_v10 = vadd.f32 %v4206_v62, %v4205_v24  ;;  %v4208_v48 = vpop.f32.mrb[166].mxu1  ;;  %v4127_v25 = vpop.f32.mrb[167].mxu0 }
 0x242   :  { %v3546_v27 = vpack.c.bf16 %v3045_v46, %v3044_v51  ;;  %v2889_v21 = vadd.f32 %v4125_v7, %v5455_v42  ;;  %v4128_v28 = vadd.f32 %v4127_v25, %v4126_v26  ;;  %v4209_v29 = vpop.f32.mrb[167].mxu1 }
 0x243   :  { %v4210_v30 = vadd.f32 %v4209_v29, %v4208_v48 }
 0x244   :  { %3564 = vst [vmem:[%s5526_s3 + $0x38] sm:$0xff] %v3546_v27   ;;  %v3009_v14 = vadd.f32 %v4207_v10, %v2889_v21  ;;  %v2892_v31 = vadd.f32 %v4128_v28, %v5458_v37 }
 0x246   :  { %v3012_v22 = vadd.f32 %v4210_v30, %v2892_v31  ;;  %v4129_v34 = vpop.f32.mrb[168].mxu0  ;;  %v3046_v49 = vmax.f32 %v3009_v14, 0.0 }
 0x247   :  { %v4211_v13 = vpop.f32.mrb[168].mxu1  ;;  %v4130_v39 = vpop.f32.mrb[169].mxu0 }
 0x248   :  { %v3047_v35 = vmax.f32 %v3012_v22, 0.0  ;;  %v4131_v50 = vadd.f32 %v4130_v39, %v4129_v34  ;;  %v4212_v36 = vpop.f32.mrb[169].mxu1  ;;  %v4132_v11 = vpop.f32.mrb[170].mxu0 }
 0x249   :  { %v4213_v42 = vadd.f32 %v4212_v36, %v4211_v13  ;;  %v4214_v40 = vpop.f32.mrb[170].mxu1  ;;  %v4133_v52 = vpop.f32.mrb[171].mxu0 }
 0x24a   :  { %v3551_v8 = vpack.c.bf16 %v3047_v35, %v3046_v49  ;;  %v2897_v47 = vadd.f32 %v4131_v50, %v5461_v2  ;;  %v4134_v53 = vadd.f32 %v4133_v52, %v4132_v11  ;;  %v4215_v54 = vpop.f32.mrb[171].mxu1 }
 0x24b   :  { %v4216_v19 = vadd.f32 %v4215_v54, %v4214_v40 }
 0x24c   :  { %3565 = vst [vmem:[%s5526_s3 + $0x40] sm:$0xff] %v3551_v8   ;;  %v3017_v37 = vadd.f32 %v4213_v42, %v2897_v47  ;;  %v2900_v43 = vadd.f32 %v4134_v53, %v5464_v4 }
 0x24e   :  { %v3020_v55 = vadd.f32 %v4216_v19, %v2900_v43  ;;  %v4135_v56 = vpop.f32.mrb[172].mxu0  ;;  %v3048_v44 = vmax.f32 %v3017_v37, 0.0 }
 0x24f   :  { %v4217_v16 = vpop.f32.mrb[172].mxu1  ;;  %v4136_v57 = vpop.f32.mrb[173].mxu0 }
 0x250   :  { %v3049_v0 = vmax.f32 %v3020_v55, 0.0  ;;  %v4137_v1 = vadd.f32 %v4136_v57, %v4135_v56  ;;  %v4218_v61 = vpop.f32.mrb[173].mxu1  ;;  %v4138_v58 = vpop.f32.mrb[174].mxu0 }
 0x251   :  { %v4219_v2 = vadd.f32 %v4218_v61, %v4217_v16  ;;  %v4220_v60 = vpop.f32.mrb[174].mxu1  ;;  %v4139_v41 = vpop.f32.mrb[175].mxu0 }
 0x252   :  { %v3556_v6 = vpack.c.bf16 %v3049_v0, %v3048_v44  ;;  %v2905_v23 = vadd.f32 %v4137_v1, %v5467_v12  ;;  %v4221_v33 = vpop.f32.mrb[175].mxu1 }
 0x254   :  { %3566 = vst [vmem:[%s5526_s3 + $0x48] sm:$0xff] %v3556_v6   ;;  %v3025_v4 = vadd.f32 %v4219_v2, %v2905_v23 }
 0x256   :  { %v3050_v3 = vmax.f32 %v3025_v4, 0.0 }
 0x258   :  { %v3507_v5 = vpack.c.bf16 %v3050_v3, %v3050_v3 }
 0x25a   :  { %3156 = vst [vmem:[%s5526_s3 + $0x50] sm:$0x1] %v3507_v5 }

// kernel: model_forward.6
= control target key start
LH: loop header
LB: loop body
LE: loop exit
PB: predicated region body
PF: predicated region fallthrough
CT: control target
= control target key end

     0   :  { %vm2127_vm0 = vmmov 0   ;;  %vm1477_vm1 = vcmask 519168   ;;  %vm1490_vm2 = vcmask 516096   ;;  %s2692_s1 = inlined_call_operand.vmem [shape: bf16[1152,64], index: 1, kind: input, shape index: {}]   ;;  %s2693_s0 = inlined_call_operand.vmem [shape: bf16[98,1152], index: 0, kind: input, shape index: {}]   ;;  %s2694_s2 = inlined_call_operand.vmem [shape: f32[1,64], index: 2, kind: input, shape index: {}]   ;;  %s2695_s3 = inlined_call_operand.vmem [shape: bf16[98,64], index: 3, kind: output, shape index: {}]  }
   0x1   :  { %v1967_v0 = vld [vmem:[%s2692_s1 + $0x40] sm:$0xff]   ;;  %v1969_v2 = vld [vmem:[%s2692_s1 + $0x48] sm:$0xff]   ;;  %v1971_v4 = vld [vmem:[%s2692_s1 + $0x50] sm:$0xff]  }
   0x2   :  { %v1968_v1 = vld [vmem:[%s2692_s1] sm:$0xff]   ;;  %1949 = vmatprep.subr.bf16.mxu1 %v1967_v0  ;;  %1658 = vmatprep.subr.bf16.mxu0 %v1967_v0  ;;  %v1970_v3 = vld [vmem:[%s2692_s1 + $0x8] sm:$0xff]   ;;  %v1972_v5 = vld [vmem:[%s2692_s1 + $0x10] sm:$0xff]  }
   0x3   :  { %1957 = vmatpush3.bf16.msra.mxu1 %v1968_v1  ;;  %1659 = vmatpush3.bf16.msra.mxu0 %v1968_v1  ;;  %v1973_v6 = vld [vmem:[%s2692_s1 + $0x58] sm:$0xff]   ;;  %v1975_v8 = vld [vmem:[%s2692_s1 + $0x60] sm:$0xff]   ;;  %v1977_v10 = vld [vmem:[%s2692_s1 + $0x68] sm:$0xff]  }
   0x4   :  { %1950 = vmatprep.subr.bf16.mxu1 %v1969_v2  ;;  %1660 = vmatprep.subr.bf16.mxu0 %v1969_v2  ;;  %v1974_v7 = vld [vmem:[%s2692_s1 + $0x18] sm:$0xff]   ;;  %v1976_v9 = vld [vmem:[%s2692_s1 + $0x20] sm:$0xff]   ;;  %v1978_v12 = vld [vmem:[%s2692_s1 + $0x28] sm:$0xff]  }
   0x5   :  { %v1985_v11 = vld [vmem:[%s2693_s0 + $0x124] ss:$36 sps:$4 sm:$0xff]   ;;  %v1979_v14 = vld [vmem:[%s2692_s1 + $0x70] sm:$0xff]   ;;  %v1981_v16 = vld [vmem:[%s2692_s1 + $0x78] sm:$0xff]  }
   0x6   :  { %v1989_v13 = vld [vmem:[%s2693_s0 + $0x4] ss:$36 sps:$4 sm:$0xff]   ;;  %1035 = vmatprep.mubr.bf16.mxu1 %v1985_v11  ;;  %v1980_v15 = vld [vmem:[%s2692_s1 + $0x30] sm:$0xff]   ;;  %v1982_v17 = vld [vmem:[%s2692_s1 + $0x38] sm:$0xff]  }
   0x7   :  { %1958 = vmatpush3.bf16.msra.mxu1 %v1970_v3  ;;  %1661 = vmatpush3.bf16.msra.mxu0 %v1970_v3  ;;  %v1986_v18 = vld [vmem:[%s2692_s1 + $0xc0] sm:$0xff]   ;;  %v1993_v24 = vld [vmem:[%s2692_s1 + $0xc8] sm:$0xff]   ;;  %v1997_v30 = vld [vmem:[%s2692_s1 + $0xd0] sm:$0xff]  }
   0x8   :  { %1951 = vmatprep.subr.bf16.mxu1 %v1971_v4  ;;  %1662 = vmatprep.subr.bf16.mxu0 %v1971_v4  ;;  %v1983_v19 = vld [vmem:[%s2693_s0 + $0x120] ss:$36 sps:$4 sm:$0xff]   ;;  %v1995_v25 = vld [vmem:[%s2692_s1 + $0x148] sm:$0xff]   ;;  %v2002_v31 = vld [vmem:[%s2692_s1 + $0x150] sm:$0xff]  }
   0x9   :  { %1003 = vmatprep.mubr.bf16.mxu0 %v1989_v13  ;;  %v1987_v20 = vld [vmem:[%s2693_s0] ss:$36 sps:$4 sm:$0xff]   ;;  %v1998_v26 = vld [vmem:[%s2693_s0 + $0x4c] ss:$36 sps:$4 sm:$0xff]   ;;  %v2004_v36 = vld [vmem:[%s2692_s1 + $0xd8] sm:$0xff]  }
   0xa   :  { %v1991_v21 = vld [vmem:[%s2692_s1 + $0x140] sm:$0xff]   ;;  %v1994_v27 = vld [vmem:[%s2692_s1 + $0x88] sm:$0xff]   ;;  %v2000_v32 = vld [vmem:[%s2692_s1 + $0x90] sm:$0xff]  }
   0xb   :  { %1959 = vmatpush3.bf16.msra.mxu1 %v1972_v5  ;;  %1663 = vmatpush3.bf16.msra.mxu0 %v1972_v5  ;;  %v1990_v22 = vld [vmem:[%s2692_s1 + $0x80] sm:$0xff]   ;;  %v2005_v28 = vld [vmem:[%s2693_s0 + $0x16c] ss:$36 sps:$4 sm:$0xff]   ;;  %v2009_v37 = vld [vmem:[%s2692_s1 + $0x158] sm:$0xff]  }
   0xc   :  { %1952 = vmatprep.subr.bf16.mxu1 %v1973_v6  ;;  %1664 = vmatprep.subr.bf16.mxu0 %v1973_v6  ;;  %v1992_v23 = vld [vmem:[%s2692_s1 + $0x100] sm:$0xff]   ;;  %v1996_v29 = vld [vmem:[%s2692_s1 + $0x108] sm:$0xff]   ;;  %v2003_v35 = vld [vmem:[%s2692_s1 + $0x110] sm:$0xff]  }
   0xd   :  { %v2001_v33 = vld [vmem:[%s2693_s0 + $0x48] ss:$36 sps:$4 sm:$0xff]   ;;  %v2007_v38 = vld [vmem:[%s2692_s1 + $0x98] sm:$0xff]   ;;  %v2011_v41 = vld [vmem:[%s2692_s1 + $0xe0] sm:$0xff]  }
   0xe   :  { %v2008_v34 = vld [vmem:[%s2693_s0 + $0x168] ss:$36 sps:$4 sm:$0xff]   ;;  %v2012_v39 = vld [vmem:[%s2693_s0 + $0x94] ss:$36 sps:$4 sm:$0xff]   ;;  %v2016_v43 = vld [vmem:[%s2692_s1 + $0x160] sm:$0xff]  }
   0xf   :  { %1960 = vmatpush3.bf16.msra.mxu1 %v1974_v7  ;;  %1665 = vmatpush3.bf16.msra.mxu0 %v1974_v7  ;;  %v2010_v40 = vld [vmem:[%s2692_s1 + $0x118] sm:$0xff]   ;;  %v75_v42 = vld [vmem:[%s2693_s0 + $0x1b0] sm:$0x11]  ;;  %v2014_v45 = vld [vmem:[%s2692_s1 + $0xa0] sm:$0xff]   ;;  %v2126_v7 = vmov 0.0  }
  0x10   :  { %1953 = vmatprep.subr.bf16.mxu1 %v1975_v8  ;;  %1666 = vmatprep.subr.bf16.mxu0 %v1975_v8  ;;  %v1552_v44 = vcombine.high %v75_v42, %v75_v42  ;;  %v2015_v46 = vld [vmem:[%s2693_s0 + $0x90] ss:$36 sps:$4 sm:$0xff]   ;;  %v2017_v47 = vld [vmem:[%s2692_s1 + $0x120] sm:$0xff]   ;;  %v1551_v48 = vcombine.low %v75_v42, %v75_v42  ;;  %v2018_v49 = vld [vmem:[%s2692_s1 + $0xe8] sm:$0xff]  }
  0x11   :  { %v2022_v50 = vld [vmem:[%s2692_s1 + $0x168] sm:$0xff]   ;;  %v2025_v52 = vld [vmem:[%s2693_s0 + $0xdc] ss:$36 sps:$4 sm:$0xff]   ;;  %v2024_v54 = vld [vmem:[%s2692_s1 + $0xf0] sm:$0xff]  }
  0x12   :  { %v2020_v51 = vld [vmem:[%s2692_s1 + $0xa8] sm:$0xff]   ;;  %v2029_v55 = vld [vmem:[%s2692_s1 + $0x170] sm:$0xff]   ;;  %v2028_v57 = vld [vmem:[%s2693_s0 + $0xd8] ss:$36 sps:$4 sm:$0xff]  }
  0x13   :  { %1961 = vmatpush3.bf16.msra.mxu1 %v1976_v9  ;;  %1667 = vmatpush3.bf16.msra.mxu0 %v1976_v9  ;;  %v2023_v53 = vld [vmem:[%s2692_s1 + $0x128] sm:$0xff]   ;;  %v2027_v56 = vld [vmem:[%s2692_s1 + $0xb0] sm:$0xff]   ;;  %v2031_v59 = vld [vmem:[%s2692_s1 + $0xf8] sm:$0xff]  }
  0x14   :  { %1954 = vmatprep.subr.bf16.mxu1 %v1977_v10  ;;  %1668 = vmatprep.subr.bf16.mxu0 %v1977_v10  ;;  %v2030_v58 = vld [vmem:[%s2692_s1 + $0x130] sm:$0xff]   ;;  %v2033_v60 = vld [vmem:[%s2692_s1 + $0x178] sm:$0xff]   ;;  %v2038_v0 = vld [vmem:[%s2692_s1 + $0x1c0] sm:$0xff]  }
  0x15   :  { %v2036_v61 = vld [vmem:[%s2693_s0 + $0xc] ss:$36 sps:$4 sm:$0xff]   ;;  %v2032_v62 = vld [vmem:[%s2692_s1 + $0xb8] sm:$0xff]   ;;  %v2042_v4 = vld [vmem:[%s2692_s1 + $0x180] sm:$0xff]  }
  0x16   :  { %v2037_v63 = vld [vmem:[%s2692_s1 + $0x138] sm:$0xff]   ;;  %v2034_v2 = vld [vmem:[%s2693_s0 + $0x8] ss:$36 sps:$4 sm:$0xff]   ;;  %v2039_v3 = vld [vmem:[%s2693_s0 + $0x10] ss:$36 sps:$4 sm:$0xff]  }
  0x17   :  { %1962 = vmatpush3.bf16.msra.mxu1 %v1978_v12  ;;  %1669 = vmatpush3.bf16.msra.mxu0 %v1978_v12  ;;  %v2041_v1 = vld [vmem:[%s2693_s0 + $0x14] ss:$36 sps:$4 sm:$0xff]   ;;  %v2043_v5 = vld [vmem:[%s2692_s1 + $0x200] sm:$0xff]   ;;  %v2046_v8 = vld [vmem:[%s2692_s1 + $0x1c8] sm:$0xff]  }
  0x18   :  { %1955 = vmatprep.subr.bf16.mxu1 %v1979_v14  ;;  %1670 = vmatprep.subr.bf16.mxu0 %v1979_v14  ;;  %v2044_v6 = vld [vmem:[%s2693_s0 + $0x54] ss:$36 sps:$4 sm:$0xff]   ;;  %v2048_v9 = vld [vmem:[%s2692_s1 + $0x188] sm:$0xff]   ;;  %v2049_v10 = vld [vmem:[%s2693_s0 + $0x5c] ss:$36 sps:$4 sm:$0xff]  }
  0x19   :  { %v2052_v11 = vld [vmem:[%s2692_s1 + $0x208] sm:$0xff]   ;;  %v2053_v12 = vld [vmem:[%s2692_s1 + $0x1d0] sm:$0xff]   ;;  %v2051_v14 = vld [vmem:[%s2693_s0 + $0x58] ss:$36 sps:$4 sm:$0xff]  }
  0x1a   :  { %v2047_v13 = vld [vmem:[%s2693_s0 + $0x50] ss:$36 sps:$4 sm:$0xff]   ;;  %v2095_v42 = vld [vmem:[%s2692_s1 + $0x1f8] sm:$0xff]  }
  0x1b   :  { %1963 = vmatpush3.bf16.msra.mxu1 %v1980_v15  ;;  %1671 = vmatpush3.bf16.msra.mxu0 %v1980_v15  ;;  %v2054_v15 = vld [vmem:[%s2693_s0 + $0x9c] ss:$36 sps:$4 sm:$0xff]  }
  0x1c   :  { %1956 = vmatprep.subr.bf16.mxu1 %v1981_v16  ;;  %1672 = vmatprep.subr.bf16.mxu0 %v1981_v16  ;;  %v2056_v16 = vld [vmem:[%s2692_s1 + $0x190] sm:$0xff]  }
  0x1f   :  { %1964 = vmatpush3.bf16.msra.mxu1 %v1982_v17  ;;  %1673 = vmatpush3.bf16.msra.mxu0 %v1982_v17  ;;  %v2058_v17 = vld [vmem:[%s2693_s0 + $0xa4] ss:$36 sps:$4 sm:$0xff]  }
  0x20   :  { %1716 = vmatprep.subr.bf16.mxu1 %v1986_v18  ;;  %1774 = vmatprep.subr.bf16.mxu0 %v1991_v21  ;;  %v2061_v18 = vld [vmem:[%s2692_s1 + $0x210] sm:$0xff]   ;;  %v2057_v21 = vld [vmem:[%s2693_s0 + $0x98] ss:$36 sps:$4 sm:$0xff]  }
  0x22   :  { %1036 = vmatmul.mubr.bf16.vlgmr.msra.gmra.mrb[0].mxu1 %v1983_v19  ;;  %1004 = vmatmul.mubr.bf16.vlgmr.msra.gmra.mrb[0].mxu0 %v1987_v20  ;;  %v2062_v19 = vld [vmem:[%s2692_s1 + $0x1d8] sm:$0xff]  }
  0x23   :  { %1717 = vmatpush3.bf16.msra.mxu1 %v1990_v22  ;;  %1775 = vmatpush3.bf16.msra.mxu0 %v1992_v23  ;;  %v2063_v20 = vld [vmem:[%s2692_s1 + $0x198] sm:$0xff]   ;;  %v2060_v22 = vld [vmem:[%s2693_s0 + $0xa0] ss:$36 sps:$4 sm:$0xff]  }
  0x24   :  { %1718 = vmatprep.subr.bf16.mxu1 %v1993_v24  ;;  %1776 = vmatprep.subr.bf16.mxu0 %v1995_v25  ;;  %v2064_v23 = vld [vmem:[%s2693_s0 + $0xe4] ss:$36 sps:$4 sm:$0xff]   ;;  %v2067_v24 = vld [vmem:[%s2693_s0 + $0xec] ss:$36 sps:$4 sm:$0xff]   ;;  %v2070_v25 = vld [vmem:[%s2692_s1 + $0x218] sm:$0xff]  }
  0x25   :  { %1011 = vmatprep.mubr.bf16.mxu0 %v1998_v26  ;;  %1043 = vmatprep.mubr.bf16.mxu1 %v2005_v28  ;;  %v2071_v26 = vld [vmem:[%s2692_s1 + $0x1e0] sm:$0xff]  }
  0x26   :  { %v2066_v28 = vld [vmem:[%s2693_s0 + $0xe0] ss:$36 sps:$4 sm:$0xff]  }
  0x27   :  { %1719 = vmatpush3.bf16.msra.mxu1 %v1994_v27  ;;  %1777 = vmatpush3.bf16.msra.mxu0 %v1996_v29  ;;  %v2072_v27 = vld [vmem:[%s2692_s1 + $0x1a0] sm:$0xff]   ;;  %v2069_v29 = vld [vmem:[%s2693_s0 + $0xe8] ss:$36 sps:$4 sm:$0xff]  }
  0x28   :  { %1720 = vmatprep.subr.bf16.mxu1 %v1997_v30  ;;  %1778 = vmatprep.subr.bf16.mxu0 %v2002_v31  ;;  %v2079_v30 = vld [vmem:[%s2692_s1 + $0x220] sm:$0xff]   ;;  %v2080_v31 = vld [vmem:[%s2692_s1 + $0x1e8] sm:$0xff]  }
  0x2a   :  { %1012 = vmatmul.mubr.bf16.gmra.mrb[4].mxu0 %v2001_v33  ;;  %1044 = vmatmul.mubr.bf16.gmra.mrb[4].mxu1 %v2008_v34  ;;  %v2073_v33 = vld [vmem:[%s2693_s0 + $0x12c] ss:$36 sps:$4 sm:$0xff]   ;;  %v2076_v34 = vld [vmem:[%s2693_s0 + $0x134] ss:$36 sps:$4 sm:$0xff]  }
  0x2b   :  { %1721 = vmatpush3.bf16.msra.mxu1 %v2000_v32  ;;  %1779 = vmatpush3.bf16.msra.mxu0 %v2003_v35  ;;  %v2081_v32 = vld [vmem:[%s2692_s1 + $0x1a8] sm:$0xff]  }
  0x2c   :  { %1722 = vmatprep.subr.bf16.mxu1 %v2004_v36  ;;  %1780 = vmatprep.subr.bf16.mxu0 %v2009_v37  ;;  %v2087_v35 = vld [vmem:[%s2692_s1 + $0x228] sm:$0xff]   ;;  %v2089_v36 = vld [vmem:[%s2692_s1 + $0x1f0] sm:$0xff]  }
  0x2d   :  { %1019 = vmatprep.mubr.bf16.mxu0 %v2012_v39  ;;  %1051 = vmatprep.mubr.bf16.mxu1 %v1552_v44  ;;  %v2075_v37 = vld [vmem:[%s2693_s0 + $0x128] ss:$36 sps:$4 sm:$0xff]   ;;  %v2090_v39 = vld [vmem:[%s2692_s1 + $0x1b0] sm:$0xff]   ;;  %v2097_v44 = vld [vmem:[%s2692_s1 + $0x1b8] sm:$0xff]  }
  0x2f   :  { %1723 = vmatpush3.bf16.msra.mxu1 %v2007_v38  ;;  %1781 = vmatpush3.bf16.msra.mxu0 %v2010_v40  ;;  %v2078_v38 = vld [vmem:[%s2693_s0 + $0x130] ss:$36 sps:$4 sm:$0xff]  }
  0x30   :  { %1724 = vmatprep.subr.bf16.mxu1 %v2011_v41  ;;  %1782 = vmatprep.subr.bf16.mxu0 %v2016_v43  ;;  %v2082_v40 = vld [vmem:[%s2693_s0 + $0x174] ss:$36 sps:$4 sm:$0xff]   ;;  %v2085_v43 = vld [vmem:[%s2693_s0 + $0x17c] ss:$36 sps:$4 sm:$0xff]  }
  0x31   :  { %v2093_v41 = vld [vmem:[%s2692_s1 + $0x230] sm:$0xff]  }
  0x32   :  { %1020 = vmatmul.mubr.bf16.gmra.mrb[8].mxu0 %v2015_v46  ;;  %1052 = vmatmul.mubr.bf16.gmra.mrb[8].mxu1 %v1551_v48  ;;  %v76_v46 = vld [vmem:[%s2693_s0 + $0x1b8] sm:$0x11]  ;;  %v2084_v48 = vld [vmem:[%s2693_s0 + $0x170] ss:$36 sps:$4 sm:$0xff]  }
  0x33   :  { %1725 = vmatpush3.bf16.msra.mxu1 %v2014_v45  ;;  %1783 = vmatpush3.bf16.msra.mxu0 %v2017_v47  ;;  %v2101_v45 = vld [vmem:[%s2692_s1 + $0x238] sm:$0xff]   ;;  %v77_v47 = vld [vmem:[%s2693_s0 + $0x1c0] sm:$0x11] }
  0x34   :  { %1726 = vmatprep.subr.bf16.mxu1 %v2018_v49  ;;  %1784 = vmatprep.subr.bf16.mxu0 %v2022_v50  ;;  %v2088_v49 = vld [vmem:[%s2693_s0 + $0x178] ss:$36 sps:$4 sm:$0xff]   ;;  %v1554_v50 = vcombine.high %v76_v46, %v76_v46 }
  0x35   :  { %1027 = vmatprep.mubr.bf16.mxu0 %v2025_v52  ;;  %1091 = vmatprep.mubr.bf16.mxu1 %v2036_v61  ;;  %v1553_v52 = vcombine.low %v76_v46, %v76_v46  ;;  %v2109_v61 = vld [vmem:[%s2693_s0 + $0xa8] ss:$36 sps:$4 sm:$0xff]  }
  0x37   :  { %1727 = vmatpush3.bf16.msra.mxu1 %v2020_v51  ;;  %1785 = vmatpush3.bf16.msra.mxu0 %v2023_v53  ;;  %v1556_v51 = vcombine.high %v77_v47, %v77_v47  ;;  %v1555_v53 = vcombine.low %v77_v47, %v77_v47 }
  0x38   :  { %1728 = vmatprep.subr.bf16.mxu1 %v2024_v54  ;;  %1786 = vmatprep.subr.bf16.mxu0 %v2029_v55  ;;  %v2100_v54 = vld [vmem:[%s2693_s0 + $0x1c] ss:$36 sps:$4 sm:$0xff]  }
  0x39   :  { %v2098_v55 = vld [vmem:[%s2693_s0 + $0x18] ss:$36 sps:$4 sm:$0xff]  }
  0x3a   :  { %1028 = vmatmul.mubr.bf16.gmra.mrb[12].mxu0 %v2028_v57  ;;  %v2103_v57 = vld [vmem:[%s2693_s0 + $0x64] ss:$36 sps:$4 sm:$0xff]  }
  0x3b   :  { %1729 = vmatpush3.bf16.msra.mxu1 %v2027_v56  ;;  %1787 = vmatpush3.bf16.msra.mxu0 %v2030_v58  ;;  %v2102_v56 = vld [vmem:[%s2693_s0 + $0x20] ss:$36 sps:$4 sm:$0xff]  }
  0x3c   :  { %1730 = vmatprep.subr.bf16.mxu1 %v2031_v59  ;;  %1788 = vmatprep.subr.bf16.mxu0 %v2033_v60  ;;  %v2105_v58 = vld [vmem:[%s2693_s0 + $0x60] ss:$36 sps:$4 sm:$0xff]   ;;  %v2106_v59 = vld [vmem:[%s2693_s0 + $0x68] ss:$36 sps:$4 sm:$0xff]  }
  0x3d   :  { %1179 = vmatprep.mubr.bf16.mxu0 %v2041_v1  ;;  %v2107_v60 = vld [vmem:[%s2693_s0 + $0xac] ss:$36 sps:$4 sm:$0xff]   ;;  %v2114_v1 = vld [vmem:[%s2693_s0 + $0xf8] ss:$36 sps:$4 sm:$0xff]  }
  0x3f   :  { %1731 = vmatpush3.bf16.msra.mxu1 %v2032_v62  ;;  %1789 = vmatpush3.bf16.msra.mxu0 %v2037_v63  ;;  %v2110_v62 = vld [vmem:[%s2693_s0 + $0xb0] ss:$36 sps:$4 sm:$0xff]  }
  0x40   :  { %1832 = vmatprep.subr.bf16.mxu1 %v2038_v0  ;;  %1905 = vmatprep.subr.bf16.mxu0 %v2126_v7  ;;  %v2111_v63 = vld [vmem:[%s2693_s0 + $0xf4] ss:$36 sps:$4 sm:$0xff]  }
  0x41   :  { %v2113_v0 = vld [vmem:[%s2693_s0 + $0xf0] ss:$36 sps:$4 sm:$0xff]  }
  0x42   :  { %1092 = vmatmul.mubr.bf16.vlgmr.msra.gmra.mrb[12].mxu1 %v2034_v2  ;;  %1180 = vmatmul.mubr.bf16.vlgmr.msra.gmra.mrb[16].mxu0 %v2039_v3  ;;  %v2115_v2 = vld [vmem:[%s2693_s0 + $0x13c] ss:$36 sps:$4 sm:$0xff]  }
  0x43   :  { %1833 = vmatpush3.bf16.msra.mxu1 %v2042_v4  ;;  %1906 = vmatpush3.bf16.msra.mxu0 %v2043_v5  ;;  %v2117_v3 = vld [vmem:[%s2693_s0 + $0x138] ss:$36 sps:$4 sm:$0xff]   ;;  %v2118_v4 = vld [vmem:[%s2693_s0 + $0x140] ss:$36 sps:$4 sm:$0xff]  }
  0x44   :  { %1099 = vmatprep.mubr.bf16.mxu1 %v2044_v6  ;;  %1834 = vmatprep.subr.bf16.mxu1 %v2046_v8  ;;  %v2119_v5 = vld [vmem:[%s2693_s0 + $0x184] ss:$36 sps:$4 sm:$0xff]  }
  0x45   :  { %1187 = vmatprep.mubr.bf16.mxu0 %v2049_v10  ;;  %1907 = vmatprep.subr.bf16.mxu0 %v2126_v7  ;;  %v78_v6 = vld [vmem:[%s2693_s0 + $0x1c8] sm:$0x11]  ;;  %v2121_v8 = vld [vmem:[%s2693_s0 + $0x180] ss:$36 sps:$4 sm:$0xff]  }
  0x46   :  { %v1558_v10 = vcombine.high %v78_v6, %v78_v6 }
  0x47   :  { %1835 = vmatpush3.bf16.msra.mxu1 %v2048_v9  ;;  %1908 = vmatpush3.bf16.msra.mxu0 %v2052_v11  ;;  %v2122_v9 = vld [vmem:[%s2693_s0 + $0x188] ss:$36 sps:$4 sm:$0xff]   ;;  %v1557_v11 = vcombine.low %v78_v6, %v78_v6 }
  0x48   :  { %1836 = vmatprep.subr.bf16.mxu1 %v2053_v12  ;;  %1909 = vmatprep.subr.bf16.mxu0 %v2126_v7  ;;  %v2125_v12 = vld [vmem:[%s2693_s0 + $0x1d0] ss:$0 sps:$4 sm:$0x11]  }
  0x4a   :  { %1100 = vmatmul.mubr.bf16.gmra.mrb[16].mxu1 %v2047_v13  ;;  %1188 = vmatmul.mubr.bf16.gmra.mrb[20].mxu0 %v2051_v14 }
  0x4b   :  { %1107 = vmatprep.mubr.bf16.mxu1 %v2054_v15  ;;  %1837 = vmatpush3.bf16.msra.mxu1 %v2056_v16 }
  0x4c   :  { %1195 = vmatprep.mubr.bf16.mxu0 %v2058_v17  ;;  %1910 = vmatpush3.bf16.msra.mxu0 %v2061_v18 }
  0x4d   :  { %1838 = vmatprep.subr.bf16.mxu1 %v2062_v19  ;;  %1911 = vmatprep.subr.bf16.mxu0 %v2126_v7 }
  0x4f   :  { %1839 = vmatpush3.bf16.msra.mxu1 %v2063_v20 }
  0x50   :  { %1912 = vmatpush3.bf16.msra.mxu0 %v2070_v25  ;;  %1840 = vmatprep.subr.bf16.mxu1 %v2071_v26 }
  0x51   :  { %1913 = vmatprep.subr.bf16.mxu0 %v2126_v7 }
  0x52   :  { %1108 = vmatmul.mubr.bf16.gmra.mrb[20].mxu1 %v2057_v21  ;;  %1196 = vmatmul.mubr.bf16.gmra.mrb[24].mxu0 %v2060_v22 }
  0x53   :  { %1115 = vmatprep.mubr.bf16.mxu1 %v2064_v23  ;;  %1203 = vmatprep.mubr.bf16.mxu0 %v2067_v24 }
  0x54   :  { %1841 = vmatpush3.bf16.msra.mxu1 %v2072_v27  ;;  %1914 = vmatpush3.bf16.msra.mxu0 %v2079_v30 }
  0x55   :  { %1842 = vmatprep.subr.bf16.mxu1 %v2080_v31  ;;  %1915 = vmatprep.subr.bf16.mxu0 %v2126_v7 }
  0x58   :  { %1843 = vmatpush3.bf16.msra.mxu1 %v2081_v32  ;;  %1916 = vmatpush3.bf16.msra.mxu0 %v2087_v35 }
  0x59   :  { %1844 = vmatprep.subr.bf16.mxu1 %v2089_v36  ;;  %1917 = vmatprep.subr.bf16.mxu0 %v2126_v7 }
  0x5a   :  { %1116 = vmatmul.mubr.bf16.gmra.mrb[24].mxu1 %v2066_v28  ;;  %1204 = vmatmul.mubr.bf16.gmra.mrb[28].mxu0 %v2069_v29 }
  0x5b   :  { %1123 = vmatprep.mubr.bf16.mxu1 %v2073_v33  ;;  %1211 = vmatprep.mubr.bf16.mxu0 %v2076_v34 }
  0x5c   :  { %1845 = vmatpush3.bf16.msra.mxu1 %v2090_v39  ;;  %1918 = vmatpush3.bf16.msra.mxu0 %v2093_v41 }
  0x5d   :  { %1846 = vmatprep.subr.bf16.mxu1 %v2095_v42  ;;  %1919 = vmatprep.subr.bf16.mxu0 %v2126_v7 }
  0x60   :  { %1847 = vmatpush3.bf16.msra.mxu1 %v2097_v44  ;;  %1920 = vmatpush3.bf16.msra.mxu0 %v2101_v45 }
  0x62   :  { %1124 = vmatmul.mubr.bf16.gmra.mrb[28].mxu1 %v2075_v37  ;;  %1212 = vmatmul.mubr.bf16.gmra.mrb[32].mxu0 %v2078_v38 }
  0x63   :  { %1131 = vmatprep.mubr.bf16.mxu1 %v2082_v40  ;;  %1219 = vmatprep.mubr.bf16.mxu0 %v2085_v43 }
  0x6a   :  { %1132 = vmatmul.mubr.bf16.gmra.mrb[32].mxu1 %v2084_v48  ;;  %1220 = vmatmul.mubr.bf16.gmra.mrb[36].mxu0 %v2088_v49 }
  0x6b   :  { %1139 = vmatprep.mubr.bf16.mxu1 %v1554_v50  ;;  %1227 = vmatprep.mubr.bf16.mxu0 %v1556_v51 }
  0x72   :  { %1140 = vmatmul.mubr.bf16.gmra.mrb[36].mxu1 %v1553_v52  ;;  %1228 = vmatmul.mubr.bf16.gmra.mrb[40].mxu0 %v1555_v53 }
  0x73   :  { %1267 = vmatprep.mubr.bf16.mxu1 %v2100_v54  ;;  %1921 = vmatprep.mubr.msk.bf16.mxu0 %vm2127_vm0, %v2126_v7 }
  0x7a   :  { %1268 = vmatmul.mubr.bf16.vlgmr.msra.gmra.mrb[40].mxu1 %v2098_v55  ;;  %1922 = vmatmul.mubr.bf16.vlgmr.msra.gmra.mrb[44].mxu0 %v2102_v56  ;;  %v2580_v55 = vld [vmem:[%s2694_s2] ss:$0 sm:$0xff] }
  0x7b   :  { %1275 = vmatprep.mubr.bf16.mxu1 %v2103_v57  ;;  %1925 = vmatprep.mubr.msk.bf16.mxu0 %vm2127_vm0, %v2126_v7 }
  0x82   :  { %1276 = vmatmul.mubr.bf16.gmra.mrb[44].mxu1 %v2105_v58  ;;  %1926 = vmatmul.mubr.bf16.gmra.mrb[48].mxu0 %v2106_v59 }
  0x83   :  { %1283 = vmatprep.mubr.bf16.mxu1 %v2107_v60  ;;  %1929 = vmatprep.mubr.msk.bf16.mxu0 %vm2127_vm0, %v2126_v7 }
  0x8a   :  { %1284 = vmatmul.mubr.bf16.gmra.mrb[48].mxu1 %v2109_v61  ;;  %1930 = vmatmul.mubr.bf16.gmra.mrb[52].mxu0 %v2110_v62 }
  0x8b   :  { %1291 = vmatprep.mubr.bf16.mxu1 %v2111_v63  ;;  %1933 = vmatprep.mubr.msk.bf16.mxu0 %vm2127_vm0, %v2126_v7 }
  0x92   :  { %1292 = vmatmul.mubr.bf16.gmra.mrb[52].mxu1 %v2113_v0  ;;  %1934 = vmatmul.mubr.bf16.gmra.mrb[56].mxu0 %v2114_v1 }
  0x93   :  { %1299 = vmatprep.mubr.bf16.mxu1 %v2115_v2  ;;  %1937 = vmatprep.mubr.msk.bf16.mxu0 %vm2127_vm0, %v2126_v7 }
  0x9a   :  { %1300 = vmatmul.mubr.bf16.gmra.mrb[56].mxu1 %v2117_v3  ;;  %1938 = vmatmul.mubr.bf16.gmra.mrb[60].mxu0 %v2118_v4 }
  0x9b   :  { %1307 = vmatprep.mubr.bf16.mxu1 %v2119_v5  ;;  %1941 = vmatprep.mubr.msk.bf16.mxu0 %vm2127_vm0, %v2126_v7 }
  0xa2   :  { %1308 = vmatmul.mubr.bf16.gmra.mrb[60].mxu1 %v2121_v8  ;;  %1942 = vmatmul.mubr.bf16.gmra.mrb[64].mxu0 %v2122_v9 }
  0xa3   :  { %1315 = vmatprep.mubr.bf16.mxu1 %v1558_v10  ;;  %1945 = vmatprep.mubr.msk.bf16.mxu0 %vm2127_vm0, %v2126_v7 }
  0xaa   :  { %1316 = vmatmul.mubr.bf16.gmra.mrb[64].mxu1 %v1557_v11  ;;  %1946 = vmatmul.mubr.bf16.gmra.mrb[68].mxu0 %v2125_v12 }
  0xf5   :  { %v1698_v13 = vpop.f32.mrb[0].mxu1  ;;  %v1674_v14 = vpop.f32.mrb[0].mxu0 }
  0xf6   :  { %v1699_v15 = vpop.f32.mrb[1].mxu1  ;;  %v1675_v16 = vpop.f32.mrb[1].mxu0 }
  0xf7   :  { %v2563_v17 = vadd.f32 %v1699_v15, %v1698_v13  ;;  %v1701_v18 = vpop.f32.mrb[2].mxu1  ;;  %v1676_v19 = vadd.f32 %v1675_v16, %v1674_v14  ;;  %v1677_v20 = vpop.f32.mrb[2].mxu0 }
  0xf8   :  { %v1702_v21 = vpop.f32.mrb[3].mxu1  ;;  %v1678_v22 = vpop.f32.mrb[3].mxu0 }
  0xf9   :  { %v2565_v23 = vadd.f32 %v1702_v21, %v1701_v18  ;;  %v1679_v7 = vadd.f32 %v1678_v22, %v1677_v20  ;;  %v1006_v58 = vadd.f32 %v1676_v19, %v2580_v55 }
  0xfb   :  { %v1009_v1 = vadd.f32 %v1679_v7, %v2580_v55 }
  0xfd   :  { %v1680_v24 = vpop.f32.mrb[4].mxu0  ;;  %v1704_v25 = vpop.f32.mrb[4].mxu1 }
  0xfe   :  { %v1681_v26 = vpop.f32.mrb[5].mxu0  ;;  %v1705_v27 = vpop.f32.mrb[5].mxu1 }
  0xff   :  { %v1682_v28 = vadd.f32 %v1681_v26, %v1680_v24  ;;  %v1683_v29 = vpop.f32.mrb[6].mxu0  ;;  %v2567_v30 = vadd.f32 %v1705_v27, %v1704_v25  ;;  %v1707_v31 = vpop.f32.mrb[6].mxu1 }
 0x100   :  { %v1684_v32 = vpop.f32.mrb[7].mxu0  ;;  %v1708_v33 = vpop.f32.mrb[7].mxu1 }
 0x101   :  { %v1685_v34 = vadd.f32 %v1684_v32, %v1683_v29  ;;  %v2569_v35 = vadd.f32 %v1708_v33, %v1707_v31  ;;  %v1014_v13 = vadd.f32 %v1682_v28, %v2580_v55 }
 0x103   :  { %v1017_v21 = vadd.f32 %v1685_v34, %v2580_v55 }
 0x105   :  { %v1686_v36 = vpop.f32.mrb[8].mxu0  ;;  %v1710_v37 = vpop.f32.mrb[8].mxu1 }
 0x106   :  { %v1687_v38 = vpop.f32.mrb[9].mxu0  ;;  %v1711_v39 = vpop.f32.mrb[9].mxu1 }
 0x107   :  { %v1688_v40 = vadd.f32 %v1687_v38, %v1686_v36  ;;  %v1689_v41 = vpop.f32.mrb[10].mxu0  ;;  %v2571_v42 = vadd.f32 %v1711_v39, %v1710_v37  ;;  %v1713_v43 = vpop.f32.mrb[10].mxu1 }
 0x108   :  { %v1690_v44 = vpop.f32.mrb[11].mxu0  ;;  %v1714_v45 = vpop.f32.mrb[11].mxu1 }
 0x109   :  { %v1691_v46 = vadd.f32 %v1690_v44, %v1689_v41  ;;  %v1022_v33 = vadd.f32 %v1688_v40, %v2580_v55 }
 0x10b   :  { %v1025_v43 = vadd.f32 %v1691_v46, %v2580_v55 }
 0x10d   :  { %v1692_v47 = vpop.f32.mrb[12].mxu0 }
 0x10e   :  { %v1693_v48 = vpop.f32.mrb[13].mxu0 }
 0x10f   :  { %v2573_v49 = vadd.f32 %v1693_v48, %v1692_v47  ;;  %v1695_v50 = vpop.f32.mrb[14].mxu0 }
 0x110   :  { %v1696_v51 = vpop.f32.mrb[15].mxu0 }
 0x111   :  { %v2575_v52 = vadd.f32 %v1696_v51, %v1695_v50 }
 0x115   :  { %v1732_v53 = vpop.f32.mrb[12].mxu1  ;;  %v1790_v54 = vpop.f32.mrb[16].mxu0 }
 0x116   :  { %v1733_v56 = vpop.f32.mrb[13].mxu1  ;;  %v1791_v57 = vpop.f32.mrb[17].mxu0 }
 0x117   :  { %v1734_v59 = vadd.f32 %v1733_v56, %v1732_v53  ;;  %v1735_v60 = vpop.f32.mrb[14].mxu1  ;;  %v1792_v61 = vadd.f32 %v1791_v57, %v1790_v54  ;;  %v1793_v62 = vpop.f32.mrb[18].mxu0  ;;  %v1030_v57 = vadd.f32 %v2573_v49, %v2580_v55 }
 0x118   :  { %v1736_v63 = vpop.f32.mrb[15].mxu1  ;;  %v1794_v0 = vpop.f32.mrb[19].mxu0 }
 0x119   :  { %v1094_v2 = vadd.f32 %v1734_v59, %v1006_v58  ;;  %v1737_v3 = vadd.f32 %v1736_v63, %v1735_v60  ;;  %v1795_v4 = vadd.f32 %v1794_v0, %v1793_v62  ;;  %v1033_v63 = vadd.f32 %v2575_v52, %v2580_v55 }
 0x11b   :  { %v1097_v5 = vadd.f32 %v1737_v3, %v1009_v1  ;;  %v2584_v6 = vadd.f32 %v1792_v61, %v1094_v2 }
 0x11d   :  { %v2586_v8 = vadd.f32 %v1795_v4, %v1097_v5  ;;  %v1738_v9 = vpop.f32.mrb[16].mxu1  ;;  %v1796_v10 = vpop.f32.mrb[20].mxu0 }
 0x11e   :  { %v1739_v11 = vpop.f32.mrb[17].mxu1  ;;  %v1797_v12 = vpop.f32.mrb[21].mxu0 }
 0x11f   :  { %v1740_v14 = vadd.f32 %v1739_v11, %v1738_v9  ;;  %v1741_v15 = vpop.f32.mrb[18].mxu1  ;;  %v1798_v16 = vadd.f32 %v1797_v12, %v1796_v10  ;;  %v1799_v18 = vpop.f32.mrb[22].mxu0  ;;  %v1038_v12 = vadd.f32 %v2563_v17, %v2580_v55 }
 0x120   :  { %v1742_v19 = vpop.f32.mrb[19].mxu1  ;;  %v1800_v20 = vpop.f32.mrb[23].mxu0 }
 0x121   :  { %v1102_v22 = vadd.f32 %v1740_v14, %v1014_v13  ;;  %v1743_v7 = vadd.f32 %v1742_v19, %v1741_v15  ;;  %v1801_v24 = vadd.f32 %v1800_v20, %v1799_v18  ;;  %v1041_v19 = vadd.f32 %v2565_v23, %v2580_v55 }
 0x123   :  { %v1105_v25 = vadd.f32 %v1743_v7, %v1017_v21  ;;  %v2590_v26 = vadd.f32 %v1798_v16, %v1102_v22 }
 0x125   :  { %v2592_v27 = vadd.f32 %v1801_v24, %v1105_v25  ;;  %v1744_v29 = vpop.f32.mrb[20].mxu1  ;;  %v1802_v31 = vpop.f32.mrb[24].mxu0 }
 0x126   :  { %v1745_v32 = vpop.f32.mrb[21].mxu1  ;;  %v1803_v28 = vpop.f32.mrb[25].mxu0 }
 0x127   :  { %v1746_v36 = vadd.f32 %v1745_v32, %v1744_v29  ;;  %v1747_v37 = vpop.f32.mrb[22].mxu1  ;;  %v1804_v38 = vadd.f32 %v1803_v28, %v1802_v31  ;;  %v1805_v39 = vpop.f32.mrb[26].mxu0  ;;  %v1046_v28 = vadd.f32 %v2567_v30, %v2580_v55 }
 0x128   :  { %v1748_v41 = vpop.f32.mrb[23].mxu1  ;;  %v1806_v34 = vpop.f32.mrb[27].mxu0 }
 0x129   :  { %v1110_v44 = vadd.f32 %v1746_v36, %v1022_v33  ;;  %v1749_v45 = vadd.f32 %v1748_v41, %v1747_v37  ;;  %v1807_v47 = vadd.f32 %v1806_v34, %v1805_v39  ;;  %v1049_v41 = vadd.f32 %v2569_v35, %v2580_v55 }
 0x12b   :  { %v1113_v48 = vadd.f32 %v1749_v45, %v1025_v43  ;;  %v2596_v50 = vadd.f32 %v1804_v38, %v1110_v44 }
 0x12d   :  { %v2598_v51 = vadd.f32 %v1807_v47, %v1113_v48  ;;  %v1750_v53 = vpop.f32.mrb[24].mxu1  ;;  %v1808_v54 = vpop.f32.mrb[28].mxu0 }
 0x12e   :  { %v1751_v56 = vpop.f32.mrb[25].mxu1  ;;  %v1809_v40 = vpop.f32.mrb[29].mxu0 }
 0x12f   :  { %v1752_v58 = vadd.f32 %v1751_v56, %v1750_v53  ;;  %v1753_v59 = vpop.f32.mrb[26].mxu1  ;;  %v1810_v60 = vadd.f32 %v1809_v40, %v1808_v54  ;;  %v1811_v61 = vpop.f32.mrb[30].mxu0  ;;  %v1054_v40 = vadd.f32 %v2571_v42, %v2580_v55 }
 0x130   :  { %v1754_v46 = vpop.f32.mrb[27].mxu1  ;;  %v1812_v62 = vpop.f32.mrb[31].mxu0 }
 0x131   :  { %v1118_v0 = vadd.f32 %v1752_v58, %v1030_v57  ;;  %v1755_v1 = vadd.f32 %v1754_v46, %v1753_v59  ;;  %v1813_v2 = vadd.f32 %v1812_v62, %v1811_v61 }
 0x133   :  { %v1121_v3 = vadd.f32 %v1755_v1, %v1033_v63  ;;  %v2604_v4 = vadd.f32 %v1810_v60, %v1118_v0 }
 0x135   :  { %v2606_v5 = vadd.f32 %v1813_v2, %v1121_v3  ;;  %v1756_v9 = vpop.f32.mrb[28].mxu1  ;;  %v1814_v10 = vpop.f32.mrb[32].mxu0 }
 0x136   :  { %v1757_v49 = vpop.f32.mrb[29].mxu1  ;;  %v1815_v11 = vpop.f32.mrb[33].mxu0 }
 0x137   :  { %v1758_v13 = vadd.f32 %v1757_v49, %v1756_v9  ;;  %v1759_v14 = vpop.f32.mrb[30].mxu1  ;;  %v1816_v15 = vadd.f32 %v1815_v11, %v1814_v10  ;;  %v1817_v16 = vpop.f32.mrb[34].mxu0 }
 0x138   :  { %v1760_v52 = vpop.f32.mrb[31].mxu1  ;;  %v1818_v18 = vpop.f32.mrb[35].mxu0 }
 0x139   :  { %v1126_v20 = vadd.f32 %v1758_v13, %v1038_v12  ;;  %v1761_v21 = vadd.f32 %v1760_v52, %v1759_v14  ;;  %v1819_v22 = vadd.f32 %v1818_v18, %v1817_v16 }
 0x13b   :  { %v1129_v7 = vadd.f32 %v1761_v21, %v1041_v19  ;;  %v2612_v24 = vadd.f32 %v1816_v15, %v1126_v20 }
 0x13d   :  { %v2614_v25 = vadd.f32 %v1819_v22, %v1129_v7  ;;  %v1762_v29 = vpop.f32.mrb[32].mxu1  ;;  %v1820_v31 = vpop.f32.mrb[36].mxu0 }
 0x13e   :  { %v1763_v17 = vpop.f32.mrb[33].mxu1  ;;  %v1821_v32 = vpop.f32.mrb[37].mxu0 }
 0x13f   :  { %v1764_v33 = vadd.f32 %v1763_v17, %v1762_v29  ;;  %v1765_v36 = vpop.f32.mrb[34].mxu1  ;;  %v1822_v37 = vadd.f32 %v1821_v32, %v1820_v31  ;;  %v1823_v38 = vpop.f32.mrb[38].mxu0 }
 0x140   :  { %v1766_v23 = vpop.f32.mrb[35].mxu1  ;;  %v1824_v39 = vpop.f32.mrb[39].mxu0 }
 0x141   :  { %v1134_v34 = vadd.f32 %v1764_v33, %v1046_v28  ;;  %v1767_v43 = vadd.f32 %v1766_v23, %v1765_v36  ;;  %v1825_v44 = vadd.f32 %v1824_v39, %v1823_v38 }
 0x143   :  { %v1137_v45 = vadd.f32 %v1767_v43, %v1049_v41  ;;  %v2620_v47 = vadd.f32 %v1822_v37, %v1134_v34 }
 0x145   :  { %v2622_v48 = vadd.f32 %v1825_v44, %v1137_v45  ;;  %v1768_v53 = vpop.f32.mrb[36].mxu1  ;;  %v1826_v54 = vpop.f32.mrb[40].mxu0 }
 0x146   :  { %v1769_v30 = vpop.f32.mrb[37].mxu1  ;;  %v1827_v56 = vpop.f32.mrb[41].mxu0 }
 0x147   :  { %v1770_v57 = vadd.f32 %v1769_v30, %v1768_v53  ;;  %v1771_v58 = vpop.f32.mrb[38].mxu1  ;;  %v1828_v59 = vadd.f32 %v1827_v56, %v1826_v54  ;;  %v1829_v60 = vpop.f32.mrb[42].mxu0 }
 0x148   :  { %v1772_v35 = vpop.f32.mrb[39].mxu1  ;;  %v1830_v61 = vpop.f32.mrb[43].mxu0 }
 0x149   :  { %v1142_v46 = vadd.f32 %v1770_v57, %v1054_v40 }
 0x14b   :  { %v2626_v62 = vadd.f32 %v1828_v59, %v1142_v46 }
 0x14d   :  { %v1848_v63 = vpop.f32.mrb[40].mxu1  ;;  %v1357_v0 = vpop.f32.mrb[44].mxu0 }
 0x14e   :  { %v1849_v1 = vpop.f32.mrb[41].mxu1  ;;  %v1923_v2 = vpop.f32.mrb[45].mxu0 }
 0x14f   :  { %v1850_v3 = vadd.f32 %v1849_v1, %v1848_v63  ;;  %v1851_v9 = vpop.f32.mrb[42].mxu1  ;;  %v1360_v10 = vpop.f32.mrb[46].mxu0 }
 0x150   :  { %v1852_v49 = vpop.f32.mrb[43].mxu1  ;;  %v1924_v11 = vpop.f32.mrb[47].mxu0 }
 0x151   :  { %v1853_v12 = vadd.f32 %v1852_v49, %v1851_v9  ;;  %v1270_v42 = vadd.f32 %v1850_v3, %v2584_v6 }
 0x153   :  { %v1358_v55 = vadd.f32 %v1357_v0, %v1270_v42  ;;  %v1273_v13 = vadd.f32 %v1853_v12, %v2586_v8 }
 0x155   :  { %v1411_v14 = vmax.f32 %v1358_v55, 0.0  ;;  %v1361_v15 = vadd.f32 %v1360_v10, %v1273_v13  ;;  %v1854_v16 = vpop.f32.mrb[44].mxu1  ;;  %v1365_v52 = vpop.f32.mrb[48].mxu0 }
 0x156   :  { %v1855_v18 = vpop.f32.mrb[45].mxu1  ;;  %v1927_v19 = vpop.f32.mrb[49].mxu0 }
 0x157   :  { %v1645_v20 = vpack.c.bf16 %v1411_v14, %v1411_v14  ;;  %v1412_v21 = vmax.f32 %v1361_v15, 0.0  ;;  %v1856_v22 = vadd.f32 %v1855_v18, %v1854_v16  ;;  %v1857_v7 = vpop.f32.mrb[46].mxu1  ;;  %v1368_v29 = vpop.f32.mrb[50].mxu0 }
 0x158   :  { %v1858_v31 = vpop.f32.mrb[47].mxu1  ;;  %v1928_v17 = vpop.f32.mrb[51].mxu0 }
 0x159   :  { %1478 = vst.msk [vmem:[%s2695_s3] sm:$0xf] %vm1477_vm1, %v1645_v20  ;;  %v1646_v6 = vpack.c.bf16 %v1412_v21, %v1412_v21  ;;  %v1859_v8 = vadd.f32 %v1858_v31, %v1857_v7  ;;  %v1278_v32 = vadd.f32 %v1856_v22, %v2590_v26 }
 0x15b   :  { %1479 = vst.msk [vmem:[%s2695_s3 + $0x4] sm:$0xf] %vm1477_vm1, %v1646_v6  ;;  %v1366_v28 = vadd.f32 %v1365_v52, %v1278_v32  ;;  %v1281_v33 = vadd.f32 %v1859_v8, %v2592_v27 }
 0x15d   :  { %v1413_v36 = vmax.f32 %v1366_v28, 0.0  ;;  %v1369_v37 = vadd.f32 %v1368_v29, %v1281_v33  ;;  %v1860_v38 = vpop.f32.mrb[48].mxu1  ;;  %v1373_v23 = vpop.f32.mrb[52].mxu0 }
 0x15e   :  { %v1861_v39 = vpop.f32.mrb[49].mxu1  ;;  %v1931_v41 = vpop.f32.mrb[53].mxu0 }
 0x15f   :  { %v1647_v34 = vpack.c.bf16 %v1413_v36, %v1413_v36  ;;  %v1414_v43 = vmax.f32 %v1369_v37, 0.0  ;;  %v1862_v44 = vadd.f32 %v1861_v39, %v1860_v38  ;;  %v1863_v45 = vpop.f32.mrb[50].mxu1  ;;  %v1376_v53 = vpop.f32.mrb[54].mxu0 }
 0x160   :  { %v1864_v26 = vpop.f32.mrb[51].mxu1  ;;  %v1932_v54 = vpop.f32.mrb[55].mxu0 }
 0x161   :  { %1480 = vst.msk [vmem:[%s2695_s3 + $0x8] sm:$0xf] %vm1477_vm1, %v1647_v34  ;;  %v1648_v30 = vpack.c.bf16 %v1414_v43, %v1414_v43  ;;  %v1865_v27 = vadd.f32 %v1864_v26, %v1863_v45  ;;  %v1286_v56 = vadd.f32 %v1862_v44, %v2596_v50 }
 0x163   :  { %1481 = vst.msk [vmem:[%s2695_s3 + $0xc] sm:$0xf] %vm1477_vm1, %v1648_v30  ;;  %v1374_v40 = vadd.f32 %v1373_v23, %v1286_v56  ;;  %v1289_v57 = vadd.f32 %v1865_v27, %v2598_v51 }
 0x165   :  { %v1415_v58 = vmax.f32 %v1374_v40, 0.0  ;;  %v1377_v59 = vadd.f32 %v1376_v53, %v1289_v57  ;;  %v1866_v60 = vpop.f32.mrb[52].mxu1  ;;  %v1381_v35 = vpop.f32.mrb[56].mxu0 }
 0x166   :  { %v1867_v61 = vpop.f32.mrb[53].mxu1  ;;  %v1935_v46 = vpop.f32.mrb[57].mxu0 }
 0x167   :  { %v1649_v63 = vpack.c.bf16 %v1415_v58, %v1415_v58  ;;  %v1416_v0 = vmax.f32 %v1377_v59, 0.0  ;;  %v1868_v1 = vadd.f32 %v1867_v61, %v1866_v60  ;;  %v1869_v2 = vpop.f32.mrb[54].mxu1  ;;  %v1384_v3 = vpop.f32.mrb[58].mxu0 }
 0x168   :  { %v1870_v50 = vpop.f32.mrb[55].mxu1  ;;  %v1936_v9 = vpop.f32.mrb[59].mxu0 }
 0x169   :  { %1482 = vst.msk [vmem:[%s2695_s3 + $0x10] sm:$0xf] %vm1477_vm1, %v1649_v63  ;;  %v1650_v10 = vpack.c.bf16 %v1416_v0, %v1416_v0  ;;  %v1871_v51 = vadd.f32 %v1870_v50, %v1869_v2  ;;  %v1294_v49 = vadd.f32 %v1868_v1, %v2604_v4 }
 0x16b   :  { %1483 = vst.msk [vmem:[%s2695_s3 + $0x14] sm:$0xf] %vm1477_vm1, %v1650_v10  ;;  %v1382_v11 = vadd.f32 %v1381_v35, %v1294_v49  ;;  %v1297_v12 = vadd.f32 %v1871_v51, %v2606_v5 }
 0x16d   :  { %v1417_v42 = vmax.f32 %v1382_v11, 0.0  ;;  %v1385_v55 = vadd.f32 %v1384_v3, %v1297_v12  ;;  %v1872_v13 = vpop.f32.mrb[56].mxu1  ;;  %v1389_v14 = vpop.f32.mrb[60].mxu0 }
 0x16e   :  { %v1873_v15 = vpop.f32.mrb[57].mxu1  ;;  %v1939_v16 = vpop.f32.mrb[61].mxu0 }
 0x16f   :  { %v1651_v52 = vpack.c.bf16 %v1417_v42, %v1417_v42  ;;  %v1418_v18 = vmax.f32 %v1385_v55, 0.0  ;;  %v1874_v19 = vadd.f32 %v1873_v15, %v1872_v13  ;;  %v1875_v20 = vpop.f32.mrb[58].mxu1  ;;  %v1392_v21 = vpop.f32.mrb[62].mxu0 }
 0x170   :  { %v1876_v4 = vpop.f32.mrb[59].mxu1  ;;  %v1940_v22 = vpop.f32.mrb[63].mxu0 }
 0x171   :  { %1484 = vst.msk [vmem:[%s2695_s3 + $0x18] sm:$0xf] %vm1477_vm1, %v1651_v52  ;;  %v1652_v7 = vpack.c.bf16 %v1418_v18, %v1418_v18  ;;  %v1877_v5 = vadd.f32 %v1876_v4, %v1875_v20  ;;  %v1302_v29 = vadd.f32 %v1874_v19, %v2612_v24 }
 0x173   :  { %1485 = vst.msk [vmem:[%s2695_s3 + $0x1c] sm:$0xf] %vm1477_vm1, %v1652_v7  ;;  %v1390_v31 = vadd.f32 %v1389_v14, %v1302_v29  ;;  %v1305_v17 = vadd.f32 %v1877_v5, %v2614_v25 }
 0x175   :  { %v1419_v6 = vmax.f32 %v1390_v31, 0.0  ;;  %v1393_v8 = vadd.f32 %v1392_v21, %v1305_v17  ;;  %v1878_v32 = vpop.f32.mrb[60].mxu1  ;;  %v1397_v28 = vpop.f32.mrb[64].mxu0 }
 0x176   :  { %v1879_v33 = vpop.f32.mrb[61].mxu1  ;;  %v1943_v36 = vpop.f32.mrb[65].mxu0 }
 0x177   :  { %v1653_v37 = vpack.c.bf16 %v1419_v6, %v1419_v6  ;;  %v1420_v38 = vmax.f32 %v1393_v8, 0.0  ;;  %v1880_v23 = vadd.f32 %v1879_v33, %v1878_v32  ;;  %v1881_v39 = vpop.f32.mrb[62].mxu1  ;;  %v1400_v41 = vpop.f32.mrb[66].mxu0 }
 0x178   :  { %v1882_v24 = vpop.f32.mrb[63].mxu1  ;;  %v1944_v34 = vpop.f32.mrb[67].mxu0 }
 0x179   :  { %1486 = vst.msk [vmem:[%s2695_s3 + $0x20] sm:$0xf] %vm1477_vm1, %v1653_v37  ;;  %v1654_v43 = vpack.c.bf16 %v1420_v38, %v1420_v38  ;;  %v1883_v25 = vadd.f32 %v1882_v24, %v1881_v39  ;;  %v1310_v44 = vadd.f32 %v1880_v23, %v2620_v47 }
 0x17b   :  { %1487 = vst.msk [vmem:[%s2695_s3 + $0x24] sm:$0xf] %vm1477_vm1, %v1654_v43  ;;  %v1398_v45 = vadd.f32 %v1397_v28, %v1310_v44  ;;  %v1313_v53 = vadd.f32 %v1883_v25, %v2622_v48 }
 0x17d   :  { %v1421_v26 = vmax.f32 %v1398_v45, 0.0  ;;  %v1401_v54 = vadd.f32 %v1400_v41, %v1313_v53  ;;  %v1884_v30 = vpop.f32.mrb[64].mxu1  ;;  %v1405_v27 = vpop.f32.mrb[68].mxu0 }
 0x17e   :  { %v1885_v56 = vpop.f32.mrb[65].mxu1  ;;  %v1947_v40 = vpop.f32.mrb[69].mxu0 }
 0x17f   :  { %v1655_v57 = vpack.c.bf16 %v1421_v26, %v1421_v26  ;;  %v1422_v58 = vmax.f32 %v1401_v54, 0.0  ;;  %v1886_v59 = vadd.f32 %v1885_v56, %v1884_v30  ;;  %v1887_v60 = vpop.f32.mrb[66].mxu1  ;;  %v1408_v35 = vpop.f32.mrb[70].mxu0 }
 0x180   :  { %v1888_v47 = vpop.f32.mrb[67].mxu1  ;;  %v1948_v61 = vpop.f32.mrb[71].mxu0 }
 0x181   :  { %1488 = vst.msk [vmem:[%s2695_s3 + $0x28] sm:$0xf] %vm1477_vm1, %v1655_v57  ;;  %v1656_v46 = vpack.c.bf16 %v1422_v58, %v1422_v58  ;;  %v1318_v48 = vadd.f32 %v1886_v59, %v2626_v62 }
 0x183   :  { %1489 = vst.msk [vmem:[%s2695_s3 + $0x2c] sm:$0xf] %vm1477_vm1, %v1656_v46  ;;  %v1406_v63 = vadd.f32 %v1405_v27, %v1318_v48 }
 0x185   :  { %v1423_v0 = vmax.f32 %v1406_v63, 0.0 }
 0x187   :  { %v1657_v1 = vpack.c.bf16 %v1423_v0, %v1423_v0 }
 0x189   :  { %1491 = vst.msk [vmem:[%s2695_s3 + $0x30] sm:$0x1] %vm1490_vm2, %v1657_v1 }

// kernel: model_forward.7
= control target key start
LH: loop header
LB: loop body
LE: loop exit
PB: predicated region body
PF: predicated region fallthrough
CT: control target
= control target key end

     0   :  { %v812_v36 = vlaneseq  ;;  %v8598_v37 = vmov 1966171168   ;;  %s11242_s0 = inlined_call_operand.vmem [shape: bf16[2,3136], index: 0, kind: input, shape index: {}]   ;;  %s11243_s1 = inlined_call_operand.vmem [shape: bf16[3136,512], index: 1, kind: input, shape index: {}]   ;;  %s11244_s2 = inlined_call_operand.vmem [shape: f32[1,512], index: 2, kind: input, shape index: {}]   ;;  %s11245_s3 = inlined_call_operand.vmem [shape: bf16[512,7], index: 3, kind: input, shape index: {}]   ;;  %s11246_s4 = inlined_call_operand.vmem [shape: f32[1,7], index: 4, kind: input, shape index: {}]   ;;  %s11247_s5 = inlined_call_operand.hbm [shape: f32[2,6], index: 5, kind: output, shape index: {}]  }
   0x1   :  { %v7361_v0 = vld [vmem:[%s11243_s1 + $0x4] ss:$16 sps:$4 sm:$0xff]   ;;  %v7363_v1 = vld [vmem:[%s11243_s1 + $0xc] ss:$16 sps:$4 sm:$0xff]   ;;  %v7365_v2 = vld [vmem:[%s11243_s1] ss:$16 sps:$4 sm:$0xff]   ;;  %v838_v38 = vunpack.c.l.s4 %v8598_v37 }
   0x2   :  { %4945 = vmatprep.subr.bf16.mxu0 %v7361_v0  ;;  %v7366_v3 = vld [vmem:[%s11243_s1 + $0x8] ss:$16 sps:$4 sm:$0xff]   ;;  %5478 = vmatprep.subr.bf16.mxu1 %v7363_v1  ;;  %v7367_v4 = vld [vmem:[%s11243_s1 + $0x24] ss:$16 sps:$4 sm:$0xff]   ;;  %v7369_v5 = vld [vmem:[%s11243_s1 + $0x2c] ss:$16 sps:$4 sm:$0xff]  }
   0x3   :  { %4946 = vmatpush1.bf16.msra.mxu0 %v7365_v2  ;;  %5479 = vmatpush1.bf16.msra.mxu1 %v7366_v3  ;;  %v7371_v6 = vld [vmem:[%s11243_s1 + $0x20] ss:$16 sps:$4 sm:$0xff]   ;;  %v7372_v7 = vld [vmem:[%s11243_s1 + $0x28] ss:$16 sps:$4 sm:$0xff]   ;;  %v7373_v8 = vld [vmem:[%s11243_s1 + $0x44] ss:$16 sps:$4 sm:$0xff]   ;;  %v839_v43 = vunpack.c.0.s8 %v838_v38 }
   0x4   :  { %4947 = vmatprep.subr.bf16.mxu0 %v7367_v4  ;;  %5480 = vmatprep.subr.bf16.mxu1 %v7369_v5  ;;  %v7375_v9 = vld [vmem:[%s11243_s1 + $0x4c] ss:$16 sps:$4 sm:$0xff]   ;;  %v7377_v10 = vld [vmem:[%s11243_s1 + $0x40] ss:$16 sps:$4 sm:$0xff]   ;;  %v7378_v11 = vld [vmem:[%s11243_s1 + $0x48] ss:$16 sps:$4 sm:$0xff]  }
   0x5   :  { %v7379_v12 = vld [vmem:[%s11243_s1 + $0x64] ss:$16 sps:$4 sm:$0xff]   ;;  %v7381_v13 = vld [vmem:[%s11243_s1 + $0x6c] ss:$16 sps:$4 sm:$0xff]   ;;  %v7383_v14 = vld [vmem:[%s11243_s1 + $0x60] ss:$16 sps:$4 sm:$0xff]  }
   0x6   :  { %v7384_v15 = vld [vmem:[%s11243_s1 + $0x68] ss:$16 sps:$4 sm:$0xff]   ;;  %v7385_v16 = vld [vmem:[%s11243_s1 + $0x84] ss:$16 sps:$4 sm:$0xff]   ;;  %v7387_v17 = vld [vmem:[%s11243_s1 + $0x8c] ss:$16 sps:$4 sm:$0xff]  }
   0x7   :  { %4948 = vmatpush1.bf16.msra.mxu0 %v7371_v6  ;;  %5481 = vmatpush1.bf16.msra.mxu1 %v7372_v7  ;;  %v7389_v18 = vld [vmem:[%s11243_s1 + $0x80] ss:$16 sps:$4 sm:$0xff]   ;;  %v7390_v19 = vld [vmem:[%s11243_s1 + $0x88] ss:$16 sps:$4 sm:$0xff]   ;;  %v7391_v20 = vld [vmem:[%s11243_s1 + $0xa4] ss:$16 sps:$4 sm:$0xff]  }
   0x8   :  { %4949 = vmatprep.subr.bf16.mxu0 %v7373_v8  ;;  %5482 = vmatprep.subr.bf16.mxu1 %v7375_v9  ;;  %v7393_v21 = vld [vmem:[%s11243_s1 + $0xac] ss:$16 sps:$4 sm:$0xff]   ;;  %v7395_v22 = vld [vmem:[%s11243_s1 + $0xa0] ss:$16 sps:$4 sm:$0xff]   ;;  %v7396_v23 = vld [vmem:[%s11243_s1 + $0xa8] ss:$16 sps:$4 sm:$0xff]  }
   0x9   :  { %v7397_v24 = vld [vmem:[%s11243_s1 + $0xc4] ss:$16 sps:$4 sm:$0xff]   ;;  %v7399_v25 = vld [vmem:[%s11243_s1 + $0xcc] ss:$16 sps:$4 sm:$0xff]   ;;  %v7401_v26 = vld [vmem:[%s11243_s1 + $0xc0] ss:$16 sps:$4 sm:$0xff]  }
   0xa   :  { %v7402_v27 = vld [vmem:[%s11243_s1 + $0xc8] ss:$16 sps:$4 sm:$0xff]   ;;  %v7403_v28 = vld [vmem:[%s11243_s1 + $0xe4] ss:$16 sps:$4 sm:$0xff]   ;;  %v7405_v29 = vld [vmem:[%s11243_s1 + $0xec] ss:$16 sps:$4 sm:$0xff]  }
   0xb   :  { %4950 = vmatpush1.bf16.msra.mxu0 %v7377_v10  ;;  %5483 = vmatpush1.bf16.msra.mxu1 %v7378_v11  ;;  %v7407_v30 = vld [vmem:[%s11243_s1 + $0xe0] ss:$16 sps:$4 sm:$0xff]   ;;  %v7408_v31 = vld [vmem:[%s11243_s1 + $0xe8] ss:$16 sps:$4 sm:$0xff]   ;;  %v7409_v32 = vld [vmem:[%s11243_s1 + $0x104] ss:$16 sps:$4 sm:$0xff]  }
   0xc   :  { %4951 = vmatprep.subr.bf16.mxu0 %v7379_v12  ;;  %5484 = vmatprep.subr.bf16.mxu1 %v7381_v13  ;;  %v7411_v33 = vld [vmem:[%s11243_s1 + $0x10c] ss:$16 sps:$4 sm:$0xff]   ;;  %v7413_v34 = vld [vmem:[%s11243_s1 + $0x100] ss:$16 sps:$4 sm:$0xff]   ;;  %v7414_v35 = vld [vmem:[%s11243_s1 + $0x108] ss:$16 sps:$4 sm:$0xff]  }
   0xd   :  { %v7415_v39 = vld [vmem:[%s11243_s1 + $0x124] ss:$16 sps:$4 sm:$0xff]   ;;  %v7417_v40 = vld [vmem:[%s11243_s1 + $0x12c] ss:$16 sps:$4 sm:$0xff]   ;;  %v7419_v41 = vld [vmem:[%s11243_s1 + $0x120] ss:$16 sps:$4 sm:$0xff]  }
   0xe   :  { %v8749_v42 = vshrl.u32 %v812_v36, 7  ;;  %v7420_v44 = vld [vmem:[%s11243_s1 + $0x128] ss:$16 sps:$4 sm:$0xff]   ;;  %v7421_v45 = vld [vmem:[%s11243_s1 + $0x144] ss:$16 sps:$4 sm:$0xff]  }
   0xf   :  { %4952 = vmatpush1.bf16.msra.mxu0 %v7383_v14  ;;  %5485 = vmatpush1.bf16.msra.mxu1 %v7384_v15  ;;  %v7423_v46 = vld [vmem:[%s11243_s1 + $0x14c] ss:$16 sps:$4 sm:$0xff]   ;;  %v7425_v47 = vld [vmem:[%s11243_s1 + $0x140] ss:$16 sps:$4 sm:$0xff]   ;;  %v7426_v48 = vld [vmem:[%s11243_s1 + $0x148] ss:$16 sps:$4 sm:$0xff]  }
  0x10   :  { %4953 = vmatprep.subr.bf16.mxu0 %v7385_v16  ;;  %5486 = vmatprep.subr.bf16.mxu1 %v7387_v17  ;;  %v8767_v49 = vsub.s32 %v839_v43, %v8749_v42  ;;  %v7427_v50 = vld [vmem:[%s11243_s1 + $0x164] ss:$16 sps:$4 sm:$0xff]   ;;  %v7429_v51 = vld [vmem:[%s11243_s1 + $0x16c] ss:$16 sps:$4 sm:$0xff]   ;;  %v7431_v53 = vld [vmem:[%s11243_s1 + $0x160] ss:$16 sps:$4 sm:$0xff]  }
  0x11   :  { %v8778_v52 = vld [vmem:[%s11242_s0] sm:$0xff]  ;;  %v7432_v55 = vld [vmem:[%s11243_s1 + $0x168] ss:$16 sps:$4 sm:$0xff]   ;;  %v7435_v57 = vld [vmem:[%s11243_s1 + $0x18c] ss:$16 sps:$4 sm:$0xff]  }
  0x12   :  { %v843_v54 = vrot.slane %v8778_v52, %v8767_v49  ;;  %v7433_v56 = vld [vmem:[%s11243_s1 + $0x184] ss:$16 sps:$4 sm:$0xff]   ;;  %v7437_v59 = vld [vmem:[%s11243_s1 + $0x180] ss:$16 sps:$4 sm:$0xff]   ;;  %v7438_v61 = vld [vmem:[%s11243_s1 + $0x188] ss:$16 sps:$4 sm:$0xff]  }
  0x13   :  { %4954 = vmatpush1.bf16.msra.mxu0 %v7389_v18  ;;  %5487 = vmatpush1.bf16.msra.mxu1 %v7390_v19  ;;  %v7439_v62 = vld [vmem:[%s11243_s1 + $0x1a4] ss:$16 sps:$4 sm:$0xff]   ;;  %v7441_v63 = vld [vmem:[%s11243_s1 + $0x1ac] ss:$16 sps:$4 sm:$0xff]   ;;  %v7443_v0 = vld [vmem:[%s11243_s1 + $0x1a0] ss:$16 sps:$4 sm:$0xff]  }
  0x14   :  { %4955 = vmatprep.subr.bf16.mxu0 %v7391_v20  ;;  %5488 = vmatprep.subr.bf16.mxu1 %v7393_v21  ;;  %v851_v58 = vcombine.high %v843_v54, %v843_v54  ;;  %v7444_v1 = vld [vmem:[%s11243_s1 + $0x1a8] ss:$16 sps:$4 sm:$0xff]   ;;  %v7445_v2 = vld [vmem:[%s11243_s1 + $0x1c4] ss:$16 sps:$4 sm:$0xff]   ;;  %v7447_v3 = vld [vmem:[%s11243_s1 + $0x1cc] ss:$16 sps:$4 sm:$0xff]   ;;  %v8847_v13 = vrot.slane %v843_v54, %v8767_v49 }
  0x15   :  { %v7449_v4 = vld [vmem:[%s11243_s1 + $0x1c0] ss:$16 sps:$4 sm:$0xff]   ;;  %v7450_v5 = vld [vmem:[%s11243_s1 + $0x1c8] ss:$16 sps:$4 sm:$0xff]   ;;  %v7451_v6 = vld [vmem:[%s11243_s1 + $0x1e4] ss:$16 sps:$4 sm:$0xff]  }
  0x16   :  { %v873_v60 = vrot.slane %v851_v58, %v8767_v49  ;;  %v7453_v7 = vld [vmem:[%s11243_s1 + $0x1ec] ss:$16 sps:$4 sm:$0xff]   ;;  %v7455_v8 = vld [vmem:[%s11243_s1 + $0x1e0] ss:$16 sps:$4 sm:$0xff]   ;;  %v7456_v9 = vld [vmem:[%s11243_s1 + $0x1e8] ss:$16 sps:$4 sm:$0xff]  }
  0x17   :  { %4956 = vmatpush1.bf16.msra.mxu0 %v7395_v22  ;;  %5489 = vmatpush1.bf16.msra.mxu1 %v7396_v23  ;;  %v7459_v10 = vld [vmem:[%s11243_s1 + $0x204] ss:$16 sps:$4 sm:$0xff]   ;;  %v7462_v11 = vld [vmem:[%s11243_s1 + $0x20c] ss:$16 sps:$4 sm:$0xff]   ;;  %v7457_v12 = vld [vmem:[%s11243_s1 + $0x200] ss:$16 sps:$4 sm:$0xff]  }
  0x18   :  { %4957 = vmatprep.subr.bf16.mxu0 %v7397_v24  ;;  %5490 = vmatprep.subr.bf16.mxu1 %v7399_v25  ;;  %v7460_v14 = vld [vmem:[%s11243_s1 + $0x208] ss:$16 sps:$4 sm:$0xff]   ;;  %v7465_v15 = vld [vmem:[%s11243_s1 + $0x224] ss:$16 sps:$4 sm:$0xff]   ;;  %v7468_v16 = vld [vmem:[%s11243_s1 + $0x22c] ss:$16 sps:$4 sm:$0xff]   ;;  %v883_v17 = vcombine.high %v873_v60, %v873_v60 }
  0x19   :  { %4977 = vmatprep.mubr.bf16.mxu0 %v873_v60  ;;  %5510 = vmatprep.mubr.bf16.mxu1 %v873_v60  ;;  %v7463_v18 = vld [vmem:[%s11243_s1 + $0x220] ss:$16 sps:$4 sm:$0xff]   ;;  %v7466_v19 = vld [vmem:[%s11243_s1 + $0x228] ss:$16 sps:$4 sm:$0xff]   ;;  %v7471_v20 = vld [vmem:[%s11243_s1 + $0x244] ss:$16 sps:$4 sm:$0xff]  }
  0x1a   :  { %v7474_v21 = vld [vmem:[%s11243_s1 + $0x24c] ss:$16 sps:$4 sm:$0xff]   ;;  %v7469_v22 = vld [vmem:[%s11243_s1 + $0x240] ss:$16 sps:$4 sm:$0xff]   ;;  %v7472_v23 = vld [vmem:[%s11243_s1 + $0x248] ss:$16 sps:$4 sm:$0xff]  }
  0x1b   :  { %4958 = vmatpush1.bf16.msra.mxu0 %v7401_v26  ;;  %5491 = vmatpush1.bf16.msra.mxu1 %v7402_v27  ;;  %v7477_v24 = vld [vmem:[%s11243_s1 + $0x264] ss:$16 sps:$4 sm:$0xff]   ;;  %v7480_v25 = vld [vmem:[%s11243_s1 + $0x26c] ss:$16 sps:$4 sm:$0xff]   ;;  %v7475_v26 = vld [vmem:[%s11243_s1 + $0x260] ss:$16 sps:$4 sm:$0xff]  }
  0x1c   :  { %4959 = vmatprep.subr.bf16.mxu0 %v7403_v28  ;;  %5492 = vmatprep.subr.bf16.mxu1 %v7405_v29  ;;  %v7478_v27 = vld [vmem:[%s11243_s1 + $0x268] ss:$16 sps:$4 sm:$0xff]   ;;  %v7483_v28 = vld [vmem:[%s11243_s1 + $0x284] ss:$16 sps:$4 sm:$0xff]   ;;  %v7486_v29 = vld [vmem:[%s11243_s1 + $0x28c] ss:$16 sps:$4 sm:$0xff]  }
  0x1d   :  { %v7495_v37 = vld [vmem:[%s11243_s1 + $0x2c4] ss:$16 sps:$4 sm:$0xff]   ;;  %v7498_v38 = vld [vmem:[%s11243_s1 + $0x2cc] ss:$16 sps:$4 sm:$0xff]   ;;  %v7511_v54 = vld [vmem:[%s11243_s1 + $0x320] ss:$16 sps:$4 sm:$0xff]  }
  0x1e   :  { %v7504_v43 = vld [vmem:[%s11243_s1 + $0x2ec] ss:$16 sps:$4 sm:$0xff]   ;;  %v7517_v58 = vld [vmem:[%s11243_s1 + $0x340] ss:$16 sps:$4 sm:$0xff]   ;;  %v7525_v60 = vld [vmem:[%s11243_s1 + $0x364] ss:$16 sps:$4 sm:$0xff]  }
  0x1f   :  { %4960 = vmatpush1.bf16.msra.mxu0 %v7407_v30  ;;  %5493 = vmatpush1.bf16.msra.mxu1 %v7408_v31  ;;  %v7481_v30 = vld [vmem:[%s11243_s1 + $0x280] ss:$16 sps:$4 sm:$0xff]   ;;  %v7484_v31 = vld [vmem:[%s11243_s1 + $0x288] ss:$16 sps:$4 sm:$0xff]  }
  0x20   :  { %4961 = vmatprep.subr.bf16.mxu0 %v7409_v32  ;;  %5494 = vmatprep.subr.bf16.mxu1 %v7411_v33  ;;  %v7489_v32 = vld [vmem:[%s11243_s1 + $0x2a4] ss:$16 sps:$4 sm:$0xff]   ;;  %v7492_v33 = vld [vmem:[%s11243_s1 + $0x2ac] ss:$16 sps:$4 sm:$0xff]  }
  0x23   :  { %4962 = vmatpush1.bf16.msra.mxu0 %v7413_v34  ;;  %5495 = vmatpush1.bf16.msra.mxu1 %v7414_v35  ;;  %v7487_v34 = vld [vmem:[%s11243_s1 + $0x2a0] ss:$16 sps:$4 sm:$0xff]   ;;  %v7490_v35 = vld [vmem:[%s11243_s1 + $0x2a8] ss:$16 sps:$4 sm:$0xff]  }
  0x24   :  { %4963 = vmatprep.subr.bf16.mxu0 %v7415_v39  ;;  %5496 = vmatprep.subr.bf16.mxu1 %v7417_v40  ;;  %v7493_v39 = vld [vmem:[%s11243_s1 + $0x2c0] ss:$16 sps:$4 sm:$0xff]   ;;  %v7496_v40 = vld [vmem:[%s11243_s1 + $0x2c8] ss:$16 sps:$4 sm:$0xff]  }
  0x27   :  { %4964 = vmatpush1.bf16.msra.mxu0 %v7419_v41  ;;  %5497 = vmatpush1.bf16.msra.mxu1 %v7420_v44  ;;  %v7501_v41 = vld [vmem:[%s11243_s1 + $0x2e4] ss:$16 sps:$4 sm:$0xff]   ;;  %v7499_v44 = vld [vmem:[%s11243_s1 + $0x2e0] ss:$16 sps:$4 sm:$0xff]  }
  0x28   :  { %4965 = vmatprep.subr.bf16.mxu0 %v7421_v45  ;;  %5498 = vmatprep.subr.bf16.mxu1 %v7423_v46  ;;  %v7502_v45 = vld [vmem:[%s11243_s1 + $0x2e8] ss:$16 sps:$4 sm:$0xff]   ;;  %v7507_v46 = vld [vmem:[%s11243_s1 + $0x304] ss:$16 sps:$4 sm:$0xff]  }
  0x2b   :  { %4966 = vmatpush1.bf16.msra.mxu0 %v7425_v47  ;;  %5499 = vmatpush1.bf16.msra.mxu1 %v7426_v48  ;;  %v7510_v47 = vld [vmem:[%s11243_s1 + $0x30c] ss:$16 sps:$4 sm:$0xff]   ;;  %v7505_v48 = vld [vmem:[%s11243_s1 + $0x300] ss:$16 sps:$4 sm:$0xff]  }
  0x2c   :  { %4967 = vmatprep.subr.bf16.mxu0 %v7427_v50  ;;  %5500 = vmatprep.subr.bf16.mxu1 %v7429_v51  ;;  %v7508_v50 = vld [vmem:[%s11243_s1 + $0x308] ss:$16 sps:$4 sm:$0xff]   ;;  %v7513_v51 = vld [vmem:[%s11243_s1 + $0x324] ss:$16 sps:$4 sm:$0xff]  }
  0x2f   :  { %4968 = vmatpush1.bf16.msra.mxu0 %v7431_v53  ;;  %5501 = vmatpush1.bf16.msra.mxu1 %v7432_v55  ;;  %v7516_v53 = vld [vmem:[%s11243_s1 + $0x32c] ss:$16 sps:$4 sm:$0xff]   ;;  %v7514_v55 = vld [vmem:[%s11243_s1 + $0x328] ss:$16 sps:$4 sm:$0xff]  }
  0x30   :  { %4969 = vmatprep.subr.bf16.mxu0 %v7433_v56  ;;  %5502 = vmatprep.subr.bf16.mxu1 %v7435_v57  ;;  %v7519_v56 = vld [vmem:[%s11243_s1 + $0x344] ss:$16 sps:$4 sm:$0xff]   ;;  %v7522_v57 = vld [vmem:[%s11243_s1 + $0x34c] ss:$16 sps:$4 sm:$0xff]  }
  0x33   :  { %4970 = vmatpush1.bf16.msra.mxu0 %v7437_v59  ;;  %5503 = vmatpush1.bf16.msra.mxu1 %v7438_v61  ;;  %v7520_v59 = vld [vmem:[%s11243_s1 + $0x348] ss:$16 sps:$4 sm:$0xff]   ;;  %v7528_v61 = vld [vmem:[%s11243_s1 + $0x36c] ss:$16 sps:$4 sm:$0xff]  }
  0x34   :  { %4971 = vmatprep.subr.bf16.mxu0 %v7439_v62  ;;  %5504 = vmatprep.subr.bf16.mxu1 %v7441_v63  ;;  %v7523_v62 = vld [vmem:[%s11243_s1 + $0x360] ss:$16 sps:$4 sm:$0xff]   ;;  %v7526_v63 = vld [vmem:[%s11243_s1 + $0x368] ss:$16 sps:$4 sm:$0xff]  }
  0x37   :  { %4972 = vmatpush1.bf16.msra.mxu0 %v7443_v0  ;;  %5505 = vmatpush1.bf16.msra.mxu1 %v7444_v1  ;;  %v7531_v0 = vld [vmem:[%s11243_s1 + $0x384] ss:$16 sps:$4 sm:$0xff]   ;;  %v7534_v1 = vld [vmem:[%s11243_s1 + $0x38c] ss:$16 sps:$4 sm:$0xff]  }
  0x38   :  { %4973 = vmatprep.subr.bf16.mxu0 %v7445_v2  ;;  %5506 = vmatprep.subr.bf16.mxu1 %v7447_v3  ;;  %v7529_v2 = vld [vmem:[%s11243_s1 + $0x380] ss:$16 sps:$4 sm:$0xff]   ;;  %v7532_v3 = vld [vmem:[%s11243_s1 + $0x388] ss:$16 sps:$4 sm:$0xff]  }
  0x3b   :  { %4974 = vmatpush1.bf16.msra.mxu0 %v7449_v4  ;;  %5507 = vmatpush1.bf16.msra.mxu1 %v7450_v5  ;;  %v7537_v4 = vld [vmem:[%s11243_s1 + $0x3a4] ss:$16 sps:$4 sm:$0xff]   ;;  %v7540_v5 = vld [vmem:[%s11243_s1 + $0x3ac] ss:$16 sps:$4 sm:$0xff]  }
  0x3c   :  { %4975 = vmatprep.subr.bf16.mxu0 %v7451_v6  ;;  %5508 = vmatprep.subr.bf16.mxu1 %v7453_v7  ;;  %v7535_v6 = vld [vmem:[%s11243_s1 + $0x3a0] ss:$16 sps:$4 sm:$0xff]   ;;  %v7538_v7 = vld [vmem:[%s11243_s1 + $0x3a8] ss:$16 sps:$4 sm:$0xff]  }
  0x3f   :  { %4976 = vmatpush1.bf16.msra.mxu0 %v7455_v8  ;;  %5509 = vmatpush1.bf16.msra.mxu1 %v7456_v9  ;;  %v7543_v8 = vld [vmem:[%s11243_s1 + $0x3c4] ss:$16 sps:$4 sm:$0xff]   ;;  %v7546_v9 = vld [vmem:[%s11243_s1 + $0x3cc] ss:$16 sps:$4 sm:$0xff]  }
  0x40   :  { %4986 = vmatprep.subr.bf16.mxu0 %v7459_v10  ;;  %5519 = vmatprep.subr.bf16.mxu1 %v7462_v11  ;;  %v836_v10 = vcombine.high %v8778_v52, %v8778_v52  ;;  %v7541_v11 = vld [vmem:[%s11243_s1 + $0x3c0] ss:$16 sps:$4 sm:$0xff]   ;;  %v7552_v52 = vld [vmem:[%s11243_s1 + $0x3ec] ss:$16 sps:$4 sm:$0xff]  }
  0x42   :  { %4978 = vmatmul.mubr.bf16.vlgmr.msra.gmra.mrb[0].mxu0 %v8847_v13  ;;  %5511 = vmatmul.mubr.bf16.vlgmr.msra.gmra.mrb[0].mxu1 %v8847_v13 }
  0x43   :  { %4987 = vmatpush1.bf16.msra.mxu0 %v7457_v12  ;;  %5520 = vmatpush1.bf16.msra.mxu1 %v7460_v14  ;;  %v7544_v12 = vld [vmem:[%s11243_s1 + $0x3c8] ss:$16 sps:$4 sm:$0xff]   ;;  %v7549_v14 = vld [vmem:[%s11243_s1 + $0x3e4] ss:$16 sps:$4 sm:$0xff]  }
  0x44   :  { %4988 = vmatprep.subr.bf16.mxu0 %v7465_v15  ;;  %5521 = vmatprep.subr.bf16.mxu1 %v7468_v16  ;;  %v9031_v15 = vrot.slane %v836_v10, %v8767_v49  ;;  %v7547_v16 = vld [vmem:[%s11243_s1 + $0x3e0] ss:$16 sps:$4 sm:$0xff]  }
  0x45   :  { %5018 = vmatprep.mubr.bf16.mxu0 %v883_v17  ;;  %5551 = vmatprep.mubr.bf16.mxu1 %v883_v17  ;;  %v7550_v17 = vld [vmem:[%s11243_s1 + $0x3e8] ss:$16 sps:$4 sm:$0xff]   ;;  %v7625_v10 = vld [vmem:[%s11243_s1 + $0x580] ss:$16 sps:$4 sm:$0xff]  }
  0x47   :  { %4989 = vmatpush1.bf16.msra.mxu0 %v7463_v18  ;;  %5522 = vmatpush1.bf16.msra.mxu1 %v7466_v19  ;;  %v7555_v18 = vld [vmem:[%s11243_s1 + $0x404] ss:$16 sps:$4 sm:$0xff]   ;;  %v7558_v19 = vld [vmem:[%s11243_s1 + $0x40c] ss:$16 sps:$4 sm:$0xff]  }
  0x48   :  { %4990 = vmatprep.subr.bf16.mxu0 %v7471_v20  ;;  %5523 = vmatprep.subr.bf16.mxu1 %v7474_v21  ;;  %v852_v20 = vcombine.high %v9031_v15, %v9031_v15  ;;  %v7553_v21 = vld [vmem:[%s11243_s1 + $0x400] ss:$16 sps:$4 sm:$0xff]  }
  0x4b   :  { %4991 = vmatpush1.bf16.msra.mxu0 %v7469_v22  ;;  %5524 = vmatpush1.bf16.msra.mxu1 %v7472_v23  ;;  %v881_v22 = vcombine.high %v8847_v13, %v8847_v13  ;;  %v7556_v23 = vld [vmem:[%s11243_s1 + $0x408] ss:$16 sps:$4 sm:$0xff]   ;;  %v7559_v13 = vld [vmem:[%s11243_s1 + $0x420] ss:$16 sps:$4 sm:$0xff]  }
  0x4c   :  { %4992 = vmatprep.subr.bf16.mxu0 %v7477_v24  ;;  %5525 = vmatprep.subr.bf16.mxu1 %v7480_v25  ;;  %v7561_v24 = vld [vmem:[%s11243_s1 + $0x424] ss:$16 sps:$4 sm:$0xff]   ;;  %v7564_v25 = vld [vmem:[%s11243_s1 + $0x42c] ss:$16 sps:$4 sm:$0xff]  }
  0x4f   :  { %4993 = vmatpush1.bf16.msra.mxu0 %v7475_v26  ;;  %5526 = vmatpush1.bf16.msra.mxu1 %v7478_v27  ;;  %v9062_v26 = vrot.slane %v852_v20, %v8767_v49  ;;  %v7562_v27 = vld [vmem:[%s11243_s1 + $0x428] ss:$16 sps:$4 sm:$0xff]  }
  0x50   :  { %4994 = vmatprep.subr.bf16.mxu0 %v7483_v28  ;;  %5527 = vmatprep.subr.bf16.mxu1 %v7486_v29  ;;  %v7567_v28 = vld [vmem:[%s11243_s1 + $0x444] ss:$16 sps:$4 sm:$0xff]   ;;  %v7570_v29 = vld [vmem:[%s11243_s1 + $0x44c] ss:$16 sps:$4 sm:$0xff]   ;;  %v7640_v20 = vld [vmem:[%s11243_s1 + $0x5c8] ss:$16 sps:$4 sm:$0xff]  }
  0x53   :  { %4995 = vmatpush1.bf16.msra.mxu0 %v7481_v30  ;;  %5528 = vmatpush1.bf16.msra.mxu1 %v7484_v31  ;;  %v7565_v30 = vld [vmem:[%s11243_s1 + $0x440] ss:$16 sps:$4 sm:$0xff]   ;;  %v7568_v31 = vld [vmem:[%s11243_s1 + $0x448] ss:$16 sps:$4 sm:$0xff]  }
  0x54   :  { %4996 = vmatprep.subr.bf16.mxu0 %v7489_v32  ;;  %5529 = vmatprep.subr.bf16.mxu1 %v7492_v33  ;;  %v7573_v32 = vld [vmem:[%s11243_s1 + $0x464] ss:$16 sps:$4 sm:$0xff]   ;;  %v7576_v33 = vld [vmem:[%s11243_s1 + $0x46c] ss:$16 sps:$4 sm:$0xff]  }
  0x57   :  { %4997 = vmatpush1.bf16.msra.mxu0 %v7487_v34  ;;  %5530 = vmatpush1.bf16.msra.mxu1 %v7490_v35  ;;  %v7571_v34 = vld [vmem:[%s11243_s1 + $0x460] ss:$16 sps:$4 sm:$0xff]   ;;  %v7574_v35 = vld [vmem:[%s11243_s1 + $0x468] ss:$16 sps:$4 sm:$0xff]  }
  0x58   :  { %4998 = vmatprep.subr.bf16.mxu0 %v7495_v37  ;;  %5531 = vmatprep.subr.bf16.mxu1 %v7498_v38  ;;  %v7579_v37 = vld [vmem:[%s11243_s1 + $0x484] ss:$16 sps:$4 sm:$0xff]   ;;  %v7582_v38 = vld [vmem:[%s11243_s1 + $0x48c] ss:$16 sps:$4 sm:$0xff]  }
  0x5b   :  { %4999 = vmatpush1.bf16.msra.mxu0 %v7493_v39  ;;  %5532 = vmatpush1.bf16.msra.mxu1 %v7496_v40  ;;  %v7577_v39 = vld [vmem:[%s11243_s1 + $0x480] ss:$16 sps:$4 sm:$0xff]   ;;  %v7580_v40 = vld [vmem:[%s11243_s1 + $0x488] ss:$16 sps:$4 sm:$0xff]  }
  0x5c   :  { %5000 = vmatprep.subr.bf16.mxu0 %v7501_v41  ;;  %5533 = vmatprep.subr.bf16.mxu1 %v7504_v43  ;;  %v7585_v41 = vld [vmem:[%s11243_s1 + $0x4a4] ss:$16 sps:$4 sm:$0xff]   ;;  %v7588_v43 = vld [vmem:[%s11243_s1 + $0x4ac] ss:$16 sps:$4 sm:$0xff]  }
  0x5f   :  { %5001 = vmatpush1.bf16.msra.mxu0 %v7499_v44  ;;  %5534 = vmatpush1.bf16.msra.mxu1 %v7502_v45  ;;  %v7583_v44 = vld [vmem:[%s11243_s1 + $0x4a0] ss:$16 sps:$4 sm:$0xff]   ;;  %v7586_v45 = vld [vmem:[%s11243_s1 + $0x4a8] ss:$16 sps:$4 sm:$0xff]  }
  0x60   :  { %5002 = vmatprep.subr.bf16.mxu0 %v7507_v46  ;;  %5535 = vmatprep.subr.bf16.mxu1 %v7510_v47  ;;  %v7591_v46 = vld [vmem:[%s11243_s1 + $0x4c4] ss:$16 sps:$4 sm:$0xff]   ;;  %v7594_v47 = vld [vmem:[%s11243_s1 + $0x4cc] ss:$16 sps:$4 sm:$0xff]  }
  0x63   :  { %5003 = vmatpush1.bf16.msra.mxu0 %v7505_v48  ;;  %5536 = vmatpush1.bf16.msra.mxu1 %v7508_v50  ;;  %v7589_v48 = vld [vmem:[%s11243_s1 + $0x4c0] ss:$16 sps:$4 sm:$0xff]   ;;  %v7592_v50 = vld [vmem:[%s11243_s1 + $0x4c8] ss:$16 sps:$4 sm:$0xff]  }
  0x64   :  { %5004 = vmatprep.subr.bf16.mxu0 %v7513_v51  ;;  %5537 = vmatprep.subr.bf16.mxu1 %v7516_v53  ;;  %v7597_v51 = vld [vmem:[%s11243_s1 + $0x4e4] ss:$16 sps:$4 sm:$0xff]   ;;  %v7600_v53 = vld [vmem:[%s11243_s1 + $0x4ec] ss:$16 sps:$4 sm:$0xff]  }
  0x67   :  { %5005 = vmatpush1.bf16.msra.mxu0 %v7511_v54  ;;  %5538 = vmatpush1.bf16.msra.mxu1 %v7514_v55  ;;  %v7595_v54 = vld [vmem:[%s11243_s1 + $0x4e0] ss:$16 sps:$4 sm:$0xff]   ;;  %v7598_v55 = vld [vmem:[%s11243_s1 + $0x4e8] ss:$16 sps:$4 sm:$0xff]  }
  0x68   :  { %5006 = vmatprep.subr.bf16.mxu0 %v7519_v56  ;;  %5539 = vmatprep.subr.bf16.mxu1 %v7522_v57  ;;  %v7603_v56 = vld [vmem:[%s11243_s1 + $0x504] ss:$16 sps:$4 sm:$0xff]   ;;  %v7606_v57 = vld [vmem:[%s11243_s1 + $0x50c] ss:$16 sps:$4 sm:$0xff]  }
  0x6b   :  { %5007 = vmatpush1.bf16.msra.mxu0 %v7517_v58  ;;  %5540 = vmatpush1.bf16.msra.mxu1 %v7520_v59  ;;  %v7601_v58 = vld [vmem:[%s11243_s1 + $0x500] ss:$16 sps:$4 sm:$0xff]   ;;  %v7604_v59 = vld [vmem:[%s11243_s1 + $0x508] ss:$16 sps:$4 sm:$0xff]  }
  0x6c   :  { %5008 = vmatprep.subr.bf16.mxu0 %v7525_v60  ;;  %5541 = vmatprep.subr.bf16.mxu1 %v7528_v61  ;;  %v7609_v60 = vld [vmem:[%s11243_s1 + $0x524] ss:$16 sps:$4 sm:$0xff]   ;;  %v7612_v61 = vld [vmem:[%s11243_s1 + $0x52c] ss:$16 sps:$4 sm:$0xff]  }
  0x6f   :  { %5009 = vmatpush1.bf16.msra.mxu0 %v7523_v62  ;;  %5542 = vmatpush1.bf16.msra.mxu1 %v7526_v63  ;;  %v7607_v62 = vld [vmem:[%s11243_s1 + $0x520] ss:$16 sps:$4 sm:$0xff]   ;;  %v7610_v63 = vld [vmem:[%s11243_s1 + $0x528] ss:$16 sps:$4 sm:$0xff]  }
  0x70   :  { %5010 = vmatprep.subr.bf16.mxu0 %v7531_v0  ;;  %5543 = vmatprep.subr.bf16.mxu1 %v7534_v1  ;;  %v7615_v0 = vld [vmem:[%s11243_s1 + $0x544] ss:$16 sps:$4 sm:$0xff]   ;;  %v7618_v1 = vld [vmem:[%s11243_s1 + $0x54c] ss:$16 sps:$4 sm:$0xff]  }
  0x73   :  { %5011 = vmatpush1.bf16.msra.mxu0 %v7529_v2  ;;  %5544 = vmatpush1.bf16.msra.mxu1 %v7532_v3  ;;  %v7613_v2 = vld [vmem:[%s11243_s1 + $0x540] ss:$16 sps:$4 sm:$0xff]   ;;  %v7616_v3 = vld [vmem:[%s11243_s1 + $0x548] ss:$16 sps:$4 sm:$0xff]  }
  0x74   :  { %5012 = vmatprep.subr.bf16.mxu0 %v7537_v4  ;;  %5545 = vmatprep.subr.bf16.mxu1 %v7540_v5  ;;  %v7621_v4 = vld [vmem:[%s11243_s1 + $0x564] ss:$16 sps:$4 sm:$0xff]   ;;  %v7624_v5 = vld [vmem:[%s11243_s1 + $0x56c] ss:$16 sps:$4 sm:$0xff]  }
  0x77   :  { %5013 = vmatpush1.bf16.msra.mxu0 %v7535_v6  ;;  %5546 = vmatpush1.bf16.msra.mxu1 %v7538_v7  ;;  %v7619_v6 = vld [vmem:[%s11243_s1 + $0x560] ss:$16 sps:$4 sm:$0xff]   ;;  %v7622_v7 = vld [vmem:[%s11243_s1 + $0x568] ss:$16 sps:$4 sm:$0xff]  }
  0x78   :  { %5014 = vmatprep.subr.bf16.mxu0 %v7543_v8  ;;  %5547 = vmatprep.subr.bf16.mxu1 %v7546_v9  ;;  %v7627_v8 = vld [vmem:[%s11243_s1 + $0x584] ss:$16 sps:$4 sm:$0xff]   ;;  %v7630_v9 = vld [vmem:[%s11243_s1 + $0x58c] ss:$16 sps:$4 sm:$0xff]  }
  0x7b   :  { %5015 = vmatpush1.bf16.msra.mxu0 %v7541_v11  ;;  %5548 = vmatpush1.bf16.msra.mxu1 %v7544_v12  ;;  %v7628_v11 = vld [vmem:[%s11243_s1 + $0x588] ss:$16 sps:$4 sm:$0xff]   ;;  %v7633_v12 = vld [vmem:[%s11243_s1 + $0x5a4] ss:$16 sps:$4 sm:$0xff]  }
  0x7c   :  { %5016 = vmatprep.subr.bf16.mxu0 %v7549_v14  ;;  %5549 = vmatprep.subr.bf16.mxu1 %v7552_v52  ;;  %v7636_v14 = vld [vmem:[%s11243_s1 + $0x5ac] ss:$16 sps:$4 sm:$0xff]   ;;  %v7631_v52 = vld [vmem:[%s11243_s1 + $0x5a0] ss:$16 sps:$4 sm:$0xff]  }
  0x7f   :  { %5017 = vmatpush1.bf16.msra.mxu0 %v7547_v16  ;;  %5550 = vmatpush1.bf16.msra.mxu1 %v7550_v17  ;;  %v7634_v16 = vld [vmem:[%s11243_s1 + $0x5a8] ss:$16 sps:$4 sm:$0xff]   ;;  %v7639_v17 = vld [vmem:[%s11243_s1 + $0x5c4] ss:$16 sps:$4 sm:$0xff]  }
  0x80   :  { %5027 = vmatprep.subr.bf16.mxu0 %v7555_v18  ;;  %5560 = vmatprep.subr.bf16.mxu1 %v7558_v19  ;;  %v7642_v18 = vld [vmem:[%s11243_s1 + $0x5cc] ss:$16 sps:$4 sm:$0xff]   ;;  %v7637_v19 = vld [vmem:[%s11243_s1 + $0x5c0] ss:$16 sps:$4 sm:$0xff]  }
  0x82   :  { %5019 = vmatmul.mubr.bf16.vlgmr.msra.gmra.mrb[0].mxu0 %v881_v22  ;;  %5552 = vmatmul.mubr.bf16.vlgmr.msra.gmra.mrb[0].mxu1 %v881_v22  ;;  %v7648_v22 = vld [vmem:[%s11243_s1 + $0x5ec] ss:$16 sps:$4 sm:$0xff]  }
  0x83   :  { %5028 = vmatpush1.bf16.msra.mxu0 %v7553_v21  ;;  %5561 = vmatpush1.bf16.msra.mxu1 %v7556_v23  ;;  %v7645_v21 = vld [vmem:[%s11243_s1 + $0x5e4] ss:$16 sps:$4 sm:$0xff]   ;;  %v7643_v23 = vld [vmem:[%s11243_s1 + $0x5e0] ss:$16 sps:$4 sm:$0xff]  }
  0x84   :  { %5029 = vmatprep.subr.bf16.mxu0 %v7561_v24  ;;  %5562 = vmatprep.subr.bf16.mxu1 %v7564_v25  ;;  %v7646_v24 = vld [vmem:[%s11243_s1 + $0x5e8] ss:$16 sps:$4 sm:$0xff]   ;;  %v7652_v25 = vld [vmem:[%s11243_s1 + $0x604] ss:$16 sps:$4 sm:$0xff]  }
  0x85   :  { %5059 = vmatprep.mubr.bf16.mxu0 %v9062_v26  ;;  %5592 = vmatprep.mubr.bf16.mxu1 %v9062_v26 }
  0x87   :  { %5030 = vmatpush1.bf16.msra.mxu0 %v7559_v13  ;;  %5563 = vmatpush1.bf16.msra.mxu1 %v7562_v27  ;;  %v7655_v13 = vld [vmem:[%s11243_s1 + $0x60c] ss:$16 sps:$4 sm:$0xff]   ;;  %v7650_v27 = vld [vmem:[%s11243_s1 + $0x600] ss:$16 sps:$4 sm:$0xff]  }
  0x88   :  { %5031 = vmatprep.subr.bf16.mxu0 %v7567_v28  ;;  %5564 = vmatprep.subr.bf16.mxu1 %v7570_v29  ;;  %v9251_v28 = vrot.slane %v9031_v15, %v8767_v49  ;;  %v7653_v29 = vld [vmem:[%s11243_s1 + $0x608] ss:$16 sps:$4 sm:$0xff]   ;;  %v884_v15 = vcombine.high %v9062_v26, %v9062_v26  ;;  %v7664_v26 = vld [vmem:[%s11243_s1 + $0x644] ss:$16 sps:$4 sm:$0xff]  }
  0x8b   :  { %5032 = vmatpush1.bf16.msra.mxu0 %v7565_v30  ;;  %5565 = vmatpush1.bf16.msra.mxu1 %v7568_v31  ;;  %v7658_v30 = vld [vmem:[%s11243_s1 + $0x624] ss:$16 sps:$4 sm:$0xff]   ;;  %v7661_v31 = vld [vmem:[%s11243_s1 + $0x62c] ss:$16 sps:$4 sm:$0xff]  }
  0x8c   :  { %5033 = vmatprep.subr.bf16.mxu0 %v7573_v32  ;;  %5566 = vmatprep.subr.bf16.mxu1 %v7576_v33  ;;  %v7656_v32 = vld [vmem:[%s11243_s1 + $0x620] ss:$16 sps:$4 sm:$0xff]   ;;  %v7659_v33 = vld [vmem:[%s11243_s1 + $0x628] ss:$16 sps:$4 sm:$0xff]  }
  0x8f   :  { %5034 = vmatpush1.bf16.msra.mxu0 %v7571_v34  ;;  %5567 = vmatpush1.bf16.msra.mxu1 %v7574_v35  ;;  %v7667_v34 = vld [vmem:[%s11243_s1 + $0x64c] ss:$16 sps:$4 sm:$0xff]   ;;  %v7662_v35 = vld [vmem:[%s11243_s1 + $0x640] ss:$16 sps:$4 sm:$0xff]  }
  0x90   :  { %5035 = vmatprep.subr.bf16.mxu0 %v7579_v37  ;;  %5568 = vmatprep.subr.bf16.mxu1 %v7582_v38  ;;  %v7665_v37 = vld [vmem:[%s11243_s1 + $0x648] ss:$16 sps:$4 sm:$0xff]   ;;  %v7670_v38 = vld [vmem:[%s11243_s1 + $0x664] ss:$16 sps:$4 sm:$0xff]  }
  0x93   :  { %5036 = vmatpush1.bf16.msra.mxu0 %v7577_v39  ;;  %5569 = vmatpush1.bf16.msra.mxu1 %v7580_v40  ;;  %v7673_v39 = vld [vmem:[%s11243_s1 + $0x66c] ss:$16 sps:$4 sm:$0xff]   ;;  %v7668_v40 = vld [vmem:[%s11243_s1 + $0x660] ss:$16 sps:$4 sm:$0xff]  }
  0x94   :  { %5037 = vmatprep.subr.bf16.mxu0 %v7585_v41  ;;  %5570 = vmatprep.subr.bf16.mxu1 %v7588_v43  ;;  %v7671_v41 = vld [vmem:[%s11243_s1 + $0x668] ss:$16 sps:$4 sm:$0xff]   ;;  %v7676_v43 = vld [vmem:[%s11243_s1 + $0x684] ss:$16 sps:$4 sm:$0xff]  }
  0x97   :  { %5038 = vmatpush1.bf16.msra.mxu0 %v7583_v44  ;;  %5571 = vmatpush1.bf16.msra.mxu1 %v7586_v45  ;;  %v7679_v44 = vld [vmem:[%s11243_s1 + $0x68c] ss:$16 sps:$4 sm:$0xff]   ;;  %v7674_v45 = vld [vmem:[%s11243_s1 + $0x680] ss:$16 sps:$4 sm:$0xff]  }
  0x98   :  { %5039 = vmatprep.subr.bf16.mxu0 %v7591_v46  ;;  %5572 = vmatprep.subr.bf16.mxu1 %v7594_v47  ;;  %v7677_v46 = vld [vmem:[%s11243_s1 + $0x688] ss:$16 sps:$4 sm:$0xff]   ;;  %v7682_v47 = vld [vmem:[%s11243_s1 + $0x6a4] ss:$16 sps:$4 sm:$0xff]  }
  0x9b   :  { %5040 = vmatpush1.bf16.msra.mxu0 %v7589_v48  ;;  %5573 = vmatpush1.bf16.msra.mxu1 %v7592_v50  ;;  %v7685_v48 = vld [vmem:[%s11243_s1 + $0x6ac] ss:$16 sps:$4 sm:$0xff]   ;;  %v7680_v50 = vld [vmem:[%s11243_s1 + $0x6a0] ss:$16 sps:$4 sm:$0xff]  }
  0x9c   :  { %5041 = vmatprep.subr.bf16.mxu0 %v7597_v51  ;;  %5574 = vmatprep.subr.bf16.mxu1 %v7600_v53  ;;  %v7683_v51 = vld [vmem:[%s11243_s1 + $0x6a8] ss:$16 sps:$4 sm:$0xff]   ;;  %v7688_v53 = vld [vmem:[%s11243_s1 + $0x6c4] ss:$16 sps:$4 sm:$0xff]  }
  0x9f   :  { %5042 = vmatpush1.bf16.msra.mxu0 %v7595_v54  ;;  %5575 = vmatpush1.bf16.msra.mxu1 %v7598_v55  ;;  %v7691_v54 = vld [vmem:[%s11243_s1 + $0x6cc] ss:$16 sps:$4 sm:$0xff]   ;;  %v7686_v55 = vld [vmem:[%s11243_s1 + $0x6c0] ss:$16 sps:$4 sm:$0xff]  }
  0xa0   :  { %5043 = vmatprep.subr.bf16.mxu0 %v7603_v56  ;;  %5576 = vmatprep.subr.bf16.mxu1 %v7606_v57  ;;  %v7689_v56 = vld [vmem:[%s11243_s1 + $0x6c8] ss:$16 sps:$4 sm:$0xff]   ;;  %v7694_v57 = vld [vmem:[%s11243_s1 + $0x6e4] ss:$16 sps:$4 sm:$0xff]  }
  0xa3   :  { %5044 = vmatpush1.bf16.msra.mxu0 %v7601_v58  ;;  %5577 = vmatpush1.bf16.msra.mxu1 %v7604_v59  ;;  %v7697_v58 = vld [vmem:[%s11243_s1 + $0x6ec] ss:$16 sps:$4 sm:$0xff]   ;;  %v7692_v59 = vld [vmem:[%s11243_s1 + $0x6e0] ss:$16 sps:$4 sm:$0xff]  }
  0xa4   :  { %5045 = vmatprep.subr.bf16.mxu0 %v7609_v60  ;;  %5578 = vmatprep.subr.bf16.mxu1 %v7612_v61  ;;  %v7695_v60 = vld [vmem:[%s11243_s1 + $0x6e8] ss:$16 sps:$4 sm:$0xff]   ;;  %v7700_v61 = vld [vmem:[%s11243_s1 + $0x704] ss:$16 sps:$4 sm:$0xff]  }
  0xa7   :  { %5046 = vmatpush1.bf16.msra.mxu0 %v7607_v62  ;;  %5579 = vmatpush1.bf16.msra.mxu1 %v7610_v63  ;;  %v7703_v62 = vld [vmem:[%s11243_s1 + $0x70c] ss:$16 sps:$4 sm:$0xff]   ;;  %v7698_v63 = vld [vmem:[%s11243_s1 + $0x700] ss:$16 sps:$4 sm:$0xff]  }
  0xa8   :  { %5047 = vmatprep.subr.bf16.mxu0 %v7615_v0  ;;  %5580 = vmatprep.subr.bf16.mxu1 %v7618_v1  ;;  %v7701_v0 = vld [vmem:[%s11243_s1 + $0x708] ss:$16 sps:$4 sm:$0xff]   ;;  %v7706_v1 = vld [vmem:[%s11243_s1 + $0x724] ss:$16 sps:$4 sm:$0xff]  }
  0xab   :  { %5048 = vmatpush1.bf16.msra.mxu0 %v7613_v2  ;;  %5581 = vmatpush1.bf16.msra.mxu1 %v7616_v3  ;;  %v7709_v2 = vld [vmem:[%s11243_s1 + $0x72c] ss:$16 sps:$4 sm:$0xff]   ;;  %v7704_v3 = vld [vmem:[%s11243_s1 + $0x720] ss:$16 sps:$4 sm:$0xff]  }
  0xac   :  { %5049 = vmatprep.subr.bf16.mxu0 %v7621_v4  ;;  %5582 = vmatprep.subr.bf16.mxu1 %v7624_v5  ;;  %v7707_v4 = vld [vmem:[%s11243_s1 + $0x728] ss:$16 sps:$4 sm:$0xff]   ;;  %v7712_v5 = vld [vmem:[%s11243_s1 + $0x744] ss:$16 sps:$4 sm:$0xff]  }
  0xaf   :  { %5050 = vmatpush1.bf16.msra.mxu0 %v7619_v6  ;;  %5583 = vmatpush1.bf16.msra.mxu1 %v7622_v7  ;;  %v7715_v6 = vld [vmem:[%s11243_s1 + $0x74c] ss:$16 sps:$4 sm:$0xff]   ;;  %v7710_v7 = vld [vmem:[%s11243_s1 + $0x740] ss:$16 sps:$4 sm:$0xff]  }
  0xb0   :  { %5051 = vmatprep.subr.bf16.mxu0 %v7627_v8  ;;  %5584 = vmatprep.subr.bf16.mxu1 %v7630_v9  ;;  %v7713_v8 = vld [vmem:[%s11243_s1 + $0x748] ss:$16 sps:$4 sm:$0xff]   ;;  %v7718_v9 = vld [vmem:[%s11243_s1 + $0x764] ss:$16 sps:$4 sm:$0xff]  }
  0xb3   :  { %5052 = vmatpush1.bf16.msra.mxu0 %v7625_v10  ;;  %5585 = vmatpush1.bf16.msra.mxu1 %v7628_v11  ;;  %v7721_v10 = vld [vmem:[%s11243_s1 + $0x76c] ss:$16 sps:$4 sm:$0xff]   ;;  %v7716_v11 = vld [vmem:[%s11243_s1 + $0x760] ss:$16 sps:$4 sm:$0xff]  }
  0xb4   :  { %5053 = vmatprep.subr.bf16.mxu0 %v7633_v12  ;;  %5586 = vmatprep.subr.bf16.mxu1 %v7636_v14  ;;  %v7719_v12 = vld [vmem:[%s11243_s1 + $0x768] ss:$16 sps:$4 sm:$0xff]   ;;  %v7724_v14 = vld [vmem:[%s11243_s1 + $0x784] ss:$16 sps:$4 sm:$0xff]  }
  0xb7   :  { %5054 = vmatpush1.bf16.msra.mxu0 %v7631_v52  ;;  %5587 = vmatpush1.bf16.msra.mxu1 %v7634_v16  ;;  %v7727_v52 = vld [vmem:[%s11243_s1 + $0x78c] ss:$16 sps:$4 sm:$0xff]   ;;  %v7722_v16 = vld [vmem:[%s11243_s1 + $0x780] ss:$16 sps:$4 sm:$0xff]  }
  0xb8   :  { %5055 = vmatprep.subr.bf16.mxu0 %v7639_v17  ;;  %5588 = vmatprep.subr.bf16.mxu1 %v7642_v18  ;;  %v7725_v17 = vld [vmem:[%s11243_s1 + $0x788] ss:$16 sps:$4 sm:$0xff]   ;;  %v7730_v18 = vld [vmem:[%s11243_s1 + $0x7a4] ss:$16 sps:$4 sm:$0xff]  }
  0xbb   :  { %5056 = vmatpush1.bf16.msra.mxu0 %v7637_v19  ;;  %5589 = vmatpush1.bf16.msra.mxu1 %v7640_v20  ;;  %v7733_v19 = vld [vmem:[%s11243_s1 + $0x7ac] ss:$16 sps:$4 sm:$0xff]   ;;  %v7728_v20 = vld [vmem:[%s11243_s1 + $0x7a0] ss:$16 sps:$4 sm:$0xff]  }
  0xbc   :  { %5057 = vmatprep.subr.bf16.mxu0 %v7645_v21  ;;  %5590 = vmatprep.subr.bf16.mxu1 %v7648_v22  ;;  %v7731_v21 = vld [vmem:[%s11243_s1 + $0x7a8] ss:$16 sps:$4 sm:$0xff]   ;;  %v7736_v22 = vld [vmem:[%s11243_s1 + $0x7c4] ss:$16 sps:$4 sm:$0xff]  }
  0xbf   :  { %5058 = vmatpush1.bf16.msra.mxu0 %v7643_v23  ;;  %5591 = vmatpush1.bf16.msra.mxu1 %v7646_v24  ;;  %v7739_v23 = vld [vmem:[%s11243_s1 + $0x7cc] ss:$16 sps:$4 sm:$0xff]  }
  0xc0   :  { %5068 = vmatprep.subr.bf16.mxu0 %v7652_v25  ;;  %5601 = vmatprep.subr.bf16.mxu1 %v7655_v13  ;;  %v9425_v24 = vld.sshfl [vmem:[%s11242_s0 + $0x8] sm:$0xff pattern:$0x75316420]  ;;  %v7734_v25 = vld [vmem:[%s11243_s1 + $0x7c0] ss:$16 sps:$4 sm:$0xff]  }
  0xc1   :  { %v7737_v13 = vld [vmem:[%s11243_s1 + $0x7c8] ss:$16 sps:$4 sm:$0xff]  }
  0xc2   :  { %5060 = vmatmul.mubr.bf16.vlgmr.msra.gmra.mrb[0].mxu0 %v9251_v28  ;;  %5593 = vmatmul.mubr.bf16.vlgmr.msra.gmra.mrb[0].mxu1 %v9251_v28 }
  0xc3   :  { %5069 = vmatpush1.bf16.msra.mxu0 %v7650_v27  ;;  %5602 = vmatpush1.bf16.msra.mxu1 %v7653_v29  ;;  %v7742_v27 = vld [vmem:[%s11243_s1 + $0x7e4] ss:$16 sps:$4 sm:$0xff]   ;;  %v7745_v29 = vld [vmem:[%s11243_s1 + $0x7ec] ss:$16 sps:$4 sm:$0xff]  }
  0xc4   :  { %5070 = vmatprep.subr.bf16.mxu0 %v7658_v30  ;;  %5603 = vmatprep.subr.bf16.mxu1 %v7661_v31  ;;  %v7740_v30 = vld [vmem:[%s11243_s1 + $0x7e0] ss:$16 sps:$4 sm:$0xff]   ;;  %v7743_v31 = vld [vmem:[%s11243_s1 + $0x7e8] ss:$16 sps:$4 sm:$0xff]  }
  0xc5   :  { %5100 = vmatprep.mubr.bf16.mxu0 %v884_v15  ;;  %5633 = vmatprep.mubr.bf16.mxu1 %v884_v15  ;;  %v7748_v15 = vld [vmem:[%s11243_s1 + $0x804] ss:$16 sps:$4 sm:$0xff]  }
  0xc7   :  { %5071 = vmatpush1.bf16.msra.mxu0 %v7656_v32  ;;  %5604 = vmatpush1.bf16.msra.mxu1 %v7659_v33  ;;  %v7751_v32 = vld [vmem:[%s11243_s1 + $0x80c] ss:$16 sps:$4 sm:$0xff]   ;;  %v900_v33 = vcombine.high %v9425_v24, %v9425_v24 }
  0xc8   :  { %5072 = vmatprep.subr.bf16.mxu0 %v7664_v26  ;;  %5605 = vmatprep.subr.bf16.mxu1 %v7667_v34  ;;  %v882_v26 = vcombine.high %v9251_v28, %v9251_v28  ;;  %v7746_v34 = vld [vmem:[%s11243_s1 + $0x800] ss:$16 sps:$4 sm:$0xff]   ;;  %v7757_v28 = vld [vmem:[%s11243_s1 + $0x82c] ss:$16 sps:$4 sm:$0xff]  }
  0xcb   :  { %5073 = vmatpush1.bf16.msra.mxu0 %v7662_v35  ;;  %5606 = vmatpush1.bf16.msra.mxu1 %v7665_v37  ;;  %v7749_v35 = vld [vmem:[%s11243_s1 + $0x808] ss:$16 sps:$4 sm:$0xff]   ;;  %v7754_v37 = vld [vmem:[%s11243_s1 + $0x824] ss:$16 sps:$4 sm:$0xff]  }
  0xcc   :  { %5074 = vmatprep.subr.bf16.mxu0 %v7670_v38  ;;  %5607 = vmatprep.subr.bf16.mxu1 %v7673_v39  ;;  %v9468_v38 = vrot.slane %v900_v33, %v8767_v49  ;;  %v7752_v39 = vld [vmem:[%s11243_s1 + $0x820] ss:$16 sps:$4 sm:$0xff]   ;;  %v7833_v33 = vld [vmem:[%s11243_s1 + $0x9c8] ss:$16 sps:$4 sm:$0xff]  }
  0xcf   :  { %5075 = vmatpush1.bf16.msra.mxu0 %v7668_v40  ;;  %5608 = vmatpush1.bf16.msra.mxu1 %v7671_v41  ;;  %v7755_v40 = vld [vmem:[%s11243_s1 + $0x828] ss:$16 sps:$4 sm:$0xff]   ;;  %v7760_v41 = vld [vmem:[%s11243_s1 + $0x844] ss:$16 sps:$4 sm:$0xff]  }
  0xd0   :  { %5076 = vmatprep.subr.bf16.mxu0 %v7676_v43  ;;  %5609 = vmatprep.subr.bf16.mxu1 %v7679_v44  ;;  %v7763_v43 = vld [vmem:[%s11243_s1 + $0x84c] ss:$16 sps:$4 sm:$0xff]   ;;  %v7758_v44 = vld [vmem:[%s11243_s1 + $0x840] ss:$16 sps:$4 sm:$0xff]  }
  0xd3   :  { %5077 = vmatpush1.bf16.msra.mxu0 %v7674_v45  ;;  %5610 = vmatpush1.bf16.msra.mxu1 %v7677_v46  ;;  %v7761_v45 = vld [vmem:[%s11243_s1 + $0x848] ss:$16 sps:$4 sm:$0xff]   ;;  %v7766_v46 = vld [vmem:[%s11243_s1 + $0x864] ss:$16 sps:$4 sm:$0xff]  }
  0xd4   :  { %5078 = vmatprep.subr.bf16.mxu0 %v7682_v47  ;;  %5611 = vmatprep.subr.bf16.mxu1 %v7685_v48  ;;  %v7769_v47 = vld [vmem:[%s11243_s1 + $0x86c] ss:$16 sps:$4 sm:$0xff]   ;;  %v7764_v48 = vld [vmem:[%s11243_s1 + $0x860] ss:$16 sps:$4 sm:$0xff]  }
  0xd7   :  { %5079 = vmatpush1.bf16.msra.mxu0 %v7680_v50  ;;  %5612 = vmatpush1.bf16.msra.mxu1 %v7683_v51  ;;  %v7767_v50 = vld [vmem:[%s11243_s1 + $0x868] ss:$16 sps:$4 sm:$0xff]   ;;  %v7772_v51 = vld [vmem:[%s11243_s1 + $0x884] ss:$16 sps:$4 sm:$0xff]  }
  0xd8   :  { %5080 = vmatprep.subr.bf16.mxu0 %v7688_v53  ;;  %5613 = vmatprep.subr.bf16.mxu1 %v7691_v54  ;;  %v7775_v53 = vld [vmem:[%s11243_s1 + $0x88c] ss:$16 sps:$4 sm:$0xff]   ;;  %v7770_v54 = vld [vmem:[%s11243_s1 + $0x880] ss:$16 sps:$4 sm:$0xff]  }
  0xdb   :  { %5081 = vmatpush1.bf16.msra.mxu0 %v7686_v55  ;;  %5614 = vmatpush1.bf16.msra.mxu1 %v7689_v56  ;;  %v7773_v55 = vld [vmem:[%s11243_s1 + $0x888] ss:$16 sps:$4 sm:$0xff]   ;;  %v7778_v56 = vld [vmem:[%s11243_s1 + $0x8a4] ss:$16 sps:$4 sm:$0xff]  }
  0xdc   :  { %5082 = vmatprep.subr.bf16.mxu0 %v7694_v57  ;;  %5615 = vmatprep.subr.bf16.mxu1 %v7697_v58  ;;  %v7781_v57 = vld [vmem:[%s11243_s1 + $0x8ac] ss:$16 sps:$4 sm:$0xff]   ;;  %v7776_v58 = vld [vmem:[%s11243_s1 + $0x8a0] ss:$16 sps:$4 sm:$0xff]  }
  0xdf   :  { %5083 = vmatpush1.bf16.msra.mxu0 %v7692_v59  ;;  %5616 = vmatpush1.bf16.msra.mxu1 %v7695_v60  ;;  %v7779_v59 = vld [vmem:[%s11243_s1 + $0x8a8] ss:$16 sps:$4 sm:$0xff]   ;;  %v7784_v60 = vld [vmem:[%s11243_s1 + $0x8c4] ss:$16 sps:$4 sm:$0xff]  }
  0xe0   :  { %5084 = vmatprep.subr.bf16.mxu0 %v7700_v61  ;;  %5617 = vmatprep.subr.bf16.mxu1 %v7703_v62  ;;  %v7787_v61 = vld [vmem:[%s11243_s1 + $0x8cc] ss:$16 sps:$4 sm:$0xff]   ;;  %v7782_v62 = vld [vmem:[%s11243_s1 + $0x8c0] ss:$16 sps:$4 sm:$0xff]  }
  0xe3   :  { %5085 = vmatpush1.bf16.msra.mxu0 %v7698_v63  ;;  %5618 = vmatpush1.bf16.msra.mxu1 %v7701_v0  ;;  %v7785_v63 = vld [vmem:[%s11243_s1 + $0x8c8] ss:$16 sps:$4 sm:$0xff]   ;;  %v7790_v0 = vld [vmem:[%s11243_s1 + $0x8e4] ss:$16 sps:$4 sm:$0xff]  }
  0xe4   :  { %5086 = vmatprep.subr.bf16.mxu0 %v7706_v1  ;;  %5619 = vmatprep.subr.bf16.mxu1 %v7709_v2  ;;  %v7793_v1 = vld [vmem:[%s11243_s1 + $0x8ec] ss:$16 sps:$4 sm:$0xff]   ;;  %v7788_v2 = vld [vmem:[%s11243_s1 + $0x8e0] ss:$16 sps:$4 sm:$0xff]  }
  0xe7   :  { %5087 = vmatpush1.bf16.msra.mxu0 %v7704_v3  ;;  %5620 = vmatpush1.bf16.msra.mxu1 %v7707_v4  ;;  %v7791_v3 = vld [vmem:[%s11243_s1 + $0x8e8] ss:$16 sps:$4 sm:$0xff]   ;;  %v7796_v4 = vld [vmem:[%s11243_s1 + $0x904] ss:$16 sps:$4 sm:$0xff]  }
  0xe8   :  { %5088 = vmatprep.subr.bf16.mxu0 %v7712_v5  ;;  %5621 = vmatprep.subr.bf16.mxu1 %v7715_v6  ;;  %v7799_v5 = vld [vmem:[%s11243_s1 + $0x90c] ss:$16 sps:$4 sm:$0xff]   ;;  %v7794_v6 = vld [vmem:[%s11243_s1 + $0x900] ss:$16 sps:$4 sm:$0xff]  }
  0xeb   :  { %5089 = vmatpush1.bf16.msra.mxu0 %v7710_v7  ;;  %5622 = vmatpush1.bf16.msra.mxu1 %v7713_v8  ;;  %v7797_v7 = vld [vmem:[%s11243_s1 + $0x908] ss:$16 sps:$4 sm:$0xff]   ;;  %v7802_v8 = vld [vmem:[%s11243_s1 + $0x924] ss:$16 sps:$4 sm:$0xff]  }
  0xec   :  { %5090 = vmatprep.subr.bf16.mxu0 %v7718_v9  ;;  %5623 = vmatprep.subr.bf16.mxu1 %v7721_v10  ;;  %v7805_v9 = vld [vmem:[%s11243_s1 + $0x92c] ss:$16 sps:$4 sm:$0xff]   ;;  %v7800_v10 = vld [vmem:[%s11243_s1 + $0x920] ss:$16 sps:$4 sm:$0xff]  }
  0xef   :  { %5091 = vmatpush1.bf16.msra.mxu0 %v7716_v11  ;;  %5624 = vmatpush1.bf16.msra.mxu1 %v7719_v12  ;;  %v7803_v11 = vld [vmem:[%s11243_s1 + $0x928] ss:$16 sps:$4 sm:$0xff]   ;;  %v7808_v12 = vld [vmem:[%s11243_s1 + $0x944] ss:$16 sps:$4 sm:$0xff]  }
  0xf0   :  { %5092 = vmatprep.subr.bf16.mxu0 %v7724_v14  ;;  %5625 = vmatprep.subr.bf16.mxu1 %v7727_v52  ;;  %v7811_v14 = vld [vmem:[%s11243_s1 + $0x94c] ss:$16 sps:$4 sm:$0xff]   ;;  %v7806_v52 = vld [vmem:[%s11243_s1 + $0x940] ss:$16 sps:$4 sm:$0xff]  }
  0xf3   :  { %5093 = vmatpush1.bf16.msra.mxu0 %v7722_v16  ;;  %5626 = vmatpush1.bf16.msra.mxu1 %v7725_v17  ;;  %v7809_v16 = vld [vmem:[%s11243_s1 + $0x948] ss:$16 sps:$4 sm:$0xff]   ;;  %v7814_v17 = vld [vmem:[%s11243_s1 + $0x964] ss:$16 sps:$4 sm:$0xff]  }
  0xf4   :  { %5094 = vmatprep.subr.bf16.mxu0 %v7730_v18  ;;  %5627 = vmatprep.subr.bf16.mxu1 %v7733_v19  ;;  %v7817_v18 = vld [vmem:[%s11243_s1 + $0x96c] ss:$16 sps:$4 sm:$0xff]   ;;  %v7812_v19 = vld [vmem:[%s11243_s1 + $0x960] ss:$16 sps:$4 sm:$0xff]  }
  0xf7   :  { %5095 = vmatpush1.bf16.msra.mxu0 %v7728_v20  ;;  %5628 = vmatpush1.bf16.msra.mxu1 %v7731_v21  ;;  %v7815_v20 = vld [vmem:[%s11243_s1 + $0x968] ss:$16 sps:$4 sm:$0xff]   ;;  %v7820_v21 = vld [vmem:[%s11243_s1 + $0x984] ss:$16 sps:$4 sm:$0xff]  }
  0xf8   :  { %5096 = vmatprep.subr.bf16.mxu0 %v7736_v22  ;;  %5629 = vmatprep.subr.bf16.mxu1 %v7739_v23  ;;  %v7823_v22 = vld [vmem:[%s11243_s1 + $0x98c] ss:$16 sps:$4 sm:$0xff]   ;;  %v7818_v23 = vld [vmem:[%s11243_s1 + $0x980] ss:$16 sps:$4 sm:$0xff]  }
  0xfb   :  { %5097 = vmatpush1.bf16.msra.mxu0 %v7734_v25  ;;  %5630 = vmatpush1.bf16.msra.mxu1 %v7737_v13  ;;  %v7821_v25 = vld [vmem:[%s11243_s1 + $0x988] ss:$16 sps:$4 sm:$0xff]   ;;  %v7826_v13 = vld [vmem:[%s11243_s1 + $0x9a4] ss:$16 sps:$4 sm:$0xff]  }
  0xfc   :  { %5098 = vmatprep.subr.bf16.mxu0 %v7742_v27  ;;  %5631 = vmatprep.subr.bf16.mxu1 %v7745_v29  ;;  %v7829_v27 = vld [vmem:[%s11243_s1 + $0x9ac] ss:$16 sps:$4 sm:$0xff]   ;;  %v7824_v29 = vld [vmem:[%s11243_s1 + $0x9a0] ss:$16 sps:$4 sm:$0xff]  }
  0xff   :  { %5099 = vmatpush1.bf16.msra.mxu0 %v7740_v30  ;;  %5632 = vmatpush1.bf16.msra.mxu1 %v7743_v31  ;;  %v7827_v30 = vld [vmem:[%s11243_s1 + $0x9a8] ss:$16 sps:$4 sm:$0xff]   ;;  %v7832_v31 = vld [vmem:[%s11243_s1 + $0x9c4] ss:$16 sps:$4 sm:$0xff]  }
 0x100   :  { %5109 = vmatprep.subr.bf16.mxu0 %v7748_v15  ;;  %5642 = vmatprep.subr.bf16.mxu1 %v7751_v32  ;;  %v7835_v15 = vld [vmem:[%s11243_s1 + $0x9cc] ss:$16 sps:$4 sm:$0xff]   ;;  %v7830_v32 = vld [vmem:[%s11243_s1 + $0x9c0] ss:$16 sps:$4 sm:$0xff]  }
 0x102   :  { %5101 = vmatmul.mubr.bf16.vlgmr.msra.gmra.mrb[0].mxu0 %v882_v26  ;;  %5634 = vmatmul.mubr.bf16.vlgmr.msra.gmra.mrb[0].mxu1 %v882_v26  ;;  %v7838_v26 = vld [vmem:[%s11243_s1 + $0x9e4] ss:$16 sps:$4 sm:$0xff]  }
 0x103   :  { %5110 = vmatpush1.bf16.msra.mxu0 %v7746_v34  ;;  %5643 = vmatpush1.bf16.msra.mxu1 %v7749_v35  ;;  %v7841_v34 = vld [vmem:[%s11243_s1 + $0x9ec] ss:$16 sps:$4 sm:$0xff]   ;;  %v7836_v35 = vld [vmem:[%s11243_s1 + $0x9e0] ss:$16 sps:$4 sm:$0xff]  }
 0x104   :  { %5111 = vmatprep.subr.bf16.mxu0 %v7754_v37  ;;  %5644 = vmatprep.subr.bf16.mxu1 %v7757_v28  ;;  %v7839_v37 = vld [vmem:[%s11243_s1 + $0x9e8] ss:$16 sps:$4 sm:$0xff]   ;;  %v7844_v28 = vld [vmem:[%s11243_s1 + $0xa04] ss:$16 sps:$4 sm:$0xff]  }
 0x105   :  { %5141 = vmatprep.mubr.bf16.mxu0 %v9468_v38  ;;  %5674 = vmatprep.mubr.bf16.mxu1 %v9468_v38 }
 0x107   :  { %5112 = vmatpush1.bf16.msra.mxu0 %v7752_v39  ;;  %5645 = vmatpush1.bf16.msra.mxu1 %v7755_v40  ;;  %v7847_v39 = vld [vmem:[%s11243_s1 + $0xa0c] ss:$16 sps:$4 sm:$0xff]   ;;  %v9654_v40 = vrot.slane %v9425_v24, %v8767_v49 }
 0x108   :  { %5113 = vmatprep.subr.bf16.mxu0 %v7760_v41  ;;  %5646 = vmatprep.subr.bf16.mxu1 %v7763_v43  ;;  %v7842_v41 = vld [vmem:[%s11243_s1 + $0xa00] ss:$16 sps:$4 sm:$0xff]   ;;  %v7845_v43 = vld [vmem:[%s11243_s1 + $0xa08] ss:$16 sps:$4 sm:$0xff]   ;;  %v7853_v24 = vld [vmem:[%s11243_s1 + $0xa2c] ss:$16 sps:$4 sm:$0xff]  }
 0x10b   :  { %5114 = vmatpush1.bf16.msra.mxu0 %v7758_v44  ;;  %5647 = vmatpush1.bf16.msra.mxu1 %v7761_v45  ;;  %v7850_v44 = vld [vmem:[%s11243_s1 + $0xa24] ss:$16 sps:$4 sm:$0xff]   ;;  %v932_v45 = vcombine.high %v9468_v38, %v9468_v38 }
 0x10c   :  { %5115 = vmatprep.subr.bf16.mxu0 %v7766_v46  ;;  %5648 = vmatprep.subr.bf16.mxu1 %v7769_v47  ;;  %v7848_v46 = vld [vmem:[%s11243_s1 + $0xa20] ss:$16 sps:$4 sm:$0xff]   ;;  %v7851_v47 = vld [vmem:[%s11243_s1 + $0xa28] ss:$16 sps:$4 sm:$0xff]   ;;  %v7856_v38 = vld [vmem:[%s11243_s1 + $0xa44] ss:$16 sps:$4 sm:$0xff]  }
 0x10f   :  { %5116 = vmatpush1.bf16.msra.mxu0 %v7764_v48  ;;  %5649 = vmatpush1.bf16.msra.mxu1 %v7767_v50  ;;  %v7859_v48 = vld [vmem:[%s11243_s1 + $0xa4c] ss:$16 sps:$4 sm:$0xff]   ;;  %v7854_v50 = vld [vmem:[%s11243_s1 + $0xa40] ss:$16 sps:$4 sm:$0xff]  }
 0x110   :  { %5117 = vmatprep.subr.bf16.mxu0 %v7772_v51  ;;  %5650 = vmatprep.subr.bf16.mxu1 %v7775_v53  ;;  %v7857_v51 = vld [vmem:[%s11243_s1 + $0xa48] ss:$16 sps:$4 sm:$0xff]   ;;  %v7862_v53 = vld [vmem:[%s11243_s1 + $0xa64] ss:$16 sps:$4 sm:$0xff]  }
 0x113   :  { %5118 = vmatpush1.bf16.msra.mxu0 %v7770_v54  ;;  %5651 = vmatpush1.bf16.msra.mxu1 %v7773_v55  ;;  %v7865_v54 = vld [vmem:[%s11243_s1 + $0xa6c] ss:$16 sps:$4 sm:$0xff]   ;;  %v7860_v55 = vld [vmem:[%s11243_s1 + $0xa60] ss:$16 sps:$4 sm:$0xff]  }
 0x114   :  { %5119 = vmatprep.subr.bf16.mxu0 %v7778_v56  ;;  %5652 = vmatprep.subr.bf16.mxu1 %v7781_v57  ;;  %v7863_v56 = vld [vmem:[%s11243_s1 + $0xa68] ss:$16 sps:$4 sm:$0xff]   ;;  %v7868_v57 = vld [vmem:[%s11243_s1 + $0xa84] ss:$16 sps:$4 sm:$0xff]  }
 0x117   :  { %5120 = vmatpush1.bf16.msra.mxu0 %v7776_v58  ;;  %5653 = vmatpush1.bf16.msra.mxu1 %v7779_v59  ;;  %v7871_v58 = vld [vmem:[%s11243_s1 + $0xa8c] ss:$16 sps:$4 sm:$0xff]   ;;  %v7866_v59 = vld [vmem:[%s11243_s1 + $0xa80] ss:$16 sps:$4 sm:$0xff]  }
 0x118   :  { %5121 = vmatprep.subr.bf16.mxu0 %v7784_v60  ;;  %5654 = vmatprep.subr.bf16.mxu1 %v7787_v61  ;;  %v7869_v60 = vld [vmem:[%s11243_s1 + $0xa88] ss:$16 sps:$4 sm:$0xff]   ;;  %v7874_v61 = vld [vmem:[%s11243_s1 + $0xaa4] ss:$16 sps:$4 sm:$0xff]  }
 0x11b   :  { %5122 = vmatpush1.bf16.msra.mxu0 %v7782_v62  ;;  %5655 = vmatpush1.bf16.msra.mxu1 %v7785_v63  ;;  %v7877_v62 = vld [vmem:[%s11243_s1 + $0xaac] ss:$16 sps:$4 sm:$0xff]   ;;  %v7872_v63 = vld [vmem:[%s11243_s1 + $0xaa0] ss:$16 sps:$4 sm:$0xff]  }
 0x11c   :  { %5123 = vmatprep.subr.bf16.mxu0 %v7790_v0  ;;  %5656 = vmatprep.subr.bf16.mxu1 %v7793_v1  ;;  %v7875_v0 = vld [vmem:[%s11243_s1 + $0xaa8] ss:$16 sps:$4 sm:$0xff]   ;;  %v7880_v1 = vld [vmem:[%s11243_s1 + $0xac4] ss:$16 sps:$4 sm:$0xff]  }
 0x11f   :  { %5124 = vmatpush1.bf16.msra.mxu0 %v7788_v2  ;;  %5657 = vmatpush1.bf16.msra.mxu1 %v7791_v3  ;;  %v7883_v2 = vld [vmem:[%s11243_s1 + $0xacc] ss:$16 sps:$4 sm:$0xff]   ;;  %v7878_v3 = vld [vmem:[%s11243_s1 + $0xac0] ss:$16 sps:$4 sm:$0xff]  }
 0x120   :  { %5125 = vmatprep.subr.bf16.mxu0 %v7796_v4  ;;  %5658 = vmatprep.subr.bf16.mxu1 %v7799_v5  ;;  %v7881_v4 = vld [vmem:[%s11243_s1 + $0xac8] ss:$16 sps:$4 sm:$0xff]   ;;  %v7886_v5 = vld [vmem:[%s11243_s1 + $0xae4] ss:$16 sps:$4 sm:$0xff]  }
 0x123   :  { %5126 = vmatpush1.bf16.msra.mxu0 %v7794_v6  ;;  %5659 = vmatpush1.bf16.msra.mxu1 %v7797_v7  ;;  %v7889_v6 = vld [vmem:[%s11243_s1 + $0xaec] ss:$16 sps:$4 sm:$0xff]   ;;  %v7884_v7 = vld [vmem:[%s11243_s1 + $0xae0] ss:$16 sps:$4 sm:$0xff]  }
 0x124   :  { %5127 = vmatprep.subr.bf16.mxu0 %v7802_v8  ;;  %5660 = vmatprep.subr.bf16.mxu1 %v7805_v9  ;;  %v7887_v8 = vld [vmem:[%s11243_s1 + $0xae8] ss:$16 sps:$4 sm:$0xff]   ;;  %v7892_v9 = vld [vmem:[%s11243_s1 + $0xb04] ss:$16 sps:$4 sm:$0xff]  }
 0x127   :  { %5128 = vmatpush1.bf16.msra.mxu0 %v7800_v10  ;;  %5661 = vmatpush1.bf16.msra.mxu1 %v7803_v11  ;;  %v7895_v10 = vld [vmem:[%s11243_s1 + $0xb0c] ss:$16 sps:$4 sm:$0xff]   ;;  %v7890_v11 = vld [vmem:[%s11243_s1 + $0xb00] ss:$16 sps:$4 sm:$0xff]  }
 0x128   :  { %5129 = vmatprep.subr.bf16.mxu0 %v7808_v12  ;;  %5662 = vmatprep.subr.bf16.mxu1 %v7811_v14  ;;  %v7893_v12 = vld [vmem:[%s11243_s1 + $0xb08] ss:$16 sps:$4 sm:$0xff]   ;;  %v7898_v14 = vld [vmem:[%s11243_s1 + $0xb24] ss:$16 sps:$4 sm:$0xff]  }
 0x12b   :  { %5130 = vmatpush1.bf16.msra.mxu0 %v7806_v52  ;;  %5663 = vmatpush1.bf16.msra.mxu1 %v7809_v16  ;;  %v7901_v52 = vld [vmem:[%s11243_s1 + $0xb2c] ss:$16 sps:$4 sm:$0xff]   ;;  %v7896_v16 = vld [vmem:[%s11243_s1 + $0xb20] ss:$16 sps:$4 sm:$0xff]  }
 0x12c   :  { %5131 = vmatprep.subr.bf16.mxu0 %v7814_v17  ;;  %5664 = vmatprep.subr.bf16.mxu1 %v7817_v18  ;;  %v7899_v17 = vld [vmem:[%s11243_s1 + $0xb28] ss:$16 sps:$4 sm:$0xff]   ;;  %v7904_v18 = vld [vmem:[%s11243_s1 + $0xb44] ss:$16 sps:$4 sm:$0xff]  }
 0x12f   :  { %5132 = vmatpush1.bf16.msra.mxu0 %v7812_v19  ;;  %5665 = vmatpush1.bf16.msra.mxu1 %v7815_v20  ;;  %v7907_v19 = vld [vmem:[%s11243_s1 + $0xb4c] ss:$16 sps:$4 sm:$0xff]   ;;  %v7902_v20 = vld [vmem:[%s11243_s1 + $0xb40] ss:$16 sps:$4 sm:$0xff]  }
 0x130   :  { %5133 = vmatprep.subr.bf16.mxu0 %v7820_v21  ;;  %5666 = vmatprep.subr.bf16.mxu1 %v7823_v22  ;;  %v7905_v21 = vld [vmem:[%s11243_s1 + $0xb48] ss:$16 sps:$4 sm:$0xff]   ;;  %v7910_v22 = vld [vmem:[%s11243_s1 + $0xb64] ss:$16 sps:$4 sm:$0xff]  }
 0x133   :  { %5134 = vmatpush1.bf16.msra.mxu0 %v7818_v23  ;;  %5667 = vmatpush1.bf16.msra.mxu1 %v7821_v25  ;;  %v7913_v23 = vld [vmem:[%s11243_s1 + $0xb6c] ss:$16 sps:$4 sm:$0xff]   ;;  %v7908_v25 = vld [vmem:[%s11243_s1 + $0xb60] ss:$16 sps:$4 sm:$0xff]  }
 0x134   :  { %5135 = vmatprep.subr.bf16.mxu0 %v7826_v13  ;;  %5668 = vmatprep.subr.bf16.mxu1 %v7829_v27  ;;  %v7911_v13 = vld [vmem:[%s11243_s1 + $0xb68] ss:$16 sps:$4 sm:$0xff]   ;;  %v7916_v27 = vld [vmem:[%s11243_s1 + $0xb84] ss:$16 sps:$4 sm:$0xff]  }
 0x137   :  { %5136 = vmatpush1.bf16.msra.mxu0 %v7824_v29  ;;  %5669 = vmatpush1.bf16.msra.mxu1 %v7827_v30  ;;  %v7919_v29 = vld [vmem:[%s11243_s1 + $0xb8c] ss:$16 sps:$4 sm:$0xff]   ;;  %v7914_v30 = vld [vmem:[%s11243_s1 + $0xb80] ss:$16 sps:$4 sm:$0xff]  }
 0x138   :  { %5137 = vmatprep.subr.bf16.mxu0 %v7832_v31  ;;  %5670 = vmatprep.subr.bf16.mxu1 %v7835_v15  ;;  %v7917_v31 = vld [vmem:[%s11243_s1 + $0xb88] ss:$16 sps:$4 sm:$0xff]   ;;  %v7922_v15 = vld [vmem:[%s11243_s1 + $0xba4] ss:$16 sps:$4 sm:$0xff]  }
 0x13b   :  { %5138 = vmatpush1.bf16.msra.mxu0 %v7830_v32  ;;  %5671 = vmatpush1.bf16.msra.mxu1 %v7833_v33  ;;  %v7925_v32 = vld [vmem:[%s11243_s1 + $0xbac] ss:$16 sps:$4 sm:$0xff]   ;;  %v7920_v33 = vld [vmem:[%s11243_s1 + $0xba0] ss:$16 sps:$4 sm:$0xff]  }
 0x13c   :  { %5139 = vmatprep.subr.bf16.mxu0 %v7838_v26  ;;  %5672 = vmatprep.subr.bf16.mxu1 %v7841_v34  ;;  %v7923_v26 = vld [vmem:[%s11243_s1 + $0xba8] ss:$16 sps:$4 sm:$0xff]   ;;  %v7928_v34 = vld [vmem:[%s11243_s1 + $0xbc4] ss:$16 sps:$4 sm:$0xff]  }
 0x13f   :  { %5140 = vmatpush1.bf16.msra.mxu0 %v7836_v35  ;;  %5673 = vmatpush1.bf16.msra.mxu1 %v7839_v37  ;;  %v7931_v35 = vld [vmem:[%s11243_s1 + $0xbcc] ss:$16 sps:$4 sm:$0xff]  }
 0x140   :  { %5150 = vmatprep.subr.bf16.mxu0 %v7844_v28  ;;  %5683 = vmatprep.subr.bf16.mxu1 %v7847_v39  ;;  %v8572_v37 = vld [vmem:[%s11242_s0 + $0x8] sm:$0xff]  ;;  %v7926_v39 = vld [vmem:[%s11243_s1 + $0xbc0] ss:$16 sps:$4 sm:$0xff]  }
 0x141   :  { %v885_v28 = vcombine.high %v8572_v37, %v8572_v37  ;;  %v8015_v37 = vld [vmem:[%s11243_s1 + $0xd8c] ss:$16 sps:$4 sm:$0xff]  }
 0x142   :  { %5142 = vmatmul.mubr.bf16.vlgmr.msra.gmra.mrb[0].mxu0 %v9654_v40  ;;  %5675 = vmatmul.mubr.bf16.vlgmr.msra.gmra.mrb[0].mxu1 %v9654_v40 }
 0x143   :  { %5151 = vmatpush1.bf16.msra.mxu0 %v7842_v41  ;;  %5684 = vmatpush1.bf16.msra.mxu1 %v7845_v43  ;;  %v7929_v41 = vld [vmem:[%s11243_s1 + $0xbc8] ss:$16 sps:$4 sm:$0xff]   ;;  %v7934_v43 = vld [vmem:[%s11243_s1 + $0xbe4] ss:$16 sps:$4 sm:$0xff]  }
 0x144   :  { %5152 = vmatprep.subr.bf16.mxu0 %v7850_v44  ;;  %5685 = vmatprep.subr.bf16.mxu1 %v7853_v24  ;;  %v7937_v44 = vld [vmem:[%s11243_s1 + $0xbec] ss:$16 sps:$4 sm:$0xff]   ;;  %v9844_v24 = vrot.slane %v885_v28, %v8767_v49  ;;  %v8010_v28 = vld [vmem:[%s11243_s1 + $0xd80] ss:$16 sps:$4 sm:$0xff]  }
 0x145   :  { %5182 = vmatprep.mubr.bf16.mxu0 %v932_v45  ;;  %5715 = vmatprep.mubr.bf16.mxu1 %v932_v45  ;;  %v7932_v45 = vld [vmem:[%s11243_s1 + $0xbe0] ss:$16 sps:$4 sm:$0xff]  }
 0x147   :  { %5153 = vmatpush1.bf16.msra.mxu0 %v7848_v46  ;;  %5686 = vmatpush1.bf16.msra.mxu1 %v7851_v47  ;;  %v7935_v46 = vld [vmem:[%s11243_s1 + $0xbe8] ss:$16 sps:$4 sm:$0xff]   ;;  %v7940_v47 = vld [vmem:[%s11243_s1 + $0xc04] ss:$16 sps:$4 sm:$0xff]  }
 0x148   :  { %5154 = vmatprep.subr.bf16.mxu0 %v7856_v38  ;;  %5687 = vmatprep.subr.bf16.mxu1 %v7859_v48  ;;  %v7943_v38 = vld [vmem:[%s11243_s1 + $0xc0c] ss:$16 sps:$4 sm:$0xff]   ;;  %v901_v48 = vcombine.high %v9844_v24, %v9844_v24 }
 0x14b   :  { %5155 = vmatpush1.bf16.msra.mxu0 %v7854_v50  ;;  %5688 = vmatpush1.bf16.msra.mxu1 %v7857_v51  ;;  %v930_v50 = vcombine.high %v9654_v40, %v9654_v40  ;;  %v7938_v51 = vld [vmem:[%s11243_s1 + $0xc00] ss:$16 sps:$4 sm:$0xff]   ;;  %v7949_v40 = vld [vmem:[%s11243_s1 + $0xc2c] ss:$16 sps:$4 sm:$0xff]  }
 0x14c   :  { %5156 = vmatprep.subr.bf16.mxu0 %v7862_v53  ;;  %5689 = vmatprep.subr.bf16.mxu1 %v7865_v54  ;;  %v7941_v53 = vld [vmem:[%s11243_s1 + $0xc08] ss:$16 sps:$4 sm:$0xff]   ;;  %v7946_v54 = vld [vmem:[%s11243_s1 + $0xc24] ss:$16 sps:$4 sm:$0xff]  }
 0x14f   :  { %5157 = vmatpush1.bf16.msra.mxu0 %v7860_v55  ;;  %5690 = vmatpush1.bf16.msra.mxu1 %v7863_v56  ;;  %v9875_v55 = vrot.slane %v901_v48, %v8767_v49  ;;  %v7944_v56 = vld [vmem:[%s11243_s1 + $0xc20] ss:$16 sps:$4 sm:$0xff]   ;;  %v8025_v48 = vld [vmem:[%s11243_s1 + $0xdc8] ss:$16 sps:$4 sm:$0xff]  }
 0x150   :  { %5158 = vmatprep.subr.bf16.mxu0 %v7868_v57  ;;  %5691 = vmatprep.subr.bf16.mxu1 %v7871_v58  ;;  %v7947_v57 = vld [vmem:[%s11243_s1 + $0xc28] ss:$16 sps:$4 sm:$0xff]   ;;  %v7952_v58 = vld [vmem:[%s11243_s1 + $0xc44] ss:$16 sps:$4 sm:$0xff]  }
 0x153   :  { %5159 = vmatpush1.bf16.msra.mxu0 %v7866_v59  ;;  %5692 = vmatpush1.bf16.msra.mxu1 %v7869_v60  ;;  %v7955_v59 = vld [vmem:[%s11243_s1 + $0xc4c] ss:$16 sps:$4 sm:$0xff]   ;;  %v7950_v60 = vld [vmem:[%s11243_s1 + $0xc40] ss:$16 sps:$4 sm:$0xff]  }
 0x154   :  { %5160 = vmatprep.subr.bf16.mxu0 %v7874_v61  ;;  %5693 = vmatprep.subr.bf16.mxu1 %v7877_v62  ;;  %v7953_v61 = vld [vmem:[%s11243_s1 + $0xc48] ss:$16 sps:$4 sm:$0xff]   ;;  %v7958_v62 = vld [vmem:[%s11243_s1 + $0xc64] ss:$16 sps:$4 sm:$0xff]  }
 0x157   :  { %5161 = vmatpush1.bf16.msra.mxu0 %v7872_v63  ;;  %5694 = vmatpush1.bf16.msra.mxu1 %v7875_v0  ;;  %v7961_v63 = vld [vmem:[%s11243_s1 + $0xc6c] ss:$16 sps:$4 sm:$0xff]   ;;  %v7956_v0 = vld [vmem:[%s11243_s1 + $0xc60] ss:$16 sps:$4 sm:$0xff]  }
 0x158   :  { %5162 = vmatprep.subr.bf16.mxu0 %v7880_v1  ;;  %5695 = vmatprep.subr.bf16.mxu1 %v7883_v2  ;;  %v7959_v1 = vld [vmem:[%s11243_s1 + $0xc68] ss:$16 sps:$4 sm:$0xff]   ;;  %v7964_v2 = vld [vmem:[%s11243_s1 + $0xc84] ss:$16 sps:$4 sm:$0xff]  }
 0x15b   :  { %5163 = vmatpush1.bf16.msra.mxu0 %v7878_v3  ;;  %5696 = vmatpush1.bf16.msra.mxu1 %v7881_v4  ;;  %v7967_v3 = vld [vmem:[%s11243_s1 + $0xc8c] ss:$16 sps:$4 sm:$0xff]   ;;  %v7962_v4 = vld [vmem:[%s11243_s1 + $0xc80] ss:$16 sps:$4 sm:$0xff]  }
 0x15c   :  { %5164 = vmatprep.subr.bf16.mxu0 %v7886_v5  ;;  %5697 = vmatprep.subr.bf16.mxu1 %v7889_v6  ;;  %v7965_v5 = vld [vmem:[%s11243_s1 + $0xc88] ss:$16 sps:$4 sm:$0xff]   ;;  %v7970_v6 = vld [vmem:[%s11243_s1 + $0xca4] ss:$16 sps:$4 sm:$0xff]  }
 0x15f   :  { %5165 = vmatpush1.bf16.msra.mxu0 %v7884_v7  ;;  %5698 = vmatpush1.bf16.msra.mxu1 %v7887_v8  ;;  %v7973_v7 = vld [vmem:[%s11243_s1 + $0xcac] ss:$16 sps:$4 sm:$0xff]   ;;  %v7968_v8 = vld [vmem:[%s11243_s1 + $0xca0] ss:$16 sps:$4 sm:$0xff]  }
 0x160   :  { %5166 = vmatprep.subr.bf16.mxu0 %v7892_v9  ;;  %5699 = vmatprep.subr.bf16.mxu1 %v7895_v10  ;;  %v7971_v9 = vld [vmem:[%s11243_s1 + $0xca8] ss:$16 sps:$4 sm:$0xff]   ;;  %v7976_v10 = vld [vmem:[%s11243_s1 + $0xcc4] ss:$16 sps:$4 sm:$0xff]  }
 0x163   :  { %5167 = vmatpush1.bf16.msra.mxu0 %v7890_v11  ;;  %5700 = vmatpush1.bf16.msra.mxu1 %v7893_v12  ;;  %v7979_v11 = vld [vmem:[%s11243_s1 + $0xccc] ss:$16 sps:$4 sm:$0xff]   ;;  %v7974_v12 = vld [vmem:[%s11243_s1 + $0xcc0] ss:$16 sps:$4 sm:$0xff]  }
 0x164   :  { %5168 = vmatprep.subr.bf16.mxu0 %v7898_v14  ;;  %5701 = vmatprep.subr.bf16.mxu1 %v7901_v52  ;;  %v7977_v14 = vld [vmem:[%s11243_s1 + $0xcc8] ss:$16 sps:$4 sm:$0xff]   ;;  %v7982_v52 = vld [vmem:[%s11243_s1 + $0xce4] ss:$16 sps:$4 sm:$0xff]  }
 0x167   :  { %5169 = vmatpush1.bf16.msra.mxu0 %v7896_v16  ;;  %5702 = vmatpush1.bf16.msra.mxu1 %v7899_v17  ;;  %v7985_v16 = vld [vmem:[%s11243_s1 + $0xcec] ss:$16 sps:$4 sm:$0xff]   ;;  %v7980_v17 = vld [vmem:[%s11243_s1 + $0xce0] ss:$16 sps:$4 sm:$0xff]  }
 0x168   :  { %5170 = vmatprep.subr.bf16.mxu0 %v7904_v18  ;;  %5703 = vmatprep.subr.bf16.mxu1 %v7907_v19  ;;  %v7983_v18 = vld [vmem:[%s11243_s1 + $0xce8] ss:$16 sps:$4 sm:$0xff]   ;;  %v7988_v19 = vld [vmem:[%s11243_s1 + $0xd04] ss:$16 sps:$4 sm:$0xff]  }
 0x16b   :  { %5171 = vmatpush1.bf16.msra.mxu0 %v7902_v20  ;;  %5704 = vmatpush1.bf16.msra.mxu1 %v7905_v21  ;;  %v7991_v20 = vld [vmem:[%s11243_s1 + $0xd0c] ss:$16 sps:$4 sm:$0xff]   ;;  %v7986_v21 = vld [vmem:[%s11243_s1 + $0xd00] ss:$16 sps:$4 sm:$0xff]  }
 0x16c   :  { %5172 = vmatprep.subr.bf16.mxu0 %v7910_v22  ;;  %5705 = vmatprep.subr.bf16.mxu1 %v7913_v23  ;;  %v7989_v22 = vld [vmem:[%s11243_s1 + $0xd08] ss:$16 sps:$4 sm:$0xff]   ;;  %v7994_v23 = vld [vmem:[%s11243_s1 + $0xd24] ss:$16 sps:$4 sm:$0xff]  }
 0x16f   :  { %5173 = vmatpush1.bf16.msra.mxu0 %v7908_v25  ;;  %5706 = vmatpush1.bf16.msra.mxu1 %v7911_v13  ;;  %v7997_v25 = vld [vmem:[%s11243_s1 + $0xd2c] ss:$16 sps:$4 sm:$0xff]   ;;  %v7992_v13 = vld [vmem:[%s11243_s1 + $0xd20] ss:$16 sps:$4 sm:$0xff]  }
 0x170   :  { %5174 = vmatprep.subr.bf16.mxu0 %v7916_v27  ;;  %5707 = vmatprep.subr.bf16.mxu1 %v7919_v29  ;;  %v7995_v27 = vld [vmem:[%s11243_s1 + $0xd28] ss:$16 sps:$4 sm:$0xff]   ;;  %v8000_v29 = vld [vmem:[%s11243_s1 + $0xd44] ss:$16 sps:$4 sm:$0xff]  }
 0x173   :  { %5175 = vmatpush1.bf16.msra.mxu0 %v7914_v30  ;;  %5708 = vmatpush1.bf16.msra.mxu1 %v7917_v31  ;;  %v8003_v30 = vld [vmem:[%s11243_s1 + $0xd4c] ss:$16 sps:$4 sm:$0xff]   ;;  %v7998_v31 = vld [vmem:[%s11243_s1 + $0xd40] ss:$16 sps:$4 sm:$0xff]  }
 0x174   :  { %5176 = vmatprep.subr.bf16.mxu0 %v7922_v15  ;;  %5709 = vmatprep.subr.bf16.mxu1 %v7925_v32  ;;  %v8001_v15 = vld [vmem:[%s11243_s1 + $0xd48] ss:$16 sps:$4 sm:$0xff]   ;;  %v8006_v32 = vld [vmem:[%s11243_s1 + $0xd64] ss:$16 sps:$4 sm:$0xff]  }
 0x177   :  { %5177 = vmatpush1.bf16.msra.mxu0 %v7920_v33  ;;  %5710 = vmatpush1.bf16.msra.mxu1 %v7923_v26  ;;  %v8009_v33 = vld [vmem:[%s11243_s1 + $0xd6c] ss:$16 sps:$4 sm:$0xff]   ;;  %v8004_v26 = vld [vmem:[%s11243_s1 + $0xd60] ss:$16 sps:$4 sm:$0xff]  }
 0x178   :  { %5178 = vmatprep.subr.bf16.mxu0 %v7928_v34  ;;  %5711 = vmatprep.subr.bf16.mxu1 %v7931_v35  ;;  %v8007_v34 = vld [vmem:[%s11243_s1 + $0xd68] ss:$16 sps:$4 sm:$0xff]   ;;  %v8012_v35 = vld [vmem:[%s11243_s1 + $0xd84] ss:$16 sps:$4 sm:$0xff]  }
 0x17b   :  { %5179 = vmatpush1.bf16.msra.mxu0 %v7926_v39  ;;  %5712 = vmatpush1.bf16.msra.mxu1 %v7929_v41  ;;  %v8013_v39 = vld [vmem:[%s11243_s1 + $0xd88] ss:$16 sps:$4 sm:$0xff]   ;;  %v8018_v41 = vld [vmem:[%s11243_s1 + $0xda4] ss:$16 sps:$4 sm:$0xff]  }
 0x17c   :  { %5180 = vmatprep.subr.bf16.mxu0 %v7934_v43  ;;  %5713 = vmatprep.subr.bf16.mxu1 %v7937_v44  ;;  %v8021_v43 = vld [vmem:[%s11243_s1 + $0xdac] ss:$16 sps:$4 sm:$0xff]   ;;  %v8016_v44 = vld [vmem:[%s11243_s1 + $0xda0] ss:$16 sps:$4 sm:$0xff]  }
 0x17f   :  { %5181 = vmatpush1.bf16.msra.mxu0 %v7932_v45  ;;  %5714 = vmatpush1.bf16.msra.mxu1 %v7935_v46  ;;  %v8019_v45 = vld [vmem:[%s11243_s1 + $0xda8] ss:$16 sps:$4 sm:$0xff]   ;;  %v8024_v46 = vld [vmem:[%s11243_s1 + $0xdc4] ss:$16 sps:$4 sm:$0xff]  }
 0x180   :  { %5191 = vmatprep.subr.bf16.mxu0 %v7940_v47  ;;  %5724 = vmatprep.subr.bf16.mxu1 %v7943_v38  ;;  %v8027_v47 = vld [vmem:[%s11243_s1 + $0xdcc] ss:$16 sps:$4 sm:$0xff]   ;;  %v8022_v38 = vld [vmem:[%s11243_s1 + $0xdc0] ss:$16 sps:$4 sm:$0xff]  }
 0x182   :  { %5183 = vmatmul.mubr.bf16.vlgmr.msra.gmra.mrb[0].mxu0 %v930_v50  ;;  %5716 = vmatmul.mubr.bf16.vlgmr.msra.gmra.mrb[0].mxu1 %v930_v50  ;;  %v8030_v50 = vld [vmem:[%s11243_s1 + $0xde4] ss:$16 sps:$4 sm:$0xff]  }
 0x183   :  { %5192 = vmatpush1.bf16.msra.mxu0 %v7938_v51  ;;  %5725 = vmatpush1.bf16.msra.mxu1 %v7941_v53  ;;  %v8033_v51 = vld [vmem:[%s11243_s1 + $0xdec] ss:$16 sps:$4 sm:$0xff]   ;;  %v8028_v53 = vld [vmem:[%s11243_s1 + $0xde0] ss:$16 sps:$4 sm:$0xff]  }
 0x184   :  { %5193 = vmatprep.subr.bf16.mxu0 %v7946_v54  ;;  %5726 = vmatprep.subr.bf16.mxu1 %v7949_v40  ;;  %v8031_v54 = vld [vmem:[%s11243_s1 + $0xde8] ss:$16 sps:$4 sm:$0xff]   ;;  %v8037_v40 = vld [vmem:[%s11243_s1 + $0xe04] ss:$16 sps:$4 sm:$0xff]  }
 0x185   :  { %5223 = vmatprep.mubr.bf16.mxu0 %v9875_v55  ;;  %5756 = vmatprep.mubr.bf16.mxu1 %v9875_v55 }
 0x187   :  { %5194 = vmatpush1.bf16.msra.mxu0 %v7944_v56  ;;  %5727 = vmatpush1.bf16.msra.mxu1 %v7947_v57  ;;  %v8040_v56 = vld [vmem:[%s11243_s1 + $0xe0c] ss:$16 sps:$4 sm:$0xff]   ;;  %v10061_v57 = vrot.slane %v9844_v24, %v8767_v49 }
 0x188   :  { %5195 = vmatprep.subr.bf16.mxu0 %v7952_v58  ;;  %5728 = vmatprep.subr.bf16.mxu1 %v7955_v59  ;;  %v8035_v58 = vld [vmem:[%s11243_s1 + $0xe00] ss:$16 sps:$4 sm:$0xff]   ;;  %v8038_v59 = vld [vmem:[%s11243_s1 + $0xe08] ss:$16 sps:$4 sm:$0xff]   ;;  %v8046_v24 = vld [vmem:[%s11243_s1 + $0xe2c] ss:$16 sps:$4 sm:$0xff]  }
 0x18b   :  { %5196 = vmatpush1.bf16.msra.mxu0 %v7950_v60  ;;  %5729 = vmatpush1.bf16.msra.mxu1 %v7953_v61  ;;  %v8043_v60 = vld [vmem:[%s11243_s1 + $0xe24] ss:$16 sps:$4 sm:$0xff]   ;;  %v933_v61 = vcombine.high %v9875_v55, %v9875_v55 }
 0x18c   :  { %5197 = vmatprep.subr.bf16.mxu0 %v7958_v62  ;;  %5730 = vmatprep.subr.bf16.mxu1 %v7961_v63  ;;  %v8041_v62 = vld [vmem:[%s11243_s1 + $0xe20] ss:$16 sps:$4 sm:$0xff]   ;;  %v8044_v63 = vld [vmem:[%s11243_s1 + $0xe28] ss:$16 sps:$4 sm:$0xff]   ;;  %v8049_v55 = vld [vmem:[%s11243_s1 + $0xe44] ss:$16 sps:$4 sm:$0xff]  }
 0x18f   :  { %5198 = vmatpush1.bf16.msra.mxu0 %v7956_v0  ;;  %5731 = vmatpush1.bf16.msra.mxu1 %v7959_v1  ;;  %v8052_v0 = vld [vmem:[%s11243_s1 + $0xe4c] ss:$16 sps:$4 sm:$0xff]   ;;  %v8047_v1 = vld [vmem:[%s11243_s1 + $0xe40] ss:$16 sps:$4 sm:$0xff]  }
 0x190   :  { %5199 = vmatprep.subr.bf16.mxu0 %v7964_v2  ;;  %5732 = vmatprep.subr.bf16.mxu1 %v7967_v3  ;;  %v8050_v2 = vld [vmem:[%s11243_s1 + $0xe48] ss:$16 sps:$4 sm:$0xff]   ;;  %v8055_v3 = vld [vmem:[%s11243_s1 + $0xe64] ss:$16 sps:$4 sm:$0xff]  }
 0x193   :  { %5200 = vmatpush1.bf16.msra.mxu0 %v7962_v4  ;;  %5733 = vmatpush1.bf16.msra.mxu1 %v7965_v5  ;;  %v8058_v4 = vld [vmem:[%s11243_s1 + $0xe6c] ss:$16 sps:$4 sm:$0xff]   ;;  %v8053_v5 = vld [vmem:[%s11243_s1 + $0xe60] ss:$16 sps:$4 sm:$0xff]  }
 0x194   :  { %5201 = vmatprep.subr.bf16.mxu0 %v7970_v6  ;;  %5734 = vmatprep.subr.bf16.mxu1 %v7973_v7  ;;  %v8056_v6 = vld [vmem:[%s11243_s1 + $0xe68] ss:$16 sps:$4 sm:$0xff]   ;;  %v8061_v7 = vld [vmem:[%s11243_s1 + $0xe84] ss:$16 sps:$4 sm:$0xff]  }
 0x197   :  { %5202 = vmatpush1.bf16.msra.mxu0 %v7968_v8  ;;  %5735 = vmatpush1.bf16.msra.mxu1 %v7971_v9  ;;  %v8064_v8 = vld [vmem:[%s11243_s1 + $0xe8c] ss:$16 sps:$4 sm:$0xff]   ;;  %v8059_v9 = vld [vmem:[%s11243_s1 + $0xe80] ss:$16 sps:$4 sm:$0xff]  }
 0x198   :  { %5203 = vmatprep.subr.bf16.mxu0 %v7976_v10  ;;  %5736 = vmatprep.subr.bf16.mxu1 %v7979_v11  ;;  %v8062_v10 = vld [vmem:[%s11243_s1 + $0xe88] ss:$16 sps:$4 sm:$0xff]   ;;  %v8067_v11 = vld [vmem:[%s11243_s1 + $0xea4] ss:$16 sps:$4 sm:$0xff]  }
 0x19b   :  { %5204 = vmatpush1.bf16.msra.mxu0 %v7974_v12  ;;  %5737 = vmatpush1.bf16.msra.mxu1 %v7977_v14  ;;  %v8070_v12 = vld [vmem:[%s11243_s1 + $0xeac] ss:$16 sps:$4 sm:$0xff]   ;;  %v8065_v14 = vld [vmem:[%s11243_s1 + $0xea0] ss:$16 sps:$4 sm:$0xff]  }
 0x19c   :  { %5205 = vmatprep.subr.bf16.mxu0 %v7982_v52  ;;  %5738 = vmatprep.subr.bf16.mxu1 %v7985_v16  ;;  %v8068_v52 = vld [vmem:[%s11243_s1 + $0xea8] ss:$16 sps:$4 sm:$0xff]   ;;  %v8073_v16 = vld [vmem:[%s11243_s1 + $0xec4] ss:$16 sps:$4 sm:$0xff]  }
 0x19f   :  { %5206 = vmatpush1.bf16.msra.mxu0 %v7980_v17  ;;  %5739 = vmatpush1.bf16.msra.mxu1 %v7983_v18  ;;  %v8076_v17 = vld [vmem:[%s11243_s1 + $0xecc] ss:$16 sps:$4 sm:$0xff]   ;;  %v8071_v18 = vld [vmem:[%s11243_s1 + $0xec0] ss:$16 sps:$4 sm:$0xff]  }
 0x1a0   :  { %5207 = vmatprep.subr.bf16.mxu0 %v7988_v19  ;;  %5740 = vmatprep.subr.bf16.mxu1 %v7991_v20  ;;  %v8074_v19 = vld [vmem:[%s11243_s1 + $0xec8] ss:$16 sps:$4 sm:$0xff]   ;;  %v8079_v20 = vld [vmem:[%s11243_s1 + $0xee4] ss:$16 sps:$4 sm:$0xff]  }
 0x1a3   :  { %5208 = vmatpush1.bf16.msra.mxu0 %v7986_v21  ;;  %5741 = vmatpush1.bf16.msra.mxu1 %v7989_v22  ;;  %v8082_v21 = vld [vmem:[%s11243_s1 + $0xeec] ss:$16 sps:$4 sm:$0xff]   ;;  %v8077_v22 = vld [vmem:[%s11243_s1 + $0xee0] ss:$16 sps:$4 sm:$0xff]  }
 0x1a4   :  { %5209 = vmatprep.subr.bf16.mxu0 %v7994_v23  ;;  %5742 = vmatprep.subr.bf16.mxu1 %v7997_v25  ;;  %v8080_v23 = vld [vmem:[%s11243_s1 + $0xee8] ss:$16 sps:$4 sm:$0xff]   ;;  %v8085_v25 = vld [vmem:[%s11243_s1 + $0xf04] ss:$16 sps:$4 sm:$0xff]  }
 0x1a7   :  { %5210 = vmatpush1.bf16.msra.mxu0 %v7992_v13  ;;  %5743 = vmatpush1.bf16.msra.mxu1 %v7995_v27  ;;  %v8088_v13 = vld [vmem:[%s11243_s1 + $0xf0c] ss:$16 sps:$4 sm:$0xff]   ;;  %v8083_v27 = vld [vmem:[%s11243_s1 + $0xf00] ss:$16 sps:$4 sm:$0xff]  }
 0x1a8   :  { %5211 = vmatprep.subr.bf16.mxu0 %v8000_v29  ;;  %5744 = vmatprep.subr.bf16.mxu1 %v8003_v30  ;;  %v8086_v29 = vld [vmem:[%s11243_s1 + $0xf08] ss:$16 sps:$4 sm:$0xff]   ;;  %v8091_v30 = vld [vmem:[%s11243_s1 + $0xf24] ss:$16 sps:$4 sm:$0xff]  }
 0x1ab   :  { %5212 = vmatpush1.bf16.msra.mxu0 %v7998_v31  ;;  %5745 = vmatpush1.bf16.msra.mxu1 %v8001_v15  ;;  %v8094_v31 = vld [vmem:[%s11243_s1 + $0xf2c] ss:$16 sps:$4 sm:$0xff]   ;;  %v8089_v15 = vld [vmem:[%s11243_s1 + $0xf20] ss:$16 sps:$4 sm:$0xff]  }
 0x1ac   :  { %5213 = vmatprep.subr.bf16.mxu0 %v8006_v32  ;;  %5746 = vmatprep.subr.bf16.mxu1 %v8009_v33  ;;  %v8092_v32 = vld [vmem:[%s11243_s1 + $0xf28] ss:$16 sps:$4 sm:$0xff]   ;;  %v8097_v33 = vld [vmem:[%s11243_s1 + $0xf44] ss:$16 sps:$4 sm:$0xff]  }
 0x1af   :  { %5214 = vmatpush1.bf16.msra.mxu0 %v8004_v26  ;;  %5747 = vmatpush1.bf16.msra.mxu1 %v8007_v34  ;;  %v8100_v26 = vld [vmem:[%s11243_s1 + $0xf4c] ss:$16 sps:$4 sm:$0xff]   ;;  %v8095_v34 = vld [vmem:[%s11243_s1 + $0xf40] ss:$16 sps:$4 sm:$0xff]  }
 0x1b0   :  { %5215 = vmatprep.subr.bf16.mxu0 %v8012_v35  ;;  %5748 = vmatprep.subr.bf16.mxu1 %v8015_v37  ;;  %v8098_v35 = vld [vmem:[%s11243_s1 + $0xf48] ss:$16 sps:$4 sm:$0xff]   ;;  %v8103_v37 = vld [vmem:[%s11243_s1 + $0xf64] ss:$16 sps:$4 sm:$0xff]  }
 0x1b3   :  { %5216 = vmatpush1.bf16.msra.mxu0 %v8010_v28  ;;  %5749 = vmatpush1.bf16.msra.mxu1 %v8013_v39  ;;  %v8106_v28 = vld [vmem:[%s11243_s1 + $0xf6c] ss:$16 sps:$4 sm:$0xff]  }
 0x1b4   :  { %5217 = vmatprep.subr.bf16.mxu0 %v8018_v41  ;;  %5750 = vmatprep.subr.bf16.mxu1 %v8021_v43 }
 0x1b7   :  { %5218 = vmatpush1.bf16.msra.mxu0 %v8016_v44  ;;  %5751 = vmatpush1.bf16.msra.mxu1 %v8019_v45 }
 0x1b8   :  { %5219 = vmatprep.subr.bf16.mxu0 %v8024_v46  ;;  %5752 = vmatprep.subr.bf16.mxu1 %v8027_v47 }
 0x1bb   :  { %5220 = vmatpush1.bf16.msra.mxu0 %v8022_v38  ;;  %5753 = vmatpush1.bf16.msra.mxu1 %v8025_v48 }
 0x1bc   :  { %5221 = vmatprep.subr.bf16.mxu0 %v8030_v50  ;;  %5754 = vmatprep.subr.bf16.mxu1 %v8033_v51 }
 0x1bf   :  { %5222 = vmatpush1.bf16.msra.mxu0 %v8028_v53  ;;  %5755 = vmatpush1.bf16.msra.mxu1 %v8031_v54 }
 0x1c0   :  { %5232 = vmatprep.subr.bf16.mxu0 %v8037_v40  ;;  %5765 = vmatprep.subr.bf16.mxu1 %v8040_v56 }
 0x1c2   :  { %5224 = vmatmul.mubr.bf16.vlgmr.msra.gmra.mrb[0].mxu0 %v10061_v57  ;;  %5757 = vmatmul.mubr.bf16.vlgmr.msra.gmra.mrb[0].mxu1 %v10061_v57 }
 0x1c3   :  { %5233 = vmatpush1.bf16.msra.mxu0 %v8035_v58  ;;  %5766 = vmatpush1.bf16.msra.mxu1 %v8038_v59 }
 0x1c4   :  { %5234 = vmatprep.subr.bf16.mxu0 %v8043_v60  ;;  %5767 = vmatprep.subr.bf16.mxu1 %v8046_v24 }
 0x1c5   :  { %5264 = vmatprep.mubr.bf16.mxu0 %v933_v61  ;;  %5797 = vmatprep.mubr.bf16.mxu1 %v933_v61 }
 0x1c7   :  { %5235 = vmatpush1.bf16.msra.mxu0 %v8041_v62  ;;  %5768 = vmatpush1.bf16.msra.mxu1 %v8044_v63 }
 0x1c8   :  { %5236 = vmatprep.subr.bf16.mxu0 %v8049_v55  ;;  %5769 = vmatprep.subr.bf16.mxu1 %v8052_v0 }
 0x1cb   :  { %5237 = vmatpush1.bf16.msra.mxu0 %v8047_v1  ;;  %5770 = vmatpush1.bf16.msra.mxu1 %v8050_v2 }
 0x1cc   :  { %5238 = vmatprep.subr.bf16.mxu0 %v8055_v3  ;;  %5771 = vmatprep.subr.bf16.mxu1 %v8058_v4 }
 0x1cf   :  { %5239 = vmatpush1.bf16.msra.mxu0 %v8053_v5  ;;  %5772 = vmatpush1.bf16.msra.mxu1 %v8056_v6 }
 0x1d0   :  { %5240 = vmatprep.subr.bf16.mxu0 %v8061_v7  ;;  %5773 = vmatprep.subr.bf16.mxu1 %v8064_v8 }
 0x1d3   :  { %5241 = vmatpush1.bf16.msra.mxu0 %v8059_v9  ;;  %5774 = vmatpush1.bf16.msra.mxu1 %v8062_v10 }
 0x1d4   :  { %5242 = vmatprep.subr.bf16.mxu0 %v8067_v11  ;;  %5775 = vmatprep.subr.bf16.mxu1 %v8070_v12 }
 0x1d7   :  { %5243 = vmatpush1.bf16.msra.mxu0 %v8065_v14  ;;  %5776 = vmatpush1.bf16.msra.mxu1 %v8068_v52 }
 0x1d8   :  { %5244 = vmatprep.subr.bf16.mxu0 %v8073_v16  ;;  %5777 = vmatprep.subr.bf16.mxu1 %v8076_v17 }
 0x1db   :  { %5245 = vmatpush1.bf16.msra.mxu0 %v8071_v18  ;;  %5778 = vmatpush1.bf16.msra.mxu1 %v8074_v19 }
 0x1dc   :  { %5246 = vmatprep.subr.bf16.mxu0 %v8079_v20  ;;  %5779 = vmatprep.subr.bf16.mxu1 %v8082_v21 }
 0x1df   :  { %5247 = vmatpush1.bf16.msra.mxu0 %v8077_v22  ;;  %5780 = vmatpush1.bf16.msra.mxu1 %v8080_v23 }
 0x1e0   :  { %5248 = vmatprep.subr.bf16.mxu0 %v8085_v25  ;;  %5781 = vmatprep.subr.bf16.mxu1 %v8088_v13 }
 0x1e3   :  { %5249 = vmatpush1.bf16.msra.mxu0 %v8083_v27  ;;  %5782 = vmatpush1.bf16.msra.mxu1 %v8086_v29 }
 0x1e4   :  { %5250 = vmatprep.subr.bf16.mxu0 %v8091_v30  ;;  %5783 = vmatprep.subr.bf16.mxu1 %v8094_v31 }
 0x1e7   :  { %5251 = vmatpush1.bf16.msra.mxu0 %v8089_v15  ;;  %5784 = vmatpush1.bf16.msra.mxu1 %v8092_v32 }
 0x1e8   :  { %5252 = vmatprep.subr.bf16.mxu0 %v8097_v33  ;;  %5785 = vmatprep.subr.bf16.mxu1 %v8100_v26 }
 0x1e9   :  { %10 = vsyncpa [#allocation3], 0  ;;  %v8101_v39 = vld [vmem:[%s11243_s1 + $0xf60] ss:$16 sps:$4 sm:$0xff]   ;;  %v8104_v41 = vld [vmem:[%s11243_s1 + $0xf68] ss:$16 sps:$4 sm:$0xff]   ;;  %v931_v0 = vcombine.high %v10061_v57, %v10061_v57 }
 0x1ea   :  { %v8109_v43 = vld [vmem:[%s11243_s1 + $0xf84] ss:$16 sps:$4 sm:$0xff]   ;;  %v8112_v44 = vld [vmem:[%s11243_s1 + $0xf8c] ss:$16 sps:$4 sm:$0xff]   ;;  %v8107_v45 = vld [vmem:[%s11243_s1 + $0xf80] ss:$16 sps:$4 sm:$0xff]  }
 0x1eb   :  { %5253 = vmatpush1.bf16.msra.mxu0 %v8095_v34  ;;  %5786 = vmatpush1.bf16.msra.mxu1 %v8098_v35  ;;  %v8110_v46 = vld [vmem:[%s11243_s1 + $0xf88] ss:$16 sps:$4 sm:$0xff]   ;;  %v8115_v47 = vld [vmem:[%s11243_s1 + $0xfa4] ss:$16 sps:$4 sm:$0xff]   ;;  %v8118_v38 = vld [vmem:[%s11243_s1 + $0xfac] ss:$16 sps:$4 sm:$0xff]  }
 0x1ec   :  { %5254 = vmatprep.subr.bf16.mxu0 %v8103_v37  ;;  %5787 = vmatprep.subr.bf16.mxu1 %v8106_v28  ;;  %v8113_v48 = vld [vmem:[%s11243_s1 + $0xfa0] ss:$16 sps:$4 sm:$0xff]   ;;  %v8116_v50 = vld [vmem:[%s11243_s1 + $0xfa8] ss:$16 sps:$4 sm:$0xff]   ;;  %v8121_v51 = vld [vmem:[%s11243_s1 + $0xfc4] ss:$16 sps:$4 sm:$0xff]  }
 0x1ed   :  { %v8124_v53 = vld [vmem:[%s11243_s1 + $0xfcc] ss:$16 sps:$4 sm:$0xff]   ;;  %v10238_v54 = vld [vmem:[%s11242_s0 + $0x10] sm:$0xff]  ;;  %v8122_v56 = vld [vmem:[%s11243_s1 + $0xfc8] ss:$16 sps:$4 sm:$0xff]   ;;  %vm4941_vm0 = vcmask 523264  }
 0x1ee   :  { %v8119_v40 = vld [vmem:[%s11243_s1 + $0xfc0] ss:$16 sps:$4 sm:$0xff]   ;;  %v8127_v58 = vld [vmem:[%s11243_s1 + $0xfe4] ss:$16 sps:$4 sm:$0xff]   ;;  %v8130_v59 = vld [vmem:[%s11243_s1 + $0xfec] ss:$16 sps:$4 sm:$0xff]   ;;  %v10254_v60 = vrot.slane %v10238_v54, %v8767_v49 }
 0x1ef   :  { %5255 = vmatpush1.bf16.msra.mxu0 %v8101_v39  ;;  %5788 = vmatpush1.bf16.msra.mxu1 %v8104_v41  ;;  %v8125_v24 = vld [vmem:[%s11243_s1 + $0xfe0] ss:$16 sps:$4 sm:$0xff]   ;;  %v8128_v61 = vld [vmem:[%s11243_s1 + $0xfe8] ss:$16 sps:$4 sm:$0xff]   ;;  %v8133_v62 = vld [vmem:[%s11243_s1 + $0x1004] ss:$16 sps:$4 sm:$0xff]  }
 0x1f0   :  { %5256 = vmatprep.subr.bf16.mxu0 %v8109_v43  ;;  %5789 = vmatprep.subr.bf16.mxu1 %v8112_v44  ;;  %v8136_v63 = vld [vmem:[%s11243_s1 + $0x100c] ss:$16 sps:$4 sm:$0xff]   ;;  %v949_v55 = vcombine.high %v10254_v60, %v10254_v60  ;;  %v8131_v1 = vld [vmem:[%s11243_s1 + $0x1000] ss:$16 sps:$4 sm:$0xff]   ;;  %v8134_v2 = vld [vmem:[%s11243_s1 + $0x1008] ss:$16 sps:$4 sm:$0xff]  }
 0x1f1   :  { %v8139_v3 = vld [vmem:[%s11243_s1 + $0x1024] ss:$16 sps:$4 sm:$0xff]   ;;  %v8142_v57 = vld [vmem:[%s11243_s1 + $0x102c] ss:$16 sps:$4 sm:$0xff]   ;;  %v8137_v5 = vld [vmem:[%s11243_s1 + $0x1020] ss:$16 sps:$4 sm:$0xff]  }
 0x1f2   :  { %v10285_v4 = vrot.slane %v949_v55, %v8767_v49  ;;  %v8140_v6 = vld [vmem:[%s11243_s1 + $0x1028] ss:$16 sps:$4 sm:$0xff]   ;;  %v8145_v7 = vld [vmem:[%s11243_s1 + $0x1044] ss:$16 sps:$4 sm:$0xff]   ;;  %v8148_v8 = vld [vmem:[%s11243_s1 + $0x104c] ss:$16 sps:$4 sm:$0xff]  }
 0x1f3   :  { %5257 = vmatpush1.bf16.msra.mxu0 %v8107_v45  ;;  %5790 = vmatpush1.bf16.msra.mxu1 %v8110_v46  ;;  %v8143_v9 = vld [vmem:[%s11243_s1 + $0x1040] ss:$16 sps:$4 sm:$0xff]   ;;  %v8146_v10 = vld [vmem:[%s11243_s1 + $0x1048] ss:$16 sps:$4 sm:$0xff]   ;;  %v8151_v11 = vld [vmem:[%s11243_s1 + $0x1064] ss:$16 sps:$4 sm:$0xff]  }
 0x1f4   :  { %5258 = vmatprep.subr.bf16.mxu0 %v8115_v47  ;;  %5791 = vmatprep.subr.bf16.mxu1 %v8118_v38  ;;  %v8154_v12 = vld [vmem:[%s11243_s1 + $0x106c] ss:$16 sps:$4 sm:$0xff]   ;;  %v8149_v14 = vld [vmem:[%s11243_s1 + $0x1060] ss:$16 sps:$4 sm:$0xff]   ;;  %v8152_v52 = vld [vmem:[%s11243_s1 + $0x1068] ss:$16 sps:$4 sm:$0xff]  }
 0x1f5   :  { %v8157_v16 = vld [vmem:[%s11243_s1 + $0x1084] ss:$16 sps:$4 sm:$0xff]   ;;  %v8160_v17 = vld [vmem:[%s11243_s1 + $0x108c] ss:$16 sps:$4 sm:$0xff]   ;;  %v8155_v18 = vld [vmem:[%s11243_s1 + $0x1080] ss:$16 sps:$4 sm:$0xff]  }
 0x1f6   :  { %v8158_v19 = vld [vmem:[%s11243_s1 + $0x1088] ss:$16 sps:$4 sm:$0xff]   ;;  %v8163_v20 = vld [vmem:[%s11243_s1 + $0x10a4] ss:$16 sps:$4 sm:$0xff]   ;;  %v8166_v21 = vld [vmem:[%s11243_s1 + $0x10ac] ss:$16 sps:$4 sm:$0xff]  }
 0x1f7   :  { %5259 = vmatpush1.bf16.msra.mxu0 %v8113_v48  ;;  %5792 = vmatpush1.bf16.msra.mxu1 %v8116_v50  ;;  %v8161_v22 = vld [vmem:[%s11243_s1 + $0x10a0] ss:$16 sps:$4 sm:$0xff]   ;;  %v8164_v23 = vld [vmem:[%s11243_s1 + $0x10a8] ss:$16 sps:$4 sm:$0xff]   ;;  %v8169_v25 = vld [vmem:[%s11243_s1 + $0x10c4] ss:$16 sps:$4 sm:$0xff]  }
 0x1f8   :  { %5260 = vmatprep.subr.bf16.mxu0 %v8121_v51  ;;  %5793 = vmatprep.subr.bf16.mxu1 %v8124_v53  ;;  %v8172_v13 = vld [vmem:[%s11243_s1 + $0x10cc] ss:$16 sps:$4 sm:$0xff]   ;;  %v8167_v27 = vld [vmem:[%s11243_s1 + $0x10c0] ss:$16 sps:$4 sm:$0xff]   ;;  %v8170_v29 = vld [vmem:[%s11243_s1 + $0x10c8] ss:$16 sps:$4 sm:$0xff]  }
 0x1f9   :  { %v8175_v30 = vld [vmem:[%s11243_s1 + $0x10e4] ss:$16 sps:$4 sm:$0xff]   ;;  %v8178_v31 = vld [vmem:[%s11243_s1 + $0x10ec] ss:$16 sps:$4 sm:$0xff]   ;;  %v8173_v15 = vld [vmem:[%s11243_s1 + $0x10e0] ss:$16 sps:$4 sm:$0xff]  }
 0x1fa   :  { %v8176_v32 = vld [vmem:[%s11243_s1 + $0x10e8] ss:$16 sps:$4 sm:$0xff]   ;;  %v8181_v33 = vld [vmem:[%s11243_s1 + $0x1104] ss:$16 sps:$4 sm:$0xff]   ;;  %v8184_v26 = vld [vmem:[%s11243_s1 + $0x110c] ss:$16 sps:$4 sm:$0xff]  }
 0x1fb   :  { %5261 = vmatpush1.bf16.msra.mxu0 %v8119_v40  ;;  %5794 = vmatpush1.bf16.msra.mxu1 %v8122_v56  ;;  %v8179_v34 = vld [vmem:[%s11243_s1 + $0x1100] ss:$16 sps:$4 sm:$0xff]   ;;  %v8182_v35 = vld [vmem:[%s11243_s1 + $0x1108] ss:$16 sps:$4 sm:$0xff]   ;;  %v8187_v37 = vld [vmem:[%s11243_s1 + $0x1124] ss:$16 sps:$4 sm:$0xff]  }
 0x1fc   :  { %5262 = vmatprep.subr.bf16.mxu0 %v8127_v58  ;;  %5795 = vmatprep.subr.bf16.mxu1 %v8130_v59  ;;  %v8190_v28 = vld [vmem:[%s11243_s1 + $0x112c] ss:$16 sps:$4 sm:$0xff]   ;;  %v8185_v39 = vld [vmem:[%s11243_s1 + $0x1120] ss:$16 sps:$4 sm:$0xff]   ;;  %v8188_v41 = vld [vmem:[%s11243_s1 + $0x1128] ss:$16 sps:$4 sm:$0xff]  }
 0x1fd   :  { %v8193_v43 = vld [vmem:[%s11243_s1 + $0x1144] ss:$16 sps:$4 sm:$0xff]   ;;  %v8196_v44 = vld [vmem:[%s11243_s1 + $0x114c] ss:$16 sps:$4 sm:$0xff]   ;;  %v8191_v45 = vld [vmem:[%s11243_s1 + $0x1140] ss:$16 sps:$4 sm:$0xff]  }
 0x1fe   :  { %v8194_v46 = vld [vmem:[%s11243_s1 + $0x1148] ss:$16 sps:$4 sm:$0xff]   ;;  %v8199_v47 = vld [vmem:[%s11243_s1 + $0x1164] ss:$16 sps:$4 sm:$0xff]   ;;  %v8202_v38 = vld [vmem:[%s11243_s1 + $0x116c] ss:$16 sps:$4 sm:$0xff]  }
 0x1ff   :  { %5263 = vmatpush1.bf16.msra.mxu0 %v8125_v24  ;;  %5796 = vmatpush1.bf16.msra.mxu1 %v8128_v61  ;;  %v8197_v48 = vld [vmem:[%s11243_s1 + $0x1160] ss:$16 sps:$4 sm:$0xff]   ;;  %v8200_v50 = vld [vmem:[%s11243_s1 + $0x1168] ss:$16 sps:$4 sm:$0xff]   ;;  %v8205_v51 = vld [vmem:[%s11243_s1 + $0x1184] ss:$16 sps:$4 sm:$0xff]  }
 0x200   :  { %5273 = vmatprep.subr.bf16.mxu0 %v8133_v62  ;;  %5806 = vmatprep.subr.bf16.mxu1 %v8136_v63  ;;  %v8208_v53 = vld [vmem:[%s11243_s1 + $0x118c] ss:$16 sps:$4 sm:$0xff]   ;;  %v8203_v40 = vld [vmem:[%s11243_s1 + $0x1180] ss:$16 sps:$4 sm:$0xff]   ;;  %v8206_v56 = vld [vmem:[%s11243_s1 + $0x1188] ss:$16 sps:$4 sm:$0xff]  }
 0x201   :  { %v8211_v58 = vld [vmem:[%s11243_s1 + $0x11a4] ss:$16 sps:$4 sm:$0xff]   ;;  %v8214_v59 = vld [vmem:[%s11243_s1 + $0x11ac] ss:$16 sps:$4 sm:$0xff]   ;;  %v8209_v24 = vld [vmem:[%s11243_s1 + $0x11a0] ss:$16 sps:$4 sm:$0xff]  }
 0x202   :  { %5265 = vmatmul.mubr.bf16.vlgmr.msra.gmra.mrb[0].mxu0 %v931_v0  ;;  %5798 = vmatmul.mubr.bf16.vlgmr.msra.gmra.mrb[0].mxu1 %v931_v0  ;;  %v8212_v61 = vld [vmem:[%s11243_s1 + $0x11a8] ss:$16 sps:$4 sm:$0xff]   ;;  %v8217_v62 = vld [vmem:[%s11243_s1 + $0x11c4] ss:$16 sps:$4 sm:$0xff]   ;;  %v8220_v63 = vld [vmem:[%s11243_s1 + $0x11cc] ss:$16 sps:$4 sm:$0xff]  }
 0x203   :  { %5274 = vmatpush1.bf16.msra.mxu0 %v8131_v1  ;;  %5807 = vmatpush1.bf16.msra.mxu1 %v8134_v2  ;;  %v8215_v55 = vld [vmem:[%s11243_s1 + $0x11c0] ss:$16 sps:$4 sm:$0xff]   ;;  %v8218_v0 = vld [vmem:[%s11243_s1 + $0x11c8] ss:$16 sps:$4 sm:$0xff]   ;;  %v8223_v1 = vld [vmem:[%s11243_s1 + $0x11e4] ss:$16 sps:$4 sm:$0xff]  }
 0x204   :  { %5275 = vmatprep.subr.bf16.mxu0 %v8139_v3  ;;  %5808 = vmatprep.subr.bf16.mxu1 %v8142_v57  ;;  %v8226_v2 = vld [vmem:[%s11243_s1 + $0x11ec] ss:$16 sps:$4 sm:$0xff]   ;;  %v8221_v3 = vld [vmem:[%s11243_s1 + $0x11e0] ss:$16 sps:$4 sm:$0xff]   ;;  %v8224_v57 = vld [vmem:[%s11243_s1 + $0x11e8] ss:$16 sps:$4 sm:$0xff]  }
 0x205   :  { %5305 = vmatprep.mubr.bf16.mxu0 %v10285_v4  ;;  %5838 = vmatprep.mubr.bf16.mxu1 %v10285_v4  ;;  %vm6366_vm2 = vcmask 50176   ;;  %vm6378_vm4 = vcmask 41984  }
 0x207   :  { %5276 = vmatpush1.bf16.msra.mxu0 %v8137_v5  ;;  %5809 = vmatpush1.bf16.msra.mxu1 %v8140_v6  ;;  %v8229_v5 = vld [vmem:[%s11243_s1 + $0x1204] ss:$16 sps:$4 sm:$0xff]   ;;  %v8232_v6 = vld [vmem:[%s11243_s1 + $0x120c] ss:$16 sps:$4 sm:$0xff]  }
 0x208   :  { %5277 = vmatprep.subr.bf16.mxu0 %v8145_v7  ;;  %5810 = vmatprep.subr.bf16.mxu1 %v8148_v8  ;;  %v10471_v7 = vrot.slane %v10254_v60, %v8767_v49  ;;  %v8227_v8 = vld [vmem:[%s11243_s1 + $0x1200] ss:$16 sps:$4 sm:$0xff]   ;;  %v8238_v60 = vld [vmem:[%s11243_s1 + $0x122c] ss:$16 sps:$4 sm:$0xff]  }
 0x20b   :  { %5278 = vmatpush1.bf16.msra.mxu0 %v8143_v9  ;;  %5811 = vmatpush1.bf16.msra.mxu1 %v8146_v10  ;;  %v8230_v9 = vld [vmem:[%s11243_s1 + $0x1208] ss:$16 sps:$4 sm:$0xff]   ;;  %v8235_v10 = vld [vmem:[%s11243_s1 + $0x1224] ss:$16 sps:$4 sm:$0xff]  }
 0x20c   :  { %5279 = vmatprep.subr.bf16.mxu0 %v8151_v11  ;;  %5812 = vmatprep.subr.bf16.mxu1 %v8154_v12  ;;  %v981_v11 = vcombine.high %v10285_v4, %v10285_v4  ;;  %v8233_v12 = vld [vmem:[%s11243_s1 + $0x1220] ss:$16 sps:$4 sm:$0xff]   ;;  %v8241_v4 = vld [vmem:[%s11243_s1 + $0x1244] ss:$16 sps:$4 sm:$0xff]  }
 0x20f   :  { %5280 = vmatpush1.bf16.msra.mxu0 %v8149_v14  ;;  %5813 = vmatpush1.bf16.msra.mxu1 %v8152_v52  ;;  %v8236_v14 = vld [vmem:[%s11243_s1 + $0x1228] ss:$16 sps:$4 sm:$0xff]   ;;  %v8244_v52 = vld [vmem:[%s11243_s1 + $0x124c] ss:$16 sps:$4 sm:$0xff]  }
 0x210   :  { %5281 = vmatprep.subr.bf16.mxu0 %v8157_v16  ;;  %5814 = vmatprep.subr.bf16.mxu1 %v8160_v17  ;;  %v8239_v16 = vld [vmem:[%s11243_s1 + $0x1240] ss:$16 sps:$4 sm:$0xff]   ;;  %v8242_v17 = vld [vmem:[%s11243_s1 + $0x1248] ss:$16 sps:$4 sm:$0xff]  }
 0x213   :  { %5282 = vmatpush1.bf16.msra.mxu0 %v8155_v18  ;;  %5815 = vmatpush1.bf16.msra.mxu1 %v8158_v19  ;;  %v8247_v18 = vld [vmem:[%s11243_s1 + $0x1264] ss:$16 sps:$4 sm:$0xff]   ;;  %v8250_v19 = vld [vmem:[%s11243_s1 + $0x126c] ss:$16 sps:$4 sm:$0xff]  }
 0x214   :  { %5283 = vmatprep.subr.bf16.mxu0 %v8163_v20  ;;  %5816 = vmatprep.subr.bf16.mxu1 %v8166_v21  ;;  %v8245_v20 = vld [vmem:[%s11243_s1 + $0x1260] ss:$16 sps:$4 sm:$0xff]   ;;  %v8248_v21 = vld [vmem:[%s11243_s1 + $0x1268] ss:$16 sps:$4 sm:$0xff]  }
 0x217   :  { %5284 = vmatpush1.bf16.msra.mxu0 %v8161_v22  ;;  %5817 = vmatpush1.bf16.msra.mxu1 %v8164_v23  ;;  %v8253_v22 = vld [vmem:[%s11243_s1 + $0x1284] ss:$16 sps:$4 sm:$0xff]   ;;  %v8256_v23 = vld [vmem:[%s11243_s1 + $0x128c] ss:$16 sps:$4 sm:$0xff]  }
 0x218   :  { %5285 = vmatprep.subr.bf16.mxu0 %v8169_v25  ;;  %5818 = vmatprep.subr.bf16.mxu1 %v8172_v13  ;;  %v8251_v25 = vld [vmem:[%s11243_s1 + $0x1280] ss:$16 sps:$4 sm:$0xff]   ;;  %v8254_v13 = vld [vmem:[%s11243_s1 + $0x1288] ss:$16 sps:$4 sm:$0xff]  }
 0x21b   :  { %5286 = vmatpush1.bf16.msra.mxu0 %v8167_v27  ;;  %5819 = vmatpush1.bf16.msra.mxu1 %v8170_v29  ;;  %v8259_v27 = vld [vmem:[%s11243_s1 + $0x12a4] ss:$16 sps:$4 sm:$0xff]   ;;  %v8262_v29 = vld [vmem:[%s11243_s1 + $0x12ac] ss:$16 sps:$4 sm:$0xff]  }
 0x21c   :  { %5287 = vmatprep.subr.bf16.mxu0 %v8175_v30  ;;  %5820 = vmatprep.subr.bf16.mxu1 %v8178_v31  ;;  %v8257_v30 = vld [vmem:[%s11243_s1 + $0x12a0] ss:$16 sps:$4 sm:$0xff]   ;;  %v8260_v31 = vld [vmem:[%s11243_s1 + $0x12a8] ss:$16 sps:$4 sm:$0xff]  }
 0x21f   :  { %5288 = vmatpush1.bf16.msra.mxu0 %v8173_v15  ;;  %5821 = vmatpush1.bf16.msra.mxu1 %v8176_v32  ;;  %v8265_v15 = vld [vmem:[%s11243_s1 + $0x12c4] ss:$16 sps:$4 sm:$0xff]   ;;  %v8268_v32 = vld [vmem:[%s11243_s1 + $0x12cc] ss:$16 sps:$4 sm:$0xff]  }
 0x220   :  { %5289 = vmatprep.subr.bf16.mxu0 %v8181_v33  ;;  %5822 = vmatprep.subr.bf16.mxu1 %v8184_v26  ;;  %v8263_v33 = vld [vmem:[%s11243_s1 + $0x12c0] ss:$16 sps:$4 sm:$0xff]   ;;  %v8266_v26 = vld [vmem:[%s11243_s1 + $0x12c8] ss:$16 sps:$4 sm:$0xff]  }
 0x223   :  { %5290 = vmatpush1.bf16.msra.mxu0 %v8179_v34  ;;  %5823 = vmatpush1.bf16.msra.mxu1 %v8182_v35  ;;  %v8271_v34 = vld [vmem:[%s11243_s1 + $0x12e4] ss:$16 sps:$4 sm:$0xff]   ;;  %v8274_v35 = vld [vmem:[%s11243_s1 + $0x12ec] ss:$16 sps:$4 sm:$0xff]  }
 0x224   :  { %5291 = vmatprep.subr.bf16.mxu0 %v8187_v37  ;;  %5824 = vmatprep.subr.bf16.mxu1 %v8190_v28  ;;  %v8269_v37 = vld [vmem:[%s11243_s1 + $0x12e0] ss:$16 sps:$4 sm:$0xff]   ;;  %v8272_v28 = vld [vmem:[%s11243_s1 + $0x12e8] ss:$16 sps:$4 sm:$0xff]  }
 0x227   :  { %5292 = vmatpush1.bf16.msra.mxu0 %v8185_v39  ;;  %5825 = vmatpush1.bf16.msra.mxu1 %v8188_v41  ;;  %v8277_v39 = vld [vmem:[%s11243_s1 + $0x1304] ss:$16 sps:$4 sm:$0xff]   ;;  %v8280_v41 = vld [vmem:[%s11243_s1 + $0x130c] ss:$16 sps:$4 sm:$0xff]  }
 0x228   :  { %5293 = vmatprep.subr.bf16.mxu0 %v8193_v43  ;;  %5826 = vmatprep.subr.bf16.mxu1 %v8196_v44  ;;  %v8275_v43 = vld [vmem:[%s11243_s1 + $0x1300] ss:$16 sps:$4 sm:$0xff]   ;;  %v8278_v44 = vld [vmem:[%s11243_s1 + $0x1308] ss:$16 sps:$4 sm:$0xff]  }
 0x22b   :  { %5294 = vmatpush1.bf16.msra.mxu0 %v8191_v45  ;;  %5827 = vmatpush1.bf16.msra.mxu1 %v8194_v46  ;;  %v8283_v45 = vld [vmem:[%s11243_s1 + $0x1324] ss:$16 sps:$4 sm:$0xff]   ;;  %v8286_v46 = vld [vmem:[%s11243_s1 + $0x132c] ss:$16 sps:$4 sm:$0xff]  }
 0x22c   :  { %5295 = vmatprep.subr.bf16.mxu0 %v8199_v47  ;;  %5828 = vmatprep.subr.bf16.mxu1 %v8202_v38  ;;  %v8281_v47 = vld [vmem:[%s11243_s1 + $0x1320] ss:$16 sps:$4 sm:$0xff]   ;;  %v8284_v38 = vld [vmem:[%s11243_s1 + $0x1328] ss:$16 sps:$4 sm:$0xff]  }
 0x22f   :  { %5296 = vmatpush1.bf16.msra.mxu0 %v8197_v48  ;;  %5829 = vmatpush1.bf16.msra.mxu1 %v8200_v50  ;;  %v8289_v48 = vld [vmem:[%s11243_s1 + $0x1344] ss:$16 sps:$4 sm:$0xff]   ;;  %v8292_v50 = vld [vmem:[%s11243_s1 + $0x134c] ss:$16 sps:$4 sm:$0xff]  }
 0x230   :  { %5297 = vmatprep.subr.bf16.mxu0 %v8205_v51  ;;  %5830 = vmatprep.subr.bf16.mxu1 %v8208_v53  ;;  %v8287_v51 = vld [vmem:[%s11243_s1 + $0x1340] ss:$16 sps:$4 sm:$0xff]   ;;  %v8290_v53 = vld [vmem:[%s11243_s1 + $0x1348] ss:$16 sps:$4 sm:$0xff]  }
 0x233   :  { %5298 = vmatpush1.bf16.msra.mxu0 %v8203_v40  ;;  %5831 = vmatpush1.bf16.msra.mxu1 %v8206_v56  ;;  %v8295_v40 = vld [vmem:[%s11243_s1 + $0x1364] ss:$16 sps:$4 sm:$0xff]   ;;  %v8298_v56 = vld [vmem:[%s11243_s1 + $0x136c] ss:$16 sps:$4 sm:$0xff]  }
 0x234   :  { %5299 = vmatprep.subr.bf16.mxu0 %v8211_v58  ;;  %5832 = vmatprep.subr.bf16.mxu1 %v8214_v59  ;;  %v8293_v58 = vld [vmem:[%s11243_s1 + $0x1360] ss:$16 sps:$4 sm:$0xff]   ;;  %v8296_v59 = vld [vmem:[%s11243_s1 + $0x1368] ss:$16 sps:$4 sm:$0xff]  }
 0x237   :  { %5300 = vmatpush1.bf16.msra.mxu0 %v8209_v24  ;;  %5833 = vmatpush1.bf16.msra.mxu1 %v8212_v61  ;;  %v8301_v24 = vld [vmem:[%s11243_s1 + $0x1384] ss:$16 sps:$4 sm:$0xff]   ;;  %v8304_v61 = vld [vmem:[%s11243_s1 + $0x138c] ss:$16 sps:$4 sm:$0xff]  }
 0x238   :  { %5301 = vmatprep.subr.bf16.mxu0 %v8217_v62  ;;  %5834 = vmatprep.subr.bf16.mxu1 %v8220_v63  ;;  %v8299_v62 = vld [vmem:[%s11243_s1 + $0x1380] ss:$16 sps:$4 sm:$0xff]   ;;  %v8302_v63 = vld [vmem:[%s11243_s1 + $0x1388] ss:$16 sps:$4 sm:$0xff]  }
 0x23b   :  { %5302 = vmatpush1.bf16.msra.mxu0 %v8215_v55  ;;  %5835 = vmatpush1.bf16.msra.mxu1 %v8218_v0  ;;  %v8307_v55 = vld [vmem:[%s11243_s1 + $0x13a4] ss:$16 sps:$4 sm:$0xff]   ;;  %v8310_v0 = vld [vmem:[%s11243_s1 + $0x13ac] ss:$16 sps:$4 sm:$0xff]  }
 0x23c   :  { %5303 = vmatprep.subr.bf16.mxu0 %v8223_v1  ;;  %5836 = vmatprep.subr.bf16.mxu1 %v8226_v2  ;;  %v8305_v1 = vld [vmem:[%s11243_s1 + $0x13a0] ss:$16 sps:$4 sm:$0xff]   ;;  %v8308_v2 = vld [vmem:[%s11243_s1 + $0x13a8] ss:$16 sps:$4 sm:$0xff]  }
 0x23f   :  { %5304 = vmatpush1.bf16.msra.mxu0 %v8221_v3  ;;  %5837 = vmatpush1.bf16.msra.mxu1 %v8224_v57  ;;  %v8313_v3 = vld [vmem:[%s11243_s1 + $0x13c4] ss:$16 sps:$4 sm:$0xff]   ;;  %v8316_v57 = vld [vmem:[%s11243_s1 + $0x13cc] ss:$16 sps:$4 sm:$0xff]  }
 0x240   :  { %5314 = vmatprep.subr.bf16.mxu0 %v8229_v5  ;;  %5847 = vmatprep.subr.bf16.mxu1 %v8232_v6  ;;  %v934_v5 = vcombine.high %v10238_v54, %v10238_v54  ;;  %v8311_v6 = vld [vmem:[%s11243_s1 + $0x13c0] ss:$16 sps:$4 sm:$0xff]   ;;  %v8322_v54 = vld [vmem:[%s11243_s1 + $0x13ec] ss:$16 sps:$4 sm:$0xff]  }
 0x242   :  { %5306 = vmatmul.mubr.bf16.vlgmr.msra.gmra.mrb[0].mxu0 %v10471_v7  ;;  %5839 = vmatmul.mubr.bf16.vlgmr.msra.gmra.mrb[0].mxu1 %v10471_v7 }
 0x243   :  { %5315 = vmatpush1.bf16.msra.mxu0 %v8227_v8  ;;  %5848 = vmatpush1.bf16.msra.mxu1 %v8230_v9  ;;  %v8314_v8 = vld [vmem:[%s11243_s1 + $0x13c8] ss:$16 sps:$4 sm:$0xff]   ;;  %v8319_v9 = vld [vmem:[%s11243_s1 + $0x13e4] ss:$16 sps:$4 sm:$0xff]  }
 0x244   :  { %5316 = vmatprep.subr.bf16.mxu0 %v8235_v10  ;;  %5849 = vmatprep.subr.bf16.mxu1 %v8238_v60  ;;  %v10660_v10 = vrot.slane %v934_v5, %v8767_v49  ;;  %v8317_v60 = vld [vmem:[%s11243_s1 + $0x13e0] ss:$16 sps:$4 sm:$0xff]  }
 0x245   :  { %5346 = vmatprep.mubr.bf16.mxu0 %v981_v11  ;;  %5879 = vmatprep.mubr.bf16.mxu1 %v981_v11  ;;  %v8320_v11 = vld [vmem:[%s11243_s1 + $0x13e8] ss:$16 sps:$4 sm:$0xff]   ;;  %v8395_v5 = vld [vmem:[%s11243_s1 + $0x1580] ss:$16 sps:$4 sm:$0xff]  }
 0x247   :  { %5317 = vmatpush1.bf16.msra.mxu0 %v8233_v12  ;;  %5850 = vmatpush1.bf16.msra.mxu1 %v8236_v14  ;;  %v8325_v12 = vld [vmem:[%s11243_s1 + $0x1404] ss:$16 sps:$4 sm:$0xff]   ;;  %v8328_v14 = vld [vmem:[%s11243_s1 + $0x140c] ss:$16 sps:$4 sm:$0xff]  }
 0x248   :  { %5318 = vmatprep.subr.bf16.mxu0 %v8241_v4  ;;  %5851 = vmatprep.subr.bf16.mxu1 %v8244_v52  ;;  %v950_v4 = vcombine.high %v10660_v10, %v10660_v10  ;;  %v979_v52 = vcombine.high %v10471_v7, %v10471_v7  ;;  %v8334_v7 = vld [vmem:[%s11243_s1 + $0x142c] ss:$16 sps:$4 sm:$0xff]  }
 0x24b   :  { %5319 = vmatpush1.bf16.msra.mxu0 %v8239_v16  ;;  %5852 = vmatpush1.bf16.msra.mxu1 %v8242_v17  ;;  %v8323_v16 = vld [vmem:[%s11243_s1 + $0x1400] ss:$16 sps:$4 sm:$0xff]   ;;  %v8326_v17 = vld [vmem:[%s11243_s1 + $0x1408] ss:$16 sps:$4 sm:$0xff]  }
 0x24c   :  { %5320 = vmatprep.subr.bf16.mxu0 %v8247_v18  ;;  %5853 = vmatprep.subr.bf16.mxu1 %v8250_v19  ;;  %v8331_v18 = vld [vmem:[%s11243_s1 + $0x1424] ss:$16 sps:$4 sm:$0xff]   ;;  %v10691_v19 = vrot.slane %v950_v4, %v8767_v49  ;;  %v8410_v4 = vld [vmem:[%s11243_s1 + $0x15c8] ss:$16 sps:$4 sm:$0xff]  }
 0x24f   :  { %5321 = vmatpush1.bf16.msra.mxu0 %v8245_v20  ;;  %5854 = vmatpush1.bf16.msra.mxu1 %v8248_v21  ;;  %v8329_v20 = vld [vmem:[%s11243_s1 + $0x1420] ss:$16 sps:$4 sm:$0xff]   ;;  %v8332_v21 = vld [vmem:[%s11243_s1 + $0x1428] ss:$16 sps:$4 sm:$0xff]  }
 0x250   :  { %5322 = vmatprep.subr.bf16.mxu0 %v8253_v22  ;;  %5855 = vmatprep.subr.bf16.mxu1 %v8256_v23  ;;  %v8337_v22 = vld [vmem:[%s11243_s1 + $0x1444] ss:$16 sps:$4 sm:$0xff]   ;;  %v8340_v23 = vld [vmem:[%s11243_s1 + $0x144c] ss:$16 sps:$4 sm:$0xff]  }
 0x253   :  { %5323 = vmatpush1.bf16.msra.mxu0 %v8251_v25  ;;  %5856 = vmatpush1.bf16.msra.mxu1 %v8254_v13  ;;  %v8335_v25 = vld [vmem:[%s11243_s1 + $0x1440] ss:$16 sps:$4 sm:$0xff]   ;;  %v8338_v13 = vld [vmem:[%s11243_s1 + $0x1448] ss:$16 sps:$4 sm:$0xff]  }
 0x254   :  { %5324 = vmatprep.subr.bf16.mxu0 %v8259_v27  ;;  %5857 = vmatprep.subr.bf16.mxu1 %v8262_v29  ;;  %v8343_v27 = vld [vmem:[%s11243_s1 + $0x1464] ss:$16 sps:$4 sm:$0xff]   ;;  %v8346_v29 = vld [vmem:[%s11243_s1 + $0x146c] ss:$16 sps:$4 sm:$0xff]  }
 0x257   :  { %5325 = vmatpush1.bf16.msra.mxu0 %v8257_v30  ;;  %5858 = vmatpush1.bf16.msra.mxu1 %v8260_v31  ;;  %v8341_v30 = vld [vmem:[%s11243_s1 + $0x1460] ss:$16 sps:$4 sm:$0xff]   ;;  %v8344_v31 = vld [vmem:[%s11243_s1 + $0x1468] ss:$16 sps:$4 sm:$0xff]  }
 0x258   :  { %5326 = vmatprep.subr.bf16.mxu0 %v8265_v15  ;;  %5859 = vmatprep.subr.bf16.mxu1 %v8268_v32  ;;  %v8349_v15 = vld [vmem:[%s11243_s1 + $0x1484] ss:$16 sps:$4 sm:$0xff]   ;;  %v8352_v32 = vld [vmem:[%s11243_s1 + $0x148c] ss:$16 sps:$4 sm:$0xff]  }
 0x25b   :  { %5327 = vmatpush1.bf16.msra.mxu0 %v8263_v33  ;;  %5860 = vmatpush1.bf16.msra.mxu1 %v8266_v26  ;;  %v8347_v33 = vld [vmem:[%s11243_s1 + $0x1480] ss:$16 sps:$4 sm:$0xff]   ;;  %v8350_v26 = vld [vmem:[%s11243_s1 + $0x1488] ss:$16 sps:$4 sm:$0xff]  }
 0x25c   :  { %5328 = vmatprep.subr.bf16.mxu0 %v8271_v34  ;;  %5861 = vmatprep.subr.bf16.mxu1 %v8274_v35  ;;  %v8355_v34 = vld [vmem:[%s11243_s1 + $0x14a4] ss:$16 sps:$4 sm:$0xff]   ;;  %v8358_v35 = vld [vmem:[%s11243_s1 + $0x14ac] ss:$16 sps:$4 sm:$0xff]  }
 0x25f   :  { %5329 = vmatpush1.bf16.msra.mxu0 %v8269_v37  ;;  %5862 = vmatpush1.bf16.msra.mxu1 %v8272_v28  ;;  %v8353_v37 = vld [vmem:[%s11243_s1 + $0x14a0] ss:$16 sps:$4 sm:$0xff]   ;;  %v8356_v28 = vld [vmem:[%s11243_s1 + $0x14a8] ss:$16 sps:$4 sm:$0xff]  }
 0x260   :  { %5330 = vmatprep.subr.bf16.mxu0 %v8277_v39  ;;  %5863 = vmatprep.subr.bf16.mxu1 %v8280_v41  ;;  %v8361_v39 = vld [vmem:[%s11243_s1 + $0x14c4] ss:$16 sps:$4 sm:$0xff]   ;;  %v8364_v41 = vld [vmem:[%s11243_s1 + $0x14cc] ss:$16 sps:$4 sm:$0xff]  }
 0x263   :  { %5331 = vmatpush1.bf16.msra.mxu0 %v8275_v43  ;;  %5864 = vmatpush1.bf16.msra.mxu1 %v8278_v44  ;;  %v8359_v43 = vld [vmem:[%s11243_s1 + $0x14c0] ss:$16 sps:$4 sm:$0xff]   ;;  %v8362_v44 = vld [vmem:[%s11243_s1 + $0x14c8] ss:$16 sps:$4 sm:$0xff]  }
 0x264   :  { %5332 = vmatprep.subr.bf16.mxu0 %v8283_v45  ;;  %5865 = vmatprep.subr.bf16.mxu1 %v8286_v46  ;;  %v8367_v45 = vld [vmem:[%s11243_s1 + $0x14e4] ss:$16 sps:$4 sm:$0xff]   ;;  %v8370_v46 = vld [vmem:[%s11243_s1 + $0x14ec] ss:$16 sps:$4 sm:$0xff]  }
 0x267   :  { %5333 = vmatpush1.bf16.msra.mxu0 %v8281_v47  ;;  %5866 = vmatpush1.bf16.msra.mxu1 %v8284_v38  ;;  %v8365_v47 = vld [vmem:[%s11243_s1 + $0x14e0] ss:$16 sps:$4 sm:$0xff]   ;;  %v8368_v38 = vld [vmem:[%s11243_s1 + $0x14e8] ss:$16 sps:$4 sm:$0xff]  }
 0x268   :  { %5334 = vmatprep.subr.bf16.mxu0 %v8289_v48  ;;  %5867 = vmatprep.subr.bf16.mxu1 %v8292_v50  ;;  %v8373_v48 = vld [vmem:[%s11243_s1 + $0x1504] ss:$16 sps:$4 sm:$0xff]   ;;  %v8376_v50 = vld [vmem:[%s11243_s1 + $0x150c] ss:$16 sps:$4 sm:$0xff]  }
 0x26b   :  { %5335 = vmatpush1.bf16.msra.mxu0 %v8287_v51  ;;  %5868 = vmatpush1.bf16.msra.mxu1 %v8290_v53  ;;  %v8371_v51 = vld [vmem:[%s11243_s1 + $0x1500] ss:$16 sps:$4 sm:$0xff]   ;;  %v8374_v53 = vld [vmem:[%s11243_s1 + $0x1508] ss:$16 sps:$4 sm:$0xff]  }
 0x26c   :  { %5336 = vmatprep.subr.bf16.mxu0 %v8295_v40  ;;  %5869 = vmatprep.subr.bf16.mxu1 %v8298_v56  ;;  %v8379_v40 = vld [vmem:[%s11243_s1 + $0x1524] ss:$16 sps:$4 sm:$0xff]   ;;  %v8382_v56 = vld [vmem:[%s11243_s1 + $0x152c] ss:$16 sps:$4 sm:$0xff]  }
 0x26f   :  { %5337 = vmatpush1.bf16.msra.mxu0 %v8293_v58  ;;  %5870 = vmatpush1.bf16.msra.mxu1 %v8296_v59  ;;  %v8377_v58 = vld [vmem:[%s11243_s1 + $0x1520] ss:$16 sps:$4 sm:$0xff]   ;;  %v8380_v59 = vld [vmem:[%s11243_s1 + $0x1528] ss:$16 sps:$4 sm:$0xff]  }
 0x270   :  { %5338 = vmatprep.subr.bf16.mxu0 %v8301_v24  ;;  %5871 = vmatprep.subr.bf16.mxu1 %v8304_v61  ;;  %v8385_v24 = vld [vmem:[%s11243_s1 + $0x1544] ss:$16 sps:$4 sm:$0xff]   ;;  %v8388_v61 = vld [vmem:[%s11243_s1 + $0x154c] ss:$16 sps:$4 sm:$0xff]  }
 0x273   :  { %5339 = vmatpush1.bf16.msra.mxu0 %v8299_v62  ;;  %5872 = vmatpush1.bf16.msra.mxu1 %v8302_v63  ;;  %v8383_v62 = vld [vmem:[%s11243_s1 + $0x1540] ss:$16 sps:$4 sm:$0xff]   ;;  %v8386_v63 = vld [vmem:[%s11243_s1 + $0x1548] ss:$16 sps:$4 sm:$0xff]  }
 0x274   :  { %5340 = vmatprep.subr.bf16.mxu0 %v8307_v55  ;;  %5873 = vmatprep.subr.bf16.mxu1 %v8310_v0  ;;  %v8391_v55 = vld [vmem:[%s11243_s1 + $0x1564] ss:$16 sps:$4 sm:$0xff]   ;;  %v8394_v0 = vld [vmem:[%s11243_s1 + $0x156c] ss:$16 sps:$4 sm:$0xff]  }
 0x277   :  { %5341 = vmatpush1.bf16.msra.mxu0 %v8305_v1  ;;  %5874 = vmatpush1.bf16.msra.mxu1 %v8308_v2  ;;  %v8389_v1 = vld [vmem:[%s11243_s1 + $0x1560] ss:$16 sps:$4 sm:$0xff]   ;;  %v8392_v2 = vld [vmem:[%s11243_s1 + $0x1568] ss:$16 sps:$4 sm:$0xff]  }
 0x278   :  { %5342 = vmatprep.subr.bf16.mxu0 %v8313_v3  ;;  %5875 = vmatprep.subr.bf16.mxu1 %v8316_v57  ;;  %v8397_v3 = vld [vmem:[%s11243_s1 + $0x1584] ss:$16 sps:$4 sm:$0xff]   ;;  %v8400_v57 = vld [vmem:[%s11243_s1 + $0x158c] ss:$16 sps:$4 sm:$0xff]  }
 0x27b   :  { %5343 = vmatpush1.bf16.msra.mxu0 %v8311_v6  ;;  %5876 = vmatpush1.bf16.msra.mxu1 %v8314_v8  ;;  %v8398_v6 = vld [vmem:[%s11243_s1 + $0x1588] ss:$16 sps:$4 sm:$0xff]   ;;  %v8403_v8 = vld [vmem:[%s11243_s1 + $0x15a4] ss:$16 sps:$4 sm:$0xff]  }
 0x27c   :  { %5344 = vmatprep.subr.bf16.mxu0 %v8319_v9  ;;  %5877 = vmatprep.subr.bf16.mxu1 %v8322_v54  ;;  %v8406_v9 = vld [vmem:[%s11243_s1 + $0x15ac] ss:$16 sps:$4 sm:$0xff]   ;;  %v8401_v54 = vld [vmem:[%s11243_s1 + $0x15a0] ss:$16 sps:$4 sm:$0xff]  }
 0x27f   :  { %5345 = vmatpush1.bf16.msra.mxu0 %v8317_v60  ;;  %5878 = vmatpush1.bf16.msra.mxu1 %v8320_v11  ;;  %v8404_v60 = vld [vmem:[%s11243_s1 + $0x15a8] ss:$16 sps:$4 sm:$0xff]   ;;  %v8409_v11 = vld [vmem:[%s11243_s1 + $0x15c4] ss:$16 sps:$4 sm:$0xff]  }
 0x280   :  { %5355 = vmatprep.subr.bf16.mxu0 %v8325_v12  ;;  %5888 = vmatprep.subr.bf16.mxu1 %v8328_v14  ;;  %v8412_v12 = vld [vmem:[%s11243_s1 + $0x15cc] ss:$16 sps:$4 sm:$0xff]   ;;  %v8407_v14 = vld [vmem:[%s11243_s1 + $0x15c0] ss:$16 sps:$4 sm:$0xff]  }
 0x282   :  { %5347 = vmatmul.mubr.bf16.vlgmr.msra.gmra.mrb[0].mxu0 %v979_v52  ;;  %5880 = vmatmul.mubr.bf16.vlgmr.msra.gmra.mrb[0].mxu1 %v979_v52  ;;  %v8415_v52 = vld [vmem:[%s11243_s1 + $0x15e4] ss:$16 sps:$4 sm:$0xff]  }
 0x283   :  { %5356 = vmatpush1.bf16.msra.mxu0 %v8323_v16  ;;  %5889 = vmatpush1.bf16.msra.mxu1 %v8326_v17  ;;  %v8418_v16 = vld [vmem:[%s11243_s1 + $0x15ec] ss:$16 sps:$4 sm:$0xff]   ;;  %v8413_v17 = vld [vmem:[%s11243_s1 + $0x15e0] ss:$16 sps:$4 sm:$0xff]  }
 0x284   :  { %5357 = vmatprep.subr.bf16.mxu0 %v8331_v18  ;;  %5890 = vmatprep.subr.bf16.mxu1 %v8334_v7  ;;  %v8416_v18 = vld [vmem:[%s11243_s1 + $0x15e8] ss:$16 sps:$4 sm:$0xff]   ;;  %v8422_v7 = vld [vmem:[%s11243_s1 + $0x1604] ss:$16 sps:$4 sm:$0xff]  }
 0x285   :  { %5387 = vmatprep.mubr.bf16.mxu0 %v10691_v19  ;;  %5920 = vmatprep.mubr.bf16.mxu1 %v10691_v19 }
 0x287   :  { %5358 = vmatpush1.bf16.msra.mxu0 %v8329_v20  ;;  %5891 = vmatpush1.bf16.msra.mxu1 %v8332_v21  ;;  %v8425_v20 = vld [vmem:[%s11243_s1 + $0x160c] ss:$16 sps:$4 sm:$0xff]   ;;  %v10877_v21 = vrot.slane %v10660_v10, %v8767_v49 }
 0x288   :  { %5359 = vmatprep.subr.bf16.mxu0 %v8337_v22  ;;  %5892 = vmatprep.subr.bf16.mxu1 %v8340_v23  ;;  %v8420_v22 = vld [vmem:[%s11243_s1 + $0x1600] ss:$16 sps:$4 sm:$0xff]   ;;  %v8423_v23 = vld [vmem:[%s11243_s1 + $0x1608] ss:$16 sps:$4 sm:$0xff]   ;;  %v8431_v10 = vld [vmem:[%s11243_s1 + $0x162c] ss:$16 sps:$4 sm:$0xff]  }
 0x28b   :  { %5360 = vmatpush1.bf16.msra.mxu0 %v8335_v25  ;;  %5893 = vmatpush1.bf16.msra.mxu1 %v8338_v13  ;;  %v8428_v25 = vld [vmem:[%s11243_s1 + $0x1624] ss:$16 sps:$4 sm:$0xff]   ;;  %v982_v13 = vcombine.high %v10691_v19, %v10691_v19 }
 0x28c   :  { %5361 = vmatprep.subr.bf16.mxu0 %v8343_v27  ;;  %5894 = vmatprep.subr.bf16.mxu1 %v8346_v29  ;;  %v8426_v27 = vld [vmem:[%s11243_s1 + $0x1620] ss:$16 sps:$4 sm:$0xff]   ;;  %v8429_v29 = vld [vmem:[%s11243_s1 + $0x1628] ss:$16 sps:$4 sm:$0xff]   ;;  %v8434_v19 = vld [vmem:[%s11243_s1 + $0x1644] ss:$16 sps:$4 sm:$0xff]  }
 0x28f   :  { %5362 = vmatpush1.bf16.msra.mxu0 %v8341_v30  ;;  %5895 = vmatpush1.bf16.msra.mxu1 %v8344_v31  ;;  %v8437_v30 = vld [vmem:[%s11243_s1 + $0x164c] ss:$16 sps:$4 sm:$0xff]   ;;  %v8432_v31 = vld [vmem:[%s11243_s1 + $0x1640] ss:$16 sps:$4 sm:$0xff]  }
 0x290   :  { %5363 = vmatprep.subr.bf16.mxu0 %v8349_v15  ;;  %5896 = vmatprep.subr.bf16.mxu1 %v8352_v32  ;;  %v8435_v15 = vld [vmem:[%s11243_s1 + $0x1648] ss:$16 sps:$4 sm:$0xff]   ;;  %v8440_v32 = vld [vmem:[%s11243_s1 + $0x1664] ss:$16 sps:$4 sm:$0xff]  }
 0x293   :  { %5364 = vmatpush1.bf16.msra.mxu0 %v8347_v33  ;;  %5897 = vmatpush1.bf16.msra.mxu1 %v8350_v26  ;;  %v8443_v33 = vld [vmem:[%s11243_s1 + $0x166c] ss:$16 sps:$4 sm:$0xff]   ;;  %v8438_v26 = vld [vmem:[%s11243_s1 + $0x1660] ss:$16 sps:$4 sm:$0xff]  }
 0x294   :  { %5365 = vmatprep.subr.bf16.mxu0 %v8355_v34  ;;  %5898 = vmatprep.subr.bf16.mxu1 %v8358_v35  ;;  %v8441_v34 = vld [vmem:[%s11243_s1 + $0x1668] ss:$16 sps:$4 sm:$0xff]   ;;  %v8446_v35 = vld [vmem:[%s11243_s1 + $0x1684] ss:$16 sps:$4 sm:$0xff]  }
 0x297   :  { %5366 = vmatpush1.bf16.msra.mxu0 %v8353_v37  ;;  %5899 = vmatpush1.bf16.msra.mxu1 %v8356_v28  ;;  %v8449_v37 = vld [vmem:[%s11243_s1 + $0x168c] ss:$16 sps:$4 sm:$0xff]   ;;  %v8444_v28 = vld [vmem:[%s11243_s1 + $0x1680] ss:$16 sps:$4 sm:$0xff]  }
 0x298   :  { %5367 = vmatprep.subr.bf16.mxu0 %v8361_v39  ;;  %5900 = vmatprep.subr.bf16.mxu1 %v8364_v41  ;;  %v8447_v39 = vld [vmem:[%s11243_s1 + $0x1688] ss:$16 sps:$4 sm:$0xff]   ;;  %v8452_v41 = vld [vmem:[%s11243_s1 + $0x16a4] ss:$16 sps:$4 sm:$0xff]  }
 0x29b   :  { %5368 = vmatpush1.bf16.msra.mxu0 %v8359_v43  ;;  %5901 = vmatpush1.bf16.msra.mxu1 %v8362_v44  ;;  %v8455_v43 = vld [vmem:[%s11243_s1 + $0x16ac] ss:$16 sps:$4 sm:$0xff]   ;;  %v8450_v44 = vld [vmem:[%s11243_s1 + $0x16a0] ss:$16 sps:$4 sm:$0xff]  }
 0x29c   :  { %5369 = vmatprep.subr.bf16.mxu0 %v8367_v45  ;;  %5902 = vmatprep.subr.bf16.mxu1 %v8370_v46  ;;  %v8453_v45 = vld [vmem:[%s11243_s1 + $0x16a8] ss:$16 sps:$4 sm:$0xff]   ;;  %v8458_v46 = vld [vmem:[%s11243_s1 + $0x16c4] ss:$16 sps:$4 sm:$0xff]  }
 0x29f   :  { %5370 = vmatpush1.bf16.msra.mxu0 %v8365_v47  ;;  %5903 = vmatpush1.bf16.msra.mxu1 %v8368_v38  ;;  %v8461_v47 = vld [vmem:[%s11243_s1 + $0x16cc] ss:$16 sps:$4 sm:$0xff]   ;;  %v8456_v38 = vld [vmem:[%s11243_s1 + $0x16c0] ss:$16 sps:$4 sm:$0xff]  }
 0x2a0   :  { %5371 = vmatprep.subr.bf16.mxu0 %v8373_v48  ;;  %5904 = vmatprep.subr.bf16.mxu1 %v8376_v50  ;;  %v8459_v48 = vld [vmem:[%s11243_s1 + $0x16c8] ss:$16 sps:$4 sm:$0xff]   ;;  %v8464_v50 = vld [vmem:[%s11243_s1 + $0x16e4] ss:$16 sps:$4 sm:$0xff]  }
 0x2a3   :  { %5372 = vmatpush1.bf16.msra.mxu0 %v8371_v51  ;;  %5905 = vmatpush1.bf16.msra.mxu1 %v8374_v53  ;;  %v8467_v51 = vld [vmem:[%s11243_s1 + $0x16ec] ss:$16 sps:$4 sm:$0xff]   ;;  %v8462_v53 = vld [vmem:[%s11243_s1 + $0x16e0] ss:$16 sps:$4 sm:$0xff]  }
 0x2a4   :  { %5373 = vmatprep.subr.bf16.mxu0 %v8379_v40  ;;  %5906 = vmatprep.subr.bf16.mxu1 %v8382_v56  ;;  %v8465_v40 = vld [vmem:[%s11243_s1 + $0x16e8] ss:$16 sps:$4 sm:$0xff]   ;;  %v8470_v56 = vld [vmem:[%s11243_s1 + $0x1704] ss:$16 sps:$4 sm:$0xff]  }
 0x2a7   :  { %5374 = vmatpush1.bf16.msra.mxu0 %v8377_v58  ;;  %5907 = vmatpush1.bf16.msra.mxu1 %v8380_v59  ;;  %v8473_v58 = vld [vmem:[%s11243_s1 + $0x170c] ss:$16 sps:$4 sm:$0xff]   ;;  %v8468_v59 = vld [vmem:[%s11243_s1 + $0x1700] ss:$16 sps:$4 sm:$0xff]  }
 0x2a8   :  { %5375 = vmatprep.subr.bf16.mxu0 %v8385_v24  ;;  %5908 = vmatprep.subr.bf16.mxu1 %v8388_v61  ;;  %v8471_v24 = vld [vmem:[%s11243_s1 + $0x1708] ss:$16 sps:$4 sm:$0xff]   ;;  %v8476_v61 = vld [vmem:[%s11243_s1 + $0x1724] ss:$16 sps:$4 sm:$0xff]  }
 0x2ab   :  { %5376 = vmatpush1.bf16.msra.mxu0 %v8383_v62  ;;  %5909 = vmatpush1.bf16.msra.mxu1 %v8386_v63  ;;  %v8479_v62 = vld [vmem:[%s11243_s1 + $0x172c] ss:$16 sps:$4 sm:$0xff]   ;;  %v8474_v63 = vld [vmem:[%s11243_s1 + $0x1720] ss:$16 sps:$4 sm:$0xff]  }
 0x2ac   :  { %5377 = vmatprep.subr.bf16.mxu0 %v8391_v55  ;;  %5910 = vmatprep.subr.bf16.mxu1 %v8394_v0  ;;  %v8477_v55 = vld [vmem:[%s11243_s1 + $0x1728] ss:$16 sps:$4 sm:$0xff]   ;;  %v8482_v0 = vld [vmem:[%s11243_s1 + $0x1744] ss:$16 sps:$4 sm:$0xff]  }
 0x2af   :  { %5378 = vmatpush1.bf16.msra.mxu0 %v8389_v1  ;;  %5911 = vmatpush1.bf16.msra.mxu1 %v8392_v2  ;;  %v8485_v1 = vld [vmem:[%s11243_s1 + $0x174c] ss:$16 sps:$4 sm:$0xff]   ;;  %v8480_v2 = vld [vmem:[%s11243_s1 + $0x1740] ss:$16 sps:$4 sm:$0xff]  }
 0x2b0   :  { %5379 = vmatprep.subr.bf16.mxu0 %v8397_v3  ;;  %5912 = vmatprep.subr.bf16.mxu1 %v8400_v57  ;;  %v8483_v3 = vld [vmem:[%s11243_s1 + $0x1748] ss:$16 sps:$4 sm:$0xff]   ;;  %v8488_v57 = vld [vmem:[%s11243_s1 + $0x1764] ss:$16 sps:$4 sm:$0xff]  }
 0x2b3   :  { %5380 = vmatpush1.bf16.msra.mxu0 %v8395_v5  ;;  %5913 = vmatpush1.bf16.msra.mxu1 %v8398_v6  ;;  %v8491_v5 = vld [vmem:[%s11243_s1 + $0x176c] ss:$16 sps:$4 sm:$0xff]   ;;  %v8486_v6 = vld [vmem:[%s11243_s1 + $0x1760] ss:$16 sps:$4 sm:$0xff]  }
 0x2b4   :  { %5381 = vmatprep.subr.bf16.mxu0 %v8403_v8  ;;  %5914 = vmatprep.subr.bf16.mxu1 %v8406_v9  ;;  %v8489_v8 = vld [vmem:[%s11243_s1 + $0x1768] ss:$16 sps:$4 sm:$0xff]   ;;  %v8494_v9 = vld [vmem:[%s11243_s1 + $0x1784] ss:$16 sps:$4 sm:$0xff]  }
 0x2b7   :  { %5382 = vmatpush1.bf16.msra.mxu0 %v8401_v54  ;;  %5915 = vmatpush1.bf16.msra.mxu1 %v8404_v60  ;;  %v8497_v54 = vld [vmem:[%s11243_s1 + $0x178c] ss:$16 sps:$4 sm:$0xff]   ;;  %v8492_v60 = vld [vmem:[%s11243_s1 + $0x1780] ss:$16 sps:$4 sm:$0xff]  }
 0x2b8   :  { %5383 = vmatprep.subr.bf16.mxu0 %v8409_v11  ;;  %5916 = vmatprep.subr.bf16.mxu1 %v8412_v12  ;;  %v8495_v11 = vld [vmem:[%s11243_s1 + $0x1788] ss:$16 sps:$4 sm:$0xff]   ;;  %v8500_v12 = vld [vmem:[%s11243_s1 + $0x17a4] ss:$16 sps:$4 sm:$0xff]  }
 0x2bb   :  { %5384 = vmatpush1.bf16.msra.mxu0 %v8407_v14  ;;  %5917 = vmatpush1.bf16.msra.mxu1 %v8410_v4  ;;  %v8503_v14 = vld [vmem:[%s11243_s1 + $0x17ac] ss:$16 sps:$4 sm:$0xff]   ;;  %v8498_v4 = vld [vmem:[%s11243_s1 + $0x17a0] ss:$16 sps:$4 sm:$0xff]  }
 0x2bc   :  { %5385 = vmatprep.subr.bf16.mxu0 %v8415_v52  ;;  %5918 = vmatprep.subr.bf16.mxu1 %v8418_v16  ;;  %v8501_v52 = vld [vmem:[%s11243_s1 + $0x17a8] ss:$16 sps:$4 sm:$0xff]   ;;  %v8506_v16 = vld [vmem:[%s11243_s1 + $0x17c4] ss:$16 sps:$4 sm:$0xff]  }
 0x2bf   :  { %5386 = vmatpush1.bf16.msra.mxu0 %v8413_v17  ;;  %5919 = vmatpush1.bf16.msra.mxu1 %v8416_v18  ;;  %v8509_v17 = vld [vmem:[%s11243_s1 + $0x17cc] ss:$16 sps:$4 sm:$0xff]   ;;  %v8504_v18 = vld [vmem:[%s11243_s1 + $0x17c0] ss:$16 sps:$4 sm:$0xff]  }
 0x2c0   :  { %5396 = vmatprep.subr.bf16.mxu0 %v8422_v7  ;;  %5929 = vmatprep.subr.bf16.mxu1 %v8425_v20  ;;  %v8507_v7 = vld [vmem:[%s11243_s1 + $0x17c8] ss:$16 sps:$4 sm:$0xff]   ;;  %v8512_v20 = vld [vmem:[%s11243_s1 + $0x17e4] ss:$16 sps:$4 sm:$0xff]  }
 0x2c2   :  { %5388 = vmatmul.mubr.bf16.vlgmr.msra.gmra.mrb[0].mxu0 %v10877_v21  ;;  %5921 = vmatmul.mubr.bf16.vlgmr.msra.gmra.mrb[0].mxu1 %v10877_v21 }
 0x2c3   :  { %5397 = vmatpush1.bf16.msra.mxu0 %v8420_v22  ;;  %5930 = vmatpush1.bf16.msra.mxu1 %v8423_v23  ;;  %v8515_v22 = vld [vmem:[%s11243_s1 + $0x17ec] ss:$16 sps:$4 sm:$0xff]   ;;  %v8510_v23 = vld [vmem:[%s11243_s1 + $0x17e0] ss:$16 sps:$4 sm:$0xff]  }
 0x2c4   :  { %5398 = vmatprep.subr.bf16.mxu0 %v8428_v25  ;;  %5931 = vmatprep.subr.bf16.mxu1 %v8431_v10  ;;  %v8513_v25 = vld [vmem:[%s11243_s1 + $0x17e8] ss:$16 sps:$4 sm:$0xff]   ;;  %v8518_v10 = vld [vmem:[%s11243_s1 + $0x1804] ss:$16 sps:$4 sm:$0xff]  }
 0x2c5   :  { %5428 = vmatprep.mubr.bf16.mxu0 %v982_v13  ;;  %5961 = vmatprep.mubr.bf16.mxu1 %v982_v13  ;;  %v8521_v13 = vld [vmem:[%s11243_s1 + $0x180c] ss:$16 sps:$4 sm:$0xff]  }
 0x2c7   :  { %5399 = vmatpush1.bf16.msra.mxu0 %v8426_v27  ;;  %5932 = vmatpush1.bf16.msra.mxu1 %v8429_v29  ;;  %v980_v27 = vcombine.high %v10877_v21, %v10877_v21  ;;  %v8516_v29 = vld [vmem:[%s11243_s1 + $0x1800] ss:$16 sps:$4 sm:$0xff]   ;;  %v8527_v21 = vld [vmem:[%s11243_s1 + $0x182c] ss:$16 sps:$4 sm:$0xff]  }
 0x2c8   :  { %5400 = vmatprep.subr.bf16.mxu0 %v8434_v19  ;;  %5933 = vmatprep.subr.bf16.mxu1 %v8437_v30  ;;  %v8519_v19 = vld [vmem:[%s11243_s1 + $0x1808] ss:$16 sps:$4 sm:$0xff]   ;;  %v8524_v30 = vld [vmem:[%s11243_s1 + $0x1824] ss:$16 sps:$4 sm:$0xff]  }
 0x2cb   :  { %5401 = vmatpush1.bf16.msra.mxu0 %v8432_v31  ;;  %5934 = vmatpush1.bf16.msra.mxu1 %v8435_v15  ;;  %v8522_v31 = vld [vmem:[%s11243_s1 + $0x1820] ss:$16 sps:$4 sm:$0xff]   ;;  %v8525_v15 = vld [vmem:[%s11243_s1 + $0x1828] ss:$16 sps:$4 sm:$0xff]  }
 0x2cc   :  { %5402 = vmatprep.subr.bf16.mxu0 %v8440_v32  ;;  %5935 = vmatprep.subr.bf16.mxu1 %v8443_v33  ;;  %v8530_v32 = vld [vmem:[%s11243_s1 + $0x1844] ss:$16 sps:$4 sm:$0xff]   ;;  %v8533_v33 = vld [vmem:[%s11243_s1 + $0x184c] ss:$16 sps:$4 sm:$0xff]  }
 0x2cf   :  { %5403 = vmatpush1.bf16.msra.mxu0 %v8438_v26  ;;  %5936 = vmatpush1.bf16.msra.mxu1 %v8441_v34  ;;  %v8599_v26 = vmov 0   ;;  %v8528_v34 = vld [vmem:[%s11243_s1 + $0x1840] ss:$16 sps:$4 sm:$0xff]  }
 0x2d0   :  { %5404 = vmatprep.subr.bf16.mxu0 %v8446_v35  ;;  %5937 = vmatprep.subr.bf16.mxu1 %v8449_v37  ;;  %v8531_v35 = vld [vmem:[%s11243_s1 + $0x1848] ss:$16 sps:$4 sm:$0xff]   ;;  %v8536_v37 = vld [vmem:[%s11243_s1 + $0x1864] ss:$16 sps:$4 sm:$0xff]  }
 0x2d3   :  { %5405 = vmatpush1.bf16.msra.mxu0 %v8444_v28  ;;  %5938 = vmatpush1.bf16.msra.mxu1 %v8447_v39  ;;  %v8539_v28 = vld [vmem:[%s11243_s1 + $0x186c] ss:$16 sps:$4 sm:$0xff]   ;;  %v8534_v39 = vld [vmem:[%s11243_s1 + $0x1860] ss:$16 sps:$4 sm:$0xff]  }
 0x2d4   :  { %5406 = vmatprep.subr.bf16.mxu0 %v8452_v41  ;;  %5939 = vmatprep.subr.bf16.mxu1 %v8455_v43  ;;  %v8537_v41 = vld [vmem:[%s11243_s1 + $0x1868] ss:$16 sps:$4 sm:$0xff]  }
 0x2d5   :  { %v6394_v43 = vld.sshfl [vmem:[%s11242_s0 + $0x18] sm:$0x1 pattern:$0x75316420] }
 0x2d7   :  { %5407 = vmatpush1.bf16.msra.mxu0 %v8450_v44  ;;  %5940 = vmatpush1.bf16.msra.mxu1 %v8453_v45  ;;  %v8540_v44 = vld [vmem:[%s11245_s3 + $0x40] sm:$0xff]  }
 0x2d8   :  { %5408 = vmatprep.subr.bf16.mxu0 %v8458_v46  ;;  %5941 = vmatprep.subr.bf16.mxu1 %v8461_v47  ;;  %v8541_v45 = vld [vmem:[%s11245_s3 + $0xc0] sm:$0xff]   ;;  %v996_v46 = vrot.slane %v6394_v43, %v8767_v49  ;;  %v8545_v49 = vld [vmem:[%s11245_s3 + $0xc8] sm:$0xff]  }
 0x2d9   :  { %v8542_v47 = vld [vmem:[%s11245_s3] sm:$0xff]  }
 0x2db   :  { %5409 = vmatpush1.bf16.msra.mxu0 %v8456_v38  ;;  %5942 = vmatpush1.bf16.msra.mxu1 %v8459_v48  ;;  %v8543_v38 = vld [vmem:[%s11245_s3 + $0x80] sm:$0xff]   ;;  %v8544_v48 = vld [vmem:[%s11245_s3 + $0x48] sm:$0xff]  }
 0x2dc   :  { %5410 = vmatprep.subr.bf16.mxu0 %v8464_v50  ;;  %5943 = vmatprep.subr.bf16.mxu1 %v8467_v51  ;;  %v8546_v50 = vld [vmem:[%s11245_s3 + $0x8] sm:$0xff]  }
 0x2dd   :  { %v8547_v51 = vld [vmem:[%s11245_s3 + $0x88] sm:$0xff]  }
 0x2df   :  { %5411 = vmatpush1.bf16.msra.mxu0 %v8462_v53  ;;  %5944 = vmatpush1.bf16.msra.mxu1 %v8465_v40  ;;  %v8548_v53 = vld [vmem:[%s11245_s3 + $0x50] sm:$0xff]  }
 0x2e0   :  { %5412 = vmatprep.subr.bf16.mxu0 %v8470_v56  ;;  %5945 = vmatprep.subr.bf16.mxu1 %v8473_v58  ;;  %v8549_v40 = vld [vmem:[%s11245_s3 + $0xd0] sm:$0xff]  }
 0x2e1   :  { %v8550_v56 = vld [vmem:[%s11245_s3 + $0x10] sm:$0xff]  }
 0x2e2   :  { %v8551_v58 = vld [vmem:[%s11245_s3 + $0x90] sm:$0xff]  }
 0x2e3   :  { %5413 = vmatpush1.bf16.msra.mxu0 %v8468_v59  ;;  %5946 = vmatpush1.bf16.msra.mxu1 %v8471_v24  ;;  %v8552_v59 = vld [vmem:[%s11245_s3 + $0x58] sm:$0xff]  }
 0x2e4   :  { %5414 = vmatprep.subr.bf16.mxu0 %v8476_v61  ;;  %5947 = vmatprep.subr.bf16.mxu1 %v8479_v62  ;;  %v8553_v24 = vld [vmem:[%s11245_s3 + $0xd8] sm:$0xff]  }
 0x2e5   :  { %v8554_v61 = vld [vmem:[%s11245_s3 + $0x18] sm:$0xff]  }
 0x2e6   :  { %v8555_v62 = vld [vmem:[%s11245_s3 + $0x98] sm:$0xff]  }
 0x2e7   :  { %5415 = vmatpush1.bf16.msra.mxu0 %v8474_v63  ;;  %5948 = vmatpush1.bf16.msra.mxu1 %v8477_v55  ;;  %v8556_v63 = vld [vmem:[%s11245_s3 + $0x60] sm:$0xff]  }
 0x2e8   :  { %5416 = vmatprep.subr.bf16.mxu0 %v8482_v0  ;;  %5949 = vmatprep.subr.bf16.mxu1 %v8485_v1  ;;  %v8557_v55 = vld [vmem:[%s11245_s3 + $0xe0] sm:$0xff]  }
 0x2e9   :  { %v8558_v0 = vld [vmem:[%s11245_s3 + $0x20] sm:$0xff]  }
 0x2ea   :  { %v8559_v1 = vld [vmem:[%s11245_s3 + $0xa0] sm:$0xff]  }
 0x2eb   :  { %5417 = vmatpush1.bf16.msra.mxu0 %v8480_v2  ;;  %5950 = vmatpush1.bf16.msra.mxu1 %v8483_v3  ;;  %v8560_v2 = vld [vmem:[%s11245_s3 + $0x68] sm:$0xff]  }
 0x2ec   :  { %5418 = vmatprep.subr.bf16.mxu0 %v8488_v57  ;;  %5951 = vmatprep.subr.bf16.mxu1 %v8491_v5  ;;  %v8561_v3 = vld [vmem:[%s11245_s3 + $0xe8] sm:$0xff]  }
 0x2ed   :  { %v8562_v57 = vld [vmem:[%s11245_s3 + $0x28] sm:$0xff]  }
 0x2ee   :  { %v8563_v5 = vld [vmem:[%s11245_s3 + $0xa8] sm:$0xff]  }
 0x2ef   :  { %5419 = vmatpush1.bf16.msra.mxu0 %v8486_v6  ;;  %5952 = vmatpush1.bf16.msra.mxu1 %v8489_v8  ;;  %v8564_v6 = vld [vmem:[%s11245_s3 + $0x70] sm:$0xff]  }
 0x2f0   :  { %5420 = vmatprep.subr.bf16.mxu0 %v8494_v9  ;;  %5953 = vmatprep.subr.bf16.mxu1 %v8497_v54  ;;  %v8565_v8 = vld [vmem:[%s11245_s3 + $0xf0] sm:$0xff]  }
 0x2f1   :  { %v8566_v9 = vld [vmem:[%s11245_s3 + $0x30] sm:$0xff]  }
 0x2f2   :  { %v8567_v54 = vld [vmem:[%s11245_s3 + $0xb0] sm:$0xff]  }
 0x2f3   :  { %5421 = vmatpush1.bf16.msra.mxu0 %v8492_v60  ;;  %5954 = vmatpush1.bf16.msra.mxu1 %v8495_v11  ;;  %v8568_v60 = vld [vmem:[%s11245_s3 + $0x78] sm:$0xff]  }
 0x2f4   :  { %5422 = vmatprep.subr.bf16.mxu0 %v8500_v12  ;;  %5955 = vmatprep.subr.bf16.mxu1 %v8503_v14  ;;  %v8569_v11 = vld [vmem:[%s11245_s3 + $0xf8] sm:$0xff]  }
 0x2f5   :  { %v8570_v12 = vld [vmem:[%s11245_s3 + $0x38] sm:$0xff]  }
 0x2f6   :  { %v8571_v14 = vld [vmem:[%s11245_s3 + $0xb8] sm:$0xff]  }
 0x2f7   :  { %5423 = vmatpush1.bf16.msra.mxu0 %v8498_v4  ;;  %5956 = vmatpush1.bf16.msra.mxu1 %v8501_v52  ;;  %v814_v4 = vsub.s32 0, %v8749_v42  ;;  %v822_v52 = vsub.s32 2, %v8749_v42 }
 0x2f8   :  { %5424 = vmatprep.subr.bf16.mxu0 %v8506_v16  ;;  %5957 = vmatprep.subr.bf16.mxu1 %v8509_v17  ;;  %v810_v16 = vld [vmem:[%s11244_s2] sm:$0xf]  ;;  %v818_v17 = vsub.s32 1, %v8749_v42 }
 0x2fb   :  { %5425 = vmatpush1.bf16.msra.mxu0 %v8504_v18  ;;  %5958 = vmatpush1.bf16.msra.mxu1 %v8507_v7  ;;  %v826_v18 = vsub.s32 3, %v8749_v42  ;;  %v815_v7 = vrot.slane %v810_v16, %v814_v4 }
 0x2fc   :  { %5426 = vmatprep.subr.bf16.mxu0 %v8512_v20  ;;  %5959 = vmatprep.subr.bf16.mxu1 %v8515_v22  ;;  %v823_v20 = vrot.slane %v810_v16, %v822_v52  ;;  %v819_v22 = vrot.slane %v810_v16, %v818_v17 }
 0x2ff   :  { %5427 = vmatpush1.bf16.msra.mxu0 %v8510_v23  ;;  %5960 = vmatpush1.bf16.msra.mxu1 %v8513_v25  ;;  %v827_v23 = vrot.slane %v810_v16, %v826_v18 }
 0x300   :  { %5437 = vmatprep.subr.bf16.mxu0 %v8518_v10  ;;  %5970 = vmatprep.subr.bf16.mxu1 %v8521_v13 }
 0x302   :  { %5429 = vmatmul.mubr.bf16.vlgmr.msra.gmra.mrb[0].mxu0 %v980_v27  ;;  %5962 = vmatmul.mubr.bf16.vlgmr.msra.gmra.mrb[0].mxu1 %v980_v27 }
 0x303   :  { %5438 = vmatpush1.bf16.msra.mxu0 %v8516_v29  ;;  %5971 = vmatpush1.bf16.msra.mxu1 %v8519_v19 }
 0x304   :  { %5439 = vmatprep.subr.bf16.mxu0 %v8524_v30  ;;  %5972 = vmatprep.subr.bf16.mxu1 %v8527_v21 }
 0x305   :  { %5469 = vmatprep.mubr.bf16.mxu0 %v8599_v26  ;;  %6002 = vmatprep.mubr.bf16.mxu1 %v8599_v26 }
 0x307   :  { %5440 = vmatpush1.bf16.msra.mxu0 %v8522_v31  ;;  %5973 = vmatpush1.bf16.msra.mxu1 %v8525_v15 }
 0x308   :  { %5441 = vmatprep.subr.bf16.mxu0 %v8530_v32  ;;  %5974 = vmatprep.subr.bf16.mxu1 %v8533_v33 }
 0x30b   :  { %5442 = vmatpush1.bf16.msra.mxu0 %v8528_v34  ;;  %5975 = vmatpush1.bf16.msra.mxu1 %v8531_v35 }
 0x30c   :  { %5443 = vmatprep.subr.bf16.mxu0 %v8536_v37  ;;  %5976 = vmatprep.subr.bf16.mxu1 %v8539_v28 }
 0x30f   :  { %5444 = vmatpush1.bf16.msra.mxu0 %v8534_v39  ;;  %5977 = vmatpush1.bf16.msra.mxu1 %v8537_v41 }
 0x310   :  { %7214 = vmatprep.subr.bf16.mxu0 %v8540_v44  ;;  %7236 = vmatprep.subr.bf16.mxu1 %v8541_v45  ;;  %v7181_v45 = vld [vmem:[%s11246_s4] ss:$0 sm:$0xff]  ;;  %s8600_s4 = smov [#allocation2]  }
 0x311   :  { %s6386_s6 = sshll.u32 %s8600_s4, 4  ;;  %s6387_s6 = int_to_ptr.vmem [resolvable:$true] %s6386_s6 }
 0x312   :  { %7179 = vmatmul.mubr.msk.bf16.vlgmr.msra.gmra.mrb[0].mxu0 %vm4941_vm0, %v996_v46  ;;  %7180 = vmatmul.mubr.msk.bf16.vlgmr.msra.gmra.mrb[0].mxu1 %vm4941_vm0, %v996_v46  ;;  %s8574_s7 = scalar_lea.vmem %s6387_s6, 32  ;;  %p8579_p1 = scmp.lt.s32.totalorder %s6387_s6, %s6387_s6 }
 0x313   :  { %7215 = vmatpush3.bf16.msra.mxu0 %v8542_v47  ;;  %7237 = vmatpush3.bf16.msra.mxu1 %v8543_v38  ;;  %v6363_v38 = vand.u32 127, %v812_v36  ;;  %p8575_p0 = scmp.ne.s32.totalorder %s6387_s6, %s8574_s7  ;;  %p8580_p2 = scmp.lt.s32.totalorder %s8574_s7, %s8574_s7 }
 0x314   :  { %7216 = vmatprep.subr.bf16.mxu0 %v8544_v48  ;;  %7238 = vmatprep.subr.bf16.mxu1 %v8545_v49 }
 0x315   :  { %vm6364_vm1 = vcmp.lt.s32.totalorder %v6363_v38, 6  ;;  %vm6370_vm3 = vcmp.eq.s32.totalorder %v6363_v38, 6  ;;  %p8581_p3 = por %p8580_p2, %p8579_p1 }
 0x317   :  { %7217 = vmatpush3.bf16.msra.mxu0 %v8546_v50  ;;  %7239 = vmatpush3.bf16.msra.mxu1 %v8547_v51  ;;  %p8582_p4 = pnand %p8581_p3, %p8575_p0 }
 0x318   :  { %7218 = vmatprep.subr.bf16.mxu0 %v8548_v53  ;;  %7240 = vmatprep.subr.bf16.mxu1 %v8549_v40 }
 0x31b   :  { %7219 = vmatpush3.bf16.msra.mxu0 %v8550_v56  ;;  %7241 = vmatpush3.bf16.msra.mxu1 %v8551_v58 }
 0x31c   :  { %7220 = vmatprep.subr.bf16.mxu0 %v8552_v59  ;;  %7242 = vmatprep.subr.bf16.mxu1 %v8553_v24 }
 0x31f   :  { %7221 = vmatpush3.bf16.msra.mxu0 %v8554_v61  ;;  %7243 = vmatpush3.bf16.msra.mxu1 %v8555_v62 }
 0x320   :  { %7222 = vmatprep.subr.bf16.mxu0 %v8556_v63  ;;  %7244 = vmatprep.subr.bf16.mxu1 %v8557_v55 }
 0x323   :  { %7223 = vmatpush3.bf16.msra.mxu0 %v8558_v0  ;;  %7245 = vmatpush3.bf16.msra.mxu1 %v8559_v1 }
 0x324   :  { %7224 = vmatprep.subr.bf16.mxu0 %v8560_v2  ;;  %7246 = vmatprep.subr.bf16.mxu1 %v8561_v3 }
 0x327   :  { %7225 = vmatpush3.bf16.msra.mxu0 %v8562_v57  ;;  %7247 = vmatpush3.bf16.msra.mxu1 %v8563_v5 }
 0x328   :  { %7226 = vmatprep.subr.bf16.mxu0 %v8564_v6  ;;  %7248 = vmatprep.subr.bf16.mxu1 %v8565_v8 }
 0x32b   :  { %7227 = vmatpush3.bf16.msra.mxu0 %v8566_v9  ;;  %7249 = vmatpush3.bf16.msra.mxu1 %v8567_v54 }
 0x32c   :  { %7228 = vmatprep.subr.bf16.mxu0 %v8568_v60  ;;  %7250 = vmatprep.subr.bf16.mxu1 %v8569_v11 }
 0x32f   :  { %7229 = vmatpush3.bf16.msra.mxu0 %v8570_v12  ;;  %7251 = vmatpush3.bf16.msra.mxu1 %v8571_v14 }
 0x3e5   :  { %v5471_v25 = vpop.f32.mrb[0].mxu0  ;;  %v6004_v10 = vpop.f32.mrb[0].mxu1 }
 0x3e6   :  { %v7258_v13 = vadd.f32 %v5471_v25, %v815_v7  ;;  %v7260_v27 = vadd.f32 %v6004_v10, %v823_v20  ;;  %v5473_v29 = vpop.f32.mrb[1].mxu0  ;;  %v6006_v19 = vpop.f32.mrb[1].mxu1 }
 0x3e7   :  { %v7259_v30 = vadd.f32 %v5473_v29, %v819_v22  ;;  %v7261_v21 = vadd.f32 %v6006_v19, %v827_v23  ;;  %v5475_v31 = vpop.f32.mrb[2].mxu0  ;;  %v6008_v15 = vpop.f32.mrb[2].mxu1 }
 0x3e8   :  { %v6011_v32 = vmax.f32 %v7258_v13, 0.0  ;;  %v6013_v33 = vmax.f32 %v7260_v27, 0.0  ;;  %v5476_v26 = vpop.f32.mrb[3].mxu0  ;;  %v6009_v34 = vpop.f32.mrb[3].mxu1 }
 0x3e9   :  { %v6012_v35 = vmax.f32 %v7259_v30, 0.0  ;;  %v6014_v42 = vmax.f32 %v7261_v21, 0.0 }
 0x3ea   :  { %v6015_v39 = vpack.c.bf16 %v6011_v32, %v6011_v32  ;;  %v6017_v41 = vpack.c.bf16 %v6013_v33, %v6013_v33 }
 0x3eb   :  { %v6016_v37 = vpack.c.bf16 %v6012_v35, %v6012_v35  ;;  %v6018_v28 = vpack.c.bf16 %v6014_v42, %v6014_v42 }
 0x3ed   :  { %6314 = vmatprep.mubr.bf16.mxu0 %v6016_v37  ;;  %6354 = vmatprep.mubr.bf16.mxu1 %v6018_v28 }
 0x3ee   :  { %6315 = vmatmul.mubr.bf16.vlgmr.msra.gmra.mrb[4].mxu0 %v6015_v39  ;;  %6355 = vmatmul.mubr.bf16.vlgmr.msra.gmra.mrb[4].mxu1 %v6017_v41 }
 0x4c1   :  { %v7230_v43 = vpop.f32.mrb[4].mxu0  ;;  %v7252_v44 = vpop.f32.mrb[4].mxu1 }
 0x4c2   :  { %v7231_v46 = vpop.f32.mrb[5].mxu0  ;;  %v7253_v47 = vpop.f32.mrb[5].mxu1 }
 0x4c3   :  { %v7232_v48 = vadd.f32 %v7231_v46, %v7230_v43  ;;  %v7254_v49 = vadd.f32 %v7253_v47, %v7252_v44  ;;  %v7233_v50 = vpop.f32.mrb[6].mxu0  ;;  %v7255_v51 = vpop.f32.mrb[6].mxu1 }
 0x4c4   :  { %v7234_v53 = vpop.f32.mrb[7].mxu0  ;;  %v7256_v40 = vpop.f32.mrb[7].mxu1 }
 0x4c5   :  { %v6317_v56 = vadd.f32 %v7232_v48, %v7181_v45 }
 0x4c7   :  { %v6357_v58 = vadd.f32 %v7254_v49, %v6317_v56 }
 0x4c9   :  { %v6365_v59 = vsel %vm6364_vm1, %v6357_v58, -inf  ;;  %v6371_v61 = vsel %vm6370_vm3, %v6357_v58, 0.0 }
 0x4ca   :  { %v6367_v24 = vsel %vm6366_vm2, %v6365_v59, -inf  ;;  %v6372_v62 = vsel %vm6366_vm2, %v6371_v61, 0.0 }
 0x4cb   :  { %6368 = vmax.xlane.f32.xlu0 %v6367_v24 }
 0x4cf   :  { %6373 = vadd.xlane.f32.xlu0 %v6372_v62 }
 0x558   :  { %v6369_v63 = vpop.xlane.xlu0 %6368 }
 0x559   :  { %v6375_v55 = vmul.f32 0.16666667, %v6369_v63 }
 0x55b   :  { %v6376_v36 = vsub.f32 %v6357_v58, %v6375_v55 }
 0x55c   :  { %v6374_v0 = vpop.xlane.xlu0 %6373 }
 0x55d   :  { %v6377_v1 = vadd.f32 %v6376_v36, %v6374_v0 }
 0x55f   :  { %6379 = vst.msk [vmem:[#allocation2] sm:$0x3] %vm6378_vm4, %v6377_v1 }
 0x560   :  { %8585 = shalt.err (!%p8582_p4)
}
 0x561   :  { %s8586_s10 = scalar_lea.hbm %s11247_s5, 32 }
 0x562   :  { %p8587_p5 = scmp.ne.s32.totalorder %s11247_s5, %s8586_s10  ;;  %p8590_p6 = scmp.lt.u32.totalorder %s8586_s10, %s11247_s5 }
 0x564   :  { %p8592_p7 = pnand %p8590_p6, %p8587_p5 }
 0x566   :  { %8595 = shalt.err (!%p8592_p7)
}
 0x567   :  { %6389 = dma.vmem_to_hbm [thread:$0]  %s6387_s6, 32, %s11247_s5, [#allocation3]  }
 0x568   :  { %8596 = dma.done.wait [#allocation3], 32  }
 0x569   :  { %8597 = vsyncadd [#allocation3], 4294967264 }
 0x56a   :  { %6393 = vsyncpa [#allocation3], 1 }

</bundles_post_ra>
